<compile_context>
chip_gen: v7x
topology: tpu7x:2x2x1
jax: 0.10.0
libtpu: 0.0.40
codegen_flags: <defaults>
</compile_context>

<pallas_src>
import jax
import jax.numpy as jnp
from jax import lax
from jax.experimental import pallas as pl
from jax.experimental.pallas import tpu as pltpu


# ---------------------------------------------------------------------------
# Conv3x3(pad=1) + bias + ReLU + MaxPool2x2  (one fused kernel per layer)
# ---------------------------------------------------------------------------
def conv_relu_pool_kernel(p_ref, w_ref, b_ref, out_ref):
    # p_ref:   (1, 4*THh, Wh, 9*Cin)   im2col patches, rows grouped by pool pos
    # w_ref:   (9*Cin, Cout)           flattened HWIO conv weight
    # b_ref:   (1, Cout)
    # out_ref: (1, THh, Wh, Cout)
    _, rows, wh, k = p_ref.shape
    cout = out_ref.shape[-1]
    thh = rows // 4

    m = p_ref[0].reshape(rows * wh, k)                    # layout-preserving merge
    y = jnp.dot(m, w_ref[...], preferred_element_type=jnp.float32) + b_ref[...]
    y = jnp.maximum(y, 0.0)                               # ReLU
    y = y.reshape(4, thh * wh, cout)                      # 4 pool positions (leading)
    pooled = jnp.maximum(jnp.maximum(y[0], y[1]),
                         jnp.maximum(y[2], y[3]))         # 2x2 max-pool
    out_ref[0] = pooled.reshape(thh, wh, cout)            # single dense store


def _build_pool_patches(x, thh):
    """x: (B, H, W, C) NHWC -> (B*nT, 4*thh, W//2, 9*C) im2col patches.

    Row ordering in a tile: pool-position s = sy*2+sx (major), pooled row i,
    pixel px; last-dim ordering: tap (dy*3+dx) major, channel minor -- matching
    w_hwio.reshape(9*C, Cout).
    """
    B, H, W, C = x.shape
    Hh, Wh = H // 2, W // 2
    nT = Hh // thh
    xp = jnp.pad(x, ((0, 0), (1, 2), (1, 2), (0, 0)))
    pos = []
    for sy in range(2):
        for sx in range(2):
            taps = [xp[:, sy + dy: sy + dy + H: 2, sx + dx: sx + dx + W: 2, :]
                    for dy in range(3) for dx in range(3)]
            pos.append(jnp.concatenate(taps, axis=-1))    # (B, Hh, Wh, 9C)
    p = jnp.stack(pos, axis=1)                            # (B, 4, Hh, Wh, 9C)
    p = p.reshape(B, 4, nT, thh, Wh, 9 * C)
    p = p.transpose(0, 2, 1, 3, 4, 5)                     # (B, nT, 4, thh, Wh, 9C)
    return p.reshape(B * nT, 4 * thh, Wh, 9 * C)


def conv_relu_pool(x, w_hwio, b, thh):
    """x: (B, H, W, Cin) NHWC -> (B, H//2, W//2, Cout)."""
    B, H, W, Cin = x.shape
    Hh, Wh = H // 2, W // 2
    nT = Hh // thh
    Cout = w_hwio.shape[-1]
    K = 9 * Cin
    w_flat = w_hwio.reshape(K, Cout)
    patches = _build_pool_patches(x, thh)                 # (B*nT, 4*thh, Wh, K)

    out = pl.pallas_call(
        conv_relu_pool_kernel,
        out_shape=jax.ShapeDtypeStruct((B * nT, thh, Wh, Cout), jnp.float32),
        grid=(B * nT,),
        in_specs=[
            pl.BlockSpec((1, 4 * thh, Wh, K), lambda i: (i, 0, 0, 0)),
            pl.BlockSpec((K, Cout), lambda i: (0, 0)),
            pl.BlockSpec((1, Cout), lambda i: (0, 0)),
        ],
        out_specs=pl.BlockSpec((1, thh, Wh, Cout), lambda i: (i, 0, 0, 0)),
        compiler_params=pltpu.CompilerParams(
            dimension_semantics=("parallel",)),
    )(patches, w_flat, b)
    return out.reshape(B, Hh, Wh, Cout)


# ---------------------------------------------------------------------------
# Classifier: Linear(16384,128) + ReLU + Linear(128,5) + Softmax, K-tiled
# ---------------------------------------------------------------------------
def classifier_kernel(x_ref, w1_ref, b1_ref, w2_ref, b2_ref, out_ref, acc_ref):
    k = pl.program_id(0)

    @pl.when(k == 0)
    def _():
        acc_ref[...] = jnp.zeros_like(acc_ref)

    acc_ref[...] += jnp.dot(x_ref[...], w1_ref[...],
                            preferred_element_type=jnp.float32)

    @pl.when(k == pl.num_programs(0) - 1)
    def _():
        h = jnp.maximum(acc_ref[...] + b1_ref[...], 0.0)
        logits = jnp.dot(h, w2_ref[...],
                         preferred_element_type=jnp.float32) + b2_ref[...]
        m = jnp.max(logits, axis=-1, keepdims=True)
        e = jnp.exp(logits - m)
        out_ref[...] = e / jnp.sum(e, axis=-1, keepdims=True)


def classifier(x_flat, w1, b1, w2, b2, tk=2048):
    B, D = x_flat.shape
    Hdim = w1.shape[1]
    ncls = w2.shape[1]
    assert D % tk == 0
    return pl.pallas_call(
        classifier_kernel,
        out_shape=jax.ShapeDtypeStruct((B, ncls), jnp.float32),
        grid=(D // tk,),
        in_specs=[
            pl.BlockSpec((B, tk), lambda k: (0, k)),
            pl.BlockSpec((tk, Hdim), lambda k: (k, 0)),
            pl.BlockSpec((1, Hdim), lambda k: (0, 0)),
            pl.BlockSpec((Hdim, ncls), lambda k: (0, 0)),
            pl.BlockSpec((1, ncls), lambda k: (0, 0)),
        ],
        out_specs=pl.BlockSpec((B, ncls), lambda k: (0, 0)),
        scratch_shapes=[pltpu.VMEM((B, Hdim), jnp.float32)],
        compiler_params=pltpu.CompilerParams(
            dimension_semantics=("arbitrary",)),
    )(x_flat, w1, b1, w2, b2)


# ---------------------------------------------------------------------------
# Full forward (PyTorch CNNModel semantics), parameters, pure-JAX reference
# ---------------------------------------------------------------------------
def cnn_forward(x_nchw, p):
    x = jnp.transpose(x_nchw, (0, 2, 3, 1)).astype(jnp.float32)   # NHWC
    x = conv_relu_pool(x, p['conv1_w'], p['conv1_b'], thh=8)      # (B, 64, 64, 16)
    x = conv_relu_pool(x, p['conv2_w'], p['conv2_b'], thh=8)      # (B, 32, 32, 32)
    x = conv_relu_pool(x, p['conv3_w'], p['conv3_b'], thh=16)     # (B, 16, 16, 64)
    B = x.shape[0]
    # nn.Flatten on NCHW -> channel-major flatten
    x_flat = jnp.transpose(x, (0, 3, 1, 2)).reshape(B, -1)        # (B, 16384)
    return classifier(x_flat, p['fc1_w'], p['fc1_b'], p['fc2_w'], p['fc2_b'])


def init_params(key):
    ks = jax.random.split(key, 10)

    def conv_w(k, cin, cout):
        scale = (2.0 / (9 * cin)) ** 0.5
        return (scale * jax.random.normal(k, (3, 3, cin, cout))).astype(jnp.float32)

    def lin_w(k, fin, fout):
        scale = (2.0 / fin) ** 0.5
        return (scale * jax.random.normal(k, (fin, fout))).astype(jnp.float32)

    def bias(k, n):
        return (0.01 * jax.random.normal(k, (1, n))).astype(jnp.float32)

    return {
        'conv1_w': conv_w(ks[0], 3, 16),  'conv1_b': bias(ks[1], 16),
        'conv2_w': conv_w(ks[2], 16, 32), 'conv2_b': bias(ks[3], 32),
        'conv3_w': conv_w(ks[4], 32, 64), 'conv3_b': bias(ks[5], 64),
        'fc1_w': lin_w(ks[6], 64 * 16 * 16, 128), 'fc1_b': bias(ks[7], 128),
        'fc2_w': lin_w(ks[8], 128, 5),            'fc2_b': bias(ks[9], 5),
    }


def reference(x_nchw, p):
    """Pure-JAX reference with the same math as the PyTorch module."""
    x = jnp.transpose(x_nchw, (0, 2, 3, 1)).astype(jnp.float32)

    def block(inp, w_hwio, b):
        dn = lax.conv_dimension_numbers(inp.shape, w_hwio.shape,
                                        ('NHWC', 'HWIO', 'NHWC'))
        y = lax.conv_general_dilated(inp, w_hwio, (1, 1), [(1, 1), (1, 1)],
                                     dimension_numbers=dn,
                                     precision=lax.Precision.HIGHEST) + b
        y = jnp.maximum(y, 0.0)
        return lax.reduce_window(y, -jnp.inf, lax.max,
                                 (1, 2, 2, 1), (1, 2, 2, 1), 'VALID')

    x = block(x, p['conv1_w'], p['conv1_b'])
    x = block(x, p['conv2_w'], p['conv2_b'])
    x = block(x, p['conv3_w'], p['conv3_b'])
    B = x.shape[0]
    xf = jnp.transpose(x, (0, 3, 1, 2)).reshape(B, -1)
    h = jnp.maximum(jnp.dot(xf, p['fc1_w'],
                            precision=lax.Precision.HIGHEST) + p['fc1_b'], 0.0)
    logits = jnp.dot(h, p['fc2_w'],
                     precision=lax.Precision.HIGHEST) + p['fc2_b']
    return jax.nn.softmax(logits, axis=-1)


if __name__ == "__main__":
    key = jax.random.PRNGKey(0)
    kx, kp = jax.random.split(key)
    B = 2
    # The module's Linear(64*16*16, 128) requires 128x128 spatial input with 3 channels.
    x = jax.random.normal(kx, (B, 3, 128, 128), jnp.float32)
    params = init_params(kp)

    fwd = jax.jit(cnn_forward)
    out = jax.block_until_ready(fwd(x, params))
    assert out.shape == (B, 5), out.shape

    ref = reference(x, params)
    max_err = float(jnp.max(jnp.abs(out - ref)))
    # tolerance covers MXU f32 multi-pass vs XLA HIGHEST-precision accumulation-order diffs
    assert max_err < 5e-3, f"max_err={max_err}"
    assert jnp.allclose(jnp.sum(out, axis=-1), 1.0, atol=1e-4)
    print("KERNEL_OK")
</pallas_src>

<mosaic_0001>
module attributes {stable_mosaic.version = 11 : i64} {
  func.func @conv_relu_pool_kernel(%arg0: i32, %arg1: memref<1x32x64x27xf32, #tpu.memory_space<vmem>>, %arg2: memref<27x16xf32, #tpu.memory_space<vmem>>, %arg3: memref<1x16xf32, #tpu.memory_space<vmem>>, %arg4: memref<1x8x64x16xf32, #tpu.memory_space<vmem>>) attributes {dimension_semantics = [#tpu.dimension_semantics<parallel>], iteration_bounds = array<i64: 16>, scalar_prefetch = 0 : i64, scratch_operands = 0 : i64, tpu.core_type = #tpu.core_type<tc>, window_params = [{transform_indices = @transform_0, window_bounds = array<i64: 1, 32, 64, 27>}, {pipeline_mode = #tpu.pipeline_mode<synchronous>, transform_indices = @transform_1, window_bounds = array<i64: 27, 16>}, {pipeline_mode = #tpu.pipeline_mode<synchronous>, transform_indices = @transform_2, window_bounds = array<i64: 1, 16>}, {transform_indices = @transform_3, window_bounds = array<i64: 1, 8, 64, 16>}]} {
    %c0 = arith.constant 0 : index
    %c0_0 = arith.constant 0 : index
    %c0_1 = arith.constant 0 : index
    %c0_2 = arith.constant 0 : index
    %0 = vector.load %arg1[%c0, %c0_0, %c0_1, %c0_2] : memref<1x32x64x27xf32, #tpu.memory_space<vmem>>, vector<1x32x64x27xf32>
    %1 = vector.shape_cast %0 : vector<1x32x64x27xf32> to vector<32x64x27xf32>
    %2 = vector.shape_cast %1 : vector<32x64x27xf32> to vector<2048x27xf32>
    %c0_3 = arith.constant 0 : index
    %c0_4 = arith.constant 0 : index
    %3 = vector.load %arg2[%c0_3, %c0_4] : memref<27x16xf32, #tpu.memory_space<vmem>>, vector<27x16xf32>
    %cst = arith.constant dense<0.000000e+00> : vector<2048x16xf32>
    %4 = tpu.matmul %2, %3, %cst {dimension_numbers = #tpu.dot_dimension_numbers<[1], [0], [0], [1], [0, 0, 1, 1], [], []>} : vector<2048x27xf32>, vector<27x16xf32>, vector<2048x16xf32> -> vector<2048x16xf32>
    %c0_5 = arith.constant 0 : index
    %c0_6 = arith.constant 0 : index
    %5 = vector.load %arg3[%c0_5, %c0_6] : memref<1x16xf32, #tpu.memory_space<vmem>>, vector<1x16xf32>
    %6 = vector.broadcast %5 : vector<1x16xf32> to vector<2048x16xf32>
    %7 = arith.addf %4, %6 : vector<2048x16xf32>
    %cst_7 = arith.constant 0.000000e+00 : f32
    %8 = vector.broadcast %cst_7 : f32 to vector<2048x16xf32>
    %9 = arith.maximumf %7, %8 : vector<2048x16xf32>
    %10 = vector.shape_cast %9 : vector<2048x16xf32> to vector<4x512x16xf32>
    %11 = vector.extract_strided_slice %10 {offsets = [0, 0, 0], sizes = [1, 512, 16], strides = [1, 1, 1]} : vector<4x512x16xf32> to vector<1x512x16xf32>
    %12 = vector.shape_cast %11 : vector<1x512x16xf32> to vector<512x16xf32>
    %13 = vector.extract_strided_slice %10 {offsets = [1, 0, 0], sizes = [1, 512, 16], strides = [1, 1, 1]} : vector<4x512x16xf32> to vector<1x512x16xf32>
    %14 = vector.shape_cast %13 : vector<1x512x16xf32> to vector<512x16xf32>
    %15 = arith.maximumf %12, %14 : vector<512x16xf32>
    %16 = vector.extract_strided_slice %10 {offsets = [2, 0, 0], sizes = [1, 512, 16], strides = [1, 1, 1]} : vector<4x512x16xf32> to vector<1x512x16xf32>
    %17 = vector.shape_cast %16 : vector<1x512x16xf32> to vector<512x16xf32>
    %18 = vector.extract_strided_slice %10 {offsets = [3, 0, 0], sizes = [1, 512, 16], strides = [1, 1, 1]} : vector<4x512x16xf32> to vector<1x512x16xf32>
    %19 = vector.shape_cast %18 : vector<1x512x16xf32> to vector<512x16xf32>
    %20 = arith.maximumf %17, %19 : vector<512x16xf32>
    %21 = arith.maximumf %15, %20 : vector<512x16xf32>
    %22 = vector.shape_cast %21 : vector<512x16xf32> to vector<8x64x16xf32>
    %c0_8 = arith.constant 0 : index
    %c0_9 = arith.constant 0 : index
    %c0_10 = arith.constant 0 : index
    %c0_11 = arith.constant 0 : index
    %23 = vector.load %arg4[%c0_8, %c0_9, %c0_10, %c0_11] : memref<1x8x64x16xf32, #tpu.memory_space<vmem>>, vector<1x8x64x16xf32>
    %24 = vector.shape_cast %23 : vector<1x8x64x16xf32> to vector<8x64x16xf32>
    %25 = vector.shape_cast %22 : vector<8x64x16xf32> to vector<1x8x64x16xf32>
    tpu.vector_store %arg4[%c0_8, %c0_9, %c0_10, %c0_11], %25 {strides = array<i32>} : memref<1x8x64x16xf32, #tpu.memory_space<vmem>>, vector<1x8x64x16xf32>,
    return
  }
  func.func @transform_0(%arg0: i32) -> (i32, i32, i32, i32) {
    %c0_i32 = arith.constant 0 : i32
    %c0_i32_0 = arith.constant 0 : i32
    %c0_i32_1 = arith.constant 0 : i32
    %c0_i32_2 = arith.constant 0 : i32
    return %arg0, %c0_i32, %c0_i32_0, %c0_i32_1 : i32, i32, i32, i32
  }
  func.func @transform_1(%arg0: i32) -> (i32, i32) {
    %c0_i32 = arith.constant 0 : i32
    %c0_i32_0 = arith.constant 0 : i32
    %c0_i32_1 = arith.constant 0 : i32
    return %c0_i32, %c0_i32_0 : i32, i32
  }
  func.func @transform_2(%arg0: i32) -> (i32, i32) {
    %c0_i32 = arith.constant 0 : i32
    %c0_i32_0 = arith.constant 0 : i32
    %c0_i32_1 = arith.constant 0 : i32
    return %c0_i32, %c0_i32_0 : i32, i32
  }
  func.func @transform_3(%arg0: i32) -> (i32, i32, i32, i32) {
    %c0_i32 = arith.constant 0 : i32
    %c0_i32_0 = arith.constant 0 : i32
    %c0_i32_1 = arith.constant 0 : i32
    %c0_i32_2 = arith.constant 0 : i32
    return %arg0, %c0_i32, %c0_i32_0, %c0_i32_1 : i32, i32, i32, i32
  }
}

module attributes {stable_mosaic.version = 11 : i64} {
  func.func @conv_relu_pool_kernel(%arg0: i32, %arg1: memref<1x32x32x144xf32, #tpu.memory_space<vmem>>, %arg2: memref<144x32xf32, #tpu.memory_space<vmem>>, %arg3: memref<1x32xf32, #tpu.memory_space<vmem>>, %arg4: memref<1x8x32x32xf32, #tpu.memory_space<vmem>>) attributes {dimension_semantics = [#tpu.dimension_semantics<parallel>], iteration_bounds = array<i64: 8>, scalar_prefetch = 0 : i64, scratch_operands = 0 : i64, tpu.core_type = #tpu.core_type<tc>, window_params = [{transform_indices = @transform_0, window_bounds = array<i64: 1, 32, 32, 144>}, {pipeline_mode = #tpu.pipeline_mode<synchronous>, transform_indices = @transform_1, window_bounds = array<i64: 144, 32>}, {pipeline_mode = #tpu.pipeline_mode<synchronous>, transform_indices = @transform_2, window_bounds = array<i64: 1, 32>}, {transform_indices = @transform_3, window_bounds = array<i64: 1, 8, 32, 32>}]} {
    %c0 = arith.constant 0 : index
    %c0_0 = arith.constant 0 : index
    %c0_1 = arith.constant 0 : index
    %c0_2 = arith.constant 0 : index
    %0 = vector.load %arg1[%c0, %c0_0, %c0_1, %c0_2] : memref<1x32x32x144xf32, #tpu.memory_space<vmem>>, vector<1x32x32x144xf32>
    %1 = vector.shape_cast %0 : vector<1x32x32x144xf32> to vector<32x32x144xf32>
    %2 = vector.shape_cast %1 : vector<32x32x144xf32> to vector<1024x144xf32>
    %c0_3 = arith.constant 0 : index
    %c0_4 = arith.constant 0 : index
    %3 = vector.load %arg2[%c0_3, %c0_4] : memref<144x32xf32, #tpu.memory_space<vmem>>, vector<144x32xf32>
    %cst = arith.constant dense<0.000000e+00> : vector<1024x32xf32>
    %4 = tpu.matmul %2, %3, %cst {dimension_numbers = #tpu.dot_dimension_numbers<[1], [0], [0], [1], [0, 0, 1, 1], [], []>} : vector<1024x144xf32>, vector<144x32xf32>, vector<1024x32xf32> -> vector<1024x32xf32>
    %c0_5 = arith.constant 0 : index
    %c0_6 = arith.constant 0 : index
    %5 = vector.load %arg3[%c0_5, %c0_6] : memref<1x32xf32, #tpu.memory_space<vmem>>, vector<1x32xf32>
    %6 = vector.broadcast %5 : vector<1x32xf32> to vector<1024x32xf32>
    %7 = arith.addf %4, %6 : vector<1024x32xf32>
    %cst_7 = arith.constant 0.000000e+00 : f32
    %8 = vector.broadcast %cst_7 : f32 to vector<1024x32xf32>
    %9 = arith.maximumf %7, %8 : vector<1024x32xf32>
    %10 = vector.shape_cast %9 : vector<1024x32xf32> to vector<4x256x32xf32>
    %11 = vector.extract_strided_slice %10 {offsets = [0, 0, 0], sizes = [1, 256, 32], strides = [1, 1, 1]} : vector<4x256x32xf32> to vector<1x256x32xf32>
    %12 = vector.shape_cast %11 : vector<1x256x32xf32> to vector<256x32xf32>
    %13 = vector.extract_strided_slice %10 {offsets = [1, 0, 0], sizes = [1, 256, 32], strides = [1, 1, 1]} : vector<4x256x32xf32> to vector<1x256x32xf32>
    %14 = vector.shape_cast %13 : vector<1x256x32xf32> to vector<256x32xf32>
    %15 = arith.maximumf %12, %14 : vector<256x32xf32>
    %16 = vector.extract_strided_slice %10 {offsets = [2, 0, 0], sizes = [1, 256, 32], strides = [1, 1, 1]} : vector<4x256x32xf32> to vector<1x256x32xf32>
    %17 = vector.shape_cast %16 : vector<1x256x32xf32> to vector<256x32xf32>
    %18 = vector.extract_strided_slice %10 {offsets = [3, 0, 0], sizes = [1, 256, 32], strides = [1, 1, 1]} : vector<4x256x32xf32> to vector<1x256x32xf32>
    %19 = vector.shape_cast %18 : vector<1x256x32xf32> to vector<256x32xf32>
    %20 = arith.maximumf %17, %19 : vector<256x32xf32>
    %21 = arith.maximumf %15, %20 : vector<256x32xf32>
    %22 = vector.shape_cast %21 : vector<256x32xf32> to vector<8x32x32xf32>
    %c0_8 = arith.constant 0 : index
    %c0_9 = arith.constant 0 : index
    %c0_10 = arith.constant 0 : index
    %c0_11 = arith.constant 0 : index
    %23 = vector.load %arg4[%c0_8, %c0_9, %c0_10, %c0_11] : memref<1x8x32x32xf32, #tpu.memory_space<vmem>>, vector<1x8x32x32xf32>
    %24 = vector.shape_cast %23 : vector<1x8x32x32xf32> to vector<8x32x32xf32>
    %25 = vector.shape_cast %22 : vector<8x32x32xf32> to vector<1x8x32x32xf32>
    tpu.vector_store %arg4[%c0_8, %c0_9, %c0_10, %c0_11], %25 {strides = array<i32>} : memref<1x8x32x32xf32, #tpu.memory_space<vmem>>, vector<1x8x32x32xf32>,
    return
  }
  func.func @transform_0(%arg0: i32) -> (i32, i32, i32, i32) {
    %c0_i32 = arith.constant 0 : i32
    %c0_i32_0 = arith.constant 0 : i32
    %c0_i32_1 = arith.constant 0 : i32
    %c0_i32_2 = arith.constant 0 : i32
    return %arg0, %c0_i32, %c0_i32_0, %c0_i32_1 : i32, i32, i32, i32
  }
  func.func @transform_1(%arg0: i32) -> (i32, i32) {
    %c0_i32 = arith.constant 0 : i32
    %c0_i32_0 = arith.constant 0 : i32
    %c0_i32_1 = arith.constant 0 : i32
    return %c0_i32, %c0_i32_0 : i32, i32
  }
  func.func @transform_2(%arg0: i32) -> (i32, i32) {
    %c0_i32 = arith.constant 0 : i32
    %c0_i32_0 = arith.constant 0 : i32
    %c0_i32_1 = arith.constant 0 : i32
    return %c0_i32, %c0_i32_0 : i32, i32
  }
  func.func @transform_3(%arg0: i32) -> (i32, i32, i32, i32) {
    %c0_i32 = arith.constant 0 : i32
    %c0_i32_0 = arith.constant 0 : i32
    %c0_i32_1 = arith.constant 0 : i32
    %c0_i32_2 = arith.constant 0 : i32
    return %arg0, %c0_i32, %c0_i32_0, %c0_i32_1 : i32, i32, i32, i32
  }
}

module attributes {stable_mosaic.version = 11 : i64} {
  func.func @conv_relu_pool_kernel(%arg0: i32, %arg1: memref<1x64x16x288xf32, #tpu.memory_space<vmem>>, %arg2: memref<288x64xf32, #tpu.memory_space<vmem>>, %arg3: memref<1x64xf32, #tpu.memory_space<vmem>>, %arg4: memref<1x16x16x64xf32, #tpu.memory_space<vmem>>) attributes {dimension_semantics = [#tpu.dimension_semantics<parallel>], iteration_bounds = array<i64: 2>, scalar_prefetch = 0 : i64, scratch_operands = 0 : i64, tpu.core_type = #tpu.core_type<tc>, window_params = [{transform_indices = @transform_0, window_bounds = array<i64: 1, 64, 16, 288>}, {pipeline_mode = #tpu.pipeline_mode<synchronous>, transform_indices = @transform_1, window_bounds = array<i64: 288, 64>}, {pipeline_mode = #tpu.pipeline_mode<synchronous>, transform_indices = @transform_2, window_bounds = array<i64: 1, 64>}, {transform_indices = @transform_3, window_bounds = array<i64: 1, 16, 16, 64>}]} {
    %c0 = arith.constant 0 : index
    %c0_0 = arith.constant 0 : index
    %c0_1 = arith.constant 0 : index
    %c0_2 = arith.constant 0 : index
    %0 = vector.load %arg1[%c0, %c0_0, %c0_1, %c0_2] : memref<1x64x16x288xf32, #tpu.memory_space<vmem>>, vector<1x64x16x288xf32>
    %1 = vector.shape_cast %0 : vector<1x64x16x288xf32> to vector<64x16x288xf32>
    %2 = vector.shape_cast %1 : vector<64x16x288xf32> to vector<1024x288xf32>
    %c0_3 = arith.constant 0 : index
    %c0_4 = arith.constant 0 : index
    %3 = vector.load %arg2[%c0_3, %c0_4] : memref<288x64xf32, #tpu.memory_space<vmem>>, vector<288x64xf32>
    %cst = arith.constant dense<0.000000e+00> : vector<1024x64xf32>
    %4 = tpu.matmul %2, %3, %cst {dimension_numbers = #tpu.dot_dimension_numbers<[1], [0], [0], [1], [0, 0, 1, 1], [], []>} : vector<1024x288xf32>, vector<288x64xf32>, vector<1024x64xf32> -> vector<1024x64xf32>
    %c0_5 = arith.constant 0 : index
    %c0_6 = arith.constant 0 : index
    %5 = vector.load %arg3[%c0_5, %c0_6] : memref<1x64xf32, #tpu.memory_space<vmem>>, vector<1x64xf32>
    %6 = vector.broadcast %5 : vector<1x64xf32> to vector<1024x64xf32>
    %7 = arith.addf %4, %6 : vector<1024x64xf32>
    %cst_7 = arith.constant 0.000000e+00 : f32
    %8 = vector.broadcast %cst_7 : f32 to vector<1024x64xf32>
    %9 = arith.maximumf %7, %8 : vector<1024x64xf32>
    %10 = vector.shape_cast %9 : vector<1024x64xf32> to vector<4x256x64xf32>
    %11 = vector.extract_strided_slice %10 {offsets = [0, 0, 0], sizes = [1, 256, 64], strides = [1, 1, 1]} : vector<4x256x64xf32> to vector<1x256x64xf32>
    %12 = vector.shape_cast %11 : vector<1x256x64xf32> to vector<256x64xf32>
    %13 = vector.extract_strided_slice %10 {offsets = [1, 0, 0], sizes = [1, 256, 64], strides = [1, 1, 1]} : vector<4x256x64xf32> to vector<1x256x64xf32>
    %14 = vector.shape_cast %13 : vector<1x256x64xf32> to vector<256x64xf32>
    %15 = arith.maximumf %12, %14 : vector<256x64xf32>
    %16 = vector.extract_strided_slice %10 {offsets = [2, 0, 0], sizes = [1, 256, 64], strides = [1, 1, 1]} : vector<4x256x64xf32> to vector<1x256x64xf32>
    %17 = vector.shape_cast %16 : vector<1x256x64xf32> to vector<256x64xf32>
    %18 = vector.extract_strided_slice %10 {offsets = [3, 0, 0], sizes = [1, 256, 64], strides = [1, 1, 1]} : vector<4x256x64xf32> to vector<1x256x64xf32>
    %19 = vector.shape_cast %18 : vector<1x256x64xf32> to vector<256x64xf32>
    %20 = arith.maximumf %17, %19 : vector<256x64xf32>
    %21 = arith.maximumf %15, %20 : vector<256x64xf32>
    %22 = vector.shape_cast %21 : vector<256x64xf32> to vector<16x16x64xf32>
    %c0_8 = arith.constant 0 : index
    %c0_9 = arith.constant 0 : index
    %c0_10 = arith.constant 0 : index
    %c0_11 = arith.constant 0 : index
    %23 = vector.load %arg4[%c0_8, %c0_9, %c0_10, %c0_11] : memref<1x16x16x64xf32, #tpu.memory_space<vmem>>, vector<1x16x16x64xf32>
    %24 = vector.shape_cast %23 : vector<1x16x16x64xf32> to vector<16x16x64xf32>
    %25 = vector.shape_cast %22 : vector<16x16x64xf32> to vector<1x16x16x64xf32>
    tpu.vector_store %arg4[%c0_8, %c0_9, %c0_10, %c0_11], %25 {strides = array<i32>} : memref<1x16x16x64xf32, #tpu.memory_space<vmem>>, vector<1x16x16x64xf32>,
    return
  }
  func.func @transform_0(%arg0: i32) -> (i32, i32, i32, i32) {
    %c0_i32 = arith.constant 0 : i32
    %c0_i32_0 = arith.constant 0 : i32
    %c0_i32_1 = arith.constant 0 : i32
    %c0_i32_2 = arith.constant 0 : i32
    return %arg0, %c0_i32, %c0_i32_0, %c0_i32_1 : i32, i32, i32, i32
  }
  func.func @transform_1(%arg0: i32) -> (i32, i32) {
    %c0_i32 = arith.constant 0 : i32
    %c0_i32_0 = arith.constant 0 : i32
    %c0_i32_1 = arith.constant 0 : i32
    return %c0_i32, %c0_i32_0 : i32, i32
  }
  func.func @transform_2(%arg0: i32) -> (i32, i32) {
    %c0_i32 = arith.constant 0 : i32
    %c0_i32_0 = arith.constant 0 : i32
    %c0_i32_1 = arith.constant 0 : i32
    return %c0_i32, %c0_i32_0 : i32, i32
  }
  func.func @transform_3(%arg0: i32) -> (i32, i32, i32, i32) {
    %c0_i32 = arith.constant 0 : i32
    %c0_i32_0 = arith.constant 0 : i32
    %c0_i32_1 = arith.constant 0 : i32
    %c0_i32_2 = arith.constant 0 : i32
    return %arg0, %c0_i32, %c0_i32_0, %c0_i32_1 : i32, i32, i32, i32
  }
}

module attributes {stable_mosaic.version = 11 : i64} {
  func.func @classifier_kernel(%arg0: i32, %arg1: memref<2x2048xf32, #tpu.memory_space<vmem>>, %arg2: memref<2048x128xf32, #tpu.memory_space<vmem>>, %arg3: memref<1x128xf32, #tpu.memory_space<vmem>>, %arg4: memref<128x5xf32, #tpu.memory_space<vmem>>, %arg5: memref<1x5xf32, #tpu.memory_space<vmem>>, %arg6: memref<2x5xf32, #tpu.memory_space<vmem>>, %arg7: memref<2x128xf32, #tpu.memory_space<vmem>>) attributes {dimension_semantics = [#tpu.dimension_semantics<arbitrary>], iteration_bounds = array<i64: 8>, scalar_prefetch = 0 : i64, scratch_operands = 1 : i64, tpu.core_type = #tpu.core_type<tc>, window_params = [{transform_indices = @transform_0, window_bounds = array<i64: 2, 2048>}, {transform_indices = @transform_1, window_bounds = array<i64: 2048, 128>}, {pipeline_mode = #tpu.pipeline_mode<synchronous>, transform_indices = @transform_2, window_bounds = array<i64: 1, 128>}, {pipeline_mode = #tpu.pipeline_mode<synchronous>, transform_indices = @transform_3, window_bounds = array<i64: 128, 5>}, {pipeline_mode = #tpu.pipeline_mode<synchronous>, transform_indices = @transform_4, window_bounds = array<i64: 1, 5>}, {pipeline_mode = #tpu.pipeline_mode<synchronous>, transform_indices = @transform_5, window_bounds = array<i64: 2, 5>}]} {
    %c0_i32 = arith.constant 0 : i32
    %0 = arith.cmpi eq, %arg0, %c0_i32 : i32
    %1 = arith.extui %0 : i1 to i32
    %c0_i32_0 = arith.constant 0 : i32
    %2 = arith.cmpi ne, %1, %c0_i32_0 : i32
    scf.if %2 {
      %cst_9 = arith.constant 0.000000e+00 : f32
      %12 = vector.broadcast %cst_9 : f32 to vector<2x128xf32>
      %c0_10 = arith.constant 0 : index
      %c0_11 = arith.constant 0 : index
      %13 = vector.load %arg7[%c0_10, %c0_11] : memref<2x128xf32, #tpu.memory_space<vmem>>, vector<2x128xf32>
      tpu.vector_store %arg7[%c0_10, %c0_11], %12 {strides = array<i32>} : memref<2x128xf32, #tpu.memory_space<vmem>>, vector<2x128xf32>,
    } else {
    }
    %c0 = arith.constant 0 : index
    %c0_1 = arith.constant 0 : index
    %3 = vector.load %arg7[%c0, %c0_1] : memref<2x128xf32, #tpu.memory_space<vmem>>, vector<2x128xf32>
    %c0_2 = arith.constant 0 : index
    %c0_3 = arith.constant 0 : index
    %4 = vector.load %arg1[%c0_2, %c0_3] : memref<2x2048xf32, #tpu.memory_space<vmem>>, vector<2x2048xf32>
    %c0_4 = arith.constant 0 : index
    %c0_5 = arith.constant 0 : index
    %5 = vector.load %arg2[%c0_4, %c0_5] : memref<2048x128xf32, #tpu.memory_space<vmem>>, vector<2048x128xf32>
    %cst = arith.constant dense<0.000000e+00> : vector<2x128xf32>
    %6 = tpu.matmul %4, %5, %cst {dimension_numbers = #tpu.dot_dimension_numbers<[1], [0], [0], [1], [0, 0, 1, 1], [], []>} : vector<2x2048xf32>, vector<2048x128xf32>, vector<2x128xf32> -> vector<2x128xf32>
    %7 = arith.addf %3, %6 : vector<2x128xf32>
    %c0_6 = arith.constant 0 : index
    %c0_7 = arith.constant 0 : index
    %8 = vector.load %arg7[%c0_6, %c0_7] : memref<2x128xf32, #tpu.memory_space<vmem>>, vector<2x128xf32>
    tpu.vector_store %arg7[%c0_6, %c0_7], %7 {strides = array<i32>} : memref<2x128xf32, #tpu.memory_space<vmem>>, vector<2x128xf32>,
    %c7_i32 = arith.constant 7 : i32
    %9 = arith.cmpi eq, %arg0, %c7_i32 : i32
    %10 = arith.extui %9 : i1 to i32
    %c0_i32_8 = arith.constant 0 : i32
    %11 = arith.cmpi ne, %10, %c0_i32_8 : i32
    scf.if %11 {
      %c0_9 = arith.constant 0 : index
      %c0_10 = arith.constant 0 : index
      %12 = vector.load %arg7[%c0_9, %c0_10] : memref<2x128xf32, #tpu.memory_space<vmem>>, vector<2x128xf32>
      %c0_11 = arith.constant 0 : index
      %c0_12 = arith.constant 0 : index
      %13 = vector.load %arg3[%c0_11, %c0_12] : memref<1x128xf32, #tpu.memory_space<vmem>>, vector<1x128xf32>
      %14 = vector.broadcast %13 : vector<1x128xf32> to vector<2x128xf32>
      %15 = arith.addf %12, %14 : vector<2x128xf32>
      %cst_13 = arith.constant 0.000000e+00 : f32
      %16 = vector.broadcast %cst_13 : f32 to vector<2x128xf32>
      %17 = arith.maximumf %15, %16 : vector<2x128xf32>
      %c0_14 = arith.constant 0 : index
      %c0_15 = arith.constant 0 : index
      %18 = vector.load %arg4[%c0_14, %c0_15] : memref<128x5xf32, #tpu.memory_space<vmem>>, vector<128x5xf32>
      %cst_16 = arith.constant dense<0.000000e+00> : vector<2x5xf32>
      %19 = tpu.matmul %17, %18, %cst_16 {dimension_numbers = #tpu.dot_dimension_numbers<[1], [0], [0], [1], [0, 0, 1, 1], [], []>} : vector<2x128xf32>, vector<128x5xf32>, vector<2x5xf32> -> vector<2x5xf32>
      %c0_17 = arith.constant 0 : index
      %c0_18 = arith.constant 0 : index
      %20 = vector.load %arg5[%c0_17, %c0_18] : memref<1x5xf32, #tpu.memory_space<vmem>>, vector<1x5xf32>
      %21 = vector.broadcast %20 : vector<1x5xf32> to vector<2x5xf32>
      %22 = arith.addf %19, %21 : vector<2x5xf32>
      %cst_19 = arith.constant dense<0xFF800000> : vector<2xf32>
      %23 = vector.multi_reduction <maximumf>, %22, %cst_19 [1] : vector<2x5xf32> to vector<2xf32>
      %24 = vector.shape_cast %23 : vector<2xf32> to vector<2x1xf32>
      %25 = vector.broadcast %24 : vector<2x1xf32> to vector<2x5xf32>
      %26 = arith.subf %22, %25 : vector<2x5xf32>
      %27 = math.exp %26 : vector<2x5xf32>
      %cst_20 = arith.constant dense<0.000000e+00> : vector<2xf32>
      %28 = vector.multi_reduction <add>, %27, %cst_20 [1] : vector<2x5xf32> to vector<2xf32>
      %29 = vector.shape_cast %28 : vector<2xf32> to vector<2x1xf32>
      %30 = vector.broadcast %29 : vector<2x1xf32> to vector<2x5xf32>
      %31 = arith.divf %27, %30 : vector<2x5xf32>
      %c0_21 = arith.constant 0 : index
      %c0_22 = arith.constant 0 : index
      %32 = vector.load %arg6[%c0_21, %c0_22] : memref<2x5xf32, #tpu.memory_space<vmem>>, vector<2x5xf32>
      tpu.vector_store %arg6[%c0_21, %c0_22], %31 {strides = array<i32>} : memref<2x5xf32, #tpu.memory_space<vmem>>, vector<2x5xf32>,
    } else {
    }
    return
  }
  func.func @transform_0(%arg0: i32) -> (i32, i32) {
    %c0_i32 = arith.constant 0 : i32
    %c0_i32_0 = arith.constant 0 : i32
    return %c0_i32, %arg0 : i32, i32
  }
  func.func @transform_1(%arg0: i32) -> (i32, i32) {
    %c0_i32 = arith.constant 0 : i32
    %c0_i32_0 = arith.constant 0 : i32
    return %arg0, %c0_i32 : i32, i32
  }
  func.func @transform_2(%arg0: i32) -> (i32, i32) {
    %c0_i32 = arith.constant 0 : i32
    %c0_i32_0 = arith.constant 0 : i32
    %c0_i32_1 = arith.constant 0 : i32
    return %c0_i32, %c0_i32_0 : i32, i32
  }
  func.func @transform_3(%arg0: i32) -> (i32, i32) {
    %c0_i32 = arith.constant 0 : i32
    %c0_i32_0 = arith.constant 0 : i32
    %c0_i32_1 = arith.constant 0 : i32
    return %c0_i32, %c0_i32_0 : i32, i32
  }
  func.func @transform_4(%arg0: i32) -> (i32, i32) {
    %c0_i32 = arith.constant 0 : i32
    %c0_i32_0 = arith.constant 0 : i32
    %c0_i32_1 = arith.constant 0 : i32
    return %c0_i32, %c0_i32_0 : i32, i32
  }
  func.func @transform_5(%arg0: i32) -> (i32, i32) {
    %c0_i32 = arith.constant 0 : i32
    %c0_i32_0 = arith.constant 0 : i32
    %c0_i32_1 = arith.constant 0 : i32
    return %c0_i32, %c0_i32_0 : i32, i32
  }
}

</mosaic_0001>

<bundles_post_ra>
// kernel: cnn_forward.4
= control target key start
LH: loop header
LB: loop body
LE: loop exit
PB: predicated region body
PF: predicated region fallthrough
CT: control target
= control target key end

     0   :  { %s4100_s12 = smov 0   ;;  %s6065_s0 = inlined_call_operand.vmem [shape: f32[16,32,64,27], index: 0, kind: input, shape index: {}]   ;;  %s6066_s1 = inlined_call_operand.vmem [shape: f32[27,16], index: 1, kind: input, shape index: {}]   ;;  %s6067_s2 = inlined_call_operand.vmem [shape: f32[1,16], index: 2, kind: input, shape index: {}]   ;;  %s6068_s3 = inlined_call_operand.vmem [shape: f32[16,8,64,16], index: 3, kind: output, shape index: {}]  }
   0x1 LB: > { %s3124_s13 = sadd.s32 4294967295, %s4077_s12   ;;  %p3128_p0 = scmp.ge.s32.totalorder %s4077_s12, 1  ;;  %s4077_s12 = sphi %s4100_s12, %s13_s12  }
   0x2   : > { %p137_p1 = scmp.lt.s32.totalorder %s4077_s12, 17 }
   0x4   : > { %p138_p2 = pnand %p3128_p0, %p137_p1 }
   0x6   : > { %141 = sbr.rel (%p138_p2) target bundleno = 522 (0x20a), region = 32 }
   0xd   : > { %v427_v0 = vld [vmem:[%s6066_s1] sm:$0xff]  ;;  %v428_v1 = vld [vmem:[%s6066_s1 + $0x8] sm:$0xff]  ;;  %v429_v2 = vld [vmem:[%s6066_s1 + $0x10] sm:$0xff]  ;;  %vm1207_vm0 = vcmask 1042432   ;;  %p161_p3 = scmp.lt.s32.totalorder %s3124_s13, 15  ;;  %vm4079_vm1 = vmmov 1  }
   0xe   : > { %v4047_v3 = vpack.c.bf16 %v428_v1, %v427_v0  ;;  %v430_v4 = vld [vmem:[%s6066_s1 + $0x18] sm:$0x7]  ;;  %vm4120_vm2 = vmpackc.low %vm1207_vm0, %vm4079_vm1  ;;  %vm438_vm3 = vcmask 220160   ;;  %vm3004_vm4 = vcmask 130048  }
   0xf   : > { %v4051_v5 = vpack.c.bf16 %v430_v4, %v429_v2  ;;  %s6470_s13 = smov (!%p161_p3, %s3124_s13), 15 }
  0x10   : > { %4048 = vmatprep.subr.bf16.mxu0 %v4047_v3  ;;  %4057 = vmatprep.subr.bf16.mxu1 %v4047_v3  ;;  %s3393_s22 = sshll.u32 %s6470_s13, 11  ;;  %s3394_s28 = sshll.u32 %s6470_s13, 9 }
  0x11   : > { %4050 = vmatpush3.bf16.msra.mxu0 %v4047_v3  ;;  %4059 = vmatpush3.bf16.msra.mxu1 %v4047_v3  ;;  %s4134_s25 = scalar_lea.vmem %s6065_s0, %s3393_s22  ;;  %s5415_s4 = scalar_lea.vmem %s6068_s3, %s3394_s28 }
  0x12   : > { %4053 = vmatprep.subr.msk.bf16.mxu0 %vm4120_vm2, %v4051_v5  ;;  %4058 = vmatprep.subr.msk.bf16.mxu1 %vm4120_vm2, %v4051_v5  ;;  %v171_v7 = vld [vmem:[%s4134_s25] sm:$0xff]  ;;  %v172_v9 = vld [vmem:[%s4134_s25 + $0x8] sm:$0xff]  ;;  %v173_v11 = vld [vmem:[%s4134_s25 + $0x10] sm:$0xff] }
  0x13   : > { %v299_v8 = vld [vmem:[%s4134_s25 + $0x400] sm:$0xff]  ;;  %3663 = vmatprep.mubr.msk.f32.mxu0 %vm438_vm3, %v171_v7  ;;  %v300_v10 = vld [vmem:[%s4134_s25 + $0x408] sm:$0xff]  ;;  %v301_v12 = vld [vmem:[%s4134_s25 + $0x410] sm:$0xff] }
  0x14   : > { %3855 = vmatprep.mubr.msk.f32.mxu1 %vm438_vm3, %v299_v8  ;;  %v174_v13 = vld [vmem:[%s4134_s25 + $0x18] sm:$0xff]  ;;  %v175_v15 = vld [vmem:[%s4134_s25 + $0x20] sm:$0xff]  ;;  %v176_v17 = vld [vmem:[%s4134_s25 + $0x28] sm:$0xff] }
  0x15   : > { %4056 = vmatpush3.bf16.msk.msra.mxu0 %vm4120_vm2, %v4051_v5  ;;  %4060 = vmatpush3.bf16.msk.msra.mxu1 %vm4120_vm2, %v4051_v5  ;;  %v302_v14 = vld [vmem:[%s4134_s25 + $0x418] sm:$0xff]  ;;  %v303_v16 = vld [vmem:[%s4134_s25 + $0x420] sm:$0xff]  ;;  %v304_v18 = vld [vmem:[%s4134_s25 + $0x428] sm:$0xff] }
  0x16   : > { %v177_v19 = vld [vmem:[%s4134_s25 + $0x30] sm:$0xff]  ;;  %v178_v21 = vld [vmem:[%s4134_s25 + $0x38] sm:$0xff]  ;;  %v179_v23 = vld [vmem:[%s4134_s25 + $0x40] sm:$0xff] }
  0x17   : > { %v305_v20 = vld [vmem:[%s4134_s25 + $0x430] sm:$0xff]  ;;  %v306_v22 = vld [vmem:[%s4134_s25 + $0x438] sm:$0xff]  ;;  %v307_v24 = vld [vmem:[%s4134_s25 + $0x440] sm:$0xff] }
  0x18   : > { %3664 = vmatmul.mubr.msk.f32.vlgmr.msra.gmra.mrb[0].mxu0 %vm438_vm3, %v172_v9  ;;  %3856 = vmatmul.mubr.msk.f32.vlgmr.msra.gmra.mrb[0].mxu1 %vm438_vm3, %v300_v10  ;;  %v180_v25 = vld [vmem:[%s4134_s25 + $0x48] sm:$0xff]  ;;  %v181_v27 = vld [vmem:[%s4134_s25 + $0x50] sm:$0xff]  ;;  %v182_v29 = vld [vmem:[%s4134_s25 + $0x58] sm:$0xff] }
  0x19   : > { %3666 = vmatprep.mubr.msk.f32.mxu0 %vm438_vm3, %v173_v11  ;;  %3858 = vmatprep.mubr.msk.f32.mxu1 %vm438_vm3, %v301_v12  ;;  %v308_v26 = vld [vmem:[%s4134_s25 + $0x448] sm:$0xff]  ;;  %v309_v28 = vld [vmem:[%s4134_s25 + $0x450] sm:$0xff]  ;;  %v310_v30 = vld [vmem:[%s4134_s25 + $0x458] sm:$0xff] }
  0x1a   : > { %v183_v31 = vld [vmem:[%s4134_s25 + $0x60] sm:$0xff]  ;;  %v184_v33 = vld [vmem:[%s4134_s25 + $0x68] sm:$0xff]  ;;  %v185_v35 = vld [vmem:[%s4134_s25 + $0x70] sm:$0xff] }
  0x1b   : > { %v311_v32 = vld [vmem:[%s4134_s25 + $0x460] sm:$0xff]  ;;  %v312_v34 = vld [vmem:[%s4134_s25 + $0x468] sm:$0xff]  ;;  %v313_v36 = vld [vmem:[%s4134_s25 + $0x470] sm:$0xff] }
  0x1c   : > { %3667 = vmatmul.mubr.msk.f32.gmra.mrb[2].mxu0 %vm438_vm3, %v174_v13  ;;  %3859 = vmatmul.mubr.msk.f32.gmra.mrb[2].mxu1 %vm438_vm3, %v302_v14  ;;  %v186_v37 = vld [vmem:[%s4134_s25 + $0x78] sm:$0xff]  ;;  %v187_v39 = vld [vmem:[%s4134_s25 + $0x80] sm:$0xff]  ;;  %v188_v41 = vld [vmem:[%s4134_s25 + $0x88] sm:$0xff] }
  0x1d   : > { %3669 = vmatprep.mubr.msk.f32.mxu0 %vm438_vm3, %v175_v15  ;;  %3861 = vmatprep.mubr.msk.f32.mxu1 %vm438_vm3, %v303_v16  ;;  %v314_v38 = vld [vmem:[%s4134_s25 + $0x478] sm:$0xff]  ;;  %v315_v40 = vld [vmem:[%s4134_s25 + $0x480] sm:$0xff]  ;;  %v316_v42 = vld [vmem:[%s4134_s25 + $0x488] sm:$0xff] }
  0x1e   : > { %v189_v43 = vld [vmem:[%s4134_s25 + $0x90] sm:$0xff]  ;;  %v190_v45 = vld [vmem:[%s4134_s25 + $0x98] sm:$0xff]  ;;  %v191_v47 = vld [vmem:[%s4134_s25 + $0xa0] sm:$0xff] }
  0x1f   : > { %v317_v44 = vld [vmem:[%s4134_s25 + $0x490] sm:$0xff]  ;;  %v318_v46 = vld [vmem:[%s4134_s25 + $0x498] sm:$0xff]  ;;  %v319_v48 = vld [vmem:[%s4134_s25 + $0x4a0] sm:$0xff] }
  0x20   : > { %3670 = vmatmul.mubr.msk.f32.gmra.mrb[4].mxu0 %vm438_vm3, %v176_v17  ;;  %3862 = vmatmul.mubr.msk.f32.gmra.mrb[4].mxu1 %vm438_vm3, %v304_v18  ;;  %v192_v49 = vld [vmem:[%s4134_s25 + $0xa8] sm:$0xff]  ;;  %v193_v51 = vld [vmem:[%s4134_s25 + $0xb0] sm:$0xff]  ;;  %v194_v53 = vld [vmem:[%s4134_s25 + $0xb8] sm:$0xff] }
  0x21   : > { %3672 = vmatprep.mubr.msk.f32.mxu0 %vm438_vm3, %v177_v19  ;;  %3864 = vmatprep.mubr.msk.f32.mxu1 %vm438_vm3, %v305_v20  ;;  %v320_v50 = vld [vmem:[%s4134_s25 + $0x4a8] sm:$0xff]  ;;  %v321_v52 = vld [vmem:[%s4134_s25 + $0x4b0] sm:$0xff]  ;;  %v322_v54 = vld [vmem:[%s4134_s25 + $0x4b8] sm:$0xff] }
  0x22   : > { %v195_v55 = vld [vmem:[%s4134_s25 + $0xc0] sm:$0xff]  ;;  %v196_v57 = vld [vmem:[%s4134_s25 + $0xc8] sm:$0xff]  ;;  %v197_v59 = vld [vmem:[%s4134_s25 + $0xd0] sm:$0xff] }
  0x23   : > { %v323_v56 = vld [vmem:[%s4134_s25 + $0x4c0] sm:$0xff]  ;;  %v324_v58 = vld [vmem:[%s4134_s25 + $0x4c8] sm:$0xff]  ;;  %v325_v60 = vld [vmem:[%s4134_s25 + $0x4d0] sm:$0xff] }
  0x24   : > { %3673 = vmatmul.mubr.msk.f32.gmra.mrb[6].mxu0 %vm438_vm3, %v178_v21  ;;  %3865 = vmatmul.mubr.msk.f32.gmra.mrb[6].mxu1 %vm438_vm3, %v306_v22  ;;  %v198_v61 = vld [vmem:[%s4134_s25 + $0xd8] sm:$0xff]  ;;  %v199_v63 = vld [vmem:[%s4134_s25 + $0xe0] sm:$0xff]  ;;  %v200_v1 = vld [vmem:[%s4134_s25 + $0xe8] sm:$0xff] }
  0x25   : > { %3675 = vmatprep.mubr.msk.f32.mxu0 %vm438_vm3, %v179_v23  ;;  %3867 = vmatprep.mubr.msk.f32.mxu1 %vm438_vm3, %v307_v24  ;;  %v326_v62 = vld [vmem:[%s4134_s25 + $0x4d8] sm:$0xff]  ;;  %v327_v0 = vld [vmem:[%s4134_s25 + $0x4e0] sm:$0xff]  ;;  %v328_v2 = vld [vmem:[%s4134_s25 + $0x4e8] sm:$0xff] }
  0x26   : > { %v201_v3 = vld [vmem:[%s4134_s25 + $0xf0] sm:$0xff]  ;;  %v202_v5 = vld [vmem:[%s4134_s25 + $0xf8] sm:$0xff]  ;;  %v203_v7 = vld [vmem:[%s4134_s25 + $0x100] sm:$0xff] }
  0x27   : > { %v329_v4 = vld [vmem:[%s4134_s25 + $0x4f0] sm:$0xff]  ;;  %v330_v6 = vld [vmem:[%s4134_s25 + $0x4f8] sm:$0xff]  ;;  %v331_v8 = vld [vmem:[%s4134_s25 + $0x500] sm:$0xff] }
  0x28   : > { %3676 = vmatmul.mubr.msk.f32.gmra.mrb[8].mxu0 %vm438_vm3, %v180_v25  ;;  %3868 = vmatmul.mubr.msk.f32.gmra.mrb[8].mxu1 %vm438_vm3, %v308_v26  ;;  %v204_v9 = vld [vmem:[%s4134_s25 + $0x108] sm:$0xff]  ;;  %v205_v11 = vld [vmem:[%s4134_s25 + $0x110] sm:$0xff]  ;;  %v206_v13 = vld [vmem:[%s4134_s25 + $0x118] sm:$0xff] }
  0x29   : > { %3678 = vmatprep.mubr.msk.f32.mxu0 %vm438_vm3, %v181_v27  ;;  %3870 = vmatprep.mubr.msk.f32.mxu1 %vm438_vm3, %v309_v28  ;;  %v332_v10 = vld [vmem:[%s4134_s25 + $0x508] sm:$0xff]  ;;  %v333_v12 = vld [vmem:[%s4134_s25 + $0x510] sm:$0xff]  ;;  %v334_v14 = vld [vmem:[%s4134_s25 + $0x518] sm:$0xff] }
  0x2a   : > { %v207_v15 = vld [vmem:[%s4134_s25 + $0x120] sm:$0xff]  ;;  %v208_v17 = vld [vmem:[%s4134_s25 + $0x128] sm:$0xff]  ;;  %v209_v19 = vld [vmem:[%s4134_s25 + $0x130] sm:$0xff] }
  0x2b   : > { %v335_v16 = vld [vmem:[%s4134_s25 + $0x520] sm:$0xff]  ;;  %v336_v18 = vld [vmem:[%s4134_s25 + $0x528] sm:$0xff]  ;;  %v337_v20 = vld [vmem:[%s4134_s25 + $0x530] sm:$0xff] }
  0x2c   : > { %3679 = vmatmul.mubr.msk.f32.gmra.mrb[10].mxu0 %vm438_vm3, %v182_v29  ;;  %3871 = vmatmul.mubr.msk.f32.gmra.mrb[10].mxu1 %vm438_vm3, %v310_v30  ;;  %v210_v21 = vld [vmem:[%s4134_s25 + $0x138] sm:$0xff]  ;;  %v211_v23 = vld [vmem:[%s4134_s25 + $0x140] sm:$0xff]  ;;  %v212_v25 = vld [vmem:[%s4134_s25 + $0x148] sm:$0xff] }
  0x2d   : > { %3681 = vmatprep.mubr.msk.f32.mxu0 %vm438_vm3, %v183_v31  ;;  %3873 = vmatprep.mubr.msk.f32.mxu1 %vm438_vm3, %v311_v32  ;;  %v338_v22 = vld [vmem:[%s4134_s25 + $0x538] sm:$0xff]  ;;  %v339_v24 = vld [vmem:[%s4134_s25 + $0x540] sm:$0xff]  ;;  %v340_v26 = vld [vmem:[%s4134_s25 + $0x548] sm:$0xff] }
  0x2e   : > { %v213_v27 = vld [vmem:[%s4134_s25 + $0x150] sm:$0xff]  ;;  %v214_v29 = vld [vmem:[%s4134_s25 + $0x158] sm:$0xff]  ;;  %v215_v31 = vld [vmem:[%s4134_s25 + $0x160] sm:$0xff] }
  0x2f   : > { %v341_v28 = vld [vmem:[%s4134_s25 + $0x550] sm:$0xff]  ;;  %v342_v30 = vld [vmem:[%s4134_s25 + $0x558] sm:$0xff]  ;;  %v343_v32 = vld [vmem:[%s4134_s25 + $0x560] sm:$0xff] }
  0x30   : > { %3682 = vmatmul.mubr.msk.f32.gmra.mrb[12].mxu0 %vm438_vm3, %v184_v33  ;;  %3874 = vmatmul.mubr.msk.f32.gmra.mrb[12].mxu1 %vm438_vm3, %v312_v34  ;;  %v216_v33 = vld [vmem:[%s4134_s25 + $0x168] sm:$0xff] }
  0x31   : > { %3684 = vmatprep.mubr.msk.f32.mxu0 %vm438_vm3, %v185_v35  ;;  %3876 = vmatprep.mubr.msk.f32.mxu1 %vm438_vm3, %v313_v36  ;;  %v344_v34 = vld [vmem:[%s4134_s25 + $0x568] sm:$0xff]  ;;  %v217_v35 = vld [vmem:[%s4134_s25 + $0x170] sm:$0xff] }
  0x32   : > { %v345_v36 = vld [vmem:[%s4134_s25 + $0x570] sm:$0xff] }
  0x34   : > { %3685 = vmatmul.mubr.msk.f32.gmra.mrb[14].mxu0 %vm438_vm3, %v186_v37  ;;  %3877 = vmatmul.mubr.msk.f32.gmra.mrb[14].mxu1 %vm438_vm3, %v314_v38  ;;  %v218_v37 = vld [vmem:[%s4134_s25 + $0x178] sm:$0xff] }
  0x35   : > { %3687 = vmatprep.mubr.msk.f32.mxu0 %vm438_vm3, %v187_v39  ;;  %3879 = vmatprep.mubr.msk.f32.mxu1 %vm438_vm3, %v315_v40  ;;  %v346_v38 = vld [vmem:[%s4134_s25 + $0x578] sm:$0xff]  ;;  %v219_v39 = vld [vmem:[%s4134_s25 + $0x180] sm:$0xff] }
  0x36   : > { %v347_v40 = vld [vmem:[%s4134_s25 + $0x580] sm:$0xff] }
  0x38   : > { %3688 = vmatmul.mubr.msk.f32.gmra.mrb[16].mxu0 %vm438_vm3, %v188_v41  ;;  %3880 = vmatmul.mubr.msk.f32.gmra.mrb[16].mxu1 %vm438_vm3, %v316_v42  ;;  %v220_v41 = vld [vmem:[%s4134_s25 + $0x188] sm:$0xff] }
  0x39   : > { %3690 = vmatprep.mubr.msk.f32.mxu0 %vm438_vm3, %v189_v43  ;;  %3882 = vmatprep.mubr.msk.f32.mxu1 %vm438_vm3, %v317_v44  ;;  %v348_v42 = vld [vmem:[%s4134_s25 + $0x588] sm:$0xff]  ;;  %v221_v43 = vld [vmem:[%s4134_s25 + $0x190] sm:$0xff] }
  0x3a   : > { %v349_v44 = vld [vmem:[%s4134_s25 + $0x590] sm:$0xff] }
  0x3c   : > { %3691 = vmatmul.mubr.msk.f32.gmra.mrb[18].mxu0 %vm438_vm3, %v190_v45  ;;  %3883 = vmatmul.mubr.msk.f32.gmra.mrb[18].mxu1 %vm438_vm3, %v318_v46  ;;  %v222_v45 = vld [vmem:[%s4134_s25 + $0x198] sm:$0xff] }
  0x3d   : > { %3693 = vmatprep.mubr.msk.f32.mxu0 %vm438_vm3, %v191_v47  ;;  %3885 = vmatprep.mubr.msk.f32.mxu1 %vm438_vm3, %v319_v48  ;;  %v350_v46 = vld [vmem:[%s4134_s25 + $0x598] sm:$0xff]  ;;  %v223_v47 = vld [vmem:[%s4134_s25 + $0x1a0] sm:$0xff] }
  0x3e   : > { %v351_v48 = vld [vmem:[%s4134_s25 + $0x5a0] sm:$0xff] }
  0x40   : > { %3694 = vmatmul.mubr.msk.f32.gmra.mrb[20].mxu0 %vm438_vm3, %v192_v49  ;;  %3886 = vmatmul.mubr.msk.f32.gmra.mrb[20].mxu1 %vm438_vm3, %v320_v50  ;;  %v224_v49 = vld [vmem:[%s4134_s25 + $0x1a8] sm:$0xff] }
  0x41   : > { %3696 = vmatprep.mubr.msk.f32.mxu0 %vm438_vm3, %v193_v51  ;;  %3888 = vmatprep.mubr.msk.f32.mxu1 %vm438_vm3, %v321_v52  ;;  %v352_v50 = vld [vmem:[%s4134_s25 + $0x5a8] sm:$0xff]  ;;  %v225_v51 = vld [vmem:[%s4134_s25 + $0x1b0] sm:$0xff] }
  0x42   : > { %v353_v52 = vld [vmem:[%s4134_s25 + $0x5b0] sm:$0xff] }
  0x44   : > { %3697 = vmatmul.mubr.msk.f32.gmra.mrb[22].mxu0 %vm438_vm3, %v194_v53  ;;  %3889 = vmatmul.mubr.msk.f32.gmra.mrb[22].mxu1 %vm438_vm3, %v322_v54  ;;  %v226_v53 = vld [vmem:[%s4134_s25 + $0x1b8] sm:$0xff] }
  0x45   : > { %3699 = vmatprep.mubr.msk.f32.mxu0 %vm438_vm3, %v195_v55  ;;  %3891 = vmatprep.mubr.msk.f32.mxu1 %vm438_vm3, %v323_v56  ;;  %v354_v54 = vld [vmem:[%s4134_s25 + $0x5b8] sm:$0xff]  ;;  %v227_v55 = vld [vmem:[%s4134_s25 + $0x1c0] sm:$0xff] }
  0x46   : > { %v355_v56 = vld [vmem:[%s4134_s25 + $0x5c0] sm:$0xff] }
  0x48   : > { %3700 = vmatmul.mubr.msk.f32.gmra.mrb[24].mxu0 %vm438_vm3, %v196_v57  ;;  %3892 = vmatmul.mubr.msk.f32.gmra.mrb[24].mxu1 %vm438_vm3, %v324_v58  ;;  %v228_v57 = vld [vmem:[%s4134_s25 + $0x1c8] sm:$0xff] }
  0x49   : > { %3702 = vmatprep.mubr.msk.f32.mxu0 %vm438_vm3, %v197_v59  ;;  %3894 = vmatprep.mubr.msk.f32.mxu1 %vm438_vm3, %v325_v60  ;;  %v356_v58 = vld [vmem:[%s4134_s25 + $0x5c8] sm:$0xff]  ;;  %v229_v59 = vld [vmem:[%s4134_s25 + $0x1d0] sm:$0xff] }
  0x4a   : > { %v357_v60 = vld [vmem:[%s4134_s25 + $0x5d0] sm:$0xff] }
  0x4c   : > { %3703 = vmatmul.mubr.msk.f32.gmra.mrb[26].mxu0 %vm438_vm3, %v198_v61  ;;  %3895 = vmatmul.mubr.msk.f32.gmra.mrb[26].mxu1 %vm438_vm3, %v326_v62  ;;  %v230_v61 = vld [vmem:[%s4134_s25 + $0x1d8] sm:$0xff] }
  0x4d   : > { %3705 = vmatprep.mubr.msk.f32.mxu0 %vm438_vm3, %v199_v63  ;;  %3897 = vmatprep.mubr.msk.f32.mxu1 %vm438_vm3, %v327_v0  ;;  %v358_v62 = vld [vmem:[%s4134_s25 + $0x5d8] sm:$0xff]  ;;  %v231_v63 = vld [vmem:[%s4134_s25 + $0x1e0] sm:$0xff] }
  0x4e   : > { %v359_v0 = vld [vmem:[%s4134_s25 + $0x5e0] sm:$0xff] }
  0x50   : > { %3706 = vmatmul.mubr.msk.f32.gmra.mrb[28].mxu0 %vm438_vm3, %v200_v1  ;;  %3898 = vmatmul.mubr.msk.f32.gmra.mrb[28].mxu1 %vm438_vm3, %v328_v2  ;;  %v232_v1 = vld [vmem:[%s4134_s25 + $0x1e8] sm:$0xff] }
  0x51   : > { %3708 = vmatprep.mubr.msk.f32.mxu0 %vm438_vm3, %v201_v3  ;;  %3900 = vmatprep.mubr.msk.f32.mxu1 %vm438_vm3, %v329_v4  ;;  %v360_v2 = vld [vmem:[%s4134_s25 + $0x5e8] sm:$0xff]  ;;  %v233_v3 = vld [vmem:[%s4134_s25 + $0x1f0] sm:$0xff] }
  0x52   : > { %v361_v4 = vld [vmem:[%s4134_s25 + $0x5f0] sm:$0xff] }
  0x54   : > { %3709 = vmatmul.mubr.msk.f32.gmra.mrb[30].mxu0 %vm438_vm3, %v202_v5  ;;  %3901 = vmatmul.mubr.msk.f32.gmra.mrb[30].mxu1 %vm438_vm3, %v330_v6  ;;  %v234_v5 = vld [vmem:[%s4134_s25 + $0x1f8] sm:$0xff] }
  0x55   : > { %3711 = vmatprep.mubr.msk.f32.mxu0 %vm438_vm3, %v203_v7  ;;  %3903 = vmatprep.mubr.msk.f32.mxu1 %vm438_vm3, %v331_v8  ;;  %v362_v6 = vld [vmem:[%s4134_s25 + $0x5f8] sm:$0xff]  ;;  %v235_v7 = vld [vmem:[%s4134_s25 + $0x200] sm:$0xff] }
  0x56   : > { %v363_v8 = vld [vmem:[%s4134_s25 + $0x600] sm:$0xff] }
  0x58   : > { %3712 = vmatmul.mubr.msk.f32.gmra.mrb[32].mxu0 %vm438_vm3, %v204_v9  ;;  %3904 = vmatmul.mubr.msk.f32.gmra.mrb[32].mxu1 %vm438_vm3, %v332_v10  ;;  %v236_v9 = vld [vmem:[%s4134_s25 + $0x208] sm:$0xff] }
  0x59   : > { %3714 = vmatprep.mubr.msk.f32.mxu0 %vm438_vm3, %v205_v11  ;;  %3906 = vmatprep.mubr.msk.f32.mxu1 %vm438_vm3, %v333_v12  ;;  %v364_v10 = vld [vmem:[%s4134_s25 + $0x608] sm:$0xff]  ;;  %v237_v11 = vld [vmem:[%s4134_s25 + $0x210] sm:$0xff] }
  0x5a   : > { %v365_v12 = vld [vmem:[%s4134_s25 + $0x610] sm:$0xff] }
  0x5c   : > { %3715 = vmatmul.mubr.msk.f32.gmra.mrb[34].mxu0 %vm438_vm3, %v206_v13  ;;  %3907 = vmatmul.mubr.msk.f32.gmra.mrb[34].mxu1 %vm438_vm3, %v334_v14  ;;  %v238_v13 = vld [vmem:[%s4134_s25 + $0x218] sm:$0xff] }
  0x5d   : > { %3717 = vmatprep.mubr.msk.f32.mxu0 %vm438_vm3, %v207_v15  ;;  %3909 = vmatprep.mubr.msk.f32.mxu1 %vm438_vm3, %v335_v16  ;;  %v366_v14 = vld [vmem:[%s4134_s25 + $0x618] sm:$0xff]  ;;  %v239_v15 = vld [vmem:[%s4134_s25 + $0x220] sm:$0xff] }
  0x5e   : > { %v367_v16 = vld [vmem:[%s4134_s25 + $0x620] sm:$0xff] }
  0x60   : > { %3718 = vmatmul.mubr.msk.f32.gmra.mrb[36].mxu0 %vm438_vm3, %v208_v17  ;;  %3910 = vmatmul.mubr.msk.f32.gmra.mrb[36].mxu1 %vm438_vm3, %v336_v18  ;;  %v240_v17 = vld [vmem:[%s4134_s25 + $0x228] sm:$0xff] }
  0x61   : > { %3720 = vmatprep.mubr.msk.f32.mxu0 %vm438_vm3, %v209_v19  ;;  %3912 = vmatprep.mubr.msk.f32.mxu1 %vm438_vm3, %v337_v20  ;;  %v368_v18 = vld [vmem:[%s4134_s25 + $0x628] sm:$0xff]  ;;  %v241_v19 = vld [vmem:[%s4134_s25 + $0x230] sm:$0xff] }
  0x62   : > { %v369_v20 = vld [vmem:[%s4134_s25 + $0x630] sm:$0xff] }
  0x64   : > { %3721 = vmatmul.mubr.msk.f32.gmra.mrb[38].mxu0 %vm438_vm3, %v210_v21  ;;  %3913 = vmatmul.mubr.msk.f32.gmra.mrb[38].mxu1 %vm438_vm3, %v338_v22  ;;  %v242_v21 = vld [vmem:[%s4134_s25 + $0x238] sm:$0xff] }
  0x65   : > { %3723 = vmatprep.mubr.msk.f32.mxu0 %vm438_vm3, %v211_v23  ;;  %3915 = vmatprep.mubr.msk.f32.mxu1 %vm438_vm3, %v339_v24  ;;  %v370_v22 = vld [vmem:[%s4134_s25 + $0x638] sm:$0xff]  ;;  %v243_v23 = vld [vmem:[%s4134_s25 + $0x240] sm:$0xff] }
  0x66   : > { %v371_v24 = vld [vmem:[%s4134_s25 + $0x640] sm:$0xff] }
  0x68   : > { %3724 = vmatmul.mubr.msk.f32.gmra.mrb[40].mxu0 %vm438_vm3, %v212_v25  ;;  %3916 = vmatmul.mubr.msk.f32.gmra.mrb[40].mxu1 %vm438_vm3, %v340_v26  ;;  %v244_v25 = vld [vmem:[%s4134_s25 + $0x248] sm:$0xff] }
  0x69   : > { %3726 = vmatprep.mubr.msk.f32.mxu0 %vm438_vm3, %v213_v27  ;;  %3918 = vmatprep.mubr.msk.f32.mxu1 %vm438_vm3, %v341_v28  ;;  %v372_v26 = vld [vmem:[%s4134_s25 + $0x648] sm:$0xff]  ;;  %v245_v27 = vld [vmem:[%s4134_s25 + $0x250] sm:$0xff] }
  0x6a   : > { %v373_v28 = vld [vmem:[%s4134_s25 + $0x650] sm:$0xff] }
  0x6c   : > { %3727 = vmatmul.mubr.msk.f32.gmra.mrb[42].mxu0 %vm438_vm3, %v214_v29  ;;  %3919 = vmatmul.mubr.msk.f32.gmra.mrb[42].mxu1 %vm438_vm3, %v342_v30  ;;  %v246_v29 = vld [vmem:[%s4134_s25 + $0x258] sm:$0xff] }
  0x6d   : > { %3729 = vmatprep.mubr.msk.f32.mxu0 %vm438_vm3, %v215_v31  ;;  %3921 = vmatprep.mubr.msk.f32.mxu1 %vm438_vm3, %v343_v32  ;;  %v374_v30 = vld [vmem:[%s4134_s25 + $0x658] sm:$0xff]  ;;  %v247_v31 = vld [vmem:[%s4134_s25 + $0x260] sm:$0xff] }
  0x6e   : > { %v375_v32 = vld [vmem:[%s4134_s25 + $0x660] sm:$0xff] }
  0x70   : > { %3730 = vmatmul.mubr.msk.f32.gmra.mrb[44].mxu0 %vm438_vm3, %v216_v33  ;;  %3922 = vmatmul.mubr.msk.f32.gmra.mrb[44].mxu1 %vm438_vm3, %v344_v34  ;;  %v248_v33 = vld [vmem:[%s4134_s25 + $0x268] sm:$0xff] }
  0x71   : > { %3732 = vmatprep.mubr.msk.f32.mxu0 %vm438_vm3, %v217_v35  ;;  %3924 = vmatprep.mubr.msk.f32.mxu1 %vm438_vm3, %v345_v36  ;;  %v376_v34 = vld [vmem:[%s4134_s25 + $0x668] sm:$0xff]  ;;  %v249_v35 = vld [vmem:[%s4134_s25 + $0x270] sm:$0xff] }
  0x72   : > { %v377_v36 = vld [vmem:[%s4134_s25 + $0x670] sm:$0xff] }
  0x74   : > { %3733 = vmatmul.mubr.msk.f32.gmra.mrb[46].mxu0 %vm438_vm3, %v218_v37  ;;  %3925 = vmatmul.mubr.msk.f32.gmra.mrb[46].mxu1 %vm438_vm3, %v346_v38  ;;  %v250_v37 = vld [vmem:[%s4134_s25 + $0x278] sm:$0xff] }
  0x75   : > { %3735 = vmatprep.mubr.msk.f32.mxu0 %vm438_vm3, %v219_v39  ;;  %3927 = vmatprep.mubr.msk.f32.mxu1 %vm438_vm3, %v347_v40  ;;  %v378_v38 = vld [vmem:[%s4134_s25 + $0x678] sm:$0xff]  ;;  %v251_v39 = vld [vmem:[%s4134_s25 + $0x280] sm:$0xff] }
  0x76   : > { %v379_v40 = vld [vmem:[%s4134_s25 + $0x680] sm:$0xff] }
  0x78   : > { %3736 = vmatmul.mubr.msk.f32.gmra.mrb[48].mxu0 %vm438_vm3, %v220_v41  ;;  %3928 = vmatmul.mubr.msk.f32.gmra.mrb[48].mxu1 %vm438_vm3, %v348_v42  ;;  %v252_v41 = vld [vmem:[%s4134_s25 + $0x288] sm:$0xff] }
  0x79   : > { %3738 = vmatprep.mubr.msk.f32.mxu0 %vm438_vm3, %v221_v43  ;;  %3930 = vmatprep.mubr.msk.f32.mxu1 %vm438_vm3, %v349_v44  ;;  %v380_v42 = vld [vmem:[%s4134_s25 + $0x688] sm:$0xff]  ;;  %v253_v43 = vld [vmem:[%s4134_s25 + $0x290] sm:$0xff] }
  0x7a   : > { %v381_v44 = vld [vmem:[%s4134_s25 + $0x690] sm:$0xff] }
  0x7c   : > { %3739 = vmatmul.mubr.msk.f32.gmra.mrb[50].mxu0 %vm438_vm3, %v222_v45  ;;  %3931 = vmatmul.mubr.msk.f32.gmra.mrb[50].mxu1 %vm438_vm3, %v350_v46  ;;  %v254_v45 = vld [vmem:[%s4134_s25 + $0x298] sm:$0xff] }
  0x7d   : > { %3741 = vmatprep.mubr.msk.f32.mxu0 %vm438_vm3, %v223_v47  ;;  %3933 = vmatprep.mubr.msk.f32.mxu1 %vm438_vm3, %v351_v48  ;;  %v382_v46 = vld [vmem:[%s4134_s25 + $0x698] sm:$0xff]  ;;  %v255_v47 = vld [vmem:[%s4134_s25 + $0x2a0] sm:$0xff] }
  0x7e   : > { %v383_v48 = vld [vmem:[%s4134_s25 + $0x6a0] sm:$0xff] }
  0x80   : > { %3742 = vmatmul.mubr.msk.f32.gmra.mrb[52].mxu0 %vm438_vm3, %v224_v49  ;;  %3934 = vmatmul.mubr.msk.f32.gmra.mrb[52].mxu1 %vm438_vm3, %v352_v50  ;;  %v256_v49 = vld [vmem:[%s4134_s25 + $0x2a8] sm:$0xff] }
  0x81   : > { %3744 = vmatprep.mubr.msk.f32.mxu0 %vm438_vm3, %v225_v51  ;;  %3936 = vmatprep.mubr.msk.f32.mxu1 %vm438_vm3, %v353_v52  ;;  %v384_v50 = vld [vmem:[%s4134_s25 + $0x6a8] sm:$0xff]  ;;  %v257_v51 = vld [vmem:[%s4134_s25 + $0x2b0] sm:$0xff] }
  0x82   : > { %v385_v52 = vld [vmem:[%s4134_s25 + $0x6b0] sm:$0xff] }
  0x84   : > { %3745 = vmatmul.mubr.msk.f32.gmra.mrb[54].mxu0 %vm438_vm3, %v226_v53  ;;  %3937 = vmatmul.mubr.msk.f32.gmra.mrb[54].mxu1 %vm438_vm3, %v354_v54  ;;  %v258_v53 = vld [vmem:[%s4134_s25 + $0x2b8] sm:$0xff] }
  0x85   : > { %3747 = vmatprep.mubr.msk.f32.mxu0 %vm438_vm3, %v227_v55  ;;  %3939 = vmatprep.mubr.msk.f32.mxu1 %vm438_vm3, %v355_v56  ;;  %v386_v54 = vld [vmem:[%s4134_s25 + $0x6b8] sm:$0xff]  ;;  %v259_v55 = vld [vmem:[%s4134_s25 + $0x2c0] sm:$0xff] }
  0x86   : > { %v387_v56 = vld [vmem:[%s4134_s25 + $0x6c0] sm:$0xff] }
  0x88   : > { %3748 = vmatmul.mubr.msk.f32.gmra.mrb[56].mxu0 %vm438_vm3, %v228_v57  ;;  %3940 = vmatmul.mubr.msk.f32.gmra.mrb[56].mxu1 %vm438_vm3, %v356_v58  ;;  %v260_v57 = vld [vmem:[%s4134_s25 + $0x2c8] sm:$0xff] }
  0x89   : > { %3750 = vmatprep.mubr.msk.f32.mxu0 %vm438_vm3, %v229_v59  ;;  %3942 = vmatprep.mubr.msk.f32.mxu1 %vm438_vm3, %v357_v60  ;;  %v388_v58 = vld [vmem:[%s4134_s25 + $0x6c8] sm:$0xff]  ;;  %v261_v59 = vld [vmem:[%s4134_s25 + $0x2d0] sm:$0xff] }
  0x8a   : > { %v389_v60 = vld [vmem:[%s4134_s25 + $0x6d0] sm:$0xff] }
  0x8c   : > { %3751 = vmatmul.mubr.msk.f32.gmra.mrb[58].mxu0 %vm438_vm3, %v230_v61  ;;  %3943 = vmatmul.mubr.msk.f32.gmra.mrb[58].mxu1 %vm438_vm3, %v358_v62  ;;  %v262_v61 = vld [vmem:[%s4134_s25 + $0x2d8] sm:$0xff] }
  0x8d   : > { %3753 = vmatprep.mubr.msk.f32.mxu0 %vm438_vm3, %v231_v63  ;;  %3945 = vmatprep.mubr.msk.f32.mxu1 %vm438_vm3, %v359_v0  ;;  %v390_v62 = vld [vmem:[%s4134_s25 + $0x6d8] sm:$0xff]  ;;  %v263_v63 = vld [vmem:[%s4134_s25 + $0x2e0] sm:$0xff] }
  0x8e   : > { %v391_v0 = vld [vmem:[%s4134_s25 + $0x6e0] sm:$0xff] }
  0x90   : > { %3754 = vmatmul.mubr.msk.f32.gmra.mrb[60].mxu0 %vm438_vm3, %v232_v1  ;;  %3946 = vmatmul.mubr.msk.f32.gmra.mrb[60].mxu1 %vm438_vm3, %v360_v2  ;;  %v264_v1 = vld [vmem:[%s4134_s25 + $0x2e8] sm:$0xff] }
  0x91   : > { %3756 = vmatprep.mubr.msk.f32.mxu0 %vm438_vm3, %v233_v3  ;;  %3948 = vmatprep.mubr.msk.f32.mxu1 %vm438_vm3, %v361_v4  ;;  %v392_v2 = vld [vmem:[%s4134_s25 + $0x6e8] sm:$0xff]  ;;  %v265_v3 = vld [vmem:[%s4134_s25 + $0x2f0] sm:$0xff] }
  0x92   : > { %v393_v4 = vld [vmem:[%s4134_s25 + $0x6f0] sm:$0xff] }
  0x94   : > { %3757 = vmatmul.mubr.msk.f32.gmra.mrb[62].mxu0 %vm438_vm3, %v234_v5  ;;  %3949 = vmatmul.mubr.msk.f32.gmra.mrb[62].mxu1 %vm438_vm3, %v362_v6  ;;  %v266_v5 = vld [vmem:[%s4134_s25 + $0x2f8] sm:$0xff] }
  0x95   : > { %3759 = vmatprep.mubr.msk.f32.mxu0 %vm438_vm3, %v235_v7  ;;  %3951 = vmatprep.mubr.msk.f32.mxu1 %vm438_vm3, %v363_v8  ;;  %v394_v6 = vld [vmem:[%s4134_s25 + $0x6f8] sm:$0xff]  ;;  %v267_v7 = vld [vmem:[%s4134_s25 + $0x300] sm:$0xff] }
  0x96   : > { %v395_v8 = vld [vmem:[%s4134_s25 + $0x700] sm:$0xff] }
  0x98   : > { %3760 = vmatmul.mubr.msk.f32.gmra.mrb[64].mxu0 %vm438_vm3, %v236_v9  ;;  %3952 = vmatmul.mubr.msk.f32.gmra.mrb[64].mxu1 %vm438_vm3, %v364_v10  ;;  %v268_v9 = vld [vmem:[%s4134_s25 + $0x308] sm:$0xff] }
  0x99   : > { %3762 = vmatprep.mubr.msk.f32.mxu0 %vm438_vm3, %v237_v11  ;;  %3954 = vmatprep.mubr.msk.f32.mxu1 %vm438_vm3, %v365_v12  ;;  %v396_v10 = vld [vmem:[%s4134_s25 + $0x708] sm:$0xff]  ;;  %v269_v11 = vld [vmem:[%s4134_s25 + $0x310] sm:$0xff] }
  0x9a   : > { %v397_v12 = vld [vmem:[%s4134_s25 + $0x710] sm:$0xff] }
  0x9c   : > { %3763 = vmatmul.mubr.msk.f32.gmra.mrb[66].mxu0 %vm438_vm3, %v238_v13  ;;  %3955 = vmatmul.mubr.msk.f32.gmra.mrb[66].mxu1 %vm438_vm3, %v366_v14  ;;  %v270_v13 = vld [vmem:[%s4134_s25 + $0x318] sm:$0xff] }
  0x9d   : > { %3765 = vmatprep.mubr.msk.f32.mxu0 %vm438_vm3, %v239_v15  ;;  %3957 = vmatprep.mubr.msk.f32.mxu1 %vm438_vm3, %v367_v16  ;;  %v398_v14 = vld [vmem:[%s4134_s25 + $0x718] sm:$0xff]  ;;  %v271_v15 = vld [vmem:[%s4134_s25 + $0x320] sm:$0xff] }
  0x9e   : > { %v399_v16 = vld [vmem:[%s4134_s25 + $0x720] sm:$0xff] }
  0xa0   : > { %3766 = vmatmul.mubr.msk.f32.gmra.mrb[68].mxu0 %vm438_vm3, %v240_v17  ;;  %3958 = vmatmul.mubr.msk.f32.gmra.mrb[68].mxu1 %vm438_vm3, %v368_v18  ;;  %v272_v17 = vld [vmem:[%s4134_s25 + $0x328] sm:$0xff] }
  0xa1   : > { %3768 = vmatprep.mubr.msk.f32.mxu0 %vm438_vm3, %v241_v19  ;;  %3960 = vmatprep.mubr.msk.f32.mxu1 %vm438_vm3, %v369_v20  ;;  %v400_v18 = vld [vmem:[%s4134_s25 + $0x728] sm:$0xff]  ;;  %v273_v19 = vld [vmem:[%s4134_s25 + $0x330] sm:$0xff] }
  0xa2   : > { %v401_v20 = vld [vmem:[%s4134_s25 + $0x730] sm:$0xff] }
  0xa4   : > { %3769 = vmatmul.mubr.msk.f32.gmra.mrb[70].mxu0 %vm438_vm3, %v242_v21  ;;  %3961 = vmatmul.mubr.msk.f32.gmra.mrb[70].mxu1 %vm438_vm3, %v370_v22  ;;  %v274_v21 = vld [vmem:[%s4134_s25 + $0x338] sm:$0xff] }
  0xa5   : > { %3771 = vmatprep.mubr.msk.f32.mxu0 %vm438_vm3, %v243_v23  ;;  %3963 = vmatprep.mubr.msk.f32.mxu1 %vm438_vm3, %v371_v24  ;;  %v402_v22 = vld [vmem:[%s4134_s25 + $0x738] sm:$0xff]  ;;  %v275_v23 = vld [vmem:[%s4134_s25 + $0x340] sm:$0xff] }
  0xa6   : > { %v403_v24 = vld [vmem:[%s4134_s25 + $0x740] sm:$0xff] }
  0xa8   : > { %3772 = vmatmul.mubr.msk.f32.gmra.mrb[72].mxu0 %vm438_vm3, %v244_v25  ;;  %3964 = vmatmul.mubr.msk.f32.gmra.mrb[72].mxu1 %vm438_vm3, %v372_v26  ;;  %v276_v25 = vld [vmem:[%s4134_s25 + $0x348] sm:$0xff] }
  0xa9   : > { %3774 = vmatprep.mubr.msk.f32.mxu0 %vm438_vm3, %v245_v27  ;;  %3966 = vmatprep.mubr.msk.f32.mxu1 %vm438_vm3, %v373_v28  ;;  %v404_v26 = vld [vmem:[%s4134_s25 + $0x748] sm:$0xff]  ;;  %v277_v27 = vld [vmem:[%s4134_s25 + $0x350] sm:$0xff] }
  0xaa   : > { %v405_v28 = vld [vmem:[%s4134_s25 + $0x750] sm:$0xff] }
  0xac   : > { %3775 = vmatmul.mubr.msk.f32.gmra.mrb[74].mxu0 %vm438_vm3, %v246_v29  ;;  %3967 = vmatmul.mubr.msk.f32.gmra.mrb[74].mxu1 %vm438_vm3, %v374_v30  ;;  %v278_v29 = vld [vmem:[%s4134_s25 + $0x358] sm:$0xff] }
  0xad   : > { %3777 = vmatprep.mubr.msk.f32.mxu0 %vm438_vm3, %v247_v31  ;;  %3969 = vmatprep.mubr.msk.f32.mxu1 %vm438_vm3, %v375_v32  ;;  %v406_v30 = vld [vmem:[%s4134_s25 + $0x758] sm:$0xff]  ;;  %v279_v31 = vld [vmem:[%s4134_s25 + $0x360] sm:$0xff] }
  0xae   : > { %v407_v32 = vld [vmem:[%s4134_s25 + $0x760] sm:$0xff] }
  0xb0   : > { %3778 = vmatmul.mubr.msk.f32.gmra.mrb[76].mxu0 %vm438_vm3, %v248_v33  ;;  %3970 = vmatmul.mubr.msk.f32.gmra.mrb[76].mxu1 %vm438_vm3, %v376_v34 }
  0xb1   : > { %3780 = vmatprep.mubr.msk.f32.mxu0 %vm438_vm3, %v249_v35  ;;  %3972 = vmatprep.mubr.msk.f32.mxu1 %vm438_vm3, %v377_v36 }
  0xb4   : > { %3781 = vmatmul.mubr.msk.f32.gmra.mrb[78].mxu0 %vm438_vm3, %v250_v37  ;;  %3973 = vmatmul.mubr.msk.f32.gmra.mrb[78].mxu1 %vm438_vm3, %v378_v38  ;;  %v280_v37 = vld [vmem:[%s4134_s25 + $0x368] sm:$0xff] }
  0xb5   : > { %3783 = vmatprep.mubr.msk.f32.mxu0 %vm438_vm3, %v251_v39  ;;  %3975 = vmatprep.mubr.msk.f32.mxu1 %vm438_vm3, %v379_v40  ;;  %v408_v38 = vld [vmem:[%s4134_s25 + $0x768] sm:$0xff]  ;;  %v281_v39 = vld [vmem:[%s4134_s25 + $0x370] sm:$0xff] }
  0xb6   : > { %v409_v40 = vld [vmem:[%s4134_s25 + $0x770] sm:$0xff] }
  0xb8   : > { %3784 = vmatmul.mubr.msk.f32.gmra.mrb[80].mxu0 %vm438_vm3, %v252_v41  ;;  %3976 = vmatmul.mubr.msk.f32.gmra.mrb[80].mxu1 %vm438_vm3, %v380_v42 }
  0xb9   : > { %3786 = vmatprep.mubr.msk.f32.mxu0 %vm438_vm3, %v253_v43  ;;  %3978 = vmatprep.mubr.msk.f32.mxu1 %vm438_vm3, %v381_v44 }
  0xbc   : > { %3787 = vmatmul.mubr.msk.f32.gmra.mrb[82].mxu0 %vm438_vm3, %v254_v45  ;;  %3979 = vmatmul.mubr.msk.f32.gmra.mrb[82].mxu1 %vm438_vm3, %v382_v46  ;;  %v282_v45 = vld [vmem:[%s4134_s25 + $0x378] sm:$0xff] }
  0xbd   : > { %3789 = vmatprep.mubr.msk.f32.mxu0 %vm438_vm3, %v255_v47  ;;  %3981 = vmatprep.mubr.msk.f32.mxu1 %vm438_vm3, %v383_v48  ;;  %v410_v46 = vld [vmem:[%s4134_s25 + $0x778] sm:$0xff]  ;;  %v283_v47 = vld [vmem:[%s4134_s25 + $0x380] sm:$0xff] }
  0xbe   : > { %v411_v48 = vld [vmem:[%s4134_s25 + $0x780] sm:$0xff] }
  0xc0   : > { %3790 = vmatmul.mubr.msk.f32.gmra.mrb[84].mxu0 %vm438_vm3, %v256_v49  ;;  %3982 = vmatmul.mubr.msk.f32.gmra.mrb[84].mxu1 %vm438_vm3, %v384_v50 }
  0xc1   : > { %3792 = vmatprep.mubr.msk.f32.mxu0 %vm438_vm3, %v257_v51  ;;  %3984 = vmatprep.mubr.msk.f32.mxu1 %vm438_vm3, %v385_v52 }
  0xc4   : > { %3793 = vmatmul.mubr.msk.f32.gmra.mrb[86].mxu0 %vm438_vm3, %v258_v53  ;;  %3985 = vmatmul.mubr.msk.f32.gmra.mrb[86].mxu1 %vm438_vm3, %v386_v54  ;;  %v284_v53 = vld [vmem:[%s4134_s25 + $0x388] sm:$0xff] }
  0xc5   : > { %3795 = vmatprep.mubr.msk.f32.mxu0 %vm438_vm3, %v259_v55  ;;  %3987 = vmatprep.mubr.msk.f32.mxu1 %vm438_vm3, %v387_v56  ;;  %v412_v54 = vld [vmem:[%s4134_s25 + $0x788] sm:$0xff]  ;;  %v285_v55 = vld [vmem:[%s4134_s25 + $0x390] sm:$0xff] }
  0xc6   : > { %v413_v56 = vld [vmem:[%s4134_s25 + $0x790] sm:$0xff] }
  0xc8   : > { %3796 = vmatmul.mubr.msk.f32.gmra.mrb[88].mxu0 %vm438_vm3, %v260_v57  ;;  %3988 = vmatmul.mubr.msk.f32.gmra.mrb[88].mxu1 %vm438_vm3, %v388_v58 }
  0xc9   : > { %3798 = vmatprep.mubr.msk.f32.mxu0 %vm438_vm3, %v261_v59  ;;  %3990 = vmatprep.mubr.msk.f32.mxu1 %vm438_vm3, %v389_v60 }
  0xcc   : > { %3799 = vmatmul.mubr.msk.f32.gmra.mrb[90].mxu0 %vm438_vm3, %v262_v61  ;;  %3991 = vmatmul.mubr.msk.f32.gmra.mrb[90].mxu1 %vm438_vm3, %v390_v62  ;;  %v286_v61 = vld [vmem:[%s4134_s25 + $0x398] sm:$0xff] }
  0xcd   : > { %3801 = vmatprep.mubr.msk.f32.mxu0 %vm438_vm3, %v263_v63  ;;  %3993 = vmatprep.mubr.msk.f32.mxu1 %vm438_vm3, %v391_v0  ;;  %v414_v62 = vld [vmem:[%s4134_s25 + $0x798] sm:$0xff]  ;;  %v287_v63 = vld [vmem:[%s4134_s25 + $0x3a0] sm:$0xff] }
  0xce   : > { %v415_v0 = vld [vmem:[%s4134_s25 + $0x7a0] sm:$0xff] }
  0xd0   : > { %3802 = vmatmul.mubr.msk.f32.gmra.mrb[92].mxu0 %vm438_vm3, %v264_v1  ;;  %3994 = vmatmul.mubr.msk.f32.gmra.mrb[92].mxu1 %vm438_vm3, %v392_v2 }
  0xd1   : > { %3804 = vmatprep.mubr.msk.f32.mxu0 %vm438_vm3, %v265_v3  ;;  %3996 = vmatprep.mubr.msk.f32.mxu1 %vm438_vm3, %v393_v4 }
  0xd4   : > { %3805 = vmatmul.mubr.msk.f32.gmra.mrb[94].mxu0 %vm438_vm3, %v266_v5  ;;  %3997 = vmatmul.mubr.msk.f32.gmra.mrb[94].mxu1 %vm438_vm3, %v394_v6  ;;  %v288_v5 = vld [vmem:[%s4134_s25 + $0x3a8] sm:$0xff] }
  0xd5   : > { %3807 = vmatprep.mubr.msk.f32.mxu0 %vm438_vm3, %v267_v7  ;;  %3999 = vmatprep.mubr.msk.f32.mxu1 %vm438_vm3, %v395_v8  ;;  %v416_v6 = vld [vmem:[%s4134_s25 + $0x7a8] sm:$0xff]  ;;  %v289_v7 = vld [vmem:[%s4134_s25 + $0x3b0] sm:$0xff] }
  0xd6   : > { %v417_v8 = vld [vmem:[%s4134_s25 + $0x7b0] sm:$0xff] }
  0xd8   : > { %3808 = vmatmul.mubr.msk.f32.gmra.mrb[96].mxu0 %vm438_vm3, %v268_v9  ;;  %4000 = vmatmul.mubr.msk.f32.gmra.mrb[96].mxu1 %vm438_vm3, %v396_v10 }
  0xd9   : > { %3810 = vmatprep.mubr.msk.f32.mxu0 %vm438_vm3, %v269_v11  ;;  %4002 = vmatprep.mubr.msk.f32.mxu1 %vm438_vm3, %v397_v12 }
  0xdc   : > { %3811 = vmatmul.mubr.msk.f32.gmra.mrb[98].mxu0 %vm438_vm3, %v270_v13  ;;  %4003 = vmatmul.mubr.msk.f32.gmra.mrb[98].mxu1 %vm438_vm3, %v398_v14  ;;  %v290_v13 = vld [vmem:[%s4134_s25 + $0x3b8] sm:$0xff] }
  0xdd   : > { %3813 = vmatprep.mubr.msk.f32.mxu0 %vm438_vm3, %v271_v15  ;;  %4005 = vmatprep.mubr.msk.f32.mxu1 %vm438_vm3, %v399_v16  ;;  %v418_v14 = vld [vmem:[%s4134_s25 + $0x7b8] sm:$0xff]  ;;  %v291_v15 = vld [vmem:[%s4134_s25 + $0x3c0] sm:$0xff] }
  0xde   : > { %v419_v16 = vld [vmem:[%s4134_s25 + $0x7c0] sm:$0xff] }
  0xe0   : > { %3814 = vmatmul.mubr.msk.f32.gmra.mrb[100].mxu0 %vm438_vm3, %v272_v17  ;;  %4006 = vmatmul.mubr.msk.f32.gmra.mrb[100].mxu1 %vm438_vm3, %v400_v18 }
  0xe1   : > { %3816 = vmatprep.mubr.msk.f32.mxu0 %vm438_vm3, %v273_v19  ;;  %4008 = vmatprep.mubr.msk.f32.mxu1 %vm438_vm3, %v401_v20 }
  0xe4   : > { %3817 = vmatmul.mubr.msk.f32.gmra.mrb[102].mxu0 %vm438_vm3, %v274_v21  ;;  %4009 = vmatmul.mubr.msk.f32.gmra.mrb[102].mxu1 %vm438_vm3, %v402_v22  ;;  %v292_v21 = vld [vmem:[%s4134_s25 + $0x3c8] sm:$0xff] }
  0xe5   : > { %3819 = vmatprep.mubr.msk.f32.mxu0 %vm438_vm3, %v275_v23  ;;  %4011 = vmatprep.mubr.msk.f32.mxu1 %vm438_vm3, %v403_v24  ;;  %v420_v22 = vld [vmem:[%s4134_s25 + $0x7c8] sm:$0xff]  ;;  %v293_v23 = vld [vmem:[%s4134_s25 + $0x3d0] sm:$0xff] }
  0xe6   : > { %v421_v24 = vld [vmem:[%s4134_s25 + $0x7d0] sm:$0xff] }
  0xe8   : > { %3820 = vmatmul.mubr.msk.f32.gmra.mrb[104].mxu0 %vm438_vm3, %v276_v25  ;;  %4012 = vmatmul.mubr.msk.f32.gmra.mrb[104].mxu1 %vm438_vm3, %v404_v26 }
  0xe9   : > { %3822 = vmatprep.mubr.msk.f32.mxu0 %vm438_vm3, %v277_v27  ;;  %4014 = vmatprep.mubr.msk.f32.mxu1 %vm438_vm3, %v405_v28 }
  0xeb   : > { %v4572_v33 = vpop.f32.mrb[0].mxu0  ;;  %v4574_v34 = vpop.f32.mrb[0].mxu1 }
  0xec   : > { %v4576_v35 = vpop.f32.mrb[1].mxu0  ;;  %3823 = vmatmul.mubr.msk.f32.gmra.mrb[106].mxu0 %vm438_vm3, %v278_v29  ;;  %v4579_v36 = vpop.f32.mrb[1].mxu1  ;;  %4015 = vmatmul.mubr.msk.f32.gmra.mrb[106].mxu1 %vm438_vm3, %v406_v30  ;;  %v294_v29 = vld [vmem:[%s4134_s25 + $0x3d8] sm:$0xff] }
  0xed   : > { %3825 = vmatprep.mubr.msk.f32.mxu0 %vm438_vm3, %v279_v31  ;;  %4017 = vmatprep.mubr.msk.f32.mxu1 %vm438_vm3, %v407_v32  ;;  %v422_v30 = vld [vmem:[%s4134_s25 + $0x7d8] sm:$0xff]  ;;  %v295_v31 = vld [vmem:[%s4134_s25 + $0x3e0] sm:$0xff] }
  0xee   : > { %v423_v32 = vld [vmem:[%s4134_s25 + $0x7e0] sm:$0xff] }
  0xef   : > { %v4588_v41 = vpop.f32.mrb[2].mxu0  ;;  %v4590_v42 = vpop.f32.mrb[2].mxu1 }
  0xf0   : > { %v4592_v43 = vpop.f32.mrb[3].mxu0  ;;  %3826 = vmatmul.mubr.msk.f32.gmra.mrb[108].mxu0 %vm438_vm3, %v280_v37  ;;  %v4595_v44 = vpop.f32.mrb[3].mxu1  ;;  %4018 = vmatmul.mubr.msk.f32.gmra.mrb[108].mxu1 %vm438_vm3, %v408_v38 }
  0xf1   : > { %3828 = vmatprep.mubr.msk.f32.mxu0 %vm438_vm3, %v281_v39  ;;  %4020 = vmatprep.mubr.msk.f32.mxu1 %vm438_vm3, %v409_v40 }
  0xf3   : > { %v4604_v49 = vpop.f32.mrb[4].mxu0  ;;  %v4606_v50 = vpop.f32.mrb[4].mxu1 }
  0xf4   : > { %v4608_v51 = vpop.f32.mrb[5].mxu0  ;;  %3829 = vmatmul.mubr.msk.f32.gmra.mrb[110].mxu0 %vm438_vm3, %v282_v45  ;;  %v4611_v52 = vpop.f32.mrb[5].mxu1  ;;  %4021 = vmatmul.mubr.msk.f32.gmra.mrb[110].mxu1 %vm438_vm3, %v410_v46  ;;  %v296_v45 = vld [vmem:[%s4134_s25 + $0x3e8] sm:$0xff] }
  0xf5   : > { %3831 = vmatprep.mubr.msk.f32.mxu0 %vm438_vm3, %v283_v47  ;;  %4023 = vmatprep.mubr.msk.f32.mxu1 %vm438_vm3, %v411_v48  ;;  %v424_v46 = vld [vmem:[%s4134_s25 + $0x7e8] sm:$0xff]  ;;  %v297_v47 = vld [vmem:[%s4134_s25 + $0x3f0] sm:$0xff] }
  0xf6   : > { %v425_v48 = vld [vmem:[%s4134_s25 + $0x7f0] sm:$0xff] }
  0xf7   : > { %v4620_v57 = vpop.f32.mrb[6].mxu0  ;;  %v4622_v58 = vpop.f32.mrb[6].mxu1 }
  0xf8   : > { %v4624_v59 = vpop.f32.mrb[7].mxu0  ;;  %3832 = vmatmul.mubr.msk.f32.gmra.mrb[112].mxu0 %vm438_vm3, %v284_v53  ;;  %v4627_v60 = vpop.f32.mrb[7].mxu1  ;;  %4024 = vmatmul.mubr.msk.f32.gmra.mrb[112].mxu1 %vm438_vm3, %v412_v54 }
  0xf9   : > { %3834 = vmatprep.mubr.msk.f32.mxu0 %vm438_vm3, %v285_v55  ;;  %4026 = vmatprep.mubr.msk.f32.mxu1 %vm438_vm3, %v413_v56 }
  0xfb   : > { %v4636_v1 = vpop.f32.mrb[8].mxu0  ;;  %v4638_v2 = vpop.f32.mrb[8].mxu1 }
  0xfc   : > { %v4640_v3 = vpop.f32.mrb[9].mxu0  ;;  %3835 = vmatmul.mubr.msk.f32.gmra.mrb[114].mxu0 %vm438_vm3, %v286_v61  ;;  %v4643_v4 = vpop.f32.mrb[9].mxu1  ;;  %4027 = vmatmul.mubr.msk.f32.gmra.mrb[114].mxu1 %vm438_vm3, %v414_v62  ;;  %v298_v61 = vld [vmem:[%s4134_s25 + $0x3f8] sm:$0xff] }
  0xfd   : > { %3837 = vmatprep.mubr.msk.f32.mxu0 %vm438_vm3, %v287_v63  ;;  %4029 = vmatprep.mubr.msk.f32.mxu1 %vm438_vm3, %v415_v0  ;;  %v426_v62 = vld [vmem:[%s4134_s25 + $0x7f8] sm:$0xff] }
  0xff   : > { %v4652_v9 = vpop.f32.mrb[10].mxu0  ;;  %v4654_v10 = vpop.f32.mrb[10].mxu1 }
 0x100   : > { %v4656_v11 = vpop.f32.mrb[11].mxu0  ;;  %3838 = vmatmul.mubr.msk.f32.gmra.mrb[116].mxu0 %vm438_vm3, %v288_v5  ;;  %v4659_v12 = vpop.f32.mrb[11].mxu1  ;;  %4030 = vmatmul.mubr.msk.f32.gmra.mrb[116].mxu1 %vm438_vm3, %v416_v6 }
 0x101   : > { %3840 = vmatprep.mubr.msk.f32.mxu0 %vm438_vm3, %v289_v7  ;;  %4032 = vmatprep.mubr.msk.f32.mxu1 %vm438_vm3, %v417_v8 }
 0x103   : > { %v4668_v17 = vpop.f32.mrb[12].mxu0  ;;  %v4670_v18 = vpop.f32.mrb[12].mxu1 }
 0x104   : > { %v4672_v19 = vpop.f32.mrb[13].mxu0  ;;  %3841 = vmatmul.mubr.msk.f32.gmra.mrb[118].mxu0 %vm438_vm3, %v290_v13  ;;  %v4675_v20 = vpop.f32.mrb[13].mxu1  ;;  %4033 = vmatmul.mubr.msk.f32.gmra.mrb[118].mxu1 %vm438_vm3, %v418_v14 }
 0x105   : > { %3843 = vmatprep.mubr.msk.f32.mxu0 %vm438_vm3, %v291_v15  ;;  %4035 = vmatprep.mubr.msk.f32.mxu1 %vm438_vm3, %v419_v16 }
 0x107   : > { %v4684_v25 = vpop.f32.mrb[14].mxu0  ;;  %v4686_v26 = vpop.f32.mrb[14].mxu1 }
 0x108   : > { %v4688_v27 = vpop.f32.mrb[15].mxu0  ;;  %3844 = vmatmul.mubr.msk.f32.gmra.mrb[120].mxu0 %vm438_vm3, %v292_v21  ;;  %v4691_v28 = vpop.f32.mrb[15].mxu1  ;;  %4036 = vmatmul.mubr.msk.f32.gmra.mrb[120].mxu1 %vm438_vm3, %v420_v22 }
 0x109   : > { %3846 = vmatprep.mubr.msk.f32.mxu0 %vm438_vm3, %v293_v23  ;;  %4038 = vmatprep.mubr.msk.f32.mxu1 %vm438_vm3, %v421_v24 }
 0x10b   : > { %v4700_v37 = vpop.f32.mrb[16].mxu0  ;;  %v4702_v38 = vpop.f32.mrb[16].mxu1 }
 0x10c   : > { %v4704_v39 = vpop.f32.mrb[17].mxu0  ;;  %3847 = vmatmul.mubr.msk.f32.gmra.mrb[122].mxu0 %vm438_vm3, %v294_v29  ;;  %v4707_v40 = vpop.f32.mrb[17].mxu1  ;;  %4039 = vmatmul.mubr.msk.f32.gmra.mrb[122].mxu1 %vm438_vm3, %v422_v30 }
 0x10d   : > { %3849 = vmatprep.mubr.msk.f32.mxu0 %vm438_vm3, %v295_v31  ;;  %4041 = vmatprep.mubr.msk.f32.mxu1 %vm438_vm3, %v423_v32 }
 0x10f   : > { %v4716_v53 = vpop.f32.mrb[18].mxu0  ;;  %v4718_v54 = vpop.f32.mrb[18].mxu1 }
 0x110   : > { %v4720_v55 = vpop.f32.mrb[19].mxu0  ;;  %3850 = vmatmul.mubr.msk.f32.gmra.mrb[124].mxu0 %vm438_vm3, %v296_v45  ;;  %v4723_v56 = vpop.f32.mrb[19].mxu1  ;;  %4042 = vmatmul.mubr.msk.f32.gmra.mrb[124].mxu1 %vm438_vm3, %v424_v46 }
 0x111   : > { %3852 = vmatprep.mubr.msk.f32.mxu0 %vm438_vm3, %v297_v47  ;;  %4044 = vmatprep.mubr.msk.f32.mxu1 %vm438_vm3, %v425_v48 }
 0x113   : > { %v4730_v63 = vpop.f32.mrb[20].mxu0  ;;  %v4732_v0 = vpop.f32.mrb[20].mxu1 }
 0x114   : > { %v4734_v5 = vpop.f32.mrb[21].mxu0  ;;  %3853 = vmatmul.mubr.msk.f32.gmra.mrb[126].mxu0 %vm438_vm3, %v298_v61  ;;  %v4737_v6 = vpop.f32.mrb[21].mxu1  ;;  %4045 = vmatmul.mubr.msk.f32.gmra.mrb[126].mxu1 %vm438_vm3, %v426_v62 }
 0x117   : > { %v4740_v7 = vpop.f32.mrb[22].mxu0  ;;  %v4742_v8 = vpop.f32.mrb[22].mxu1 }
 0x118   : > { %v4744_v13 = vpop.f32.mrb[23].mxu0  ;;  %v4746_v14 = vpop.f32.mrb[23].mxu1 }
 0x11b   : > { %v4748_v15 = vpop.f32.mrb[24].mxu0  ;;  %v4750_v16 = vpop.f32.mrb[24].mxu1 }
 0x11c   : > { %v4752_v21 = vpop.f32.mrb[25].mxu0  ;;  %v4754_v22 = vpop.f32.mrb[25].mxu1 }
 0x11f   : > { %v4756_v23 = vpop.f32.mrb[26].mxu0  ;;  %v4758_v24 = vpop.f32.mrb[26].mxu1 }
 0x120   : > { %6135 = vst [vmem:[#allocation2_spill] sm:$0xff] %v4758_v24  ;;  %v4760_v29 = vpop.f32.mrb[27].mxu0  ;;  %v4762_v30 = vpop.f32.mrb[27].mxu1 }
 0x121   : > { %6136 = vst [vmem:[#allocation3_spill] sm:$0xff] %v4760_v29  ;;  %6137 = vst [vmem:[#allocation4_spill] sm:$0xff] %v4762_v30 }
 0x123   : > { %v4764_v31 = vpop.f32.mrb[28].mxu0  ;;  %v4766_v32 = vpop.f32.mrb[28].mxu1 }
 0x124   : > { %6138 = vst [vmem:[#allocation5_spill] sm:$0xff] %v4764_v31  ;;  %6139 = vst [vmem:[#allocation6_spill] sm:$0xff] %v4766_v32  ;;  %v4768_v45 = vpop.f32.mrb[29].mxu0  ;;  %v4770_v46 = vpop.f32.mrb[29].mxu1 }
 0x125   : > { %6140 = vst [vmem:[#allocation7_spill] sm:$0xff] %v4768_v45  ;;  %6141 = vst [vmem:[#allocation8_spill] sm:$0xff] %v4770_v46 }
 0x127   : > { %v4772_v47 = vpop.f32.mrb[30].mxu0  ;;  %v4774_v48 = vpop.f32.mrb[30].mxu1 }
 0x128   : > { %6142 = vst [vmem:[#allocation9_spill] sm:$0xff] %v4772_v47  ;;  %6143 = vst [vmem:[#allocation10_spill] sm:$0xff] %v4774_v48  ;;  %v4776_v61 = vpop.f32.mrb[31].mxu0  ;;  %v4778_v62 = vpop.f32.mrb[31].mxu1 }
 0x129   : > { %6144 = vst [vmem:[#allocation11_spill] sm:$0xff] %v4776_v61  ;;  %6145 = vst [vmem:[#allocation12_spill] sm:$0xff] %v4778_v62 }
 0x12b   : > { %v4780_v24 = vpop.f32.mrb[32].mxu0  ;;  %v4782_v29 = vpop.f32.mrb[32].mxu1 }
 0x12c   : > { %6146 = vst [vmem:[#allocation13_spill] sm:$0xff] %v4780_v24  ;;  %6147 = vst [vmem:[#allocation14_spill] sm:$0xff] %v4782_v29  ;;  %v4784_v30 = vpop.f32.mrb[33].mxu0  ;;  %v4786_v31 = vpop.f32.mrb[33].mxu1 }
 0x12d   : > { %6148 = vst [vmem:[#allocation15_spill] sm:$0xff] %v4784_v30  ;;  %6149 = vst [vmem:[#allocation16_spill] sm:$0xff] %v4786_v31 }
 0x12f   : > { %v4788_v32 = vpop.f32.mrb[34].mxu0  ;;  %v4790_v45 = vpop.f32.mrb[34].mxu1 }
 0x130   : > { %6150 = vst [vmem:[#allocation17_spill] sm:$0xff] %v4788_v32  ;;  %v4792_v46 = vpop.f32.mrb[35].mxu0  ;;  %v4794_v47 = vpop.f32.mrb[35].mxu1 }
 0x131   : > { %6151 = vst [vmem:[#allocation18_spill] sm:$0xff] %v4794_v47  ;;  %v4815_v47 = vld [vmem:[%s6067_s2] ss:$0 sm:$0xff] }
 0x133   : > { %v4796_v48 = vpop.f32.mrb[36].mxu0  ;;  %v4798_v61 = vpop.f32.mrb[36].mxu1 }
 0x134   : > { %6152 = vst [vmem:[#allocation19_spill] sm:$0xff] %v4796_v48  ;;  %6153 = vst [vmem:[#allocation20_spill] sm:$0xff] %v4798_v61  ;;  %v4800_v62 = vpop.f32.mrb[37].mxu0  ;;  %v4802_v24 = vpop.f32.mrb[37].mxu1 }
 0x135   : > { %6154 = vst [vmem:[#allocation21_spill] sm:$0xff] %v4800_v62  ;;  %6155 = vst [vmem:[#allocation22_spill] sm:$0xff] %v4802_v24  ;;  %v4823_v24 = vadd.f32 %v4572_v33, %v4815_v47  ;;  %v4843_v33 = vadd.f32 %v4588_v41, %v4815_v47  ;;  %v4863_v41 = vadd.f32 %v4606_v50, %v4815_v47 }
 0x137   : > { %v4804_v29 = vpop.f32.mrb[38].mxu0  ;;  %v4806_v30 = vpop.f32.mrb[38].mxu1  ;;  %6167 = vst [vmem:[#allocation34_spill] sm:$0xff] %v4863_v41  ;;  %v4983_v41 = vadd.f32 %v4684_v25, %v4815_v47 }
 0x138   : > { %6156 = vst [vmem:[#allocation23_spill] sm:$0xff] %v4804_v29  ;;  %6157 = vst [vmem:[#allocation24_spill] sm:$0xff] %v4806_v30  ;;  %v4808_v31 = vpop.f32.mrb[39].mxu0  ;;  %v4810_v32 = vpop.f32.mrb[39].mxu1  ;;  %v4827_v30 = vadd.f32 %v4574_v34, %v4815_v47  ;;  %v4835_v29 = vadd.f32 %v4815_v47, %v4576_v35  ;;  %v4847_v34 = vadd.f32 %v4590_v42, %v4815_v47 }
 0x139   : > { %6158 = vst [vmem:[#allocation25_spill] sm:$0xff] %v4808_v31  ;;  %6159 = vst [vmem:[#allocation26_spill] sm:$0xff] %v4810_v32  ;;  %v4855_v35 = vadd.f32 %v4815_v47, %v4595_v44  ;;  %v4873_v44 = vadd.f32 %v4815_v47, %v4608_v51  ;;  %v4891_v51 = vadd.f32 %v4622_v58, %v4815_v47 }
 0x13a   : > { %6162 = vst [vmem:[#allocation29_spill] sm:$0xff] %v4827_v30  ;;  %6165 = vst [vmem:[#allocation32_spill] sm:$0xff] %v4835_v29  ;;  %v4897_v30 = vadd.f32 %v4815_v47, %v4624_v59  ;;  %v4943_v58 = vadd.f32 %v4654_v10, %v4815_v47  ;;  %v4955_v59 = vadd.f32 %v4668_v17, %v4815_v47 }
 0x13b   : > { %v4817_v48 = vpop.f32.mrb[40].mxu0  ;;  %v4819_v61 = vpop.f32.mrb[40].mxu1  ;;  %6171 = vst [vmem:[#allocation38_spill] sm:$0xff] %v4891_v51  ;;  %v4973_v17 = vadd.f32 %v4815_v47, %v4675_v20  ;;  %v5015_v51 = vadd.f32 %v4702_v38, %v4815_v47  ;;  %v5025_v20 = vadd.f32 %v4815_v47, %v4704_v39  ;;  %v5043_v39 = vadd.f32 %v4815_v47, %v4720_v55 }
 0x13c   : > { %6160 = vst [vmem:[#allocation27_spill] sm:$0xff] %v4817_v48  ;;  %6161 = vst [vmem:[#allocation28_spill] sm:$0xff] %v4819_v61  ;;  %v4829_v31 = vpop.f32.mrb[41].mxu0  ;;  %v4831_v32 = vpop.f32.mrb[41].mxu1  ;;  %v4839_v48 = vadd.f32 %v4815_v47, %v4579_v36  ;;  %v4859_v36 = vadd.f32 %v4604_v49, %v4815_v47  ;;  %v4877_v49 = vadd.f32 %v4815_v47, %v4611_v52 }
 0x13d   : > { %6163 = vst [vmem:[#allocation30_spill] sm:$0xff] %v4829_v31  ;;  %6164 = vst [vmem:[#allocation31_spill] sm:$0xff] %v4831_v32  ;;  %v4851_v31 = vadd.f32 %v4815_v47, %v4592_v43  ;;  %v4887_v61 = vadd.f32 %v4620_v57, %v4815_v47  ;;  %v4929_v52 = vadd.f32 %v4815_v47, %v4640_v3 }
 0x13e   : > { %6166 = vst [vmem:[#allocation33_spill] sm:$0xff] %v4839_v48  ;;  %6170 = vst [vmem:[#allocation37_spill] sm:$0xff] %v4877_v49  ;;  %v4939_v49 = vadd.f32 %v4652_v9, %v4815_v47  ;;  %v4947_v3 = vadd.f32 %v4815_v47, %v4656_v11  ;;  %v4959_v9 = vadd.f32 %v4670_v18, %v4815_v47 }
 0x13f   : > { %v4865_v32 = vpop.f32.mrb[42].mxu0  ;;  %v4867_v42 = vpop.f32.mrb[42].mxu1  ;;  %6172 = vst [vmem:[#allocation39_spill] sm:$0xff] %v4897_v30  ;;  %6175 = vst [vmem:[#allocation42_spill] sm:$0xff] %v4929_v52  ;;  %v4997_v30 = vadd.f32 %v4815_v47, %v4691_v28  ;;  %v5011_v28 = vadd.f32 %v4700_v37, %v4815_v47  ;;  %v5029_v37 = vadd.f32 %v4815_v47, %v4707_v40 }
 0x140   : > { %6168 = vst [vmem:[#allocation35_spill] sm:$0xff] %v4865_v32  ;;  %6169 = vst [vmem:[#allocation36_spill] sm:$0xff] %v4867_v42  ;;  %v4879_v62 = vpop.f32.mrb[43].mxu0  ;;  %v4881_v50 = vpop.f32.mrb[43].mxu1  ;;  %v4901_v32 = vadd.f32 %v4815_v47, %v4627_v60  ;;  %v4915_v60 = vadd.f32 %v4636_v1, %v4815_v47  ;;  %v4919_v42 = vadd.f32 %v4638_v2, %v4815_v47 }
 0x141   : > { %v4933_v1 = vadd.f32 %v4815_v47, %v4643_v4  ;;  %v4951_v4 = vadd.f32 %v4815_v47, %v4659_v12  ;;  %6177 = vst [vmem:[#allocation44_spill] sm:$0xff] %v4959_v9  ;;  %v4969_v12 = vadd.f32 %v4815_v47, %v4672_v19  ;;  %6178 = vst [vmem:[#allocation45_spill] sm:$0xff] %v4973_v17 }
 0x142   : > { %6173 = vst [vmem:[#allocation40_spill] sm:$0xff] %v4901_v32  ;;  %6174 = vst [vmem:[#allocation41_spill] sm:$0xff] %v4919_v42  ;;  %v4987_v19 = vadd.f32 %v4686_v26, %v4815_v47  ;;  %v4993_v42 = vadd.f32 %v4815_v47, %v4688_v27  ;;  %v5035_v17 = vadd.f32 %v4716_v53, %v4815_v47 }
 0x143   : > { %v4907_v29 = vpop.f32.mrb[44].mxu0  ;;  %v4909_v43 = vpop.f32.mrb[44].mxu1  ;;  %6176 = vst [vmem:[#allocation43_spill] sm:$0xff] %v4933_v1  ;;  %6181 = vst [vmem:[#allocation48_spill] sm:$0xff] %v4997_v30  ;;  %v5039_v26 = vadd.f32 %v4718_v54, %v4815_v47  ;;  %v5047_v40 = vadd.f32 %v4815_v47, %v4723_v56  ;;  %v5051_v27 = vadd.f32 %v4730_v63, %v4815_v47 }
 0x144   : > { %v4921_v57 = vpop.f32.mrb[45].mxu0  ;;  %v4923_v48 = vpop.f32.mrb[45].mxu1  ;;  %6179 = vst [vmem:[#allocation46_spill] sm:$0xff] %v4987_v19  ;;  %6180 = vst [vmem:[#allocation47_spill] sm:$0xff] %v4993_v42  ;;  %v5055_v53 = vadd.f32 %v4732_v0, %v4815_v47  ;;  %v5065_v56 = vadd.f32 %v4815_v47, %v4734_v5  ;;  %v5069_v63 = vadd.f32 %v4815_v47, %v4737_v6 }
 0x145   : > { %6182 = vst [vmem:[#allocation49_spill] sm:$0xff] %v5015_v51  ;;  %6183 = vst [vmem:[#allocation50_spill] sm:$0xff] %v5025_v20  ;;  %v5079_v9 = vadd.f32 %v4740_v7, %v4815_v47  ;;  %v5083_v5 = vadd.f32 %v4742_v8, %v4815_v47  ;;  %v5089_v51 = vadd.f32 %v4815_v47, %v4744_v13  ;;  %v6200_v8 = vld [vmem:[#allocation2_spill] sm:$0xff]  ;;  %v6205_v13 = vld [vmem:[#allocation5_spill] sm:$0xff] }
 0x146   : > { %6184 = vst [vmem:[#allocation51_spill] sm:$0xff] %v5029_v37  ;;  %6185 = vst [vmem:[#allocation52_spill] sm:$0xff] %v5039_v26  ;;  %v5093_v42 = vadd.f32 %v4815_v47, %v4746_v14  ;;  %v5107_v14 = vadd.f32 %v4748_v15, %v4815_v47  ;;  %v5111_v19 = vadd.f32 %v4750_v16, %v4815_v47  ;;  %v6207_v16 = vld [vmem:[#allocation6_spill] sm:$0xff]  ;;  %v6221_v26 = vld [vmem:[#allocation11_spill] sm:$0xff] }
 0x147   : > { %v4961_v2 = vpop.f32.mrb[46].mxu0  ;;  %v4963_v10 = vpop.f32.mrb[46].mxu1  ;;  %6186 = vst [vmem:[#allocation53_spill] sm:$0xff] %v5043_v39  ;;  %6187 = vst [vmem:[#allocation54_spill] sm:$0xff] %v5047_v40  ;;  %v5121_v6 = vadd.f32 %v4815_v47, %v4752_v21  ;;  %v5125_v15 = vadd.f32 %v4815_v47, %v4754_v22  ;;  %v6213_v40 = vld [vmem:[#allocation8_spill] sm:$0xff] }
 0x148   : > { %v4975_v32 = vpop.f32.mrb[47].mxu0  ;;  %v4977_v18 = vpop.f32.mrb[47].mxu1  ;;  %6188 = vst [vmem:[#allocation55_spill] sm:$0xff] %v5051_v27  ;;  %6189 = vst [vmem:[#allocation56_spill] sm:$0xff] %v5055_v53  ;;  %v6202_v53 = vld [vmem:[#allocation3_spill] sm:$0xff] }
 0x149   : > { %6190 = vst [vmem:[#allocation57_spill] sm:$0xff] %v5065_v56  ;;  %6191 = vst [vmem:[#allocation58_spill] sm:$0xff] %v5069_v63  ;;  %v5131_v63 = vadd.f32 %v4756_v23, %v4815_v47  ;;  %v5139_v21 = vadd.f32 %v4815_v47, %v6202_v53  ;;  %v5151_v23 = vadd.f32 %v6207_v16, %v4815_v47  ;;  %v6211_v27 = vld [vmem:[#allocation7_spill] sm:$0xff]  ;;  %v6217_v56 = vld [vmem:[#allocation9_spill] sm:$0xff] }
 0x14a   : > { %6192 = vst [vmem:[#allocation59_spill] sm:$0xff] %v5079_v9  ;;  %6193 = vst [vmem:[#allocation60_spill] sm:$0xff] %v5083_v5  ;;  %v5135_v9 = vadd.f32 %v6200_v8, %v4815_v47  ;;  %v6204_v5 = vld [vmem:[#allocation4_spill] sm:$0xff]  ;;  %v6219_v53 = vld [vmem:[#allocation10_spill] sm:$0xff] }
 0x14b   : > { %v5003_v52 = vpop.f32.mrb[48].mxu0  ;;  %v5005_v11 = vpop.f32.mrb[48].mxu1  ;;  %6194 = vst [vmem:[#allocation61_spill] sm:$0xff] %v5089_v51  ;;  %6195 = vst [vmem:[#allocation62_spill] sm:$0xff] %v5093_v42  ;;  %v5143_v22 = vadd.f32 %v4815_v47, %v6204_v5  ;;  %v5147_v51 = vadd.f32 %v6205_v13, %v4815_v47  ;;  %v5161_v5 = vadd.f32 %v4815_v47, %v6211_v27 }
 0x14c   : > { %v5017_v25 = vpop.f32.mrb[49].mxu0  ;;  %v5019_v1 = vpop.f32.mrb[49].mxu1  ;;  %6196 = vst [vmem:[#allocation63_spill] sm:$0xff] %v5107_v14  ;;  %6197 = vst [vmem:[#allocation64_spill] sm:$0xff] %v5111_v19  ;;  %v5165_v13 = vadd.f32 %v4815_v47, %v6213_v40  ;;  %v5175_v14 = vadd.f32 %v6217_v56, %v4815_v47  ;;  %v5179_v27 = vadd.f32 %v6219_v53, %v4815_v47 }
 0x14d   : > { %6198 = vst [vmem:[#allocation65_spill] sm:$0xff] %v5121_v6  ;;  %6199 = vst [vmem:[#allocation66_spill] sm:$0xff] %v5125_v15  ;;  %v5231_v53 = vadd.f32 %v4790_v45, %v4815_v47 }
 0x14e   : > { %6201 = vst [vmem:[#allocation2_spill] sm:$0xff] %v5135_v9  ;;  %6203 = vst [vmem:[#allocation3_spill] sm:$0xff] %v5139_v21  ;;  %v6227_v9 = vld [vmem:[#allocation13_spill] sm:$0xff] }
 0x14f   : > { %v5057_v38 = vpop.f32.mrb[50].mxu0  ;;  %v5059_v54 = vpop.f32.mrb[50].mxu1  ;;  %6206 = vst [vmem:[#allocation4_spill] sm:$0xff] %v5147_v51  ;;  %6208 = vst [vmem:[#allocation5_spill] sm:$0xff] %v5151_v23  ;;  %v6253_v51 = vld [vmem:[#allocation25_spill] sm:$0xff] }
 0x150   : > { %v5071_v30 = vpop.f32.mrb[51].mxu0  ;;  %v5073_v0 = vpop.f32.mrb[51].mxu1  ;;  %6212 = vst [vmem:[#allocation7_spill] sm:$0xff] %v5161_v5  ;;  %6214 = vst [vmem:[#allocation8_spill] sm:$0xff] %v5165_v13  ;;  %v6241_v13 = vld [vmem:[#allocation19_spill] sm:$0xff] }
 0x151   : > { %6218 = vst [vmem:[#allocation9_spill] sm:$0xff] %v5175_v14  ;;  %6220 = vst [vmem:[#allocation10_spill] sm:$0xff] %v5179_v27  ;;  %v6245_v27 = vld [vmem:[#allocation21_spill] sm:$0xff]  ;;  %v6247_v14 = vld [vmem:[#allocation22_spill] sm:$0xff] }
 0x153   : > { %v5099_v20 = vpop.f32.mrb[52].mxu0  ;;  %v5101_v55 = vpop.f32.mrb[52].mxu1 }
 0x154   : > { %v5113_v7 = vpop.f32.mrb[53].mxu0  ;;  %v5115_v37 = vpop.f32.mrb[53].mxu1 }
 0x157   : > { %v5153_v42 = vpop.f32.mrb[54].mxu0  ;;  %v5155_v8 = vpop.f32.mrb[54].mxu1 }
 0x158   : > { %6209 = vst [vmem:[#allocation6_spill] sm:$0xff] %v5153_v42  ;;  %6210 = vst [vmem:[#allocation67_spill] sm:$0xff] %v5155_v8  ;;  %v5167_v39 = vpop.f32.mrb[55].mxu0  ;;  %v5169_v16 = vpop.f32.mrb[55].mxu1  ;;  %v6229_v8 = vld [vmem:[#allocation14_spill] sm:$0xff] }
 0x159   : > { %6215 = vst [vmem:[#allocation68_spill] sm:$0xff] %v5167_v39  ;;  %6216 = vst [vmem:[#allocation69_spill] sm:$0xff] %v5169_v16  ;;  %v5185_v39 = vadd.f32 %v4815_v47, %v6221_v26  ;;  %v6223_v16 = vld [vmem:[#allocation12_spill] sm:$0xff]  ;;  %v5207_v21 = vadd.f32 %v6229_v8, %v4815_v47 }
 0x15a   : > { %v5189_v42 = vadd.f32 %v4815_v47, %v6223_v16  ;;  %v5203_v16 = vadd.f32 %v6227_v9, %v4815_v47  ;;  %v6235_v26 = vld [vmem:[#allocation16_spill] sm:$0xff] }
 0x15b   : > { %6222 = vst [vmem:[#allocation11_spill] sm:$0xff] %v5185_v39  ;;  %v5195_v6 = vpop.f32.mrb[56].mxu0  ;;  %v5197_v19 = vpop.f32.mrb[56].mxu1  ;;  %6230 = vst [vmem:[#allocation14_spill] sm:$0xff] %v5207_v21  ;;  %v5221_v9 = vadd.f32 %v4815_v47, %v6235_v26  ;;  %v6242_v8 = vld [vmem:[#allocation20_spill] sm:$0xff]  ;;  %v6251_v39 = vld [vmem:[#allocation23_spill] sm:$0xff] }
 0x15c   : > { %6224 = vst [vmem:[#allocation12_spill] sm:$0xff] %v5189_v42  ;;  %6225 = vst [vmem:[#allocation70_spill] sm:$0xff] %v5195_v6  ;;  %v5209_v56 = vpop.f32.mrb[57].mxu0  ;;  %v5211_v15 = vpop.f32.mrb[57].mxu1  ;;  %v6233_v6 = vld [vmem:[#allocation15_spill] sm:$0xff] }
 0x15d   : > { %6226 = vst [vmem:[#allocation71_spill] sm:$0xff] %v5197_v19  ;;  %6228 = vst [vmem:[#allocation13_spill] sm:$0xff] %v5203_v16  ;;  %v5217_v40 = vadd.f32 %v4815_v47, %v6233_v6  ;;  %v5235_v6 = vadd.f32 %v4815_v47, %v4792_v46  ;;  %v6240_v19 = vld [vmem:[#allocation18_spill] sm:$0xff]  ;;  %v5271_v16 = vadd.f32 %v6251_v39, %v4815_v47  ;;  %v6252_v46 = vld [vmem:[#allocation24_spill] sm:$0xff] }
 0x15e   : > { %6231 = vst [vmem:[#allocation72_spill] sm:$0xff] %v5209_v56  ;;  %6232 = vst [vmem:[#allocation73_spill] sm:$0xff] %v5211_v15  ;;  %v6237_v56 = vld [vmem:[#allocation17_spill] sm:$0xff]  ;;  %v5239_v26 = vadd.f32 %v4815_v47, %v6240_v19  ;;  %v5243_v15 = vadd.f32 %v6241_v13, %v4815_v47  ;;  %v5257_v19 = vadd.f32 %v4815_v47, %v6245_v27 }
 0x15f   : > { %6234 = vst [vmem:[#allocation15_spill] sm:$0xff] %v5217_v40  ;;  %6236 = vst [vmem:[#allocation16_spill] sm:$0xff] %v5221_v9  ;;  %v5227_v5 = vadd.f32 %v6237_v56, %v4815_v47  ;;  %v5247_v56 = vadd.f32 %v6242_v8, %v4815_v47  ;;  %v5249_v42 = vpop.f32.mrb[58].mxu0  ;;  %v5251_v45 = vpop.f32.mrb[58].mxu1  ;;  %v5261_v13 = vadd.f32 %v4815_v47, %v6247_v14 }
 0x160   : > { %6238 = vst [vmem:[#allocation17_spill] sm:$0xff] %v5231_v53  ;;  %6239 = vst [vmem:[#allocation74_spill] sm:$0xff] %v5235_v6  ;;  %v5263_v23 = vpop.f32.mrb[59].mxu0  ;;  %v5265_v8 = vpop.f32.mrb[59].mxu1  ;;  %v5275_v27 = vadd.f32 %v6252_v46, %v4815_v47  ;;  %v6258_v53 = vld [vmem:[#allocation27_spill] sm:$0xff]  ;;  %v6268_v46 = vld [vmem:[#allocation36_spill] sm:$0xff] }
 0x161   : > { %6243 = vst [vmem:[#allocation18_spill] sm:$0xff] %v5249_v42  ;;  %6244 = vst [vmem:[#allocation19_spill] sm:$0xff] %v5251_v45  ;;  %v6259_v45 = vld [vmem:[#allocation28_spill] sm:$0xff] }
 0x162   : > { %6246 = vst [vmem:[#allocation20_spill] sm:$0xff] %v5257_v19  ;;  %6248 = vst [vmem:[#allocation21_spill] sm:$0xff] %v5261_v13  ;;  %v5303_v6 = vadd.f32 %v6259_v45, %v4815_v47  ;;  %v5339_v13 = vadd.f32 %v4907_v29, %v4815_v47  ;;  %v5357_v29 = vadd.f32 %v4815_v47, %v4923_v48 }
 0x163   : > { %6249 = vst [vmem:[#allocation22_spill] sm:$0xff] %v5263_v23  ;;  %6250 = vst [vmem:[#allocation75_spill] sm:$0xff] %v5265_v8  ;;  %v5281_v23 = vadd.f32 %v4815_v47, %v6253_v51  ;;  %v6254_v8 = vld [vmem:[#allocation26_spill] sm:$0xff]  ;;  %v5291_v40 = vpop.f32.mrb[60].mxu0  ;;  %v5293_v21 = vpop.f32.mrb[60].mxu1  ;;  %v6264_v51 = vld [vmem:[#allocation31_spill] sm:$0xff] }
 0x164   : > { %v5285_v42 = vadd.f32 %v4815_v47, %v6254_v8  ;;  %6256 = vst [vmem:[#allocation24_spill] sm:$0xff] %v5291_v40  ;;  %6257 = vst [vmem:[#allocation25_spill] sm:$0xff] %v5293_v21  ;;  %v5299_v8 = vadd.f32 %v6258_v53, %v4815_v47  ;;  %v5305_v39 = vpop.f32.mrb[61].mxu0  ;;  %v5307_v9 = vpop.f32.mrb[61].mxu1  ;;  %v6262_v40 = vld [vmem:[#allocation30_spill] sm:$0xff]  ;;  %v5317_v53 = vadd.f32 %v4815_v47, %v6264_v51 }
 0x165   : > { %6260 = vst [vmem:[#allocation26_spill] sm:$0xff] %v5305_v39  ;;  %6261 = vst [vmem:[#allocation27_spill] sm:$0xff] %v5307_v9  ;;  %v5313_v14 = vadd.f32 %v4815_v47, %v6262_v40  ;;  %v6266_v39 = vld [vmem:[#allocation35_spill] sm:$0xff]  ;;  %v5327_v9 = vadd.f32 %v6268_v46, %v4815_v47  ;;  %v5331_v40 = vadd.f32 %v4815_v47, %v4879_v62 }
 0x166   : > { %6255 = vst [vmem:[#allocation23_spill] sm:$0xff] %v5285_v42  ;;  %6265 = vst [vmem:[#allocation30_spill] sm:$0xff] %v5317_v53  ;;  %v5323_v19 = vadd.f32 %v6266_v39, %v4815_v47  ;;  %v5335_v51 = vadd.f32 %v4815_v47, %v4881_v50  ;;  %v5343_v39 = vadd.f32 %v4909_v43, %v4815_v47 }
 0x167   : > { %6263 = vst [vmem:[#allocation28_spill] sm:$0xff] %v5313_v14  ;;  %6269 = vst [vmem:[#allocation35_spill] sm:$0xff] %v5327_v9  ;;  %v5345_v45 = vpop.f32.mrb[62].mxu0  ;;  %v5347_v46 = vpop.f32.mrb[62].mxu1  ;;  %v5353_v50 = vadd.f32 %v4815_v47, %v4921_v57  ;;  %v5367_v21 = vadd.f32 %v4961_v2, %v4815_v47  ;;  %v5371_v57 = vadd.f32 %v4963_v10, %v4815_v47 }
 0x168   : > { %6267 = vst [vmem:[#allocation31_spill] sm:$0xff] %v5323_v19  ;;  %6270 = vst [vmem:[#allocation36_spill] sm:$0xff] %v5343_v39  ;;  %v5359_v42 = vpop.f32.mrb[63].mxu0  ;;  %v5361_v43 = vpop.f32.mrb[63].mxu1 }
 0x169   : > { %6271 = vst [vmem:[#allocation76_spill] sm:$0xff] %v5345_v45  ;;  %6272 = vst [vmem:[#allocation77_spill] sm:$0xff] %v5347_v46  ;;  %v5381_v46 = vadd.f32 %v4815_v47, %v4977_v18 }
 0x16a   : > { %6273 = vst [vmem:[#allocation78_spill] sm:$0xff] %v5353_v50  ;;  %6274 = vst [vmem:[#allocation79_spill] sm:$0xff] %v5357_v29 }
 0x16b   : > { %6275 = vst [vmem:[#allocation80_spill] sm:$0xff] %v5359_v42  ;;  %6276 = vst [vmem:[#allocation81_spill] sm:$0xff] %v5361_v43  ;;  %v5377_v43 = vadd.f32 %v4815_v47, %v4975_v32  ;;  %v3761_v48 = vpop.f32.mrb[64].mxu0  ;;  %v3953_v19 = vpop.f32.mrb[64].mxu1 }
 0x16c   : > { %6277 = vst [vmem:[#allocation82_spill] sm:$0xff] %v5367_v21  ;;  %6278 = vst [vmem:[#allocation83_spill] sm:$0xff] %v5371_v57  ;;  %v1603_v9 = vadd.f32 %v3761_v48, %v4815_v47  ;;  %v2243_v18 = vadd.f32 %v3953_v19, %v4815_v47  ;;  %v1597_v53 = vpop.f32.mrb[65].mxu0  ;;  %v2237_v14 = vpop.f32.mrb[65].mxu1  ;;  %v5400_v19 = vadd.f32 %v5003_v52, %v4815_v47 }
 0x16d   : > { %6279 = vst [vmem:[#allocation84_spill] sm:$0xff] %v5377_v43  ;;  %6280 = vst [vmem:[#allocation85_spill] sm:$0xff] %v5381_v46  ;;  %v1598_v10 = vadd.f32 %v4815_v47, %v1597_v53  ;;  %v2238_v42 = vadd.f32 %v4815_v47, %v2237_v14  ;;  %v5404_v48 = vadd.f32 %v5005_v11, %v4815_v47  ;;  %v6281_v14 = vmax.f32 %v4823_v24, 0.0  ;;  %v6282_v43 = vld [vmem:[#allocation29_spill] sm:$0xff] }
 0x16e   : > { %v2621_v50 = vmax.f32 %v1603_v9, 0.0  ;;  %v2749_v32 = vmax.f32 %v2243_v18, 0.0  ;;  %v6283_v62 = vmax.f32 %v6282_v43, 0.0  ;;  %v6286_v24 = vld [vmem:[#allocation33_spill] sm:$0xff] }
 0x16f   : > { %v2620_v45 = vmax.f32 %v1598_v10, 0.0  ;;  %v2748_v2 = vmax.f32 %v2238_v42, 0.0  ;;  %v3764_v53 = vpop.f32.mrb[66].mxu0  ;;  %v3956_v57 = vpop.f32.mrb[66].mxu1  ;;  %v6284_v42 = vld [vmem:[#allocation32_spill] sm:$0xff] }
 0x170   : > { %v2813_v39 = vmax.f32 %v6281_v14, %v2621_v50  ;;  %v2877_v9 = vmax.f32 %v6283_v62, %v2749_v32  ;;  %v1613_v18 = vadd.f32 %v3764_v53, %v4815_v47  ;;  %v2253_v46 = vadd.f32 %v3956_v57, %v4815_v47  ;;  %v1607_v52 = vpop.f32.mrb[67].mxu0  ;;  %v2247_v21 = vpop.f32.mrb[67].mxu1 }
 0x171   : > { %v6285_v11 = vmax.f32 %v6284_v42, 0.0  ;;  %v6287_v50 = vmax.f32 %v6286_v24, 0.0  ;;  %v1608_v62 = vadd.f32 %v4815_v47, %v1607_v52  ;;  %v2248_v43 = vadd.f32 %v4815_v47, %v2247_v21 }
 0x172   : > { %v5425_v57 = vadd.f32 %v4815_v47, %v5017_v25  ;;  %v2941_v32 = vmax.f32 %v2813_v39, %v2877_v9  ;;  %v2623_v53 = vmax.f32 %v1613_v18, 0.0  ;;  %v2751_v29 = vmax.f32 %v2253_v46, 0.0 }
 0x173   : > { %v2812_v10 = vmax.f32 %v6285_v11, %v2620_v45  ;;  %v2876_v14 = vmax.f32 %v6287_v50, %v2748_v2  ;;  %v5429_v42 = vadd.f32 %v4815_v47, %v5019_v1  ;;  %v2622_v11 = vmax.f32 %v1608_v62, 0.0  ;;  %v3767_v2 = vpop.f32.mrb[68].mxu0  ;;  %v3959_v50 = vpop.f32.mrb[68].mxu1 }
 0x174   : > { %v2750_v24 = vmax.f32 %v2248_v43, 0.0  ;;  %3006 = vst.msk [vmem:[%s5415_s4 + $0x8] sm:$0xff] %vm3004_vm4, %v2941_v32  ;;  %v6288_v21 = vmax.f32 %v4843_v33, 0.0  ;;  %v6289_v25 = vmax.f32 %v4847_v34, 0.0  ;;  %v1623_v9 = vadd.f32 %v3767_v2, %v4815_v47  ;;  %v1617_v18 = vpop.f32.mrb[69].mxu0  ;;  %v2257_v1 = vpop.f32.mrb[69].mxu1 }
 0x175   : > { %v2940_v45 = vmax.f32 %v2812_v10, %v2876_v14  ;;  %v2263_v46 = vadd.f32 %v3959_v50, %v4815_v47  ;;  %v6290_v10 = vmax.f32 %v4851_v31, 0.0  ;;  %v6291_v62 = vmax.f32 %v4855_v35, 0.0 }
 0x176   : > { %v2815_v52 = vmax.f32 %v6288_v21, %v2623_v53  ;;  %v2879_v39 = vmax.f32 %v6289_v25, %v2751_v29  ;;  %v1618_v33 = vadd.f32 %v4815_v47, %v1617_v18  ;;  %v2258_v34 = vadd.f32 %v4815_v47, %v2257_v1  ;;  %v6293_v18 = vld [vmem:[#allocation34_spill] sm:$0xff] }
 0x177   : > { %3005 = vst.msk [vmem:[%s5415_s4] sm:$0xff] %vm3004_vm4, %v2940_v45  ;;  %v2814_v14 = vmax.f32 %v6290_v10, %v2622_v11  ;;  %v2878_v43 = vmax.f32 %v6291_v62, %v2750_v24  ;;  %v2605_v29 = vmax.f32 %v5400_v19, 0.0  ;;  %v2625_v53 = vmax.f32 %v1623_v9, 0.0  ;;  %v3770_v31 = vpop.f32.mrb[70].mxu0  ;;  %v3962_v11 = vpop.f32.mrb[70].mxu1 }
 0x178   : > { %v2943_v32 = vmax.f32 %v2815_v52, %v2879_v39  ;;  %v2753_v2 = vmax.f32 %v2263_v46, 0.0  ;;  %v2733_v50 = vmax.f32 %v5404_v48, 0.0  ;;  %v2624_v45 = vmax.f32 %v1618_v33, 0.0  ;;  %v1627_v9 = vpop.f32.mrb[71].mxu0  ;;  %v2267_v46 = vpop.f32.mrb[71].mxu1 }
 0x179   : > { %v2942_v21 = vmax.f32 %v2814_v14, %v2878_v43  ;;  %v2752_v25 = vmax.f32 %v2258_v34, 0.0  ;;  %v6292_v35 = vmax.f32 %v4859_v36, 0.0  ;;  %v6294_v1 = vmax.f32 %v6293_v18, 0.0  ;;  %v6296_v43 = vld [vmem:[#allocation37_spill] sm:$0xff] }
 0x17a   : > { %3008 = vst.msk [vmem:[%s5415_s4 + $0x18] sm:$0xff] %vm3004_vm4, %v2943_v32  ;;  %v1633_v52 = vadd.f32 %v3770_v31, %v4815_v47  ;;  %v2273_v39 = vadd.f32 %v3962_v11, %v4815_v47  ;;  %v6295_v14 = vmax.f32 %v4873_v44, 0.0  ;;  %v6297_v33 = vmax.f32 %v6296_v43, 0.0 }
 0x17b   : > { %v2817_v24 = vmax.f32 %v6292_v35, %v2625_v53  ;;  %v2881_v10 = vmax.f32 %v6294_v1, %v2753_v2  ;;  %3007 = vst.msk [vmem:[%s5415_s4 + $0x10] sm:$0xff] %vm3004_vm4, %v2942_v21  ;;  %v1628_v36 = vadd.f32 %v4815_v47, %v1627_v9  ;;  %v2268_v32 = vadd.f32 %v4815_v47, %v2267_v46  ;;  %v3773_v44 = vpop.f32.mrb[72].mxu0 }
 0x17c   : > { %v2816_v62 = vmax.f32 %v6295_v14, %v2624_v45  ;;  %v2880_v34 = vmax.f32 %v6297_v33, %v2752_v25  ;;  %v2604_v53 = vmax.f32 %v5425_v57, 0.0  ;;  %v2627_v31 = vmax.f32 %v1633_v52, 0.0  ;;  %v3965_v45 = vpop.f32.mrb[72].mxu1  ;;  %v6299_v14 = vld [vmem:[#allocation38_spill] sm:$0xff]  ;;  %v1637_v52 = vpop.f32.mrb[73].mxu0 }
 0x17d   : > { %v2945_v2 = vmax.f32 %v2817_v24, %v2881_v10  ;;  %v2755_v11 = vmax.f32 %v2273_v39, 0.0  ;;  %v2732_v35 = vmax.f32 %v5429_v42, 0.0  ;;  %v2626_v21 = vmax.f32 %v1628_v36, 0.0  ;;  %v2277_v39 = vpop.f32.mrb[73].mxu1  ;;  %v6303_v36 = vld [vmem:[#allocation40_spill] sm:$0xff] }
 0x17e   : > { %v2944_v18 = vmax.f32 %v2816_v62, %v2880_v34  ;;  %v2754_v1 = vmax.f32 %v2268_v32, 0.0  ;;  %v6298_v25 = vmax.f32 %v4887_v61, 0.0  ;;  %v6300_v46 = vmax.f32 %v6299_v14, 0.0  ;;  %v6301_v62 = vld [vmem:[#allocation39_spill] sm:$0xff] }
 0x17f   : > { %3010 = vst.msk [vmem:[%s5415_s4 + $0x28] sm:$0xff] %vm3004_vm4, %v2945_v2  ;;  %v1643_v24 = vadd.f32 %v3773_v44, %v4815_v47  ;;  %v2283_v10 = vadd.f32 %v3965_v45, %v4815_v47  ;;  %v6302_v33 = vmax.f32 %v6301_v62, 0.0  ;;  %v6304_v32 = vmax.f32 %v6303_v36, 0.0  ;;  %v3968_v62 = vpop.f32.mrb[74].mxu1 }
 0x180   : > { %v2819_v9 = vmax.f32 %v6298_v25, %v2627_v31  ;;  %v2883_v43 = vmax.f32 %v6300_v46, %v2755_v11  ;;  %3009 = vst.msk [vmem:[%s5415_s4 + $0x20] sm:$0xff] %vm3004_vm4, %v2944_v18  ;;  %v1638_v61 = vadd.f32 %v4815_v47, %v1637_v52  ;;  %v2278_v31 = vadd.f32 %v4815_v47, %v2277_v39 }
 0x181   : > { %v2818_v34 = vmax.f32 %v6302_v33, %v2626_v21  ;;  %v2882_v2 = vmax.f32 %v6304_v32, %v2754_v1  ;;  %v5485_v11 = vadd.f32 %v5057_v38, %v4815_v47  ;;  %v2629_v45 = vmax.f32 %v1643_v24, 0.0  ;;  %v3776_v1 = vpop.f32.mrb[74].mxu0  ;;  %v6306_v38 = vld [vmem:[#allocation41_spill] sm:$0xff] }
 0x182   : > { %v2947_v44 = vmax.f32 %v2819_v9, %v2883_v43  ;;  %v2757_v25 = vmax.f32 %v2283_v10, 0.0  ;;  %v5489_v18 = vadd.f32 %v5059_v54, %v4815_v47  ;;  %v2628_v14 = vmax.f32 %v1638_v61, 0.0  ;;  %v1647_v10 = vpop.f32.mrb[75].mxu0  ;;  %v2287_v54 = vpop.f32.mrb[75].mxu1 }
 0x183   : > { %v2946_v21 = vmax.f32 %v2818_v34, %v2882_v2  ;;  %v2756_v46 = vmax.f32 %v2278_v31, 0.0  ;;  %v6305_v52 = vmax.f32 %v4915_v60, 0.0  ;;  %v6307_v33 = vmax.f32 %v6306_v38, 0.0  ;;  %v6308_v34 = vld [vmem:[#allocation42_spill] sm:$0xff]  ;;  %v6310_v2 = vld [vmem:[#allocation43_spill] sm:$0xff] }
 0x184   : > { %3012 = vst.msk [vmem:[%s5415_s4 + $0x38] sm:$0xff] %vm3004_vm4, %v2947_v44  ;;  %v1653_v43 = vadd.f32 %v3776_v1, %v4815_v47  ;;  %v2293_v24 = vadd.f32 %v3968_v62, %v4815_v47  ;;  %v6309_v36 = vmax.f32 %v6308_v34, 0.0  ;;  %v6311_v61 = vmax.f32 %v6310_v2, 0.0 }
 0x185   : > { %v2821_v39 = vmax.f32 %v6305_v52, %v2629_v45  ;;  %v2885_v9 = vmax.f32 %v6307_v33, %v2757_v25  ;;  %3011 = vst.msk [vmem:[%s5415_s4 + $0x30] sm:$0xff] %vm3004_vm4, %v2946_v21  ;;  %v1648_v60 = vadd.f32 %v4815_v47, %v1647_v10  ;;  %v2288_v44 = vadd.f32 %v4815_v47, %v2287_v54  ;;  %v3971_v33 = vpop.f32.mrb[76].mxu1 }
 0x186   : > { %v2820_v32 = vmax.f32 %v6309_v36, %v2628_v14  ;;  %v2884_v31 = vmax.f32 %v6311_v61, %v2756_v46  ;;  %v5509_v45 = vadd.f32 %v4815_v47, %v5071_v30  ;;  %v2631_v1 = vmax.f32 %v1653_v43, 0.0  ;;  %v3779_v46 = vpop.f32.mrb[76].mxu0 }
 0x187   : > { %v2949_v25 = vmax.f32 %v2821_v39, %v2885_v9  ;;  %v2759_v62 = vmax.f32 %v2293_v24, 0.0  ;;  %v5513_v21 = vadd.f32 %v4815_v47, %v5073_v0  ;;  %v2630_v52 = vmax.f32 %v1648_v60, 0.0  ;;  %v1657_v24 = vpop.f32.mrb[77].mxu0  ;;  %v2297_v0 = vpop.f32.mrb[77].mxu1 }
 0x188   : > { %v2948_v14 = vmax.f32 %v2820_v32, %v2884_v31  ;;  %v2758_v38 = vmax.f32 %v2288_v44, 0.0  ;;  %v6312_v10 = vmax.f32 %v4939_v49, 0.0  ;;  %v6313_v30 = vmax.f32 %v4943_v58, 0.0 }
 0x189   : > { %3014 = vst.msk [vmem:[%s5415_s4 + $0x48] sm:$0xff] %vm3004_vm4, %v2949_v25  ;;  %v1663_v9 = vadd.f32 %v3779_v46, %v4815_v47  ;;  %v2303_v43 = vadd.f32 %v3971_v33, %v4815_v47  ;;  %v6314_v34 = vmax.f32 %v4947_v3, 0.0  ;;  %v6315_v32 = vmax.f32 %v4951_v4, 0.0  ;;  %v3782_v3 = vpop.f32.mrb[78].mxu0  ;;  %v6317_v46 = vld [vmem:[#allocation44_spill] sm:$0xff] }
 0x18a   : > { %v2823_v54 = vmax.f32 %v6312_v10, %v2631_v1  ;;  %v2887_v39 = vmax.f32 %v6313_v30, %v2759_v62  ;;  %3013 = vst.msk [vmem:[%s5415_s4 + $0x40] sm:$0xff] %vm3004_vm4, %v2948_v14  ;;  %v1658_v49 = vadd.f32 %v4815_v47, %v1657_v24  ;;  %v2298_v58 = vadd.f32 %v4815_v47, %v2297_v0  ;;  %v6320_v0 = vld [vmem:[#allocation45_spill] sm:$0xff] }
 0x18b   : > { %v2822_v36 = vmax.f32 %v6314_v34, %v2630_v52  ;;  %v2886_v2 = vmax.f32 %v6315_v32, %v2758_v38  ;;  %v2607_v61 = vmax.f32 %v5485_v11, 0.0  ;;  %v2633_v60 = vmax.f32 %v1663_v9, 0.0  ;;  %v3974_v52 = vpop.f32.mrb[78].mxu1 }
 0x18c   : > { %v2951_v31 = vmax.f32 %v2823_v54, %v2887_v39  ;;  %v2761_v44 = vmax.f32 %v2303_v43, 0.0  ;;  %v2735_v25 = vmax.f32 %v5489_v18, 0.0  ;;  %v2632_v62 = vmax.f32 %v1658_v49, 0.0  ;;  %v1667_v39 = vpop.f32.mrb[79].mxu0  ;;  %v2307_v9 = vpop.f32.mrb[79].mxu1 }
 0x18d   : > { %v2950_v1 = vmax.f32 %v2822_v36, %v2886_v2  ;;  %v2760_v14 = vmax.f32 %v2298_v58, 0.0  ;;  %v6316_v4 = vmax.f32 %v4955_v59, 0.0  ;;  %v6318_v33 = vmax.f32 %v6317_v46, 0.0 }
 0x18e   : > { %3016 = vst.msk [vmem:[%s5415_s4 + $0x58] sm:$0xff] %vm3004_vm4, %v2951_v31  ;;  %v1673_v54 = vadd.f32 %v3782_v3, %v4815_v47  ;;  %v2313_v30 = vadd.f32 %v3974_v52, %v4815_v47  ;;  %v6319_v43 = vmax.f32 %v4969_v12, 0.0  ;;  %v6321_v34 = vmax.f32 %v6320_v0, 0.0  ;;  %v3785_v12 = vpop.f32.mrb[80].mxu0 }
 0x18f   : > { %v2825_v38 = vmax.f32 %v6316_v4, %v2633_v60  ;;  %v2889_v10 = vmax.f32 %v6318_v33, %v2761_v44  ;;  %3015 = vst.msk [vmem:[%s5415_s4 + $0x50] sm:$0xff] %vm3004_vm4, %v2950_v1  ;;  %v1668_v59 = vadd.f32 %v4815_v47, %v1667_v39  ;;  %v2308_v32 = vadd.f32 %v4815_v47, %v2307_v9  ;;  %v6323_v4 = vld [vmem:[#allocation46_spill] sm:$0xff]  ;;  %v6325_v39 = vld [vmem:[#allocation47_spill] sm:$0xff] }
 0x190   : > { %v2824_v24 = vmax.f32 %v6319_v43, %v2632_v62  ;;  %v2888_v36 = vmax.f32 %v6321_v34, %v2760_v14  ;;  %v2606_v2 = vmax.f32 %v5509_v45, 0.0  ;;  %v2635_v58 = vmax.f32 %v1673_v54, 0.0  ;;  %v3977_v62 = vpop.f32.mrb[80].mxu1  ;;  %v1677_v54 = vpop.f32.mrb[81].mxu0 }
 0x191   : > { %v2953_v49 = vmax.f32 %v2825_v38, %v2889_v10  ;;  %v2763_v31 = vmax.f32 %v2313_v30, 0.0  ;;  %v2734_v60 = vmax.f32 %v5513_v21, 0.0  ;;  %v2634_v1 = vmax.f32 %v1668_v59, 0.0  ;;  %v2317_v30 = vpop.f32.mrb[81].mxu1 }
 0x192   : > { %v2952_v44 = vmax.f32 %v2824_v24, %v2888_v36  ;;  %v2762_v3 = vmax.f32 %v2308_v32, 0.0  ;;  %v6322_v14 = vmax.f32 %v4983_v41, 0.0  ;;  %v6324_v46 = vmax.f32 %v6323_v4, 0.0  ;;  %v6327_v24 = vld [vmem:[#allocation48_spill] sm:$0xff] }
 0x193   : > { %3018 = vst.msk [vmem:[%s5415_s4 + $0x68] sm:$0xff] %vm3004_vm4, %v2953_v49  ;;  %v1683_v38 = vadd.f32 %v3785_v12, %v4815_v47  ;;  %v2323_v10 = vadd.f32 %v3977_v62, %v4815_v47  ;;  %v6326_v9 = vmax.f32 %v6325_v39, 0.0  ;;  %v6328_v0 = vmax.f32 %v6327_v24, 0.0  ;;  %v3980_v62 = vpop.f32.mrb[82].mxu1 }
 0x194   : > { %v2827_v52 = vmax.f32 %v6322_v14, %v2635_v58  ;;  %v2891_v33 = vmax.f32 %v6324_v46, %v2763_v31  ;;  %3017 = vst.msk [vmem:[%s5415_s4 + $0x60] sm:$0xff] %vm3004_vm4, %v2952_v44  ;;  %v1678_v41 = vadd.f32 %v4815_v47, %v1677_v54  ;;  %v2318_v36 = vadd.f32 %v4815_v47, %v2317_v30  ;;  %v6332_v54 = vld [vmem:[#allocation50_spill] sm:$0xff] }
 0x195   : > { %v2826_v43 = vmax.f32 %v6326_v9, %v2634_v1  ;;  %v2890_v34 = vmax.f32 %v6328_v0, %v2762_v3  ;;  %v5569_v59 = vadd.f32 %v5099_v20, %v4815_v47  ;;  %v2637_v49 = vmax.f32 %v1683_v38, 0.0  ;;  %v3788_v3 = vpop.f32.mrb[82].mxu0  ;;  %v6330_v20 = vld [vmem:[#allocation49_spill] sm:$0xff]  ;;  %v6334_v9 = vld [vmem:[#allocation51_spill] sm:$0xff] }
 0x196   : > { %v2955_v32 = vmax.f32 %v2827_v52, %v2891_v33  ;;  %v2765_v58 = vmax.f32 %v2323_v10, 0.0  ;;  %v5573_v31 = vadd.f32 %v5101_v55, %v4815_v47  ;;  %v2636_v1 = vmax.f32 %v1678_v41, 0.0  ;;  %v1687_v10 = vpop.f32.mrb[83].mxu0  ;;  %v2327_v55 = vpop.f32.mrb[83].mxu1 }
 0x197   : > { %v2954_v44 = vmax.f32 %v2826_v43, %v2890_v34  ;;  %v2764_v12 = vmax.f32 %v2318_v36, 0.0  ;;  %v6329_v14 = vmax.f32 %v5011_v28, 0.0  ;;  %v6331_v46 = vmax.f32 %v6330_v20, 0.0 }
 0x198   : > { %3020 = vst.msk [vmem:[%s5415_s4 + $0x78] sm:$0xff] %vm3004_vm4, %v2955_v32  ;;  %v1693_v33 = vadd.f32 %v3788_v3, %v4815_v47  ;;  %v2333_v38 = vadd.f32 %v3980_v62, %v4815_v47  ;;  %v6333_v30 = vmax.f32 %v6332_v54, 0.0  ;;  %v6335_v43 = vmax.f32 %v6334_v9, 0.0  ;;  %v3983_v3 = vpop.f32.mrb[84].mxu1  ;;  %v6341_v54 = vld [vmem:[#allocation54_spill] sm:$0xff] }
 0x199   : > { %v2829_v4 = vmax.f32 %v6329_v14, %v2637_v49  ;;  %v2893_v52 = vmax.f32 %v6331_v46, %v2765_v58  ;;  %3019 = vst.msk [vmem:[%s5415_s4 + $0x70] sm:$0xff] %vm3004_vm4, %v2954_v44  ;;  %v1688_v28 = vadd.f32 %v4815_v47, %v1687_v10  ;;  %v2328_v0 = vadd.f32 %v4815_v47, %v2327_v55 }
 0x19a   : > { %v2828_v39 = vmax.f32 %v6333_v30, %v2636_v1  ;;  %v2892_v24 = vmax.f32 %v6335_v43, %v2764_v12  ;;  %v5593_v34 = vadd.f32 %v4815_v47, %v5113_v7  ;;  %v2639_v36 = vmax.f32 %v1693_v33, 0.0  ;;  %v3791_v12 = vpop.f32.mrb[84].mxu0  ;;  %v6337_v7 = vld [vmem:[#allocation52_spill] sm:$0xff] }
 0x19b   : > { %v2957_v41 = vmax.f32 %v2829_v4, %v2893_v52  ;;  %v2767_v32 = vmax.f32 %v2333_v38, 0.0  ;;  %v5597_v49 = vadd.f32 %v4815_v47, %v5115_v37  ;;  %v2638_v44 = vmax.f32 %v1688_v28, 0.0  ;;  %v1697_v33 = vpop.f32.mrb[85].mxu0  ;;  %v2337_v37 = vpop.f32.mrb[85].mxu1  ;;  %v6339_v38 = vld [vmem:[#allocation53_spill] sm:$0xff] }
 0x19c   : > { %v2956_v58 = vmax.f32 %v2828_v39, %v2892_v24  ;;  %v2766_v1 = vmax.f32 %v2328_v0, 0.0  ;;  %v6336_v62 = vmax.f32 %v5035_v17, 0.0  ;;  %v6338_v20 = vmax.f32 %v6337_v7, 0.0  ;;  %v6345_v7 = vld [vmem:[#allocation56_spill] sm:$0xff] }
 0x19d   : > { %3022 = vst.msk [vmem:[%s5415_s4 + $0x88] sm:$0xff] %vm3004_vm4, %v2957_v41  ;;  %v1703_v46 = vadd.f32 %v3791_v12, %v4815_v47  ;;  %v2343_v52 = vadd.f32 %v3983_v3, %v4815_v47  ;;  %v6340_v10 = vmax.f32 %v6339_v38, 0.0  ;;  %v6342_v30 = vmax.f32 %v6341_v54, 0.0  ;;  %v3794_v12 = vpop.f32.mrb[86].mxu0 }
 0x19e   : > { %v2831_v14 = vmax.f32 %v6336_v62, %v2639_v36  ;;  %v2895_v4 = vmax.f32 %v6338_v20, %v2767_v32  ;;  %3021 = vst.msk [vmem:[%s5415_s4 + $0x80] sm:$0xff] %vm3004_vm4, %v2956_v58  ;;  %v1698_v17 = vadd.f32 %v4815_v47, %v1697_v33  ;;  %v2338_v9 = vadd.f32 %v4815_v47, %v2337_v37  ;;  %v6347_v37 = vld [vmem:[#allocation57_spill] sm:$0xff] }
 0x19f   : > { %v2830_v55 = vmax.f32 %v6340_v10, %v2638_v44  ;;  %v2894_v39 = vmax.f32 %v6342_v30, %v2766_v1  ;;  %v2609_v43 = vmax.f32 %v5569_v59, 0.0  ;;  %v2641_v28 = vmax.f32 %v1703_v46, 0.0  ;;  %v3986_v44 = vpop.f32.mrb[86].mxu1  ;;  %v6343_v1 = vld [vmem:[#allocation55_spill] sm:$0xff]  ;;  %v1707_v46 = vpop.f32.mrb[87].mxu0 }
 0x1a0   : > { %v2959_v24 = vmax.f32 %v2831_v14, %v2895_v4  ;;  %v2769_v0 = vmax.f32 %v2343_v52, 0.0  ;;  %v2640_v32 = vmax.f32 %v1698_v17, 0.0  ;;  %v2768_v58 = vmax.f32 %v2338_v9, 0.0  ;;  %v2347_v52 = vpop.f32.mrb[87].mxu1 }
 0x1a1   : > { %v2958_v36 = vmax.f32 %v2830_v55, %v2894_v39  ;;  %v6344_v3 = vmax.f32 %v6343_v1, 0.0  ;;  %v6346_v20 = vmax.f32 %v6345_v7, 0.0  ;;  %v1713_v14 = vadd.f32 %v3794_v12, %v4815_v47  ;;  %v6349_v55 = vld [vmem:[#allocation58_spill] sm:$0xff] }
 0x1a2   : > { %3024 = vst.msk [vmem:[%s5415_s4 + $0x98] sm:$0xff] %vm3004_vm4, %v2959_v24  ;;  %v2353_v4 = vadd.f32 %v3986_v44, %v4815_v47  ;;  %v6348_v38 = vmax.f32 %v6347_v37, 0.0  ;;  %v6350_v54 = vmax.f32 %v6349_v55, 0.0  ;;  %v1708_v39 = vadd.f32 %v4815_v47, %v1707_v46  ;;  %v6353_v46 = vld [vmem:[#allocation60_spill] sm:$0xff] }
 0x1a3   : > { %v2833_v62 = vmax.f32 %v6344_v3, %v2641_v28  ;;  %v2897_v33 = vmax.f32 %v6346_v20, %v2769_v0  ;;  %3023 = vst.msk [vmem:[%s5415_s4 + $0x90] sm:$0xff] %vm3004_vm4, %v2958_v36  ;;  %v2348_v17 = vadd.f32 %v4815_v47, %v2347_v52  ;;  %v2643_v28 = vmax.f32 %v1713_v14, 0.0  ;;  %v3797_v3 = vpop.f32.mrb[88].mxu0 }
 0x1a4   : > { %v2832_v10 = vmax.f32 %v6348_v38, %v2640_v32  ;;  %v2896_v30 = vmax.f32 %v6350_v54, %v2768_v58  ;;  %v2771_v0 = vmax.f32 %v2353_v4, 0.0  ;;  %v2642_v36 = vmax.f32 %v1708_v39, 0.0  ;;  %v3989_v32 = vpop.f32.mrb[88].mxu1  ;;  %v6351_v58 = vld [vmem:[#allocation59_spill] sm:$0xff]  ;;  %v1717_v14 = vpop.f32.mrb[89].mxu0  ;;  %v6355_v38 = vld [vmem:[#allocation61_spill] sm:$0xff] }
 0x1a5   : > { %v2961_v24 = vmax.f32 %v2833_v62, %v2897_v33  ;;  %v2770_v1 = vmax.f32 %v2348_v17, 0.0  ;;  %v6352_v7 = vmax.f32 %v6351_v58, 0.0  ;;  %v6354_v52 = vmax.f32 %v6353_v46, 0.0  ;;  %v2357_v4 = vpop.f32.mrb[89].mxu1  ;;  %v6357_v54 = vld [vmem:[#allocation62_spill] sm:$0xff]  ;;  %v6360_v58 = vld [vmem:[#allocation67_spill] sm:$0xff] }
 0x1a6   : > { %v2960_v44 = vmax.f32 %v2832_v10, %v2896_v30  ;;  %v1723_v62 = vadd.f32 %v3797_v3, %v4815_v47  ;;  %v2363_v33 = vadd.f32 %v3989_v32, %v4815_v47  ;;  %v6356_v10 = vmax.f32 %v6355_v38, 0.0 }
 0x1a7   : > { %3026 = vst.msk [vmem:[%s5415_s4 + $0xa8] sm:$0xff] %vm3004_vm4, %v2961_v24  ;;  %v2835_v20 = vmax.f32 %v6352_v7, %v2643_v28  ;;  %v2899_v37 = vmax.f32 %v6354_v52, %v2771_v0  ;;  %v6358_v30 = vmax.f32 %v6357_v54, 0.0  ;;  %v1718_v17 = vadd.f32 %v4815_v47, %v1717_v14  ;;  %v5654_v28 = vld [vmem:[%s6067_s2] ss:$0 sm:$0xff]  ;;  %v3800_v52 = vpop.f32.mrb[90].mxu0  ;;  %v3992_v14 = vpop.f32.mrb[90].mxu1 }
 0x1a8   : > { %3025 = vst.msk [vmem:[%s5415_s4 + $0xa0] sm:$0xff] %vm3004_vm4, %v2960_v44  ;;  %v2834_v55 = vmax.f32 %v6356_v10, %v2642_v36  ;;  %v2358_v24 = vadd.f32 %v4815_v47, %v2357_v4  ;;  %v6359_v0 = vld [vmem:[#allocation6_spill] sm:$0xff]  ;;  %v2645_v32 = vmax.f32 %v1723_v62, 0.0  ;;  %v2773_v36 = vmax.f32 %v2363_v33, 0.0  ;;  %v6361_v4 = vld [vmem:[#allocation63_spill] sm:$0xff]  ;;  %v6363_v54 = vld [vmem:[#allocation64_spill] sm:$0xff] }
 0x1a9   : > { %v2898_v39 = vmax.f32 %v6358_v30, %v2770_v1  ;;  %v5658_v3 = vadd.f32 %v5654_v28, %v6359_v0  ;;  %v2963_v44 = vmax.f32 %v2835_v20, %v2899_v37  ;;  %v5662_v1 = vadd.f32 %v5654_v28, %v6360_v58  ;;  %v1727_v33 = vpop.f32.mrb[91].mxu0  ;;  %v2367_v0 = vpop.f32.mrb[91].mxu1 }
 0x1aa   : > { %v2644_v46 = vmax.f32 %v1718_v17, 0.0  ;;  %v2772_v47 = vmax.f32 %v2358_v24, 0.0  ;;  %v6362_v38 = vmax.f32 %v6361_v4, 0.0  ;;  %v6364_v30 = vmax.f32 %v6363_v54, 0.0  ;;  %v6367_v24 = vld [vmem:[#allocation66_spill] sm:$0xff] }
 0x1ab   : > { %v2962_v7 = vmax.f32 %v2834_v55, %v2898_v39  ;;  %3028 = vst.msk [vmem:[%s5415_s4 + $0xb8] sm:$0xff] %vm3004_vm4, %v2963_v44  ;;  %v1733_v37 = vadd.f32 %v5654_v28, %v3800_v52  ;;  %v2373_v62 = vadd.f32 %v5654_v28, %v3992_v14  ;;  %v6365_v55 = vld [vmem:[#allocation65_spill] sm:$0xff]  ;;  %v6368_v44 = vmax.f32 %v6367_v24, 0.0  ;;  %v3995_v24 = vpop.f32.mrb[92].mxu1 }
 0x1ac   : > { %v2837_v10 = vmax.f32 %v6362_v38, %v2645_v32  ;;  %v2901_v20 = vmax.f32 %v6364_v30, %v2773_v36  ;;  %v6366_v39 = vmax.f32 %v6365_v55, 0.0  ;;  %v1728_v32 = vadd.f32 %v5654_v28, %v1727_v33  ;;  %v6369_v36 = vld [vmem:[#allocation68_spill] sm:$0xff]  ;;  %v6370_v30 = vld [vmem:[#allocation69_spill] sm:$0xff] }
 0x1ad   : > { %3027 = vst.msk [vmem:[%s5415_s4 + $0xb0] sm:$0xff] %vm3004_vm4, %v2962_v7  ;;  %v2900_v58 = vmax.f32 %v6368_v44, %v2772_v47  ;;  %v2368_v4 = vadd.f32 %v5654_v28, %v2367_v0  ;;  %v5682_v52 = vadd.f32 %v5654_v28, %v6369_v36  ;;  %v2647_v38 = vmax.f32 %v1733_v37, 0.0  ;;  %v3803_v47 = vpop.f32.mrb[92].mxu0  ;;  %v6372_v44 = vld [vmem:[#allocation2_spill] sm:$0xff] }
 0x1ae   : > { %v2836_v17 = vmax.f32 %v6366_v39, %v2644_v46  ;;  %v2965_v14 = vmax.f32 %v2837_v10, %v2901_v20  ;;  %v2775_v54 = vmax.f32 %v2373_v62, 0.0  ;;  %v5686_v7 = vadd.f32 %v5654_v28, %v6370_v30  ;;  %v1737_v62 = vpop.f32.mrb[93].mxu0  ;;  %v2377_v30 = vpop.f32.mrb[93].mxu1 }
 0x1af   : > { %v2646_v55 = vmax.f32 %v1728_v32, 0.0  ;;  %v2774_v39 = vmax.f32 %v2368_v4, 0.0  ;;  %v6371_v33 = vmax.f32 %v5131_v63, 0.0  ;;  %v6373_v36 = vmax.f32 %v6372_v44, 0.0 }
 0x1b0   : > { %v2964_v46 = vmax.f32 %v2836_v17, %v2900_v58  ;;  %3030 = vst.msk [vmem:[%s5415_s4 + $0xc8] sm:$0xff] %vm3004_vm4, %v2965_v14  ;;  %v1743_v20 = vadd.f32 %v5654_v28, %v3803_v47  ;;  %v2383_v37 = vadd.f32 %v5654_v28, %v3995_v24  ;;  %v6374_v17 = vld [vmem:[#allocation3_spill] sm:$0xff]  ;;  %v6376_v4 = vmax.f32 %v5143_v22, 0.0  ;;  %v6377_v22 = vld [vmem:[#allocation4_spill] sm:$0xff] }
 0x1b1   : > { %v2839_v0 = vmax.f32 %v6371_v33, %v2647_v38  ;;  %v2903_v10 = vmax.f32 %v6373_v36, %v2775_v54  ;;  %v6375_v58 = vmax.f32 %v6374_v17, 0.0  ;;  %v1738_v63 = vadd.f32 %v5654_v28, %v1737_v62  ;;  %v3806_v17 = vpop.f32.mrb[94].mxu0 }
 0x1b2   : > { %3029 = vst.msk [vmem:[%s5415_s4 + $0xc0] sm:$0xff] %vm3004_vm4, %v2964_v46  ;;  %v2902_v14 = vmax.f32 %v6376_v4, %v2774_v39  ;;  %v2378_v38 = vadd.f32 %v5654_v28, %v2377_v30  ;;  %v2649_v24 = vmax.f32 %v1743_v20, 0.0  ;;  %v2777_v33 = vmax.f32 %v2383_v37, 0.0  ;;  %v1747_v20 = vpop.f32.mrb[95].mxu0 }
 0x1b3   : > { %v2838_v32 = vmax.f32 %v6375_v58, %v2646_v55  ;;  %v2967_v47 = vmax.f32 %v2839_v0, %v2903_v10  ;;  %v2648_v46 = vmax.f32 %v1738_v63, 0.0  ;;  %v3998_v55 = vpop.f32.mrb[94].mxu1  ;;  %v6378_v39 = vmax.f32 %v6377_v22, 0.0  ;;  %v6379_v58 = vld [vmem:[#allocation5_spill] sm:$0xff] }
 0x1b4   : > { %v2776_v12 = vmax.f32 %v2378_v38, 0.0  ;;  %v6380_v30 = vmax.f32 %v6379_v58, 0.0  ;;  %v1753_v0 = vadd.f32 %v5654_v28, %v3806_v17  ;;  %v2393_v10 = vadd.f32 %v5654_v28, %v3998_v55  ;;  %v2387_v37 = vpop.f32.mrb[95].mxu1  ;;  %v6383_v38 = vld [vmem:[#allocation8_spill] sm:$0xff] }
 0x1b5   : > { %v2966_v36 = vmax.f32 %v2838_v32, %v2902_v14  ;;  %3032 = vst.msk [vmem:[%s5415_s4 + $0xd8] sm:$0xff] %vm3004_vm4, %v2967_v47  ;;  %v2841_v62 = vmax.f32 %v6378_v39, %v2649_v24  ;;  %v6381_v32 = vld [vmem:[#allocation7_spill] sm:$0xff]  ;;  %v6384_v47 = vmax.f32 %v6383_v38, 0.0  ;;  %v1748_v24 = vadd.f32 %v5654_v28, %v1747_v20  ;;  %v6387_v38 = vld [vmem:[#allocation10_spill] sm:$0xff] }
 0x1b6   : > { %v2905_v4 = vmax.f32 %v6380_v30, %v2777_v33  ;;  %v6382_v14 = vmax.f32 %v6381_v32, 0.0  ;;  %v2388_v22 = vadd.f32 %v5654_v28, %v2387_v37  ;;  %v2651_v55 = vmax.f32 %v1753_v0, 0.0  ;;  %v3809_v32 = vpop.f32.mrb[96].mxu0 }
 0x1b7   : > { %3031 = vst.msk [vmem:[%s5415_s4 + $0xd0] sm:$0xff] %vm3004_vm4, %v2966_v36  ;;  %v2904_v44 = vmax.f32 %v6384_v47, %v2776_v12  ;;  %v2779_v39 = vmax.f32 %v2393_v10, 0.0  ;;  %v2650_v36 = vmax.f32 %v1748_v24, 0.0  ;;  %v6385_v12 = vld [vmem:[#allocation9_spill] sm:$0xff]  ;;  %v6388_v37 = vmax.f32 %v6387_v38, 0.0  ;;  %v1757_v0 = vpop.f32.mrb[97].mxu0 }
 0x1b8   : > { %v2840_v63 = vmax.f32 %v6382_v14, %v2648_v46  ;;  %v2969_v17 = vmax.f32 %v2841_v62, %v2905_v4  ;;  %v2778_v54 = vmax.f32 %v2388_v22, 0.0  ;;  %v4001_v46 = vpop.f32.mrb[96].mxu1  ;;  %v6386_v14 = vmax.f32 %v6385_v12, 0.0  ;;  %v6391_v22 = vld [vmem:[#allocation12_spill] sm:$0xff] }
 0x1b9   : > { %v2907_v47 = vmax.f32 %v6388_v37, %v2779_v39  ;;  %v1763_v62 = vadd.f32 %v5654_v28, %v3809_v32  ;;  %v2403_v4 = vadd.f32 %v5654_v28, %v4001_v46  ;;  %v2397_v10 = vpop.f32.mrb[97].mxu1  ;;  %v6393_v39 = vld [vmem:[#allocation70_spill] sm:$0xff]  ;;  %v6394_v37 = vld [vmem:[#allocation71_spill] sm:$0xff] }
 0x1ba   : > { %v2968_v30 = vmax.f32 %v2840_v63, %v2904_v44  ;;  %3034 = vst.msk [vmem:[%s5415_s4 + $0xe8] sm:$0xff] %vm3004_vm4, %v2969_v17  ;;  %v2843_v20 = vmax.f32 %v6386_v14, %v2651_v55  ;;  %v6389_v44 = vld [vmem:[#allocation11_spill] sm:$0xff]  ;;  %v6392_v17 = vmax.f32 %v6391_v22, 0.0  ;;  %v1758_v55 = vadd.f32 %v5654_v28, %v1757_v0  ;;  %v4004_v22 = vpop.f32.mrb[98].mxu1  ;;  %v6395_v0 = vld [vmem:[#allocation13_spill] sm:$0xff] }
 0x1bb   : > { %v6390_v63 = vmax.f32 %v6389_v44, 0.0  ;;  %v2398_v12 = vadd.f32 %v5654_v28, %v2397_v10  ;;  %v5742_v32 = vadd.f32 %v5654_v28, %v6393_v39  ;;  %v2653_v14 = vmax.f32 %v1763_v62, 0.0  ;;  %v6397_v39 = vld [vmem:[#allocation14_spill] sm:$0xff] }
 0x1bc   : > { %3033 = vst.msk [vmem:[%s5415_s4 + $0xe0] sm:$0xff] %vm3004_vm4, %v2968_v30  ;;  %v2906_v58 = vmax.f32 %v6392_v17, %v2778_v54  ;;  %v2971_v46 = vmax.f32 %v2843_v20, %v2907_v47  ;;  %v2781_v38 = vmax.f32 %v2403_v4, 0.0  ;;  %v5746_v30 = vadd.f32 %v5654_v28, %v6394_v37  ;;  %v3812_v54 = vpop.f32.mrb[98].mxu0  ;;  %v2407_v37 = vpop.f32.mrb[99].mxu1 }
 0x1bd   : > { %v2842_v24 = vmax.f32 %v6390_v63, %v2650_v36  ;;  %v2652_v44 = vmax.f32 %v1758_v55, 0.0  ;;  %v2780_v63 = vmax.f32 %v2398_v12, 0.0  ;;  %v6396_v10 = vmax.f32 %v6395_v0, 0.0  ;;  %v1767_v4 = vpop.f32.mrb[99].mxu0  ;;  %v6401_v12 = vld [vmem:[#allocation16_spill] sm:$0xff] }
 0x1be   : > { %3036 = vst.msk [vmem:[%s5415_s4 + $0xf8] sm:$0xff] %vm3004_vm4, %v2971_v46  ;;  %v6398_v33 = vmax.f32 %v6397_v39, 0.0  ;;  %v1773_v47 = vadd.f32 %v5654_v28, %v3812_v54  ;;  %v2413_v62 = vadd.f32 %v5654_v28, %v4004_v22  ;;  %v6402_v46 = vmax.f32 %v6401_v12, 0.0  ;;  %v6404_v39 = vld [vmem:[#allocation73_spill] sm:$0xff]  ;;  %v4007_v12 = vpop.f32.mrb[100].mxu1 }
 0x1bf   : > { %v2970_v36 = vmax.f32 %v2842_v24, %v2906_v58  ;;  %v2845_v17 = vmax.f32 %v6396_v10, %v2653_v14  ;;  %v6399_v58 = vld [vmem:[#allocation15_spill] sm:$0xff]  ;;  %v1768_v14 = vadd.f32 %v5654_v28, %v1767_v4  ;;  %v2408_v0 = vadd.f32 %v5654_v28, %v2407_v37 }
 0x1c0   : > { %v2909_v20 = vmax.f32 %v6398_v33, %v2781_v38  ;;  %v6400_v24 = vmax.f32 %v6399_v58, 0.0  ;;  %v2908_v9 = vmax.f32 %v6402_v46, %v2780_v63  ;;  %v6403_v33 = vld [vmem:[#allocation72_spill] sm:$0xff]  ;;  %v2655_v22 = vmax.f32 %v1773_v47, 0.0  ;;  %v3815_v63 = vpop.f32.mrb[100].mxu0  ;;  %v6406_v46 = vld [vmem:[#allocation17_spill] sm:$0xff] }
 0x1c1   : > { %3035 = vst.msk [vmem:[%s5415_s4 + $0xf0] sm:$0xff] %vm3004_vm4, %v2970_v36  ;;  %v5766_v38 = vadd.f32 %v5654_v28, %v6403_v33  ;;  %v2783_v10 = vmax.f32 %v2413_v62, 0.0  ;;  %v5770_v36 = vadd.f32 %v5654_v28, %v6404_v39  ;;  %v2654_v58 = vmax.f32 %v1768_v14, 0.0  ;;  %v1777_v62 = vpop.f32.mrb[101].mxu0  ;;  %v2417_v39 = vpop.f32.mrb[101].mxu1 }
 0x1c2   : > { %v2844_v55 = vmax.f32 %v6400_v24, %v2652_v44  ;;  %v2973_v54 = vmax.f32 %v2845_v17, %v2909_v20  ;;  %v2782_v24 = vmax.f32 %v2408_v0, 0.0  ;;  %v6405_v4 = vmax.f32 %v5227_v5, 0.0 }
 0x1c3   : > { %v6407_v33 = vmax.f32 %v6406_v46, 0.0  ;;  %v1783_v20 = vadd.f32 %v5654_v28, %v3815_v63  ;;  %v2423_v47 = vadd.f32 %v5654_v28, %v4007_v12  ;;  %v6410_v0 = vmax.f32 %v5239_v26, 0.0 }
 0x1c4   : > { %v2972_v44 = vmax.f32 %v2844_v55, %v2908_v9  ;;  %3038 = vst.msk [vmem:[%s5415_s4 + $0x108] sm:$0xff] %vm3004_vm4, %v2973_v54  ;;  %v2847_v37 = vmax.f32 %v6405_v4, %v2655_v22  ;;  %v6408_v9 = vld [vmem:[#allocation74_spill] sm:$0xff]  ;;  %v1778_v5 = vadd.f32 %v5654_v28, %v1777_v62  ;;  %v2418_v22 = vadd.f32 %v5654_v28, %v2417_v39 }
 0x1c5   : > { %v2911_v17 = vmax.f32 %v6407_v33, %v2783_v10  ;;  %v6409_v55 = vmax.f32 %v6408_v9, 0.0  ;;  %v2910_v54 = vmax.f32 %v6410_v0, %v2782_v24  ;;  %v2613_v10 = vmax.f32 %v5742_v32, 0.0  ;;  %v3818_v9 = vpop.f32.mrb[102].mxu0 }
 0x1c6   : > { %3037 = vst.msk [vmem:[%s5415_s4 + $0x100] sm:$0xff] %vm3004_vm4, %v2972_v44  ;;  %v2657_v12 = vmax.f32 %v1783_v20, 0.0  ;;  %v2785_v4 = vmax.f32 %v2423_v47, 0.0  ;;  %v2741_v46 = vmax.f32 %v5746_v30, 0.0  ;;  %v2656_v44 = vmax.f32 %v1778_v5, 0.0  ;;  %v1787_v20 = vpop.f32.mrb[103].mxu0 }
 0x1c7   : > { %v2846_v14 = vmax.f32 %v6409_v55, %v2654_v58  ;;  %v2975_v63 = vmax.f32 %v2847_v37, %v2911_v17  ;;  %v2784_v41 = vmax.f32 %v2418_v22, 0.0  ;;  %v4010_v58 = vpop.f32.mrb[102].mxu1  ;;  %v6411_v26 = vmax.f32 %v5243_v15, 0.0  ;;  %v6413_v55 = vld [vmem:[#allocation20_spill] sm:$0xff] }
 0x1c8   : > { %v6412_v62 = vmax.f32 %v5247_v56, 0.0  ;;  %v1793_v37 = vadd.f32 %v5654_v28, %v3818_v9  ;;  %v2433_v17 = vadd.f32 %v5654_v28, %v4010_v58  ;;  %v2427_v47 = vpop.f32.mrb[103].mxu1  ;;  %v1788_v15 = vadd.f32 %v5654_v28, %v1787_v20 }
 0x1c9   : > { %v2974_v33 = vmax.f32 %v2846_v14, %v2910_v54  ;;  %3040 = vst.msk [vmem:[%s5415_s4 + $0x118] sm:$0xff] %vm3004_vm4, %v2975_v63  ;;  %v2849_v24 = vmax.f32 %v6411_v26, %v2657_v12  ;;  %v6414_v14 = vmax.f32 %v6413_v55, 0.0  ;;  %v6415_v54 = vld [vmem:[#allocation21_spill] sm:$0xff]  ;;  %v2428_v56 = vadd.f32 %v5654_v28, %v2427_v47  ;;  %v3821_v55 = vpop.f32.mrb[104].mxu0 }
 0x1ca   : > { %v2913_v39 = vmax.f32 %v6412_v62, %v2785_v4  ;;  %v6416_v5 = vmax.f32 %v6415_v54, 0.0  ;;  %v2612_v63 = vmax.f32 %v5766_v38, 0.0  ;;  %v2659_v4 = vmax.f32 %v1793_v37, 0.0  ;;  %v1797_v37 = vpop.f32.mrb[105].mxu0 }
 0x1cb   : > { %3039 = vst.msk [vmem:[%s5415_s4 + $0x110] sm:$0xff] %vm3004_vm4, %v2974_v33  ;;  %v2848_v0 = vmax.f32 %v6414_v14, %v2656_v44  ;;  %v2787_v9 = vmax.f32 %v2433_v17, 0.0  ;;  %v2740_v58 = vmax.f32 %v5770_v36, 0.0  ;;  %v2658_v33 = vmax.f32 %v1788_v15, 0.0  ;;  %v4013_v44 = vpop.f32.mrb[104].mxu1 }
 0x1cc   : > { %v2912_v22 = vmax.f32 %v6416_v5, %v2784_v41  ;;  %v2977_v12 = vmax.f32 %v2849_v24, %v2913_v39  ;;  %v2786_v62 = vmax.f32 %v2428_v56, 0.0  ;;  %v6417_v41 = vmax.f32 %v5271_v16, 0.0  ;;  %v2437_v17 = vpop.f32.mrb[105].mxu1  ;;  %v6420_v5 = vld [vmem:[#allocation23_spill] sm:$0xff]  ;;  %v6422_v56 = vld [vmem:[#allocation18_spill] sm:$0xff] }
 0x1cd   : > { %v6418_v47 = vmax.f32 %v5275_v27, 0.0  ;;  %v1803_v24 = vadd.f32 %v5654_v28, %v3821_v55  ;;  %v2443_v39 = vadd.f32 %v5654_v28, %v4013_v44  ;;  %v1798_v16 = vadd.f32 %v5654_v28, %v1797_v37  ;;  %v6423_v44 = vld [vmem:[#allocation19_spill] sm:$0xff] }
 0x1ce   : > { %v2976_v26 = vmax.f32 %v2848_v0, %v2912_v22  ;;  %3042 = vst.msk [vmem:[%s5415_s4 + $0x128] sm:$0xff] %vm3004_vm4, %v2977_v12  ;;  %v2851_v20 = vmax.f32 %v6417_v41, %v2659_v4  ;;  %v6419_v0 = vmax.f32 %v5281_v23, 0.0  ;;  %v6421_v22 = vmax.f32 %v6420_v5, 0.0 }
 0x1cf   : > { %v2915_v14 = vmax.f32 %v6418_v47, %v2787_v9  ;;  %v2438_v27 = vadd.f32 %v5654_v28, %v2437_v17  ;;  %v5826_v12 = vadd.f32 %v5654_v28, %v6422_v56  ;;  %v2661_v9 = vmax.f32 %v1803_v24, 0.0  ;;  %v4016_v47 = vpop.f32.mrb[106].mxu1 }
 0x1d0   : > { %3041 = vst.msk [vmem:[%s5415_s4 + $0x120] sm:$0xff] %vm3004_vm4, %v2976_v26  ;;  %v2850_v54 = vmax.f32 %v6419_v0, %v2658_v33  ;;  %v2914_v15 = vmax.f32 %v6421_v22, %v2786_v62  ;;  %v2789_v55 = vmax.f32 %v2443_v39, 0.0  ;;  %v5830_v26 = vadd.f32 %v5654_v28, %v6423_v44  ;;  %v3824_v62 = vpop.f32.mrb[106].mxu0  ;;  %v2447_v5 = vpop.f32.mrb[107].mxu1 }
 0x1d1   : > { %v2979_v4 = vmax.f32 %v2851_v20, %v2915_v14  ;;  %v2660_v33 = vmax.f32 %v1798_v16, 0.0  ;;  %v2788_v41 = vmax.f32 %v2438_v27, 0.0  ;;  %v6424_v37 = vmax.f32 %v5299_v8, 0.0  ;;  %v1807_v39 = vpop.f32.mrb[107].mxu0  ;;  %v6428_v16 = vld [vmem:[#allocation30_spill] sm:$0xff] }
 0x1d2   : > { %v2978_v23 = vmax.f32 %v2850_v54, %v2914_v15  ;;  %v6425_v0 = vmax.f32 %v5303_v6, 0.0  ;;  %v1813_v14 = vadd.f32 %v5654_v28, %v3824_v62  ;;  %v2453_v24 = vadd.f32 %v5654_v28, %v4016_v47  ;;  %v6426_v54 = vld [vmem:[#allocation28_spill] sm:$0xff]  ;;  %v6431_v47 = vld [vmem:[#allocation75_spill] sm:$0xff] }
 0x1d3   : > { %3044 = vst.msk [vmem:[%s5415_s4 + $0x138] sm:$0xff] %vm3004_vm4, %v2979_v4  ;;  %v2853_v17 = vmax.f32 %v6424_v37, %v2661_v9  ;;  %v6427_v22 = vmax.f32 %v6426_v54, 0.0  ;;  %v6429_v27 = vmax.f32 %v6428_v16, 0.0  ;;  %v1808_v8 = vadd.f32 %v5654_v28, %v1807_v39  ;;  %v6430_v4 = vld [vmem:[#allocation22_spill] sm:$0xff]  ;;  %v4019_v54 = vpop.f32.mrb[108].mxu1  ;;  %v6432_v39 = vld [vmem:[#allocation31_spill] sm:$0xff] }
 0x1d4   : > { %v2917_v20 = vmax.f32 %v6425_v0, %v2789_v55  ;;  %3043 = vst.msk [vmem:[%s5415_s4 + $0x130] sm:$0xff] %vm3004_vm4, %v2978_v23  ;;  %v2448_v6 = vadd.f32 %v5654_v28, %v2447_v5  ;;  %v5850_v9 = vadd.f32 %v5654_v28, %v6430_v4  ;;  %v2663_v44 = vmax.f32 %v1813_v14, 0.0  ;;  %v6434_v16 = vld [vmem:[#allocation35_spill] sm:$0xff]  ;;  %v2457_v4 = vpop.f32.mrb[109].mxu1 }
 0x1d5   : > { %v2852_v15 = vmax.f32 %v6427_v22, %v2660_v33  ;;  %v2916_v56 = vmax.f32 %v6429_v27, %v2788_v41  ;;  %v2791_v62 = vmax.f32 %v2453_v24, 0.0  ;;  %v5854_v23 = vadd.f32 %v5654_v28, %v6431_v47  ;;  %v3827_v41 = vpop.f32.mrb[108].mxu0 }
 0x1d6   : > { %v2981_v55 = vmax.f32 %v2853_v17, %v2917_v20  ;;  %v2662_v37 = vmax.f32 %v1808_v8, 0.0  ;;  %v2790_v0 = vmax.f32 %v2448_v6, 0.0  ;;  %v6433_v5 = vmax.f32 %v6432_v39, 0.0  ;;  %v1817_v24 = vpop.f32.mrb[109].mxu0 }
 0x1d7   : > { %v2980_v33 = vmax.f32 %v2852_v15, %v2916_v56  ;;  %v6435_v27 = vmax.f32 %v6434_v16, 0.0  ;;  %v1823_v20 = vadd.f32 %v5654_v28, %v3827_v41  ;;  %v2463_v14 = vadd.f32 %v5654_v28, %v4019_v54 }
 0x1d8   : > { %3046 = vst.msk [vmem:[%s5415_s4 + $0x148] sm:$0xff] %vm3004_vm4, %v2981_v55  ;;  %v2855_v22 = vmax.f32 %v6433_v5, %v2663_v44  ;;  %v6436_v15 = vmax.f32 %v5331_v40, 0.0  ;;  %v6437_v8 = vmax.f32 %v5335_v51, 0.0  ;;  %v1818_v55 = vadd.f32 %v5654_v28, %v1817_v24  ;;  %v3830_v40 = vpop.f32.mrb[110].mxu0 }
 0x1d9   : > { %v2919_v17 = vmax.f32 %v6435_v27, %v2791_v62  ;;  %3045 = vst.msk [vmem:[%s5415_s4 + $0x140] sm:$0xff] %vm3004_vm4, %v2980_v33  ;;  %v2458_v44 = vadd.f32 %v5654_v28, %v2457_v4  ;;  %v2615_v62 = vmax.f32 %v5826_v12, 0.0  ;;  %v2665_v41 = vmax.f32 %v1823_v20, 0.0  ;;  %v6439_v27 = vld [vmem:[#allocation36_spill] sm:$0xff]  ;;  %v1827_v20 = vpop.f32.mrb[111].mxu0 }
 0x1da   : > { %v2854_v56 = vmax.f32 %v6436_v15, %v2662_v37  ;;  %v2918_v6 = vmax.f32 %v6437_v8, %v2790_v0  ;;  %v2793_v54 = vmax.f32 %v2463_v14, 0.0  ;;  %v2743_v39 = vmax.f32 %v5830_v26, 0.0  ;;  %v4022_v37 = vpop.f32.mrb[110].mxu1  ;;  %v6441_v15 = vld [vmem:[#allocation78_spill] sm:$0xff] }
 0x1db   : > { %v2983_v47 = vmax.f32 %v2855_v22, %v2919_v17  ;;  %v2664_v33 = vmax.f32 %v1818_v55, 0.0  ;;  %v2792_v16 = vmax.f32 %v2458_v44, 0.0  ;;  %v6438_v51 = vmax.f32 %v5339_v13, 0.0  ;;  %v2467_v14 = vpop.f32.mrb[111].mxu1 }
 0x1dc   : > { %v2982_v5 = vmax.f32 %v2854_v56, %v2918_v6  ;;  %v6440_v24 = vmax.f32 %v6439_v27, 0.0  ;;  %v1833_v22 = vadd.f32 %v5654_v28, %v3830_v40  ;;  %v2473_v17 = vadd.f32 %v5654_v28, %v4022_v37  ;;  %v6443_v6 = vld [vmem:[#allocation79_spill] sm:$0xff] }
 0x1dd   : > { %3048 = vst.msk [vmem:[%s5415_s4 + $0x158] sm:$0xff] %vm3004_vm4, %v2983_v47  ;;  %v2857_v0 = vmax.f32 %v6438_v51, %v2665_v41  ;;  %v6442_v56 = vmax.f32 %v6441_v15, 0.0  ;;  %v6444_v55 = vmax.f32 %v6443_v6, 0.0  ;;  %v1828_v13 = vadd.f32 %v5654_v28, %v1827_v20  ;;  %v3833_v15 = vpop.f32.mrb[112].mxu0  ;;  %v6447_v6 = vld [vmem:[#allocation83_spill] sm:$0xff] }
 0x1de   : > { %v2921_v4 = vmax.f32 %v6440_v24, %v2793_v54  ;;  %3047 = vst.msk [vmem:[%s5415_s4 + $0x150] sm:$0xff] %vm3004_vm4, %v2982_v5  ;;  %v2468_v47 = vadd.f32 %v5654_v28, %v2467_v14  ;;  %v2614_v41 = vmax.f32 %v5850_v9, 0.0  ;;  %v2667_v40 = vmax.f32 %v1833_v22, 0.0  ;;  %v1837_v22 = vpop.f32.mrb[113].mxu0 }
 0x1df   : > { %v2856_v8 = vmax.f32 %v6442_v56, %v2664_v33  ;;  %v2920_v44 = vmax.f32 %v6444_v55, %v2792_v16  ;;  %v2795_v37 = vmax.f32 %v2473_v17, 0.0  ;;  %v2666_v5 = vmax.f32 %v1828_v13, 0.0  ;;  %v4025_v33 = vpop.f32.mrb[112].mxu1  ;;  %v6445_v16 = vld [vmem:[#allocation82_spill] sm:$0xff] }
 0x1e0   : > { %v2985_v54 = vmax.f32 %v2857_v0, %v2921_v4  ;;  %v2794_v24 = vmax.f32 %v2468_v47, 0.0  ;;  %v6446_v56 = vmax.f32 %v6445_v16, 0.0  ;;  %v6448_v14 = vmax.f32 %v6447_v6, 0.0  ;;  %v2477_v17 = vpop.f32.mrb[113].mxu1  ;;  %v6451_v47 = vld [vmem:[#allocation85_spill] sm:$0xff] }
 0x1e1   : > { %v2984_v27 = vmax.f32 %v2856_v8, %v2920_v44  ;;  %v1843_v0 = vadd.f32 %v5654_v28, %v3833_v15  ;;  %v2483_v4 = vadd.f32 %v5654_v28, %v4025_v33  ;;  %v6449_v8 = vld [vmem:[#allocation84_spill] sm:$0xff]  ;;  %v2478_v16 = vadd.f32 %v5654_v28, %v2477_v17 }
 0x1e2   : > { %3050 = vst.msk [vmem:[%s5415_s4 + $0x168] sm:$0xff] %vm3004_vm4, %v2985_v54  ;;  %v2859_v20 = vmax.f32 %v6446_v56, %v2667_v40  ;;  %v2923_v55 = vmax.f32 %v6448_v14, %v2795_v37  ;;  %v6450_v44 = vmax.f32 %v6449_v8, 0.0  ;;  %v6452_v54 = vmax.f32 %v6451_v47, 0.0  ;;  %v6453_v37 = vld [vmem:[#allocation24_spill] sm:$0xff]  ;;  %v6454_v14 = vld [vmem:[#allocation25_spill] sm:$0xff]  ;;  %v4028_v47 = vpop.f32.mrb[114].mxu1 }
 0x1e3   : > { %3049 = vst.msk [vmem:[%s5415_s4 + $0x160] sm:$0xff] %vm3004_vm4, %v2984_v27  ;;  %v1838_v40 = vadd.f32 %v5654_v28, %v1837_v22  ;;  %v5910_v15 = vadd.f32 %v5654_v28, %v6453_v37  ;;  %v2669_v56 = vmax.f32 %v1843_v0, 0.0  ;;  %v2797_v6 = vmax.f32 %v2483_v4, 0.0  ;;  %v2487_v17 = vpop.f32.mrb[115].mxu1  ;;  %v6456_v37 = vld [vmem:[#allocation27_spill] sm:$0xff] }
 0x1e4   : > { %v2858_v13 = vmax.f32 %v6450_v44, %v2666_v5  ;;  %v2922_v51 = vmax.f32 %v6452_v54, %v2794_v24  ;;  %v2987_v33 = vmax.f32 %v2859_v20, %v2923_v55  ;;  %v5914_v27 = vadd.f32 %v5654_v28, %v6454_v14  ;;  %v3836_v24 = vpop.f32.mrb[114].mxu0 }
 0x1e5   : > { %v2668_v8 = vmax.f32 %v1838_v40, 0.0  ;;  %v2796_v44 = vmax.f32 %v2478_v16, 0.0  ;;  %v2861_v22 = vmax.f32 %v2605_v29, %v2669_v56  ;;  %v2925_v20 = vmax.f32 %v2733_v50, %v2797_v6  ;;  %v1847_v4 = vpop.f32.mrb[115].mxu0  ;;  %v6455_v29 = vld [vmem:[#allocation26_spill] sm:$0xff]  ;;  %v4031_v56 = vpop.f32.mrb[116].mxu1 }
 0x1e6   : > { %v2986_v5 = vmax.f32 %v2858_v13, %v2922_v51  ;;  %3052 = vst.msk [vmem:[%s5415_s4 + $0x178] sm:$0xff] %vm3004_vm4, %v2987_v33  ;;  %v1853_v55 = vadd.f32 %v5654_v28, %v3836_v24  ;;  %v2493_v0 = vadd.f32 %v5654_v28, %v4028_v47  ;;  %v1848_v19 = vadd.f32 %v5654_v28, %v1847_v4  ;;  %v2497_v24 = vpop.f32.mrb[117].mxu1 }
 0x1e7   : > { %v2860_v51 = vmax.f32 %v2604_v53, %v2668_v8  ;;  %v2924_v13 = vmax.f32 %v2732_v35, %v2796_v44  ;;  %v2488_v48 = vadd.f32 %v5654_v28, %v2487_v17  ;;  %v5934_v50 = vadd.f32 %v5654_v28, %v6455_v29  ;;  %v3839_v35 = vpop.f32.mrb[116].mxu0 }
 0x1e8   : > { %3051 = vst.msk [vmem:[%s5415_s4 + $0x170] sm:$0xff] %vm3004_vm4, %v2986_v5  ;;  %v2989_v54 = vmax.f32 %v2861_v22, %v2925_v20  ;;  %v2671_v40 = vmax.f32 %v1853_v55, 0.0  ;;  %v2799_v16 = vmax.f32 %v2493_v0, 0.0  ;;  %v5938_v33 = vadd.f32 %v5654_v28, %v6456_v37  ;;  %v1857_v44 = vpop.f32.mrb[117].mxu0 }
 0x1e9   : > { %v2988_v57 = vmax.f32 %v2860_v51, %v2924_v13  ;;  %v2670_v53 = vmax.f32 %v1848_v19, 0.0  ;;  %v2798_v42 = vmax.f32 %v2488_v48, 0.0  ;;  %v1863_v5 = vadd.f32 %v5654_v28, %v3839_v35  ;;  %v3842_v45 = vpop.f32.mrb[118].mxu0 }
 0x1ea   : > { %3054 = vst.msk [vmem:[%s5415_s4 + $0x188] sm:$0xff] %vm3004_vm4, %v2989_v54  ;;  %v2863_v6 = vmax.f32 %v2607_v61, %v2671_v40  ;;  %v2927_v14 = vmax.f32 %v2735_v25, %v2799_v16  ;;  %v2503_v8 = vadd.f32 %v5654_v28, %v4031_v56  ;;  %v1858_v11 = vadd.f32 %v5654_v28, %v1857_v44  ;;  %v1867_v29 = vpop.f32.mrb[119].mxu0 }
 0x1eb   : > { %3053 = vst.msk [vmem:[%s5415_s4 + $0x180] sm:$0xff] %vm3004_vm4, %v2988_v57  ;;  %v2862_v47 = vmax.f32 %v2606_v2, %v2670_v53  ;;  %v2926_v22 = vmax.f32 %v2734_v60, %v2798_v42  ;;  %v2498_v18 = vadd.f32 %v5654_v28, %v2497_v24  ;;  %v2617_v61 = vmax.f32 %v5910_v15, 0.0  ;;  %v4034_v2 = vpop.f32.mrb[118].mxu1 }
 0x1ec   : > { %v2991_v25 = vmax.f32 %v2863_v6, %v2927_v14  ;;  %v2673_v20 = vmax.f32 %v1863_v5, 0.0  ;;  %v2801_v55 = vmax.f32 %v2503_v8, 0.0  ;;  %v2745_v0 = vmax.f32 %v5914_v27, 0.0  ;;  %v2507_v54 = vpop.f32.mrb[119].mxu1 }
 0x1ed   : > { %v2990_v4 = vmax.f32 %v2862_v47, %v2926_v22  ;;  %v2672_v17 = vmax.f32 %v1858_v11, 0.0  ;;  %v2800_v51 = vmax.f32 %v2498_v18, 0.0  ;;  %v6457_v60 = vmax.f32 %v5573_v31, 0.0  ;;  %v4037_v8 = vpop.f32.mrb[120].mxu1 }
 0x1ee   : > { %3056 = vst.msk [vmem:[%s5415_s4 + $0x198] sm:$0xff] %vm3004_vm4, %v2991_v25  ;;  %v2865_v21 = vmax.f32 %v2609_v43, %v2673_v20  ;;  %v1873_v19 = vadd.f32 %v5654_v28, %v3842_v45  ;;  %v2513_v48 = vadd.f32 %v5654_v28, %v4034_v2  ;;  %v6458_v40 = vmax.f32 %v5593_v34, 0.0  ;;  %v3845_v34 = vpop.f32.mrb[120].mxu0  ;;  %v2517_v25 = vpop.f32.mrb[121].mxu1 }
 0x1ef   : > { %v2929_v13 = vmax.f32 %v6457_v60, %v2801_v55  ;;  %3055 = vst.msk [vmem:[%s5415_s4 + $0x190] sm:$0xff] %vm3004_vm4, %v2990_v4  ;;  %v6459_v37 = vmax.f32 %v5597_v49, 0.0  ;;  %v1868_v59 = vadd.f32 %v5654_v28, %v1867_v29  ;;  %v2508_v31 = vadd.f32 %v5654_v28, %v2507_v54  ;;  %v1877_v18 = vpop.f32.mrb[121].mxu0  ;;  %v4040_v54 = vpop.f32.mrb[122].mxu1 }
 0x1f0   : > { %v2864_v16 = vmax.f32 %v6458_v40, %v2672_v17  ;;  %v2616_v43 = vmax.f32 %v5934_v50, 0.0  ;;  %v2675_v42 = vmax.f32 %v1873_v19, 0.0  ;;  %v2803_v35 = vmax.f32 %v2513_v48, 0.0  ;;  %v3848_v29 = vpop.f32.mrb[122].mxu0 }
 0x1f1   : > { %v2928_v57 = vmax.f32 %v6459_v37, %v2800_v51  ;;  %v2993_v53 = vmax.f32 %v2865_v21, %v2929_v13  ;;  %v2744_v56 = vmax.f32 %v5938_v33, 0.0  ;;  %v2674_v14 = vmax.f32 %v1868_v59, 0.0  ;;  %v6464_v51 = vld [vmem:[#allocation76_spill] sm:$0xff]  ;;  %v6465_v13 = vld [vmem:[#allocation77_spill] sm:$0xff]  ;;  %v1887_v59 = vpop.f32.mrb[123].mxu0 }
 0x1f2   : > { %v2802_v5 = vmax.f32 %v2508_v31, 0.0  ;;  %v6460_v49 = vmax.f32 %v5658_v3, 0.0  ;;  %v6461_v24 = vmax.f32 %v5662_v1, 0.0  ;;  %v1883_v22 = vadd.f32 %v5654_v28, %v3845_v34  ;;  %v2527_v31 = vpop.f32.mrb[123].mxu1 }
 0x1f3   : > { %v2992_v6 = vmax.f32 %v2864_v16, %v2928_v57  ;;  %3058 = vst.msk [vmem:[%s5415_s4 + $0x1a8] sm:$0xff] %vm3004_vm4, %v2993_v53  ;;  %v2523_v11 = vadd.f32 %v5654_v28, %v4037_v8  ;;  %v6462_v20 = vmax.f32 %v5682_v52, 0.0  ;;  %v6463_v4 = vmax.f32 %v5686_v7, 0.0  ;;  %v4043_v36 = vpop.f32.mrb[124].mxu1 }
 0x1f4   : > { %v2867_v44 = vmax.f32 %v6460_v49, %v2675_v42  ;;  %v2931_v47 = vmax.f32 %v6461_v24, %v2803_v35  ;;  %v1878_v3 = vadd.f32 %v5654_v28, %v1877_v18  ;;  %v2518_v1 = vadd.f32 %v5654_v28, %v2517_v25  ;;  %v3851_v49 = vpop.f32.mrb[124].mxu0 }
 0x1f5   : > { %3057 = vst.msk [vmem:[%s5415_s4 + $0x1a0] sm:$0xff] %vm3004_vm4, %v2992_v6  ;;  %v2866_v55 = vmax.f32 %v6462_v20, %v2674_v14  ;;  %v2930_v17 = vmax.f32 %v6463_v4, %v2802_v5  ;;  %v5994_v45 = vadd.f32 %v5654_v28, %v6464_v51  ;;  %v2677_v21 = vmax.f32 %v1883_v22, 0.0  ;;  %v6467_v5 = vld [vmem:[#allocation81_spill] sm:$0xff]  ;;  %v1897_v22 = vpop.f32.mrb[125].mxu0 }
 0x1f6   : > { %v2995_v2 = vmax.f32 %v2867_v44, %v2931_v47  ;;  %v2805_v60 = vmax.f32 %v2523_v11, 0.0  ;;  %v5998_v19 = vadd.f32 %v5654_v28, %v6465_v13  ;;  %v2676_v48 = vmax.f32 %v1878_v3, 0.0  ;;  %v2537_v11 = vpop.f32.mrb[125].mxu1  ;;  %v3854_v9 = vpop.f32.mrb[126].mxu0 }
 0x1f7   : > { %v2994_v52 = vmax.f32 %v2866_v55, %v2930_v17  ;;  %v2804_v7 = vmax.f32 %v2518_v1, 0.0  ;;  %v2869_v40 = vmax.f32 %v2613_v10, %v2677_v21  ;;  %v1893_v37 = vadd.f32 %v5654_v28, %v3848_v29  ;;  %v6466_v10 = vld [vmem:[#allocation80_spill] sm:$0xff] }
 0x1f8   : > { %3060 = vst.msk [vmem:[%s5415_s4 + $0x1b8] sm:$0xff] %vm3004_vm4, %v2995_v2  ;;  %v2933_v16 = vmax.f32 %v2741_v46, %v2805_v60  ;;  %v2533_v57 = vadd.f32 %v5654_v28, %v4040_v54  ;;  %v2868_v53 = vmax.f32 %v2612_v63, %v2676_v48  ;;  %v1888_v32 = vadd.f32 %v5654_v28, %v1887_v59  ;;  %v1907_v60 = vpop.f32.mrb[127].mxu0 }
 0x1f9   : > { %3059 = vst.msk [vmem:[%s5415_s4 + $0x1b0] sm:$0xff] %vm3004_vm4, %v2994_v52  ;;  %v2932_v42 = vmax.f32 %v2740_v58, %v2804_v7  ;;  %v2528_v30 = vadd.f32 %v5654_v28, %v2527_v31  ;;  %v1588_v46 = vadd.f32 %v5654_v28, %v6466_v10  ;;  %v2679_v6 = vmax.f32 %v1893_v37, 0.0 }
 0x1fa   : > { %v2997_v35 = vmax.f32 %v2869_v40, %v2933_v16  ;;  %v2807_v14 = vmax.f32 %v2533_v57, 0.0  ;;  %v2228_v34 = vadd.f32 %v5654_v28, %v6467_v5  ;;  %v2678_v38 = vmax.f32 %v1888_v32, 0.0 }
 0x1fb   : > { %v2996_v8 = vmax.f32 %v2868_v53, %v2932_v42  ;;  %v2806_v63 = vmax.f32 %v2528_v30, 0.0  ;;  %v2871_v58 = vmax.f32 %v2615_v62, %v2679_v6  ;;  %v1903_v24 = vadd.f32 %v5654_v28, %v3851_v49 }
 0x1fc   : > { %3062 = vst.msk [vmem:[%s5415_s4 + $0x1c8] sm:$0xff] %vm3004_vm4, %v2997_v35  ;;  %v2935_v44 = vmax.f32 %v2743_v39, %v2807_v14  ;;  %v2543_v47 = vadd.f32 %v5654_v28, %v4043_v36  ;;  %v2870_v18 = vmax.f32 %v2614_v41, %v2678_v38  ;;  %v6468_v25 = vmax.f32 %v5854_v23, 0.0  ;;  %v4046_v41 = vpop.f32.mrb[126].mxu1 }
 0x1fd   : > { %3061 = vst.msk [vmem:[%s5415_s4 + $0x1c0] sm:$0xff] %vm3004_vm4, %v2996_v8  ;;  %v1898_v12 = vadd.f32 %v5654_v28, %v1897_v22  ;;  %v2538_v26 = vadd.f32 %v5654_v28, %v2537_v11  ;;  %v2619_v62 = vmax.f32 %v5994_v45, 0.0  ;;  %v2681_v55 = vmax.f32 %v1903_v24, 0.0  ;;  %v2547_v13 = vpop.f32.mrb[127].mxu1 }
 0x1fe   : > { %v2934_v20 = vmax.f32 %v6468_v25, %v2806_v63  ;;  %v2999_v39 = vmax.f32 %v2871_v58, %v2935_v44  ;;  %v2809_v4 = vmax.f32 %v2543_v47, 0.0  ;;  %v2747_v17 = vmax.f32 %v5998_v19, 0.0 }
 0x1ff   : > { %v2680_v1 = vmax.f32 %v1898_v12, 0.0  ;;  %v2808_v51 = vmax.f32 %v2538_v26, 0.0  ;;  %v2873_v23 = vmax.f32 %v2617_v61, %v2681_v55  ;;  %v1913_v45 = vadd.f32 %v5654_v28, %v3854_v9 }
 0x200   : > { %v2998_v3 = vmax.f32 %v2870_v18, %v2934_v20  ;;  %3064 = vst.msk [vmem:[%s5415_s4 + $0x1d8] sm:$0xff] %vm3004_vm4, %v2999_v39  ;;  %v2937_v2 = vmax.f32 %v2745_v0, %v2809_v4  ;;  %v2553_v21 = vadd.f32 %v5654_v28, %v4046_v41  ;;  %v1908_v61 = vadd.f32 %v5654_v28, %v1907_v60 }
 0x201   : > { %v2872_v19 = vmax.f32 %v2616_v43, %v2680_v1  ;;  %v2936_v15 = vmax.f32 %v2744_v56, %v2808_v51  ;;  %v2548_v27 = vadd.f32 %v5654_v28, %v2547_v13  ;;  %v2618_v0 = vmax.f32 %v1588_v46, 0.0 }
 0x202   : > { %3063 = vst.msk [vmem:[%s5415_s4 + $0x1d0] sm:$0xff] %vm3004_vm4, %v2998_v3  ;;  %v3001_v52 = vmax.f32 %v2873_v23, %v2937_v2  ;;  %v2683_v48 = vmax.f32 %v1913_v45, 0.0  ;;  %v2811_v7 = vmax.f32 %v2553_v21, 0.0  ;;  %v2746_v29 = vmax.f32 %v2228_v34, 0.0 }
 0x203   : > { %v3000_v54 = vmax.f32 %v2872_v19, %v2936_v15  ;;  %v2682_v40 = vmax.f32 %v1908_v61, 0.0  ;;  %v2810_v16 = vmax.f32 %v2548_v27, 0.0 }
 0x204   : > { %3066 = vst.msk [vmem:[%s5415_s4 + $0x1e8] sm:$0xff] %vm3004_vm4, %v3001_v52  ;;  %v2875_v50 = vmax.f32 %v2619_v62, %v2683_v48  ;;  %v2939_v43 = vmax.f32 %v2747_v17, %v2811_v7 }
 0x205   : > { %3065 = vst.msk [vmem:[%s5415_s4 + $0x1e0] sm:$0xff] %vm3004_vm4, %v3000_v54  ;;  %v2874_v33 = vmax.f32 %v2618_v0, %v2682_v40  ;;  %v2938_v56 = vmax.f32 %v2746_v29, %v2810_v16 }
 0x206   : > { %v3003_v37 = vmax.f32 %v2875_v50, %v2939_v43 }
 0x207   : > { %v3002_v28 = vmax.f32 %v2874_v33, %v2938_v56 }
 0x208   : > { %3068 = vst.msk [vmem:[%s5415_s4 + $0x1f8] sm:$0xff] %vm3004_vm4, %v3003_v37 }
 0x209   : > { %3067 = vst.msk [vmem:[%s5415_s4 + $0x1f0] sm:$0xff] %vm3004_vm4, %v3002_v28 }
 0x20a PF: > { %s13_s12 = sadd.s32 1, %s4077_s12  }
 0x20b   : > { %p10_p4 = scmp.ge.s32.totalorder %s13_s12, 18  }
 0x20d   :  { %12 = sbr.rel (!%p10_p4) target bundleno = 1 (0x1), region = 62 }

// kernel: cnn_forward.5
= control target key start
LH: loop header
LB: loop body
LE: loop exit
PB: predicated region body
PF: predicated region fallthrough
CT: control target
= control target key end

     0   :  { %s2079_s12 = smov 0   ;;  %s2949_s0 = inlined_call_operand.vmem [shape: f32[8,32,32,144], index: 0, kind: input, shape index: {}]   ;;  %s2950_s1 = inlined_call_operand.vmem [shape: f32[144,32], index: 1, kind: input, shape index: {}]   ;;  %s2951_s2 = inlined_call_operand.vmem [shape: f32[1,32], index: 2, kind: input, shape index: {}]   ;;  %s2952_s3 = inlined_call_operand.vmem [shape: f32[8,8,32,32], index: 3, kind: output, shape index: {}]  }
   0x1 LB: > { %s1854_s13 = sadd.s32 4294967295, %s2056_s12   ;;  %p1858_p0 = scmp.ge.s32.totalorder %s2056_s12, 1  ;;  %s2056_s12 = sphi %s2079_s12, %s13_s12  }
   0x2   : > { %p137_p1 = scmp.lt.s32.totalorder %s2056_s12, 9 }
   0x4   : > { %p138_p2 = pnand %p1858_p0, %p137_p1 }
   0x6   : > { %141 = sbr.rel (%p138_p2) target bundleno = 524 (0x20c), region = 32 }
   0xd   : > { %v427_v0 = vld [vmem:[%s2950_s1] sm:$0xff]  ;;  %v428_v1 = vld [vmem:[%s2950_s1 + $0x8] sm:$0xff]  ;;  %v429_v2 = vld [vmem:[%s2950_s1 + $0x10] sm:$0xff]  ;;  %p161_p3 = scmp.lt.s32.totalorder %s1854_s13, 7  ;;  %v2058_v3 = vmov 0.0|0.0   ;;  %vm452_vm0 = vcmask 130048  }
   0xe   : > { %1996 = vmatprep.subr.bf16.mxu0 %v2058_v3  ;;  %2023 = vmatprep.subr.bf16.mxu1 %v2058_v3  ;;  %v1997_v4 = vpack.c.bf16 %v428_v1, %v427_v0  ;;  %v430_v5 = vld [vmem:[%s2950_s1 + $0x18] sm:$0xff]  ;;  %v431_v7 = vld [vmem:[%s2950_s1 + $0x20] sm:$0xff]  ;;  %v432_v8 = vld [vmem:[%s2950_s1 + $0x28] sm:$0xff]  ;;  %vm1766_vm1 = vcmask 261120  }
   0xf   : > { %s2988_s13 = smov (!%p161_p3, %s1854_s13), 7  ;;  %v2000_v6 = vpack.c.bf16 %v430_v5, %v429_v2  ;;  %v2003_v11 = vpack.c.bf16 %v432_v8, %v431_v7  ;;  %v433_v12 = vld [vmem:[%s2950_s1 + $0x30] sm:$0xff]  ;;  %v434_v13 = vld [vmem:[%s2950_s1 + $0x38] sm:$0xff]  ;;  %v435_v15 = vld [vmem:[%s2950_s1 + $0x40] sm:$0xff] }
  0x10   : > { %1998 = vmatpush1.bf16.msra.mxu0 %v1997_v4  ;;  %2032 = vmatpush1.bf16.msra.mxu1 %v1997_v4  ;;  %s1994_s26 = sshll.u32 %s2988_s13, 11  ;;  %v2006_v14 = vpack.c.bf16 %v434_v13, %v433_v12  ;;  %v436_v16 = vld [vmem:[%s2950_s1 + $0x48] sm:$0xff]  ;;  %v437_v18 = vld [vmem:[%s2950_s1 + $0x50] sm:$0xff]  ;;  %v438_v19 = vld [vmem:[%s2950_s1 + $0x58] sm:$0xff]  ;;  %s1995_s4 = sshll.u32 %s2988_s13, 8 }
  0x11   : > { %1999 = vmatprep.subr.bf16.mxu0 %v2058_v3  ;;  %2024 = vmatprep.subr.bf16.mxu1 %v2058_v3  ;;  %s2115_s29 = scalar_lea.vmem %s2949_s0, %s1994_s26  ;;  %v2009_v17 = vpack.c.bf16 %v436_v16, %v435_v15  ;;  %v2012_v20 = vpack.c.bf16 %v438_v19, %v437_v18  ;;  %v439_v21 = vld [vmem:[%s2950_s1 + $0x60] sm:$0xff]  ;;  %v440_v22 = vld [vmem:[%s2950_s1 + $0x68] sm:$0xff]  ;;  %v441_v24 = vld [vmem:[%s2950_s1 + $0x70] sm:$0xff]  ;;  %s2704_s6 = scalar_lea.vmem %s2952_s3, %s1995_s4 }
  0x12   : > { %v172_v9 = vld [vmem:[%s2115_s29 + $0x8] sm:$0xff]  ;;  %v2015_v23 = vpack.c.bf16 %v440_v22, %v439_v21  ;;  %v442_v25 = vld [vmem:[%s2950_s1 + $0x78] sm:$0xff]  ;;  %v443_v27 = vld [vmem:[%s2950_s1 + $0x80] sm:$0xff] }
  0x13   : > { %v300_v10 = vld [vmem:[%s2115_s29 + $0x408] sm:$0xff]  ;;  %1864 = vmatprep.mubr.msk.f32.mxu0 %vm452_vm0, %v172_v9  ;;  %v2018_v26 = vpack.c.bf16 %v442_v25, %v441_v24  ;;  %v171_v30 = vld [vmem:[%s2115_s29] sm:$0xff]  ;;  %v174_v32 = vld [vmem:[%s2115_s29 + $0x18] sm:$0xff] }
  0x14   : > { %2001 = vmatpush1.bf16.msra.mxu0 %v2000_v6  ;;  %2033 = vmatpush1.bf16.msra.mxu1 %v2000_v6  ;;  %v444_v28 = vld [vmem:[%s2950_s1 + $0x88] sm:$0xff]  ;;  %v299_v31 = vld [vmem:[%s2115_s29 + $0x400] sm:$0xff]  ;;  %v302_v33 = vld [vmem:[%s2115_s29 + $0x418] sm:$0xff] }
  0x15   : > { %2002 = vmatprep.subr.bf16.mxu0 %v2058_v3  ;;  %2025 = vmatprep.subr.bf16.mxu1 %v2058_v3  ;;  %v2021_v29 = vpack.c.bf16 %v444_v28, %v443_v27  ;;  %v173_v34 = vld [vmem:[%s2115_s29 + $0x10] sm:$0xff]  ;;  %v176_v36 = vld [vmem:[%s2115_s29 + $0x28] sm:$0xff]  ;;  %v175_v38 = vld [vmem:[%s2115_s29 + $0x20] sm:$0xff] }
  0x16   : > { %1928 = vmatprep.mubr.msk.f32.mxu1 %vm452_vm0, %v300_v10  ;;  %v301_v35 = vld [vmem:[%s2115_s29 + $0x410] sm:$0xff]  ;;  %v304_v37 = vld [vmem:[%s2115_s29 + $0x428] sm:$0xff]  ;;  %v303_v39 = vld [vmem:[%s2115_s29 + $0x420] sm:$0xff] }
  0x17   : > { %v178_v40 = vld [vmem:[%s2115_s29 + $0x38] sm:$0xff]  ;;  %v177_v42 = vld [vmem:[%s2115_s29 + $0x30] sm:$0xff]  ;;  %v180_v44 = vld [vmem:[%s2115_s29 + $0x48] sm:$0xff] }
  0x18   : > { %2004 = vmatpush1.bf16.msra.mxu0 %v2003_v11  ;;  %2034 = vmatpush1.bf16.msra.mxu1 %v2003_v11  ;;  %v306_v41 = vld [vmem:[%s2115_s29 + $0x438] sm:$0xff]  ;;  %v305_v43 = vld [vmem:[%s2115_s29 + $0x430] sm:$0xff]  ;;  %v308_v45 = vld [vmem:[%s2115_s29 + $0x448] sm:$0xff] }
  0x19   : > { %2005 = vmatprep.subr.bf16.mxu0 %v2058_v3  ;;  %2026 = vmatprep.subr.bf16.mxu1 %v2058_v3  ;;  %v179_v46 = vld [vmem:[%s2115_s29 + $0x40] sm:$0xff]  ;;  %v182_v48 = vld [vmem:[%s2115_s29 + $0x58] sm:$0xff]  ;;  %v181_v50 = vld [vmem:[%s2115_s29 + $0x50] sm:$0xff] }
  0x1a   : > { %v307_v47 = vld [vmem:[%s2115_s29 + $0x440] sm:$0xff]  ;;  %v310_v49 = vld [vmem:[%s2115_s29 + $0x458] sm:$0xff]  ;;  %v309_v51 = vld [vmem:[%s2115_s29 + $0x450] sm:$0xff] }
  0x1b   : > { %v184_v52 = vld [vmem:[%s2115_s29 + $0x68] sm:$0xff]  ;;  %v183_v54 = vld [vmem:[%s2115_s29 + $0x60] sm:$0xff]  ;;  %v186_v56 = vld [vmem:[%s2115_s29 + $0x78] sm:$0xff] }
  0x1c   : > { %2007 = vmatpush1.bf16.msra.mxu0 %v2006_v14  ;;  %2035 = vmatpush1.bf16.msra.mxu1 %v2006_v14  ;;  %v312_v53 = vld [vmem:[%s2115_s29 + $0x468] sm:$0xff]  ;;  %v311_v55 = vld [vmem:[%s2115_s29 + $0x460] sm:$0xff]  ;;  %v314_v57 = vld [vmem:[%s2115_s29 + $0x478] sm:$0xff] }
  0x1d   : > { %2008 = vmatprep.subr.bf16.mxu0 %v2058_v3  ;;  %2027 = vmatprep.subr.bf16.mxu1 %v2058_v3  ;;  %v185_v58 = vld [vmem:[%s2115_s29 + $0x70] sm:$0xff]  ;;  %v188_v60 = vld [vmem:[%s2115_s29 + $0x88] sm:$0xff]  ;;  %v187_v62 = vld [vmem:[%s2115_s29 + $0x80] sm:$0xff] }
  0x1e   : > { %v313_v59 = vld [vmem:[%s2115_s29 + $0x470] sm:$0xff]  ;;  %v316_v61 = vld [vmem:[%s2115_s29 + $0x488] sm:$0xff]  ;;  %v315_v63 = vld [vmem:[%s2115_s29 + $0x480] sm:$0xff] }
  0x1f   : > { %v190_v0 = vld [vmem:[%s2115_s29 + $0x98] sm:$0xff]  ;;  %v189_v2 = vld [vmem:[%s2115_s29 + $0x90] sm:$0xff]  ;;  %v192_v4 = vld [vmem:[%s2115_s29 + $0xa8] sm:$0xff] }
  0x20   : > { %2010 = vmatpush1.bf16.msra.mxu0 %v2009_v17  ;;  %2036 = vmatpush1.bf16.msra.mxu1 %v2009_v17  ;;  %v318_v1 = vld [vmem:[%s2115_s29 + $0x498] sm:$0xff]  ;;  %v320_v5 = vld [vmem:[%s2115_s29 + $0x4a8] sm:$0xff]  ;;  %v191_v6 = vld [vmem:[%s2115_s29 + $0xa0] sm:$0xff] }
  0x21   : > { %2011 = vmatprep.subr.bf16.mxu0 %v2058_v3  ;;  %2028 = vmatprep.subr.bf16.mxu1 %v2058_v3  ;;  %v319_v7 = vld [vmem:[%s2115_s29 + $0x4a0] sm:$0xff]  ;;  %v194_v8 = vld [vmem:[%s2115_s29 + $0xb8] sm:$0xff]  ;;  %v193_v10 = vld [vmem:[%s2115_s29 + $0xb0] sm:$0xff] }
  0x22   : > { %v322_v9 = vld [vmem:[%s2115_s29 + $0x4b8] sm:$0xff]  ;;  %v321_v11 = vld [vmem:[%s2115_s29 + $0x4b0] sm:$0xff]  ;;  %v196_v12 = vld [vmem:[%s2115_s29 + $0xc8] sm:$0xff] }
  0x23   : > { %v324_v13 = vld [vmem:[%s2115_s29 + $0x4c8] sm:$0xff]  ;;  %v195_v14 = vld [vmem:[%s2115_s29 + $0xc0] sm:$0xff]  ;;  %v198_v16 = vld [vmem:[%s2115_s29 + $0xd8] sm:$0xff] }
  0x24   : > { %2013 = vmatpush1.bf16.msra.mxu0 %v2012_v20  ;;  %2037 = vmatpush1.bf16.msra.mxu1 %v2012_v20  ;;  %v323_v15 = vld [vmem:[%s2115_s29 + $0x4c0] sm:$0xff]  ;;  %v326_v17 = vld [vmem:[%s2115_s29 + $0x4d8] sm:$0xff]  ;;  %v197_v18 = vld [vmem:[%s2115_s29 + $0xd0] sm:$0xff] }
  0x25   : > { %2014 = vmatprep.subr.bf16.mxu0 %v2058_v3  ;;  %2029 = vmatprep.subr.bf16.mxu1 %v2058_v3  ;;  %v325_v19 = vld [vmem:[%s2115_s29 + $0x4d0] sm:$0xff]  ;;  %v200_v20 = vld [vmem:[%s2115_s29 + $0xe8] sm:$0xff]  ;;  %v199_v22 = vld [vmem:[%s2115_s29 + $0xe0] sm:$0xff] }
  0x26   : > { %v328_v21 = vld [vmem:[%s2115_s29 + $0x4e8] sm:$0xff]  ;;  %v202_v24 = vld [vmem:[%s2115_s29 + $0xf8] sm:$0xff]  ;;  %v329_v27 = vld [vmem:[%s2115_s29 + $0x4f0] sm:$0xff] }
  0x27   : > { %v330_v25 = vld [vmem:[%s2115_s29 + $0x4f8] sm:$0xff]  ;;  %v204_v28 = vld [vmem:[%s2115_s29 + $0x108] sm:$0xff] }
  0x28   : > { %2016 = vmatpush1.bf16.msra.mxu0 %v2015_v23  ;;  %2038 = vmatpush1.bf16.msra.mxu1 %v2015_v23  ;;  %v327_v23 = vld [vmem:[%s2115_s29 + $0x4e0] sm:$0xff] }
  0x29   : > { %2017 = vmatprep.subr.bf16.mxu0 %v2058_v3  ;;  %2030 = vmatprep.subr.bf16.mxu1 %v2058_v3 }
  0x2c   : > { %2019 = vmatpush1.bf16.msra.mxu0 %v2018_v26  ;;  %2039 = vmatpush1.bf16.msra.mxu1 %v2018_v26  ;;  %v201_v26 = vld [vmem:[%s2115_s29 + $0xf0] sm:$0xff] }
  0x2d   : > { %2020 = vmatprep.subr.bf16.mxu0 %v2058_v3  ;;  %2031 = vmatprep.subr.bf16.mxu1 %v2058_v3  ;;  %v317_v3 = vld [vmem:[%s2115_s29 + $0x490] sm:$0xff] }
  0x30   : > { %2022 = vmatpush1.bf16.msra.mxu0 %v2021_v29  ;;  %2040 = vmatpush1.bf16.msra.mxu1 %v2021_v29  ;;  %v332_v29 = vld [vmem:[%s2115_s29 + $0x508] sm:$0xff] }
  0x33   : > { %902 = vmatmul.mubr.f32.vlgmr.msra.gmra.mrb[0].mxu0 %v171_v30  ;;  %1222 = vmatmul.mubr.f32.vlgmr.msra.gmra.mrb[0].mxu1 %v299_v31  ;;  %v203_v30 = vld [vmem:[%s2115_s29 + $0x100] sm:$0xff] }
  0x34   : > { %1865 = vmatprep.mubr.msk.f32.mxu0 %vm452_vm0, %v174_v32  ;;  %1929 = vmatprep.mubr.msk.f32.mxu1 %vm452_vm0, %v302_v33  ;;  %v331_v31 = vld [vmem:[%s2115_s29 + $0x500] sm:$0xff]  ;;  %v206_v32 = vld [vmem:[%s2115_s29 + $0x118] sm:$0xff] }
  0x35   : > { %v334_v33 = vld [vmem:[%s2115_s29 + $0x518] sm:$0xff] }
  0x37   : > { %907 = vmatmul.mubr.f32.gmra.mrb[2].mxu0 %v173_v34  ;;  %1227 = vmatmul.mubr.f32.gmra.mrb[2].mxu1 %v301_v35  ;;  %v205_v34 = vld [vmem:[%s2115_s29 + $0x110] sm:$0xff] }
  0x38   : > { %1866 = vmatprep.mubr.msk.f32.mxu0 %vm452_vm0, %v176_v36  ;;  %1930 = vmatprep.mubr.msk.f32.mxu1 %vm452_vm0, %v304_v37  ;;  %v333_v35 = vld [vmem:[%s2115_s29 + $0x510] sm:$0xff]  ;;  %v208_v36 = vld [vmem:[%s2115_s29 + $0x128] sm:$0xff] }
  0x39   : > { %v336_v37 = vld [vmem:[%s2115_s29 + $0x528] sm:$0xff] }
  0x3b   : > { %912 = vmatmul.mubr.f32.gmra.mrb[4].mxu0 %v175_v38  ;;  %1232 = vmatmul.mubr.f32.gmra.mrb[4].mxu1 %v303_v39  ;;  %v207_v38 = vld [vmem:[%s2115_s29 + $0x120] sm:$0xff] }
  0x3c   : > { %1867 = vmatprep.mubr.msk.f32.mxu0 %vm452_vm0, %v178_v40  ;;  %1931 = vmatprep.mubr.msk.f32.mxu1 %vm452_vm0, %v306_v41  ;;  %v335_v39 = vld [vmem:[%s2115_s29 + $0x520] sm:$0xff]  ;;  %v210_v40 = vld [vmem:[%s2115_s29 + $0x138] sm:$0xff] }
  0x3d   : > { %v338_v41 = vld [vmem:[%s2115_s29 + $0x538] sm:$0xff] }
  0x3f   : > { %917 = vmatmul.mubr.f32.gmra.mrb[6].mxu0 %v177_v42  ;;  %1237 = vmatmul.mubr.f32.gmra.mrb[6].mxu1 %v305_v43  ;;  %v209_v42 = vld [vmem:[%s2115_s29 + $0x130] sm:$0xff] }
  0x40   : > { %1868 = vmatprep.mubr.msk.f32.mxu0 %vm452_vm0, %v180_v44  ;;  %1932 = vmatprep.mubr.msk.f32.mxu1 %vm452_vm0, %v308_v45  ;;  %v337_v43 = vld [vmem:[%s2115_s29 + $0x530] sm:$0xff]  ;;  %v212_v44 = vld [vmem:[%s2115_s29 + $0x148] sm:$0xff] }
  0x41   : > { %v340_v45 = vld [vmem:[%s2115_s29 + $0x548] sm:$0xff] }
  0x43   : > { %922 = vmatmul.mubr.f32.gmra.mrb[8].mxu0 %v179_v46  ;;  %1242 = vmatmul.mubr.f32.gmra.mrb[8].mxu1 %v307_v47  ;;  %v211_v46 = vld [vmem:[%s2115_s29 + $0x140] sm:$0xff] }
  0x44   : > { %1869 = vmatprep.mubr.msk.f32.mxu0 %vm452_vm0, %v182_v48  ;;  %1933 = vmatprep.mubr.msk.f32.mxu1 %vm452_vm0, %v310_v49  ;;  %v339_v47 = vld [vmem:[%s2115_s29 + $0x540] sm:$0xff]  ;;  %v214_v48 = vld [vmem:[%s2115_s29 + $0x158] sm:$0xff] }
  0x45   : > { %v342_v49 = vld [vmem:[%s2115_s29 + $0x558] sm:$0xff] }
  0x47   : > { %927 = vmatmul.mubr.f32.gmra.mrb[10].mxu0 %v181_v50  ;;  %1247 = vmatmul.mubr.f32.gmra.mrb[10].mxu1 %v309_v51  ;;  %v213_v50 = vld [vmem:[%s2115_s29 + $0x150] sm:$0xff] }
  0x48   : > { %1870 = vmatprep.mubr.msk.f32.mxu0 %vm452_vm0, %v184_v52  ;;  %1934 = vmatprep.mubr.msk.f32.mxu1 %vm452_vm0, %v312_v53  ;;  %v341_v51 = vld [vmem:[%s2115_s29 + $0x550] sm:$0xff]  ;;  %v216_v52 = vld [vmem:[%s2115_s29 + $0x168] sm:$0xff] }
  0x49   : > { %v344_v53 = vld [vmem:[%s2115_s29 + $0x568] sm:$0xff] }
  0x4b   : > { %932 = vmatmul.mubr.f32.gmra.mrb[12].mxu0 %v183_v54  ;;  %1252 = vmatmul.mubr.f32.gmra.mrb[12].mxu1 %v311_v55  ;;  %v215_v54 = vld [vmem:[%s2115_s29 + $0x160] sm:$0xff] }
  0x4c   : > { %1871 = vmatprep.mubr.msk.f32.mxu0 %vm452_vm0, %v186_v56  ;;  %1935 = vmatprep.mubr.msk.f32.mxu1 %vm452_vm0, %v314_v57  ;;  %v343_v55 = vld [vmem:[%s2115_s29 + $0x560] sm:$0xff]  ;;  %v218_v56 = vld [vmem:[%s2115_s29 + $0x178] sm:$0xff] }
  0x4d   : > { %v346_v57 = vld [vmem:[%s2115_s29 + $0x578] sm:$0xff] }
  0x4f   : > { %937 = vmatmul.mubr.f32.gmra.mrb[14].mxu0 %v185_v58  ;;  %1257 = vmatmul.mubr.f32.gmra.mrb[14].mxu1 %v313_v59  ;;  %v217_v58 = vld [vmem:[%s2115_s29 + $0x170] sm:$0xff] }
  0x50   : > { %1872 = vmatprep.mubr.msk.f32.mxu0 %vm452_vm0, %v188_v60  ;;  %1936 = vmatprep.mubr.msk.f32.mxu1 %vm452_vm0, %v316_v61  ;;  %v345_v59 = vld [vmem:[%s2115_s29 + $0x570] sm:$0xff]  ;;  %v220_v60 = vld [vmem:[%s2115_s29 + $0x188] sm:$0xff] }
  0x51   : > { %v348_v61 = vld [vmem:[%s2115_s29 + $0x588] sm:$0xff] }
  0x53   : > { %942 = vmatmul.mubr.f32.gmra.mrb[16].mxu0 %v187_v62  ;;  %1262 = vmatmul.mubr.f32.gmra.mrb[16].mxu1 %v315_v63  ;;  %v219_v62 = vld [vmem:[%s2115_s29 + $0x180] sm:$0xff] }
  0x54   : > { %1873 = vmatprep.mubr.msk.f32.mxu0 %vm452_vm0, %v190_v0  ;;  %1937 = vmatprep.mubr.msk.f32.mxu1 %vm452_vm0, %v318_v1  ;;  %v347_v63 = vld [vmem:[%s2115_s29 + $0x580] sm:$0xff]  ;;  %v222_v0 = vld [vmem:[%s2115_s29 + $0x198] sm:$0xff] }
  0x55   : > { %v350_v1 = vld [vmem:[%s2115_s29 + $0x598] sm:$0xff] }
  0x57   : > { %947 = vmatmul.mubr.f32.gmra.mrb[18].mxu0 %v189_v2  ;;  %1267 = vmatmul.mubr.f32.gmra.mrb[18].mxu1 %v317_v3  ;;  %v221_v2 = vld [vmem:[%s2115_s29 + $0x190] sm:$0xff] }
  0x58   : > { %1874 = vmatprep.mubr.msk.f32.mxu0 %vm452_vm0, %v192_v4  ;;  %1938 = vmatprep.mubr.msk.f32.mxu1 %vm452_vm0, %v320_v5  ;;  %v349_v3 = vld [vmem:[%s2115_s29 + $0x590] sm:$0xff]  ;;  %v224_v4 = vld [vmem:[%s2115_s29 + $0x1a8] sm:$0xff] }
  0x59   : > { %v352_v5 = vld [vmem:[%s2115_s29 + $0x5a8] sm:$0xff] }
  0x5b   : > { %952 = vmatmul.mubr.f32.gmra.mrb[20].mxu0 %v191_v6  ;;  %1272 = vmatmul.mubr.f32.gmra.mrb[20].mxu1 %v319_v7  ;;  %v223_v6 = vld [vmem:[%s2115_s29 + $0x1a0] sm:$0xff] }
  0x5c   : > { %1875 = vmatprep.mubr.msk.f32.mxu0 %vm452_vm0, %v194_v8  ;;  %1939 = vmatprep.mubr.msk.f32.mxu1 %vm452_vm0, %v322_v9  ;;  %v351_v7 = vld [vmem:[%s2115_s29 + $0x5a0] sm:$0xff]  ;;  %v226_v8 = vld [vmem:[%s2115_s29 + $0x1b8] sm:$0xff] }
  0x5d   : > { %v354_v9 = vld [vmem:[%s2115_s29 + $0x5b8] sm:$0xff] }
  0x5f   : > { %957 = vmatmul.mubr.f32.gmra.mrb[22].mxu0 %v193_v10  ;;  %1277 = vmatmul.mubr.f32.gmra.mrb[22].mxu1 %v321_v11  ;;  %v225_v10 = vld [vmem:[%s2115_s29 + $0x1b0] sm:$0xff] }
  0x60   : > { %1876 = vmatprep.mubr.msk.f32.mxu0 %vm452_vm0, %v196_v12  ;;  %1940 = vmatprep.mubr.msk.f32.mxu1 %vm452_vm0, %v324_v13  ;;  %v353_v11 = vld [vmem:[%s2115_s29 + $0x5b0] sm:$0xff]  ;;  %v228_v12 = vld [vmem:[%s2115_s29 + $0x1c8] sm:$0xff] }
  0x61   : > { %v356_v13 = vld [vmem:[%s2115_s29 + $0x5c8] sm:$0xff] }
  0x63   : > { %962 = vmatmul.mubr.f32.gmra.mrb[24].mxu0 %v195_v14  ;;  %1282 = vmatmul.mubr.f32.gmra.mrb[24].mxu1 %v323_v15  ;;  %v227_v14 = vld [vmem:[%s2115_s29 + $0x1c0] sm:$0xff] }
  0x64   : > { %1877 = vmatprep.mubr.msk.f32.mxu0 %vm452_vm0, %v198_v16  ;;  %1941 = vmatprep.mubr.msk.f32.mxu1 %vm452_vm0, %v326_v17  ;;  %v355_v15 = vld [vmem:[%s2115_s29 + $0x5c0] sm:$0xff]  ;;  %v230_v16 = vld [vmem:[%s2115_s29 + $0x1d8] sm:$0xff] }
  0x65   : > { %v358_v17 = vld [vmem:[%s2115_s29 + $0x5d8] sm:$0xff] }
  0x67   : > { %967 = vmatmul.mubr.f32.gmra.mrb[26].mxu0 %v197_v18  ;;  %1287 = vmatmul.mubr.f32.gmra.mrb[26].mxu1 %v325_v19  ;;  %v229_v18 = vld [vmem:[%s2115_s29 + $0x1d0] sm:$0xff] }
  0x68   : > { %1878 = vmatprep.mubr.msk.f32.mxu0 %vm452_vm0, %v200_v20  ;;  %1942 = vmatprep.mubr.msk.f32.mxu1 %vm452_vm0, %v328_v21  ;;  %v357_v19 = vld [vmem:[%s2115_s29 + $0x5d0] sm:$0xff]  ;;  %v232_v20 = vld [vmem:[%s2115_s29 + $0x1e8] sm:$0xff] }
  0x69   : > { %v360_v21 = vld [vmem:[%s2115_s29 + $0x5e8] sm:$0xff] }
  0x6b   : > { %972 = vmatmul.mubr.f32.gmra.mrb[28].mxu0 %v199_v22  ;;  %1292 = vmatmul.mubr.f32.gmra.mrb[28].mxu1 %v327_v23  ;;  %v231_v22 = vld [vmem:[%s2115_s29 + $0x1e0] sm:$0xff] }
  0x6c   : > { %1879 = vmatprep.mubr.msk.f32.mxu0 %vm452_vm0, %v202_v24  ;;  %1943 = vmatprep.mubr.msk.f32.mxu1 %vm452_vm0, %v330_v25  ;;  %v359_v23 = vld [vmem:[%s2115_s29 + $0x5e0] sm:$0xff]  ;;  %v234_v24 = vld [vmem:[%s2115_s29 + $0x1f8] sm:$0xff] }
  0x6d   : > { %v362_v25 = vld [vmem:[%s2115_s29 + $0x5f8] sm:$0xff] }
  0x6f   : > { %977 = vmatmul.mubr.f32.gmra.mrb[30].mxu0 %v201_v26  ;;  %1297 = vmatmul.mubr.f32.gmra.mrb[30].mxu1 %v329_v27  ;;  %v233_v26 = vld [vmem:[%s2115_s29 + $0x1f0] sm:$0xff] }
  0x70   : > { %1880 = vmatprep.mubr.msk.f32.mxu0 %vm452_vm0, %v204_v28  ;;  %1944 = vmatprep.mubr.msk.f32.mxu1 %vm452_vm0, %v332_v29  ;;  %v361_v27 = vld [vmem:[%s2115_s29 + $0x5f0] sm:$0xff]  ;;  %v236_v28 = vld [vmem:[%s2115_s29 + $0x208] sm:$0xff] }
  0x71   : > { %v364_v29 = vld [vmem:[%s2115_s29 + $0x608] sm:$0xff] }
  0x73   : > { %982 = vmatmul.mubr.f32.gmra.mrb[32].mxu0 %v203_v30  ;;  %1302 = vmatmul.mubr.f32.gmra.mrb[32].mxu1 %v331_v31  ;;  %v235_v30 = vld [vmem:[%s2115_s29 + $0x200] sm:$0xff] }
  0x74   : > { %1881 = vmatprep.mubr.msk.f32.mxu0 %vm452_vm0, %v206_v32  ;;  %1945 = vmatprep.mubr.msk.f32.mxu1 %vm452_vm0, %v334_v33  ;;  %v363_v31 = vld [vmem:[%s2115_s29 + $0x600] sm:$0xff]  ;;  %v238_v32 = vld [vmem:[%s2115_s29 + $0x218] sm:$0xff] }
  0x75   : > { %v366_v33 = vld [vmem:[%s2115_s29 + $0x618] sm:$0xff] }
  0x77   : > { %987 = vmatmul.mubr.f32.gmra.mrb[34].mxu0 %v205_v34  ;;  %1307 = vmatmul.mubr.f32.gmra.mrb[34].mxu1 %v333_v35  ;;  %v237_v34 = vld [vmem:[%s2115_s29 + $0x210] sm:$0xff] }
  0x78   : > { %1882 = vmatprep.mubr.msk.f32.mxu0 %vm452_vm0, %v208_v36  ;;  %1946 = vmatprep.mubr.msk.f32.mxu1 %vm452_vm0, %v336_v37  ;;  %v365_v35 = vld [vmem:[%s2115_s29 + $0x610] sm:$0xff]  ;;  %v240_v36 = vld [vmem:[%s2115_s29 + $0x228] sm:$0xff] }
  0x79   : > { %v368_v37 = vld [vmem:[%s2115_s29 + $0x628] sm:$0xff] }
  0x7b   : > { %992 = vmatmul.mubr.f32.gmra.mrb[36].mxu0 %v207_v38  ;;  %1312 = vmatmul.mubr.f32.gmra.mrb[36].mxu1 %v335_v39  ;;  %v239_v38 = vld [vmem:[%s2115_s29 + $0x220] sm:$0xff] }
  0x7c   : > { %1883 = vmatprep.mubr.msk.f32.mxu0 %vm452_vm0, %v210_v40  ;;  %1947 = vmatprep.mubr.msk.f32.mxu1 %vm452_vm0, %v338_v41  ;;  %v367_v39 = vld [vmem:[%s2115_s29 + $0x620] sm:$0xff]  ;;  %v242_v40 = vld [vmem:[%s2115_s29 + $0x238] sm:$0xff] }
  0x7d   : > { %v370_v41 = vld [vmem:[%s2115_s29 + $0x638] sm:$0xff] }
  0x7f   : > { %997 = vmatmul.mubr.f32.gmra.mrb[38].mxu0 %v209_v42  ;;  %1317 = vmatmul.mubr.f32.gmra.mrb[38].mxu1 %v337_v43  ;;  %v241_v42 = vld [vmem:[%s2115_s29 + $0x230] sm:$0xff] }
  0x80   : > { %1884 = vmatprep.mubr.msk.f32.mxu0 %vm452_vm0, %v212_v44  ;;  %1948 = vmatprep.mubr.msk.f32.mxu1 %vm452_vm0, %v340_v45  ;;  %v369_v43 = vld [vmem:[%s2115_s29 + $0x630] sm:$0xff]  ;;  %v244_v44 = vld [vmem:[%s2115_s29 + $0x248] sm:$0xff] }
  0x81   : > { %v372_v45 = vld [vmem:[%s2115_s29 + $0x648] sm:$0xff] }
  0x83   : > { %1002 = vmatmul.mubr.f32.gmra.mrb[40].mxu0 %v211_v46  ;;  %1322 = vmatmul.mubr.f32.gmra.mrb[40].mxu1 %v339_v47  ;;  %v243_v46 = vld [vmem:[%s2115_s29 + $0x240] sm:$0xff] }
  0x84   : > { %1885 = vmatprep.mubr.msk.f32.mxu0 %vm452_vm0, %v214_v48  ;;  %1949 = vmatprep.mubr.msk.f32.mxu1 %vm452_vm0, %v342_v49  ;;  %v371_v47 = vld [vmem:[%s2115_s29 + $0x640] sm:$0xff]  ;;  %v246_v48 = vld [vmem:[%s2115_s29 + $0x258] sm:$0xff] }
  0x85   : > { %v374_v49 = vld [vmem:[%s2115_s29 + $0x658] sm:$0xff] }
  0x87   : > { %1007 = vmatmul.mubr.f32.gmra.mrb[42].mxu0 %v213_v50  ;;  %1327 = vmatmul.mubr.f32.gmra.mrb[42].mxu1 %v341_v51  ;;  %v245_v50 = vld [vmem:[%s2115_s29 + $0x250] sm:$0xff] }
  0x88   : > { %1886 = vmatprep.mubr.msk.f32.mxu0 %vm452_vm0, %v216_v52  ;;  %1950 = vmatprep.mubr.msk.f32.mxu1 %vm452_vm0, %v344_v53  ;;  %v373_v51 = vld [vmem:[%s2115_s29 + $0x650] sm:$0xff]  ;;  %v248_v52 = vld [vmem:[%s2115_s29 + $0x268] sm:$0xff] }
  0x89   : > { %v376_v53 = vld [vmem:[%s2115_s29 + $0x668] sm:$0xff] }
  0x8b   : > { %1012 = vmatmul.mubr.f32.gmra.mrb[44].mxu0 %v215_v54  ;;  %1332 = vmatmul.mubr.f32.gmra.mrb[44].mxu1 %v343_v55  ;;  %v247_v54 = vld [vmem:[%s2115_s29 + $0x260] sm:$0xff] }
  0x8c   : > { %1887 = vmatprep.mubr.msk.f32.mxu0 %vm452_vm0, %v218_v56  ;;  %1951 = vmatprep.mubr.msk.f32.mxu1 %vm452_vm0, %v346_v57  ;;  %v375_v55 = vld [vmem:[%s2115_s29 + $0x660] sm:$0xff]  ;;  %v250_v56 = vld [vmem:[%s2115_s29 + $0x278] sm:$0xff] }
  0x8d   : > { %v378_v57 = vld [vmem:[%s2115_s29 + $0x678] sm:$0xff] }
  0x8f   : > { %1017 = vmatmul.mubr.f32.gmra.mrb[46].mxu0 %v217_v58  ;;  %1337 = vmatmul.mubr.f32.gmra.mrb[46].mxu1 %v345_v59  ;;  %v249_v58 = vld [vmem:[%s2115_s29 + $0x270] sm:$0xff] }
  0x90   : > { %1888 = vmatprep.mubr.msk.f32.mxu0 %vm452_vm0, %v220_v60  ;;  %1952 = vmatprep.mubr.msk.f32.mxu1 %vm452_vm0, %v348_v61  ;;  %v377_v59 = vld [vmem:[%s2115_s29 + $0x670] sm:$0xff]  ;;  %v252_v60 = vld [vmem:[%s2115_s29 + $0x288] sm:$0xff] }
  0x91   : > { %v380_v61 = vld [vmem:[%s2115_s29 + $0x688] sm:$0xff] }
  0x93   : > { %1022 = vmatmul.mubr.f32.gmra.mrb[48].mxu0 %v219_v62  ;;  %1342 = vmatmul.mubr.f32.gmra.mrb[48].mxu1 %v347_v63  ;;  %v251_v62 = vld [vmem:[%s2115_s29 + $0x280] sm:$0xff] }
  0x94   : > { %1889 = vmatprep.mubr.msk.f32.mxu0 %vm452_vm0, %v222_v0  ;;  %1953 = vmatprep.mubr.msk.f32.mxu1 %vm452_vm0, %v350_v1  ;;  %v379_v63 = vld [vmem:[%s2115_s29 + $0x680] sm:$0xff]  ;;  %v254_v0 = vld [vmem:[%s2115_s29 + $0x298] sm:$0xff] }
  0x95   : > { %v382_v1 = vld [vmem:[%s2115_s29 + $0x698] sm:$0xff] }
  0x97   : > { %1027 = vmatmul.mubr.f32.gmra.mrb[50].mxu0 %v221_v2  ;;  %1347 = vmatmul.mubr.f32.gmra.mrb[50].mxu1 %v349_v3  ;;  %v253_v2 = vld [vmem:[%s2115_s29 + $0x290] sm:$0xff] }
  0x98   : > { %1890 = vmatprep.mubr.msk.f32.mxu0 %vm452_vm0, %v224_v4  ;;  %1954 = vmatprep.mubr.msk.f32.mxu1 %vm452_vm0, %v352_v5  ;;  %v381_v3 = vld [vmem:[%s2115_s29 + $0x690] sm:$0xff]  ;;  %v256_v4 = vld [vmem:[%s2115_s29 + $0x2a8] sm:$0xff] }
  0x99   : > { %v384_v5 = vld [vmem:[%s2115_s29 + $0x6a8] sm:$0xff] }
  0x9b   : > { %1032 = vmatmul.mubr.f32.gmra.mrb[52].mxu0 %v223_v6  ;;  %1352 = vmatmul.mubr.f32.gmra.mrb[52].mxu1 %v351_v7  ;;  %v255_v6 = vld [vmem:[%s2115_s29 + $0x2a0] sm:$0xff] }
  0x9c   : > { %1891 = vmatprep.mubr.msk.f32.mxu0 %vm452_vm0, %v226_v8  ;;  %1955 = vmatprep.mubr.msk.f32.mxu1 %vm452_vm0, %v354_v9  ;;  %v383_v7 = vld [vmem:[%s2115_s29 + $0x6a0] sm:$0xff]  ;;  %v258_v8 = vld [vmem:[%s2115_s29 + $0x2b8] sm:$0xff] }
  0x9d   : > { %v386_v9 = vld [vmem:[%s2115_s29 + $0x6b8] sm:$0xff] }
  0x9f   : > { %1037 = vmatmul.mubr.f32.gmra.mrb[54].mxu0 %v225_v10  ;;  %1357 = vmatmul.mubr.f32.gmra.mrb[54].mxu1 %v353_v11  ;;  %v257_v10 = vld [vmem:[%s2115_s29 + $0x2b0] sm:$0xff] }
  0xa0   : > { %1892 = vmatprep.mubr.msk.f32.mxu0 %vm452_vm0, %v228_v12  ;;  %1956 = vmatprep.mubr.msk.f32.mxu1 %vm452_vm0, %v356_v13  ;;  %v385_v11 = vld [vmem:[%s2115_s29 + $0x6b0] sm:$0xff]  ;;  %v260_v12 = vld [vmem:[%s2115_s29 + $0x2c8] sm:$0xff] }
  0xa1   : > { %v388_v13 = vld [vmem:[%s2115_s29 + $0x6c8] sm:$0xff] }
  0xa3   : > { %1042 = vmatmul.mubr.f32.gmra.mrb[56].mxu0 %v227_v14  ;;  %1362 = vmatmul.mubr.f32.gmra.mrb[56].mxu1 %v355_v15  ;;  %v259_v14 = vld [vmem:[%s2115_s29 + $0x2c0] sm:$0xff] }
  0xa4   : > { %1893 = vmatprep.mubr.msk.f32.mxu0 %vm452_vm0, %v230_v16  ;;  %1957 = vmatprep.mubr.msk.f32.mxu1 %vm452_vm0, %v358_v17  ;;  %v387_v15 = vld [vmem:[%s2115_s29 + $0x6c0] sm:$0xff]  ;;  %v262_v16 = vld [vmem:[%s2115_s29 + $0x2d8] sm:$0xff] }
  0xa5   : > { %v390_v17 = vld [vmem:[%s2115_s29 + $0x6d8] sm:$0xff] }
  0xa7   : > { %1047 = vmatmul.mubr.f32.gmra.mrb[58].mxu0 %v229_v18  ;;  %1367 = vmatmul.mubr.f32.gmra.mrb[58].mxu1 %v357_v19  ;;  %v261_v18 = vld [vmem:[%s2115_s29 + $0x2d0] sm:$0xff] }
  0xa8   : > { %1894 = vmatprep.mubr.msk.f32.mxu0 %vm452_vm0, %v232_v20  ;;  %1958 = vmatprep.mubr.msk.f32.mxu1 %vm452_vm0, %v360_v21  ;;  %v389_v19 = vld [vmem:[%s2115_s29 + $0x6d0] sm:$0xff]  ;;  %v264_v20 = vld [vmem:[%s2115_s29 + $0x2e8] sm:$0xff] }
  0xa9   : > { %v392_v21 = vld [vmem:[%s2115_s29 + $0x6e8] sm:$0xff] }
  0xab   : > { %1052 = vmatmul.mubr.f32.gmra.mrb[60].mxu0 %v231_v22  ;;  %1372 = vmatmul.mubr.f32.gmra.mrb[60].mxu1 %v359_v23  ;;  %v263_v22 = vld [vmem:[%s2115_s29 + $0x2e0] sm:$0xff] }
  0xac   : > { %1895 = vmatprep.mubr.msk.f32.mxu0 %vm452_vm0, %v234_v24  ;;  %1959 = vmatprep.mubr.msk.f32.mxu1 %vm452_vm0, %v362_v25  ;;  %v391_v23 = vld [vmem:[%s2115_s29 + $0x6e0] sm:$0xff]  ;;  %v266_v24 = vld [vmem:[%s2115_s29 + $0x2f8] sm:$0xff] }
  0xad   : > { %v394_v25 = vld [vmem:[%s2115_s29 + $0x6f8] sm:$0xff] }
  0xaf   : > { %1057 = vmatmul.mubr.f32.gmra.mrb[62].mxu0 %v233_v26  ;;  %1377 = vmatmul.mubr.f32.gmra.mrb[62].mxu1 %v361_v27  ;;  %v265_v26 = vld [vmem:[%s2115_s29 + $0x2f0] sm:$0xff] }
  0xb0   : > { %1896 = vmatprep.mubr.msk.f32.mxu0 %vm452_vm0, %v236_v28  ;;  %1960 = vmatprep.mubr.msk.f32.mxu1 %vm452_vm0, %v364_v29  ;;  %v393_v27 = vld [vmem:[%s2115_s29 + $0x6f0] sm:$0xff]  ;;  %v268_v28 = vld [vmem:[%s2115_s29 + $0x308] sm:$0xff] }
  0xb1   : > { %v396_v29 = vld [vmem:[%s2115_s29 + $0x708] sm:$0xff] }
  0xb3   : > { %1062 = vmatmul.mubr.f32.gmra.mrb[64].mxu0 %v235_v30  ;;  %1382 = vmatmul.mubr.f32.gmra.mrb[64].mxu1 %v363_v31  ;;  %v267_v30 = vld [vmem:[%s2115_s29 + $0x300] sm:$0xff] }
  0xb4   : > { %1897 = vmatprep.mubr.msk.f32.mxu0 %vm452_vm0, %v238_v32  ;;  %1961 = vmatprep.mubr.msk.f32.mxu1 %vm452_vm0, %v366_v33  ;;  %v395_v31 = vld [vmem:[%s2115_s29 + $0x700] sm:$0xff]  ;;  %v270_v32 = vld [vmem:[%s2115_s29 + $0x318] sm:$0xff] }
  0xb5   : > { %v398_v33 = vld [vmem:[%s2115_s29 + $0x718] sm:$0xff] }
  0xb7   : > { %1067 = vmatmul.mubr.f32.gmra.mrb[66].mxu0 %v237_v34  ;;  %1387 = vmatmul.mubr.f32.gmra.mrb[66].mxu1 %v365_v35  ;;  %v269_v34 = vld [vmem:[%s2115_s29 + $0x310] sm:$0xff] }
  0xb8   : > { %1898 = vmatprep.mubr.msk.f32.mxu0 %vm452_vm0, %v240_v36  ;;  %1962 = vmatprep.mubr.msk.f32.mxu1 %vm452_vm0, %v368_v37  ;;  %v397_v35 = vld [vmem:[%s2115_s29 + $0x710] sm:$0xff]  ;;  %v272_v36 = vld [vmem:[%s2115_s29 + $0x328] sm:$0xff] }
  0xb9   : > { %v400_v37 = vld [vmem:[%s2115_s29 + $0x728] sm:$0xff] }
  0xbb   : > { %1072 = vmatmul.mubr.f32.gmra.mrb[68].mxu0 %v239_v38  ;;  %1392 = vmatmul.mubr.f32.gmra.mrb[68].mxu1 %v367_v39  ;;  %v271_v38 = vld [vmem:[%s2115_s29 + $0x320] sm:$0xff] }
  0xbc   : > { %1899 = vmatprep.mubr.msk.f32.mxu0 %vm452_vm0, %v242_v40  ;;  %1963 = vmatprep.mubr.msk.f32.mxu1 %vm452_vm0, %v370_v41  ;;  %v399_v39 = vld [vmem:[%s2115_s29 + $0x720] sm:$0xff]  ;;  %v274_v40 = vld [vmem:[%s2115_s29 + $0x338] sm:$0xff] }
  0xbd   : > { %v402_v41 = vld [vmem:[%s2115_s29 + $0x738] sm:$0xff] }
  0xbf   : > { %1077 = vmatmul.mubr.f32.gmra.mrb[70].mxu0 %v241_v42  ;;  %1397 = vmatmul.mubr.f32.gmra.mrb[70].mxu1 %v369_v43  ;;  %v273_v42 = vld [vmem:[%s2115_s29 + $0x330] sm:$0xff] }
  0xc0   : > { %1900 = vmatprep.mubr.msk.f32.mxu0 %vm452_vm0, %v244_v44  ;;  %1964 = vmatprep.mubr.msk.f32.mxu1 %vm452_vm0, %v372_v45  ;;  %v401_v43 = vld [vmem:[%s2115_s29 + $0x730] sm:$0xff]  ;;  %v276_v44 = vld [vmem:[%s2115_s29 + $0x348] sm:$0xff] }
  0xc1   : > { %v404_v45 = vld [vmem:[%s2115_s29 + $0x748] sm:$0xff] }
  0xc3   : > { %1082 = vmatmul.mubr.f32.gmra.mrb[72].mxu0 %v243_v46  ;;  %1402 = vmatmul.mubr.f32.gmra.mrb[72].mxu1 %v371_v47  ;;  %v275_v46 = vld [vmem:[%s2115_s29 + $0x340] sm:$0xff] }
  0xc4   : > { %1901 = vmatprep.mubr.msk.f32.mxu0 %vm452_vm0, %v246_v48  ;;  %1965 = vmatprep.mubr.msk.f32.mxu1 %vm452_vm0, %v374_v49  ;;  %v403_v47 = vld [vmem:[%s2115_s29 + $0x740] sm:$0xff]  ;;  %v278_v48 = vld [vmem:[%s2115_s29 + $0x358] sm:$0xff] }
  0xc5   : > { %v406_v49 = vld [vmem:[%s2115_s29 + $0x758] sm:$0xff] }
  0xc7   : > { %1087 = vmatmul.mubr.f32.gmra.mrb[74].mxu0 %v245_v50  ;;  %1407 = vmatmul.mubr.f32.gmra.mrb[74].mxu1 %v373_v51  ;;  %v277_v50 = vld [vmem:[%s2115_s29 + $0x350] sm:$0xff] }
  0xc8   : > { %1902 = vmatprep.mubr.msk.f32.mxu0 %vm452_vm0, %v248_v52  ;;  %1966 = vmatprep.mubr.msk.f32.mxu1 %vm452_vm0, %v376_v53  ;;  %v405_v51 = vld [vmem:[%s2115_s29 + $0x750] sm:$0xff]  ;;  %v280_v52 = vld [vmem:[%s2115_s29 + $0x368] sm:$0xff] }
  0xc9   : > { %v408_v53 = vld [vmem:[%s2115_s29 + $0x768] sm:$0xff] }
  0xcb   : > { %1092 = vmatmul.mubr.f32.gmra.mrb[76].mxu0 %v247_v54  ;;  %1412 = vmatmul.mubr.f32.gmra.mrb[76].mxu1 %v375_v55 }
  0xcc   : > { %1903 = vmatprep.mubr.msk.f32.mxu0 %vm452_vm0, %v250_v56  ;;  %1967 = vmatprep.mubr.msk.f32.mxu1 %vm452_vm0, %v378_v57 }
  0xcf   : > { %1097 = vmatmul.mubr.f32.gmra.mrb[78].mxu0 %v249_v58  ;;  %1417 = vmatmul.mubr.f32.gmra.mrb[78].mxu1 %v377_v59  ;;  %v279_v58 = vld [vmem:[%s2115_s29 + $0x360] sm:$0xff] }
  0xd0   : > { %1904 = vmatprep.mubr.msk.f32.mxu0 %vm452_vm0, %v252_v60  ;;  %1968 = vmatprep.mubr.msk.f32.mxu1 %vm452_vm0, %v380_v61  ;;  %v407_v59 = vld [vmem:[%s2115_s29 + $0x760] sm:$0xff]  ;;  %v282_v60 = vld [vmem:[%s2115_s29 + $0x378] sm:$0xff] }
  0xd1   : > { %v410_v61 = vld [vmem:[%s2115_s29 + $0x778] sm:$0xff] }
  0xd3   : > { %1102 = vmatmul.mubr.f32.gmra.mrb[80].mxu0 %v251_v62  ;;  %1422 = vmatmul.mubr.f32.gmra.mrb[80].mxu1 %v379_v63 }
  0xd4   : > { %1905 = vmatprep.mubr.msk.f32.mxu0 %vm452_vm0, %v254_v0  ;;  %1969 = vmatprep.mubr.msk.f32.mxu1 %vm452_vm0, %v382_v1 }
  0xd7   : > { %1107 = vmatmul.mubr.f32.gmra.mrb[82].mxu0 %v253_v2  ;;  %1427 = vmatmul.mubr.f32.gmra.mrb[82].mxu1 %v381_v3  ;;  %v281_v2 = vld [vmem:[%s2115_s29 + $0x370] sm:$0xff] }
  0xd8   : > { %1906 = vmatprep.mubr.msk.f32.mxu0 %vm452_vm0, %v256_v4  ;;  %1970 = vmatprep.mubr.msk.f32.mxu1 %vm452_vm0, %v384_v5  ;;  %v409_v3 = vld [vmem:[%s2115_s29 + $0x770] sm:$0xff]  ;;  %v284_v4 = vld [vmem:[%s2115_s29 + $0x388] sm:$0xff] }
  0xd9   : > { %v412_v5 = vld [vmem:[%s2115_s29 + $0x788] sm:$0xff] }
  0xdb   : > { %1112 = vmatmul.mubr.f32.gmra.mrb[84].mxu0 %v255_v6  ;;  %1432 = vmatmul.mubr.f32.gmra.mrb[84].mxu1 %v383_v7 }
  0xdc   : > { %1907 = vmatprep.mubr.msk.f32.mxu0 %vm452_vm0, %v258_v8  ;;  %1971 = vmatprep.mubr.msk.f32.mxu1 %vm452_vm0, %v386_v9 }
  0xdf   : > { %1117 = vmatmul.mubr.f32.gmra.mrb[86].mxu0 %v257_v10  ;;  %1437 = vmatmul.mubr.f32.gmra.mrb[86].mxu1 %v385_v11  ;;  %v283_v10 = vld [vmem:[%s2115_s29 + $0x380] sm:$0xff] }
  0xe0   : > { %1908 = vmatprep.mubr.msk.f32.mxu0 %vm452_vm0, %v260_v12  ;;  %1972 = vmatprep.mubr.msk.f32.mxu1 %vm452_vm0, %v388_v13  ;;  %v411_v11 = vld [vmem:[%s2115_s29 + $0x780] sm:$0xff]  ;;  %v286_v12 = vld [vmem:[%s2115_s29 + $0x398] sm:$0xff] }
  0xe1   : > { %v414_v13 = vld [vmem:[%s2115_s29 + $0x798] sm:$0xff] }
  0xe3   : > { %1122 = vmatmul.mubr.f32.gmra.mrb[88].mxu0 %v259_v14  ;;  %1442 = vmatmul.mubr.f32.gmra.mrb[88].mxu1 %v387_v15 }
  0xe4   : > { %1909 = vmatprep.mubr.msk.f32.mxu0 %vm452_vm0, %v262_v16  ;;  %1973 = vmatprep.mubr.msk.f32.mxu1 %vm452_vm0, %v390_v17 }
  0xe7   : > { %1127 = vmatmul.mubr.f32.gmra.mrb[90].mxu0 %v261_v18  ;;  %1447 = vmatmul.mubr.f32.gmra.mrb[90].mxu1 %v389_v19  ;;  %v285_v18 = vld [vmem:[%s2115_s29 + $0x390] sm:$0xff] }
  0xe8   : > { %1910 = vmatprep.mubr.msk.f32.mxu0 %vm452_vm0, %v264_v20  ;;  %1974 = vmatprep.mubr.msk.f32.mxu1 %vm452_vm0, %v392_v21  ;;  %v413_v19 = vld [vmem:[%s2115_s29 + $0x790] sm:$0xff]  ;;  %v288_v20 = vld [vmem:[%s2115_s29 + $0x3a8] sm:$0xff] }
  0xe9   : > { %v416_v21 = vld [vmem:[%s2115_s29 + $0x7a8] sm:$0xff] }
  0xeb   : > { %1132 = vmatmul.mubr.f32.gmra.mrb[92].mxu0 %v263_v22  ;;  %1452 = vmatmul.mubr.f32.gmra.mrb[92].mxu1 %v391_v23 }
  0xec   : > { %1911 = vmatprep.mubr.msk.f32.mxu0 %vm452_vm0, %v266_v24  ;;  %1975 = vmatprep.mubr.msk.f32.mxu1 %vm452_vm0, %v394_v25 }
  0xef   : > { %1137 = vmatmul.mubr.f32.gmra.mrb[94].mxu0 %v265_v26  ;;  %1457 = vmatmul.mubr.f32.gmra.mrb[94].mxu1 %v393_v27  ;;  %v287_v26 = vld [vmem:[%s2115_s29 + $0x3a0] sm:$0xff] }
  0xf0   : > { %1912 = vmatprep.mubr.msk.f32.mxu0 %vm452_vm0, %v268_v28  ;;  %1976 = vmatprep.mubr.msk.f32.mxu1 %vm452_vm0, %v396_v29  ;;  %v415_v27 = vld [vmem:[%s2115_s29 + $0x7a0] sm:$0xff]  ;;  %v290_v28 = vld [vmem:[%s2115_s29 + $0x3b8] sm:$0xff] }
  0xf1   : > { %v418_v29 = vld [vmem:[%s2115_s29 + $0x7b8] sm:$0xff] }
  0xf3   : > { %1142 = vmatmul.mubr.f32.gmra.mrb[96].mxu0 %v267_v30  ;;  %1462 = vmatmul.mubr.f32.gmra.mrb[96].mxu1 %v395_v31 }
  0xf4   : > { %1913 = vmatprep.mubr.msk.f32.mxu0 %vm452_vm0, %v270_v32  ;;  %1977 = vmatprep.mubr.msk.f32.mxu1 %vm452_vm0, %v398_v33 }
  0xf7   : > { %1147 = vmatmul.mubr.f32.gmra.mrb[98].mxu0 %v269_v34  ;;  %1467 = vmatmul.mubr.f32.gmra.mrb[98].mxu1 %v397_v35  ;;  %v289_v34 = vld [vmem:[%s2115_s29 + $0x3b0] sm:$0xff] }
  0xf8   : > { %1914 = vmatprep.mubr.msk.f32.mxu0 %vm452_vm0, %v272_v36  ;;  %1978 = vmatprep.mubr.msk.f32.mxu1 %vm452_vm0, %v400_v37  ;;  %v417_v35 = vld [vmem:[%s2115_s29 + $0x7b0] sm:$0xff]  ;;  %v292_v36 = vld [vmem:[%s2115_s29 + $0x3c8] sm:$0xff] }
  0xf9   : > { %v420_v37 = vld [vmem:[%s2115_s29 + $0x7c8] sm:$0xff] }
  0xfb   : > { %1152 = vmatmul.mubr.f32.gmra.mrb[100].mxu0 %v271_v38  ;;  %1472 = vmatmul.mubr.f32.gmra.mrb[100].mxu1 %v399_v39 }
  0xfc   : > { %1915 = vmatprep.mubr.msk.f32.mxu0 %vm452_vm0, %v274_v40  ;;  %1979 = vmatprep.mubr.msk.f32.mxu1 %vm452_vm0, %v402_v41 }
  0xff   : > { %1157 = vmatmul.mubr.f32.gmra.mrb[102].mxu0 %v273_v42  ;;  %1477 = vmatmul.mubr.f32.gmra.mrb[102].mxu1 %v401_v43  ;;  %v291_v42 = vld [vmem:[%s2115_s29 + $0x3c0] sm:$0xff] }
 0x100   : > { %1916 = vmatprep.mubr.msk.f32.mxu0 %vm452_vm0, %v276_v44  ;;  %1980 = vmatprep.mubr.msk.f32.mxu1 %vm452_vm0, %v404_v45  ;;  %v419_v43 = vld [vmem:[%s2115_s29 + $0x7c0] sm:$0xff]  ;;  %v294_v44 = vld [vmem:[%s2115_s29 + $0x3d8] sm:$0xff] }
 0x101   : > { %v422_v45 = vld [vmem:[%s2115_s29 + $0x7d8] sm:$0xff] }
 0x103   : > { %1162 = vmatmul.mubr.f32.gmra.mrb[104].mxu0 %v275_v46  ;;  %1482 = vmatmul.mubr.f32.gmra.mrb[104].mxu1 %v403_v47 }
 0x104   : > { %1917 = vmatprep.mubr.msk.f32.mxu0 %vm452_vm0, %v278_v48  ;;  %1981 = vmatprep.mubr.msk.f32.mxu1 %vm452_vm0, %v406_v49 }
 0x106   : > { %v2493_v54 = vpop.f32.mrb[0].mxu0  ;;  %v2495_v55 = vpop.f32.mrb[0].mxu1 }
 0x107   : > { %v905_v56 = vpop.f32.mrb[1].mxu0  ;;  %1167 = vmatmul.mubr.f32.gmra.mrb[106].mxu0 %v277_v50  ;;  %v1225_v57 = vpop.f32.mrb[1].mxu1  ;;  %1487 = vmatmul.mubr.f32.gmra.mrb[106].mxu1 %v405_v51  ;;  %v293_v50 = vld [vmem:[%s2115_s29 + $0x3d0] sm:$0xff] }
 0x108   : > { %1918 = vmatprep.mubr.msk.f32.mxu0 %vm452_vm0, %v280_v52  ;;  %1982 = vmatprep.mubr.msk.f32.mxu1 %vm452_vm0, %v408_v53  ;;  %v421_v51 = vld [vmem:[%s2115_s29 + $0x7d0] sm:$0xff]  ;;  %v296_v52 = vld [vmem:[%s2115_s29 + $0x3e8] sm:$0xff] }
 0x109   : > { %v424_v53 = vld [vmem:[%s2115_s29 + $0x7e8] sm:$0xff] }
 0x10a   : > { %v2503_v62 = vpop.f32.mrb[2].mxu0  ;;  %v2505_v63 = vpop.f32.mrb[2].mxu1 }
 0x10b   : > { %v910_v0 = vpop.f32.mrb[3].mxu0  ;;  %1172 = vmatmul.mubr.f32.gmra.mrb[108].mxu0 %v279_v58  ;;  %v1230_v1 = vpop.f32.mrb[3].mxu1  ;;  %1492 = vmatmul.mubr.f32.gmra.mrb[108].mxu1 %v407_v59 }
 0x10c   : > { %1919 = vmatprep.mubr.msk.f32.mxu0 %vm452_vm0, %v282_v60  ;;  %1983 = vmatprep.mubr.msk.f32.mxu1 %vm452_vm0, %v410_v61  ;;  %v295_v60 = vld [vmem:[%s2115_s29 + $0x3e0] sm:$0xff]  ;;  %v298_v0 = vld [vmem:[%s2115_s29 + $0x3f8] sm:$0xff] }
 0x10d   : > { %v423_v61 = vld [vmem:[%s2115_s29 + $0x7e0] sm:$0xff]  ;;  %v426_v1 = vld [vmem:[%s2115_s29 + $0x7f8] sm:$0xff] }
 0x10e   : > { %v2513_v6 = vpop.f32.mrb[4].mxu0  ;;  %v2515_v7 = vpop.f32.mrb[4].mxu1 }
 0x10f   : > { %v915_v8 = vpop.f32.mrb[5].mxu0  ;;  %1177 = vmatmul.mubr.f32.gmra.mrb[110].mxu0 %v281_v2  ;;  %v1235_v9 = vpop.f32.mrb[5].mxu1  ;;  %1497 = vmatmul.mubr.f32.gmra.mrb[110].mxu1 %v409_v3 }
 0x110   : > { %1920 = vmatprep.mubr.msk.f32.mxu0 %vm452_vm0, %v284_v4  ;;  %1984 = vmatprep.mubr.msk.f32.mxu1 %vm452_vm0, %v412_v5  ;;  %v297_v8 = vld [vmem:[%s2115_s29 + $0x3f0] sm:$0xff] }
 0x111   : > { %v425_v9 = vld [vmem:[%s2115_s29 + $0x7f0] sm:$0xff] }
 0x112   : > { %v2523_v14 = vpop.f32.mrb[6].mxu0  ;;  %v2525_v15 = vpop.f32.mrb[6].mxu1 }
 0x113   : > { %v920_v16 = vpop.f32.mrb[7].mxu0  ;;  %1182 = vmatmul.mubr.f32.gmra.mrb[112].mxu0 %v283_v10  ;;  %v1240_v17 = vpop.f32.mrb[7].mxu1  ;;  %1502 = vmatmul.mubr.f32.gmra.mrb[112].mxu1 %v411_v11 }
 0x114   : > { %1921 = vmatprep.mubr.msk.f32.mxu0 %vm452_vm0, %v286_v12  ;;  %1985 = vmatprep.mubr.msk.f32.mxu1 %vm452_vm0, %v414_v13 }
 0x116   : > { %v2533_v22 = vpop.f32.mrb[8].mxu0  ;;  %v2535_v23 = vpop.f32.mrb[8].mxu1 }
 0x117   : > { %v925_v24 = vpop.f32.mrb[9].mxu0  ;;  %1187 = vmatmul.mubr.f32.gmra.mrb[114].mxu0 %v285_v18  ;;  %v1245_v25 = vpop.f32.mrb[9].mxu1  ;;  %1507 = vmatmul.mubr.f32.gmra.mrb[114].mxu1 %v413_v19 }
 0x118   : > { %1922 = vmatprep.mubr.msk.f32.mxu0 %vm452_vm0, %v288_v20  ;;  %1986 = vmatprep.mubr.msk.f32.mxu1 %vm452_vm0, %v416_v21 }
 0x11a   : > { %v2543_v30 = vpop.f32.mrb[10].mxu0  ;;  %v2545_v31 = vpop.f32.mrb[10].mxu1 }
 0x11b   : > { %v930_v32 = vpop.f32.mrb[11].mxu0  ;;  %1192 = vmatmul.mubr.f32.gmra.mrb[116].mxu0 %v287_v26  ;;  %v1250_v33 = vpop.f32.mrb[11].mxu1  ;;  %1512 = vmatmul.mubr.f32.gmra.mrb[116].mxu1 %v415_v27 }
 0x11c   : > { %1923 = vmatprep.mubr.msk.f32.mxu0 %vm452_vm0, %v290_v28  ;;  %1987 = vmatprep.mubr.msk.f32.mxu1 %vm452_vm0, %v418_v29 }
 0x11e   : > { %v2553_v38 = vpop.f32.mrb[12].mxu0  ;;  %v2555_v39 = vpop.f32.mrb[12].mxu1 }
 0x11f   : > { %v935_v40 = vpop.f32.mrb[13].mxu0  ;;  %1197 = vmatmul.mubr.f32.gmra.mrb[118].mxu0 %v289_v34  ;;  %v1255_v41 = vpop.f32.mrb[13].mxu1  ;;  %1517 = vmatmul.mubr.f32.gmra.mrb[118].mxu1 %v417_v35 }
 0x120   : > { %1924 = vmatprep.mubr.msk.f32.mxu0 %vm452_vm0, %v292_v36  ;;  %1988 = vmatprep.mubr.msk.f32.mxu1 %vm452_vm0, %v420_v37 }
 0x122   : > { %v2563_v46 = vpop.f32.mrb[14].mxu0  ;;  %v2565_v47 = vpop.f32.mrb[14].mxu1 }
 0x123   : > { %v940_v48 = vpop.f32.mrb[15].mxu0  ;;  %1202 = vmatmul.mubr.f32.gmra.mrb[120].mxu0 %v291_v42  ;;  %v1260_v49 = vpop.f32.mrb[15].mxu1  ;;  %1522 = vmatmul.mubr.f32.gmra.mrb[120].mxu1 %v419_v43 }
 0x124   : > { %1925 = vmatprep.mubr.msk.f32.mxu0 %vm452_vm0, %v294_v44  ;;  %1989 = vmatprep.mubr.msk.f32.mxu1 %vm452_vm0, %v422_v45 }
 0x126   : > { %v2573_v56 = vpop.f32.mrb[16].mxu0  ;;  %v2575_v57 = vpop.f32.mrb[16].mxu1 }
 0x127   : > { %v945_v58 = vpop.f32.mrb[17].mxu0  ;;  %1207 = vmatmul.mubr.f32.gmra.mrb[122].mxu0 %v293_v50  ;;  %v1265_v59 = vpop.f32.mrb[17].mxu1  ;;  %1527 = vmatmul.mubr.f32.gmra.mrb[122].mxu1 %v421_v51 }
 0x128   : > { %1926 = vmatprep.mubr.msk.f32.mxu0 %vm452_vm0, %v296_v52  ;;  %1990 = vmatprep.mubr.msk.f32.mxu1 %vm452_vm0, %v424_v53 }
 0x12a   : > { %v2583_v2 = vpop.f32.mrb[18].mxu0  ;;  %v2585_v3 = vpop.f32.mrb[18].mxu1 }
 0x12b   : > { %v950_v4 = vpop.f32.mrb[19].mxu0  ;;  %1212 = vmatmul.mubr.f32.gmra.mrb[124].mxu0 %v295_v60  ;;  %v1270_v5 = vpop.f32.mrb[19].mxu1  ;;  %1532 = vmatmul.mubr.f32.gmra.mrb[124].mxu1 %v423_v61 }
 0x12c   : > { %1927 = vmatprep.mubr.msk.f32.mxu0 %vm452_vm0, %v298_v0  ;;  %1991 = vmatprep.mubr.msk.f32.mxu1 %vm452_vm0, %v426_v1 }
 0x12e   : > { %v2591_v10 = vpop.f32.mrb[20].mxu0  ;;  %v2593_v11 = vpop.f32.mrb[20].mxu1 }
 0x12f   : > { %v955_v12 = vpop.f32.mrb[21].mxu0  ;;  %1217 = vmatmul.mubr.f32.gmra.mrb[126].mxu0 %v297_v8  ;;  %v1275_v13 = vpop.f32.mrb[21].mxu1  ;;  %1537 = vmatmul.mubr.f32.gmra.mrb[126].mxu1 %v425_v9 }
 0x132   : > { %v2595_v16 = vpop.f32.mrb[22].mxu0  ;;  %v2597_v17 = vpop.f32.mrb[22].mxu1 }
 0x133   : > { %v960_v18 = vpop.f32.mrb[23].mxu0  ;;  %v1280_v19 = vpop.f32.mrb[23].mxu1 }
 0x136   : > { %v2599_v20 = vpop.f32.mrb[24].mxu0  ;;  %v2601_v21 = vpop.f32.mrb[24].mxu1 }
 0x137   : > { %v965_v24 = vpop.f32.mrb[25].mxu0  ;;  %v1285_v25 = vpop.f32.mrb[25].mxu1 }
 0x13a   : > { %v2603_v26 = vpop.f32.mrb[26].mxu0  ;;  %v2605_v27 = vpop.f32.mrb[26].mxu1 }
 0x13b   : > { %v970_v28 = vpop.f32.mrb[27].mxu0  ;;  %v1290_v29 = vpop.f32.mrb[27].mxu1 }
 0x13e   : > { %v2607_v32 = vpop.f32.mrb[28].mxu0  ;;  %v2609_v33 = vpop.f32.mrb[28].mxu1 }
 0x13f   : > { %v975_v34 = vpop.f32.mrb[29].mxu0  ;;  %v1295_v35 = vpop.f32.mrb[29].mxu1 }
 0x142   : > { %v2611_v36 = vpop.f32.mrb[30].mxu0  ;;  %v2613_v37 = vpop.f32.mrb[30].mxu1 }
 0x143   : > { %v980_v40 = vpop.f32.mrb[31].mxu0  ;;  %v1300_v41 = vpop.f32.mrb[31].mxu1 }
 0x146   : > { %v2615_v42 = vpop.f32.mrb[32].mxu0  ;;  %v2617_v43 = vpop.f32.mrb[32].mxu1 }
 0x147   : > { %v985_v44 = vpop.f32.mrb[33].mxu0  ;;  %v1305_v45 = vpop.f32.mrb[33].mxu1 }
 0x14a   : > { %v2619_v48 = vpop.f32.mrb[34].mxu0  ;;  %v2621_v49 = vpop.f32.mrb[34].mxu1 }
 0x14b   : > { %v990_v50 = vpop.f32.mrb[35].mxu0  ;;  %v1310_v51 = vpop.f32.mrb[35].mxu1 }
 0x14e   : > { %v2623_v52 = vpop.f32.mrb[36].mxu0  ;;  %v2625_v53 = vpop.f32.mrb[36].mxu1 }
 0x14f   : > { %v995_v58 = vpop.f32.mrb[37].mxu0  ;;  %v1315_v59 = vpop.f32.mrb[37].mxu1 }
 0x152   : > { %v2627_v60 = vpop.f32.mrb[38].mxu0  ;;  %v2629_v61 = vpop.f32.mrb[38].mxu1 }
 0x153   : > { %v1000_v0 = vpop.f32.mrb[39].mxu0  ;;  %v1320_v1 = vpop.f32.mrb[39].mxu1 }
 0x156   : > { %v2631_v4 = vpop.f32.mrb[40].mxu0  ;;  %v2633_v5 = vpop.f32.mrb[40].mxu1 }
 0x157   : > { %v1005_v8 = vpop.f32.mrb[41].mxu0  ;;  %v1325_v9 = vpop.f32.mrb[41].mxu1 }
 0x15a   : > { %v2635_v12 = vpop.f32.mrb[42].mxu0  ;;  %v2637_v13 = vpop.f32.mrb[42].mxu1 }
 0x15b   : > { %v1010_v18 = vpop.f32.mrb[43].mxu0  ;;  %v1330_v19 = vpop.f32.mrb[43].mxu1 }
 0x15e   : > { %v2639_v24 = vpop.f32.mrb[44].mxu0  ;;  %v2641_v25 = vpop.f32.mrb[44].mxu1 }
 0x15f   : > { %v1015_v28 = vpop.f32.mrb[45].mxu0  ;;  %v1335_v29 = vpop.f32.mrb[45].mxu1 }
 0x162   : > { %v2643_v34 = vpop.f32.mrb[46].mxu0  ;;  %v2645_v35 = vpop.f32.mrb[46].mxu1 }
 0x163   : > { %2953 = vst [vmem:[#allocation2_spill] sm:$0xff] %v2645_v35  ;;  %v1020_v40 = vpop.f32.mrb[47].mxu0  ;;  %v1340_v41 = vpop.f32.mrb[47].mxu1 }
 0x166   : > { %v2647_v44 = vpop.f32.mrb[48].mxu0  ;;  %v2649_v45 = vpop.f32.mrb[48].mxu1 }
 0x167   : > { %2954 = vst [vmem:[#allocation3_spill] sm:$0xff] %v2647_v44  ;;  %2955 = vst [vmem:[#allocation4_spill] sm:$0xff] %v2649_v45  ;;  %v1025_v50 = vpop.f32.mrb[49].mxu0  ;;  %v1345_v51 = vpop.f32.mrb[49].mxu1 }
 0x16a   : > { %v2651_v58 = vpop.f32.mrb[50].mxu0  ;;  %v2653_v59 = vpop.f32.mrb[50].mxu1 }
 0x16b   : > { %2956 = vst [vmem:[#allocation5_spill] sm:$0xff] %v2651_v58  ;;  %2957 = vst [vmem:[#allocation6_spill] sm:$0xff] %v2653_v59  ;;  %v1030_v0 = vpop.f32.mrb[51].mxu0  ;;  %v1350_v1 = vpop.f32.mrb[51].mxu1 }
 0x16e   : > { %v2655_v8 = vpop.f32.mrb[52].mxu0  ;;  %v2657_v9 = vpop.f32.mrb[52].mxu1 }
 0x16f   : > { %2958 = vst [vmem:[#allocation7_spill] sm:$0xff] %v2655_v8  ;;  %2959 = vst [vmem:[#allocation8_spill] sm:$0xff] %v2657_v9  ;;  %v1035_v18 = vpop.f32.mrb[53].mxu0  ;;  %v1355_v19 = vpop.f32.mrb[53].mxu1 }
 0x172   : > { %v2659_v28 = vpop.f32.mrb[54].mxu0  ;;  %v2661_v29 = vpop.f32.mrb[54].mxu1 }
 0x173   : > { %2960 = vst [vmem:[#allocation9_spill] sm:$0xff] %v2659_v28  ;;  %2961 = vst [vmem:[#allocation10_spill] sm:$0xff] %v2661_v29  ;;  %v1040_v40 = vpop.f32.mrb[55].mxu0  ;;  %v1360_v41 = vpop.f32.mrb[55].mxu1 }
 0x174   : > { %v2678_v40 = vld [vmem:[%s2951_s2] ss:$0 sm:$0xff] }
 0x176   : > { %v2663_v50 = vpop.f32.mrb[56].mxu0  ;;  %v2665_v51 = vpop.f32.mrb[56].mxu1 }
 0x177   : > { %2962 = vst [vmem:[#allocation11_spill] sm:$0xff] %v2663_v50  ;;  %2963 = vst [vmem:[#allocation12_spill] sm:$0xff] %v2665_v51  ;;  %v1045_v58 = vpop.f32.mrb[57].mxu0  ;;  %v1365_v59 = vpop.f32.mrb[57].mxu1 }
 0x17a   : > { %v2667_v0 = vpop.f32.mrb[58].mxu0  ;;  %v2669_v1 = vpop.f32.mrb[58].mxu1 }
 0x17b   : > { %2964 = vst [vmem:[#allocation13_spill] sm:$0xff] %v2667_v0  ;;  %2965 = vst [vmem:[#allocation14_spill] sm:$0xff] %v2669_v1  ;;  %v1050_v8 = vpop.f32.mrb[59].mxu0  ;;  %v1370_v9 = vpop.f32.mrb[59].mxu1 }
 0x17c   : > { %v904_v8 = vadd.f32 %v2678_v40, %v2493_v54  ;;  %v1224_v9 = vadd.f32 %v2678_v40, %v2495_v55 }
 0x17e   : > { %v2671_v18 = vpop.f32.mrb[60].mxu0  ;;  %v2673_v19 = vpop.f32.mrb[60].mxu1 }
 0x17f   : > { %2966 = vst [vmem:[#allocation15_spill] sm:$0xff] %v2671_v18  ;;  %2967 = vst [vmem:[#allocation16_spill] sm:$0xff] %v2673_v19  ;;  %v1055_v28 = vpop.f32.mrb[61].mxu0  ;;  %v1375_v29 = vpop.f32.mrb[61].mxu1 }
 0x182   : > { %v2680_v41 = vpop.f32.mrb[62].mxu0  ;;  %v2682_v58 = vpop.f32.mrb[62].mxu1 }
 0x183   : > { %2968 = vst [vmem:[#allocation17_spill] sm:$0xff] %v2680_v41  ;;  %2969 = vst [vmem:[#allocation18_spill] sm:$0xff] %v2682_v58  ;;  %v1060_v59 = vpop.f32.mrb[63].mxu0  ;;  %v1380_v1 = vpop.f32.mrb[63].mxu1  ;;  %v1542_v41 = vmax.f32 %v904_v8, 0.0  ;;  %v909_v58 = vadd.f32 %v2678_v40, %v2503_v62  ;;  %v914_v62 = vadd.f32 %v2678_v40, %v2513_v6 }
 0x184   : > { %v1606_v59 = vmax.f32 %v1224_v9, 0.0  ;;  %v1229_v1 = vadd.f32 %v2678_v40, %v2505_v63  ;;  %v1234_v63 = vadd.f32 %v2678_v40, %v2515_v7 }
 0x186   : > { %v1063_v28 = vpop.f32.mrb[64].mxu0  ;;  %v1383_v29 = vpop.f32.mrb[64].mxu1 }
 0x187   : > { %v1064_v19 = vadd.f32 %v2678_v40, %v1063_v28  ;;  %v1384_v18 = vadd.f32 %v2678_v40, %v1383_v29  ;;  %v1065_v0 = vpop.f32.mrb[65].mxu0  ;;  %v1385_v51 = vpop.f32.mrb[65].mxu1  ;;  %v1543_v29 = vmax.f32 %v909_v58, 0.0 }
 0x189   : > { %v1574_v54 = vmax.f32 %v1064_v19, 0.0  ;;  %v1638_v50 = vmax.f32 %v1384_v18, 0.0 }
 0x18a   : > { %v1068_v55 = vpop.f32.mrb[66].mxu0  ;;  %v1388_v45 = vpop.f32.mrb[66].mxu1 }
 0x18b   : > { %v1670_v44 = vmax.f32 %v1542_v41, %v1574_v54  ;;  %v1702_v35 = vmax.f32 %v1606_v59, %v1638_v50  ;;  %v1069_v28 = vadd.f32 %v2678_v40, %v1068_v55  ;;  %v1389_v0 = vadd.f32 %v2678_v40, %v1388_v45  ;;  %v1070_v51 = vpop.f32.mrb[67].mxu0  ;;  %v1390_v8 = vpop.f32.mrb[67].mxu1 }
 0x18c   : > { %v1607_v50 = vmax.f32 %v1229_v1, 0.0  ;;  %v1544_v51 = vmax.f32 %v914_v62, 0.0  ;;  %v1608_v8 = vmax.f32 %v1234_v63, 0.0 }
 0x18d   : > { %v1734_v18 = vmax.f32 %v1670_v44, %v1702_v35  ;;  %v1575_v19 = vmax.f32 %v1069_v28, 0.0  ;;  %v1639_v45 = vmax.f32 %v1389_v0, 0.0  ;;  %v919_v35 = vadd.f32 %v2678_v40, %v2523_v14 }
 0x18e   : > { %v1073_v41 = vpop.f32.mrb[68].mxu0  ;;  %v1393_v9 = vpop.f32.mrb[68].mxu1  ;;  %v1239_v44 = vadd.f32 %v2678_v40, %v2525_v15  ;;  %v924_v15 = vadd.f32 %v2678_v40, %v2533_v22 }
 0x18f   : > { %1767 = vst.msk [vmem:[%s2704_s6] sm:$0xff] %vm1766_vm1, %v1734_v18  ;;  %v1671_v6 = vmax.f32 %v1543_v29, %v1575_v19  ;;  %v1703_v58 = vmax.f32 %v1607_v50, %v1639_v45  ;;  %v1074_v7 = vadd.f32 %v2678_v40, %v1073_v41  ;;  %v1394_v59 = vadd.f32 %v2678_v40, %v1393_v9  ;;  %v1075_v54 = vpop.f32.mrb[69].mxu0  ;;  %v1395_v55 = vpop.f32.mrb[69].mxu1 }
 0x190   : > { %v1545_v14 = vmax.f32 %v919_v35, 0.0  ;;  %v1244_v9 = vadd.f32 %v2678_v40, %v2535_v23  ;;  %v929_v23 = vadd.f32 %v2678_v40, %v2543_v30 }
 0x191   : > { %v1735_v1 = vmax.f32 %v1671_v6, %v1703_v58  ;;  %v1576_v28 = vmax.f32 %v1074_v7, 0.0  ;;  %v1640_v0 = vmax.f32 %v1394_v59, 0.0  ;;  %v1609_v6 = vmax.f32 %v1239_v44, 0.0 }
 0x192   : > { %v1078_v18 = vpop.f32.mrb[70].mxu0  ;;  %v1398_v29 = vpop.f32.mrb[70].mxu1  ;;  %v1249_v44 = vadd.f32 %v2678_v40, %v2545_v31  ;;  %v1547_v30 = vmax.f32 %v929_v23, 0.0  ;;  %v934_v31 = vadd.f32 %v2678_v40, %v2553_v38 }
 0x193   : > { %1768 = vst.msk [vmem:[%s2704_s6 + $0x8] sm:$0xff] %vm1766_vm1, %v1735_v1  ;;  %v1672_v50 = vmax.f32 %v1544_v51, %v1576_v28  ;;  %v1704_v19 = vmax.f32 %v1608_v8, %v1640_v0  ;;  %v1079_v45 = vadd.f32 %v2678_v40, %v1078_v18  ;;  %v1399_v62 = vadd.f32 %v2678_v40, %v1398_v29  ;;  %v1080_v63 = vpop.f32.mrb[71].mxu0  ;;  %v1400_v41 = vpop.f32.mrb[71].mxu1 }
 0x194   : > { %v1546_v0 = vmax.f32 %v924_v15, 0.0  ;;  %v1610_v18 = vmax.f32 %v1244_v9, 0.0 }
 0x195   : > { %v1736_v58 = vmax.f32 %v1672_v50, %v1704_v19  ;;  %v1577_v7 = vmax.f32 %v1079_v45, 0.0  ;;  %v1641_v59 = vmax.f32 %v1399_v62, 0.0 }
 0x196   : > { %v1083_v54 = vpop.f32.mrb[72].mxu0  ;;  %v1403_v55 = vpop.f32.mrb[72].mxu1 }
 0x197   : > { %1769 = vst.msk [vmem:[%s2704_s6 + $0x10] sm:$0xff] %vm1766_vm1, %v1736_v58  ;;  %v1673_v51 = vmax.f32 %v1545_v14, %v1577_v7  ;;  %v1705_v8 = vmax.f32 %v1609_v6, %v1641_v59  ;;  %v1084_v1 = vadd.f32 %v2678_v40, %v1083_v54  ;;  %v1404_v35 = vadd.f32 %v2678_v40, %v1403_v55  ;;  %v1085_v28 = vpop.f32.mrb[73].mxu0  ;;  %v1405_v22 = vpop.f32.mrb[73].mxu1 }
 0x198   : > { %v1254_v58 = vadd.f32 %v2678_v40, %v2555_v39  ;;  %v1611_v7 = vmax.f32 %v1249_v44, 0.0  ;;  %v939_v39 = vadd.f32 %v2678_v40, %v2563_v46  ;;  %v1259_v44 = vadd.f32 %v2678_v40, %v2565_v47 }
 0x199   : > { %v1737_v29 = vmax.f32 %v1673_v51, %v1705_v8  ;;  %v1578_v50 = vmax.f32 %v1084_v1, 0.0  ;;  %v1642_v19 = vmax.f32 %v1404_v35, 0.0  ;;  %v944_v47 = vadd.f32 %v2678_v40, %v2573_v56 }
 0x19a   : > { %v1088_v45 = vpop.f32.mrb[74].mxu0  ;;  %v1408_v62 = vpop.f32.mrb[74].mxu1  ;;  %v1612_v23 = vmax.f32 %v1254_v58, 0.0  ;;  %v1549_v46 = vmax.f32 %v939_v39, 0.0 }
 0x19b   : > { %1770 = vst.msk [vmem:[%s2704_s6 + $0x18] sm:$0xff] %vm1766_vm1, %v1737_v29  ;;  %v1674_v63 = vmax.f32 %v1546_v0, %v1578_v50  ;;  %v1706_v41 = vmax.f32 %v1610_v18, %v1642_v19  ;;  %v1089_v14 = vadd.f32 %v2678_v40, %v1088_v45  ;;  %v1409_v15 = vadd.f32 %v2678_v40, %v1408_v62  ;;  %v1090_v9 = vpop.f32.mrb[75].mxu0  ;;  %v1410_v6 = vpop.f32.mrb[75].mxu1 }
 0x19c   : > { %v1548_v18 = vmax.f32 %v934_v31, 0.0  ;;  %v1613_v31 = vmax.f32 %v1259_v44, 0.0 }
 0x19d   : > { %v1738_v59 = vmax.f32 %v1674_v63, %v1706_v41  ;;  %v1579_v54 = vmax.f32 %v1089_v14, 0.0  ;;  %v1643_v55 = vmax.f32 %v1409_v15, 0.0 }
 0x19e   : > { %v1093_v51 = vpop.f32.mrb[76].mxu0  ;;  %v1413_v8 = vpop.f32.mrb[76].mxu1 }
 0x19f   : > { %1771 = vst.msk [vmem:[%s2704_s6 + $0x20] sm:$0xff] %vm1766_vm1, %v1738_v59  ;;  %v1675_v1 = vmax.f32 %v1547_v30, %v1579_v54  ;;  %v1707_v35 = vmax.f32 %v1611_v7, %v1643_v55  ;;  %v1094_v28 = vadd.f32 %v2678_v40, %v1093_v51  ;;  %v1414_v22 = vadd.f32 %v2678_v40, %v1413_v8  ;;  %v1095_v0 = vpop.f32.mrb[77].mxu0  ;;  %v1415_v38 = vpop.f32.mrb[77].mxu1 }
 0x1a0   : > { %v1264_v30 = vadd.f32 %v2678_v40, %v2575_v57  ;;  %v949_v57 = vadd.f32 %v2678_v40, %v2583_v2  ;;  %v1269_v38 = vadd.f32 %v2678_v40, %v2585_v3  ;;  %v954_v3 = vadd.f32 %v2678_v40, %v2591_v10 }
 0x1a1   : > { %v1739_v29 = vmax.f32 %v1675_v1, %v1707_v35  ;;  %v1580_v50 = vmax.f32 %v1094_v28, 0.0  ;;  %v1644_v19 = vmax.f32 %v1414_v22, 0.0  ;;  %v1550_v22 = vmax.f32 %v944_v47, 0.0 }
 0x1a2   : > { %v1098_v45 = vpop.f32.mrb[78].mxu0  ;;  %v1418_v62 = vpop.f32.mrb[78].mxu1  ;;  %v1614_v0 = vmax.f32 %v1264_v30, 0.0  ;;  %v1551_v2 = vmax.f32 %v949_v57, 0.0 }
 0x1a3   : > { %1772 = vst.msk [vmem:[%s2704_s6 + $0x28] sm:$0xff] %vm1766_vm1, %v1739_v29  ;;  %v1676_v63 = vmax.f32 %v1548_v18, %v1580_v50  ;;  %v1708_v41 = vmax.f32 %v1612_v23, %v1644_v19  ;;  %v1099_v14 = vadd.f32 %v2678_v40, %v1098_v45  ;;  %v1419_v15 = vadd.f32 %v2678_v40, %v1418_v62  ;;  %v1100_v9 = vpop.f32.mrb[79].mxu0  ;;  %v1420_v6 = vpop.f32.mrb[79].mxu1 }
 0x1a5   : > { %v1740_v58 = vmax.f32 %v1676_v63, %v1708_v41  ;;  %v1581_v7 = vmax.f32 %v1099_v14, 0.0  ;;  %v1645_v59 = vmax.f32 %v1419_v15, 0.0  ;;  %v1274_v14 = vadd.f32 %v2678_v40, %v2593_v11 }
 0x1a6   : > { %v1103_v54 = vpop.f32.mrb[80].mxu0  ;;  %v1423_v55 = vpop.f32.mrb[80].mxu1  ;;  %v1615_v15 = vmax.f32 %v1269_v38, 0.0  ;;  %v959_v11 = vadd.f32 %v2678_v40, %v2595_v16 }
 0x1a7   : > { %1773 = vst.msk [vmem:[%s2704_s6 + $0x30] sm:$0xff] %vm1766_vm1, %v1740_v58  ;;  %v1677_v51 = vmax.f32 %v1549_v46, %v1581_v7  ;;  %v1709_v8 = vmax.f32 %v1613_v31, %v1645_v59  ;;  %v1104_v1 = vadd.f32 %v2678_v40, %v1103_v54  ;;  %v1424_v35 = vadd.f32 %v2678_v40, %v1423_v55  ;;  %v1105_v28 = vpop.f32.mrb[81].mxu0  ;;  %v1425_v56 = vpop.f32.mrb[81].mxu1 }
 0x1a8   : > { %v1552_v55 = vmax.f32 %v954_v3, 0.0  ;;  %v1553_v16 = vmax.f32 %v959_v11, 0.0 }
 0x1a9   : > { %v1741_v18 = vmax.f32 %v1677_v51, %v1709_v8  ;;  %v1582_v23 = vmax.f32 %v1104_v1, 0.0  ;;  %v1646_v39 = vmax.f32 %v1424_v35, 0.0  ;;  %v1616_v51 = vmax.f32 %v1274_v14, 0.0 }
 0x1aa   : > { %v1108_v44 = vpop.f32.mrb[82].mxu0  ;;  %v1428_v29 = vpop.f32.mrb[82].mxu1  ;;  %v1279_v8 = vadd.f32 %v2678_v40, %v2597_v17  ;;  %v964_v17 = vadd.f32 %v2678_v40, %v2599_v20 }
 0x1ab   : > { %1774 = vst.msk [vmem:[%s2704_s6 + $0x38] sm:$0xff] %vm1766_vm1, %v1741_v18  ;;  %v1678_v50 = vmax.f32 %v1550_v22, %v1582_v23  ;;  %v1710_v19 = vmax.f32 %v1614_v0, %v1646_v39  ;;  %v1109_v45 = vadd.f32 %v2678_v40, %v1108_v44  ;;  %v1429_v62 = vadd.f32 %v2678_v40, %v1428_v29  ;;  %v1110_v63 = vpop.f32.mrb[83].mxu0  ;;  %v1430_v41 = vpop.f32.mrb[83].mxu1 }
 0x1ac   : > { %v1284_v44 = vadd.f32 %v2678_v40, %v2601_v21  ;;  %v1617_v29 = vmax.f32 %v1279_v8, 0.0  ;;  %v969_v21 = vadd.f32 %v2678_v40, %v2603_v26  ;;  %v1294_v8 = vadd.f32 %v2678_v40, %v2609_v33 }
 0x1ad   : > { %v1742_v9 = vmax.f32 %v1678_v50, %v1710_v19  ;;  %v1583_v6 = vmax.f32 %v1109_v45, 0.0  ;;  %v1647_v46 = vmax.f32 %v1429_v62, 0.0  ;;  %v979_v33 = vadd.f32 %v2678_v40, %v2611_v36 }
 0x1ae   : > { %v1113_v47 = vpop.f32.mrb[84].mxu0  ;;  %v1433_v30 = vpop.f32.mrb[84].mxu1  ;;  %v1555_v26 = vmax.f32 %v969_v21, 0.0 }
 0x1af   : > { %1775 = vst.msk [vmem:[%s2704_s6 + $0x40] sm:$0xff] %vm1766_vm1, %v1742_v9  ;;  %v1679_v31 = vmax.f32 %v1551_v2, %v1583_v6  ;;  %v1711_v58 = vmax.f32 %v1615_v15, %v1647_v46  ;;  %v1114_v7 = vadd.f32 %v2678_v40, %v1113_v47  ;;  %v1434_v59 = vadd.f32 %v2678_v40, %v1433_v30  ;;  %v1115_v54 = vpop.f32.mrb[85].mxu0  ;;  %v1435_v10 = vpop.f32.mrb[85].mxu1 }
 0x1b0   : > { %v1554_v9 = vmax.f32 %v964_v17, 0.0  ;;  %v1618_v6 = vmax.f32 %v1284_v44, 0.0  ;;  %v1289_v46 = vadd.f32 %v2678_v40, %v2605_v27  ;;  %v974_v27 = vadd.f32 %v2678_v40, %v2607_v32 }
 0x1b1   : > { %v1743_v1 = vmax.f32 %v1679_v31, %v1711_v58  ;;  %v1584_v35 = vmax.f32 %v1114_v7, 0.0  ;;  %v1648_v28 = vmax.f32 %v1434_v59, 0.0  ;;  %v1620_v17 = vmax.f32 %v1294_v8, 0.0 }
 0x1b2   : > { %v1118_v56 = vpop.f32.mrb[86].mxu0  ;;  %v1438_v22 = vpop.f32.mrb[86].mxu1  ;;  %v1299_v44 = vadd.f32 %v2678_v40, %v2613_v37  ;;  %v1557_v36 = vmax.f32 %v979_v33, 0.0  ;;  %v984_v37 = vadd.f32 %v2678_v40, %v2615_v42 }
 0x1b3   : > { %1776 = vst.msk [vmem:[%s2704_s6 + $0x48] sm:$0xff] %vm1766_vm1, %v1743_v1  ;;  %v1680_v0 = vmax.f32 %v1552_v55, %v1584_v35  ;;  %v1712_v57 = vmax.f32 %v1616_v51, %v1648_v28  ;;  %v1119_v38 = vadd.f32 %v2678_v40, %v1118_v56  ;;  %v1439_v18 = vadd.f32 %v2678_v40, %v1438_v22  ;;  %v1120_v23 = vpop.f32.mrb[87].mxu0  ;;  %v1440_v39 = vpop.f32.mrb[87].mxu1 }
 0x1b4   : > { %v1619_v1 = vmax.f32 %v1289_v46, 0.0 }
 0x1b5   : > { %v1744_v50 = vmax.f32 %v1680_v0, %v1712_v57  ;;  %v1585_v19 = vmax.f32 %v1119_v38, 0.0  ;;  %v1649_v45 = vmax.f32 %v1439_v18, 0.0 }
 0x1b6   : > { %v1123_v62 = vpop.f32.mrb[88].mxu0  ;;  %v1443_v63 = vpop.f32.mrb[88].mxu1 }
 0x1b7   : > { %1777 = vst.msk [vmem:[%s2704_s6 + $0x50] sm:$0xff] %vm1766_vm1, %v1744_v50  ;;  %v1681_v41 = vmax.f32 %v1553_v16, %v1585_v19  ;;  %v1713_v2 = vmax.f32 %v1617_v29, %v1649_v45  ;;  %v1124_v3 = vadd.f32 %v2678_v40, %v1123_v62  ;;  %v1444_v14 = vadd.f32 %v2678_v40, %v1443_v63  ;;  %v1125_v15 = vpop.f32.mrb[89].mxu0  ;;  %v1445_v20 = vpop.f32.mrb[89].mxu1 }
 0x1b8   : > { %v1556_v16 = vmax.f32 %v974_v27, 0.0  ;;  %v1304_v20 = vadd.f32 %v2678_v40, %v2617_v43  ;;  %v989_v43 = vadd.f32 %v2678_v40, %v2619_v48 }
 0x1b9   : > { %v1745_v47 = vmax.f32 %v1681_v41, %v1713_v2  ;;  %v1586_v30 = vmax.f32 %v1124_v3, 0.0  ;;  %v1650_v31 = vmax.f32 %v1444_v14, 0.0 }
 0x1ba   : > { %v1128_v58 = vpop.f32.mrb[90].mxu0  ;;  %v1448_v7 = vpop.f32.mrb[90].mxu1  ;;  %v1559_v48 = vmax.f32 %v989_v43, 0.0 }
 0x1bb   : > { %1778 = vst.msk [vmem:[%s2704_s6 + $0x58] sm:$0xff] %vm1766_vm1, %v1745_v47  ;;  %v1682_v59 = vmax.f32 %v1554_v9, %v1586_v30  ;;  %v1714_v54 = vmax.f32 %v1618_v6, %v1650_v31  ;;  %v1129_v10 = vadd.f32 %v2678_v40, %v1128_v58  ;;  %v1449_v55 = vadd.f32 %v2678_v40, %v1448_v7  ;;  %v1130_v51 = vpop.f32.mrb[91].mxu0  ;;  %v1450_v11 = vpop.f32.mrb[91].mxu1 }
 0x1bc   : > { %v1621_v9 = vmax.f32 %v1299_v44, 0.0  ;;  %v1309_v51 = vadd.f32 %v2678_v40, %v2621_v49  ;;  %v994_v49 = vadd.f32 %v2678_v40, %v2623_v52 }
 0x1bd   : > { %v1746_v35 = vmax.f32 %v1682_v59, %v1714_v54  ;;  %v1587_v28 = vmax.f32 %v1129_v10, 0.0  ;;  %v1651_v56 = vmax.f32 %v1449_v55, 0.0  ;;  %v1558_v10 = vmax.f32 %v984_v37, 0.0 }
 0x1be   : > { %v1133_v22 = vpop.f32.mrb[92].mxu0  ;;  %v1453_v0 = vpop.f32.mrb[92].mxu1  ;;  %v1622_v55 = vmax.f32 %v1304_v20, 0.0 }
 0x1bf   : > { %1779 = vst.msk [vmem:[%s2704_s6 + $0x60] sm:$0xff] %vm1766_vm1, %v1746_v35  ;;  %v1683_v57 = vmax.f32 %v1555_v26, %v1587_v28  ;;  %v1715_v38 = vmax.f32 %v1619_v1, %v1651_v56  ;;  %v1134_v18 = vadd.f32 %v2678_v40, %v1133_v22  ;;  %v1454_v23 = vadd.f32 %v2678_v40, %v1453_v0  ;;  %v1135_v39 = vpop.f32.mrb[93].mxu0  ;;  %v1455_v32 = vpop.f32.mrb[93].mxu1 }
 0x1c1   : > { %v1747_v29 = vmax.f32 %v1683_v57, %v1715_v38  ;;  %v1588_v50 = vmax.f32 %v1134_v18, 0.0  ;;  %v1652_v19 = vmax.f32 %v1454_v23, 0.0  ;;  %v1314_v38 = vadd.f32 %v2678_v40, %v2625_v53 }
 0x1c2   : > { %v1138_v45 = vpop.f32.mrb[94].mxu0  ;;  %v1458_v62 = vpop.f32.mrb[94].mxu1  ;;  %v1623_v18 = vmax.f32 %v1309_v51, 0.0  ;;  %v999_v53 = vadd.f32 %v2678_v40, %v2627_v60 }
 0x1c3   : > { %1780 = vst.msk [vmem:[%s2704_s6 + $0x68] sm:$0xff] %vm1766_vm1, %v1747_v29  ;;  %v1684_v63 = vmax.f32 %v1556_v16, %v1588_v50  ;;  %v1716_v41 = vmax.f32 %v1620_v17, %v1652_v19  ;;  %v1139_v2 = vadd.f32 %v2678_v40, %v1138_v45  ;;  %v1459_v3 = vadd.f32 %v2678_v40, %v1458_v62  ;;  %v1140_v14 = vpop.f32.mrb[95].mxu0  ;;  %v1460_v15 = vpop.f32.mrb[95].mxu1 }
 0x1c4   : > { %v1560_v45 = vmax.f32 %v994_v49, 0.0  ;;  %v1624_v62 = vmax.f32 %v1314_v38, 0.0  ;;  %v1561_v60 = vmax.f32 %v999_v53, 0.0  ;;  %v1334_v38 = vadd.f32 %v2678_v40, %v2641_v25 }
 0x1c5   : > { %v1748_v6 = vmax.f32 %v1684_v63, %v1716_v41  ;;  %v1589_v21 = vmax.f32 %v1139_v2, 0.0  ;;  %v1653_v46 = vmax.f32 %v1459_v3, 0.0  ;;  %v1319_v63 = vadd.f32 %v2678_v40, %v2629_v61 }
 0x1c6   : > { %v1143_v47 = vpop.f32.mrb[96].mxu0  ;;  %v1463_v30 = vpop.f32.mrb[96].mxu1  ;;  %v1004_v61 = vadd.f32 %v2678_v40, %v2631_v4  ;;  %v1019_v25 = vadd.f32 %v2678_v40, %v2643_v34 }
 0x1c7   : > { %1781 = vst.msk [vmem:[%s2704_s6 + $0x70] sm:$0xff] %vm1766_vm1, %v1748_v6  ;;  %v1685_v31 = vmax.f32 %v1557_v36, %v1589_v21  ;;  %v1717_v58 = vmax.f32 %v1621_v9, %v1653_v46  ;;  %v1144_v7 = vadd.f32 %v2678_v40, %v1143_v47  ;;  %v1464_v59 = vadd.f32 %v2678_v40, %v1463_v30  ;;  %v1145_v54 = vpop.f32.mrb[97].mxu0  ;;  %v1465_v42 = vpop.f32.mrb[97].mxu1 }
 0x1c8   : > { %v1324_v46 = vadd.f32 %v2678_v40, %v2633_v5  ;;  %v1625_v47 = vmax.f32 %v1319_v63, 0.0  ;;  %v1562_v51 = vmax.f32 %v1004_v61, 0.0  ;;  %v1009_v5 = vadd.f32 %v2678_v40, %v2635_v12  ;;  %v2972_v61 = vld [vmem:[#allocation4_spill] sm:$0xff] }
 0x1c9   : > { %v1749_v11 = vmax.f32 %v1685_v31, %v1717_v58  ;;  %v1590_v26 = vmax.f32 %v1144_v7, 0.0  ;;  %v1654_v27 = vmax.f32 %v1464_v59, 0.0  ;;  %v1565_v34 = vmax.f32 %v1019_v25, 0.0 }
 0x1ca   : > { %v1148_v8 = vpop.f32.mrb[98].mxu0  ;;  %v1468_v1 = vpop.f32.mrb[98].mxu1  ;;  %v1563_v12 = vmax.f32 %v1009_v5, 0.0  ;;  %v2973_v5 = vld [vmem:[#allocation5_spill] sm:$0xff] }
 0x1cb   : > { %1782 = vst.msk [vmem:[%s2704_s6 + $0x78] sm:$0xff] %vm1766_vm1, %v1749_v11  ;;  %v1686_v35 = vmax.f32 %v1558_v10, %v1590_v26  ;;  %v1718_v28 = vmax.f32 %v1622_v55, %v1654_v27  ;;  %v1149_v56 = vadd.f32 %v2678_v40, %v1148_v8  ;;  %v1469_v22 = vadd.f32 %v2678_v40, %v1468_v1  ;;  %v1150_v0 = vpop.f32.mrb[99].mxu0  ;;  %v1470_v57 = vpop.f32.mrb[99].mxu1 }
 0x1cc   : > { %v1626_v11 = vmax.f32 %v1324_v46, 0.0  ;;  %v1329_v26 = vadd.f32 %v2678_v40, %v2637_v13  ;;  %v1014_v13 = vadd.f32 %v2678_v40, %v2639_v24  ;;  %v1344_v46 = vadd.f32 %v2678_v40, %v2972_v61 }
 0x1cd   : > { %v1750_v23 = vmax.f32 %v1686_v35, %v1718_v28  ;;  %v1591_v39 = vmax.f32 %v1149_v56, 0.0  ;;  %v1655_v32 = vmax.f32 %v1469_v22, 0.0 }
 0x1ce   : > { %v1153_v16 = vpop.f32.mrb[100].mxu0  ;;  %v1473_v17 = vpop.f32.mrb[100].mxu1 }
 0x1cf   : > { %1783 = vst.msk [vmem:[%s2704_s6 + $0x80] sm:$0xff] %vm1766_vm1, %v1750_v23  ;;  %v1687_v33 = vmax.f32 %v1559_v48, %v1591_v39  ;;  %v1719_v44 = vmax.f32 %v1623_v18, %v1655_v32  ;;  %v1154_v29 = vadd.f32 %v2678_v40, %v1153_v16  ;;  %v1474_v50 = vadd.f32 %v2678_v40, %v1473_v17  ;;  %v1155_v19 = vpop.f32.mrb[101].mxu0  ;;  %v1475_v52 = vpop.f32.mrb[101].mxu1 }
 0x1d0   : > { %v1627_v18 = vmax.f32 %v1329_v26, 0.0  ;;  %v1564_v52 = vmax.f32 %v1014_v13, 0.0  ;;  %v1029_v26 = vadd.f32 %v2678_v40, %v2973_v5 }
 0x1d1   : > { %v1751_v41 = vmax.f32 %v1687_v33, %v1719_v44  ;;  %v1592_v2 = vmax.f32 %v1154_v29, 0.0  ;;  %v1656_v3 = vmax.f32 %v1474_v50, 0.0 }
 0x1d2   : > { %v1158_v14 = vpop.f32.mrb[102].mxu0  ;;  %v1478_v15 = vpop.f32.mrb[102].mxu1 }
 0x1d3   : > { %1784 = vst.msk [vmem:[%s2704_s6 + $0x88] sm:$0xff] %vm1766_vm1, %v1751_v41  ;;  %v1688_v36 = vmax.f32 %v1560_v45, %v1592_v2  ;;  %v1720_v37 = vmax.f32 %v1624_v62, %v1656_v3  ;;  %v1159_v20 = vadd.f32 %v2678_v40, %v1158_v14  ;;  %v1479_v9 = vadd.f32 %v2678_v40, %v1478_v15  ;;  %v1160_v6 = vpop.f32.mrb[103].mxu0  ;;  %v1480_v21 = vpop.f32.mrb[103].mxu1  ;;  %v2970_v62 = vld [vmem:[#allocation2_spill] sm:$0xff] }
 0x1d4   : > { %v1628_v45 = vmax.f32 %v1334_v38, 0.0  ;;  %v1339_v53 = vadd.f32 %v2678_v40, %v2970_v62  ;;  %v2971_v21 = vld [vmem:[#allocation3_spill] sm:$0xff]  ;;  %v1567_v38 = vmax.f32 %v1029_v26, 0.0 }
 0x1d5   : > { %v1752_v30 = vmax.f32 %v1688_v36, %v1720_v37  ;;  %v1593_v31 = vmax.f32 %v1159_v20, 0.0  ;;  %v1657_v58 = vmax.f32 %v1479_v9, 0.0 }
 0x1d6   : > { %v1163_v7 = vpop.f32.mrb[104].mxu0  ;;  %v1483_v59 = vpop.f32.mrb[104].mxu1 }
 0x1d7   : > { %1785 = vst.msk [vmem:[%s2704_s6 + $0x90] sm:$0xff] %vm1766_vm1, %v1752_v30  ;;  %v1689_v54 = vmax.f32 %v1561_v60, %v1593_v31  ;;  %v1721_v42 = vmax.f32 %v1625_v47, %v1657_v58  ;;  %v1164_v10 = vadd.f32 %v2678_v40, %v1163_v7  ;;  %v1484_v55 = vadd.f32 %v2678_v40, %v1483_v59  ;;  %v1165_v43 = vpop.f32.mrb[105].mxu0  ;;  %v1485_v4 = vpop.f32.mrb[105].mxu1 }
 0x1d8   : > { %v1024_v60 = vadd.f32 %v2678_v40, %v2971_v21  ;;  %v1629_v47 = vmax.f32 %v1339_v53, 0.0 }
 0x1d9   : > { %v1753_v27 = vmax.f32 %v1689_v54, %v1721_v42  ;;  %v1594_v8 = vmax.f32 %v1164_v10, 0.0  ;;  %v1658_v1 = vmax.f32 %v1484_v55, 0.0 }
 0x1da   : > { %v1168_v35 = vpop.f32.mrb[106].mxu0  ;;  %v1488_v28 = vpop.f32.mrb[106].mxu1 }
 0x1db   : > { %1786 = vst.msk [vmem:[%s2704_s6 + $0x98] sm:$0xff] %vm1766_vm1, %v1753_v27  ;;  %v1690_v56 = vmax.f32 %v1562_v51, %v1594_v8  ;;  %v1722_v22 = vmax.f32 %v1626_v11, %v1658_v1  ;;  %v1169_v0 = vadd.f32 %v2678_v40, %v1168_v35  ;;  %v1489_v57 = vadd.f32 %v2678_v40, %v1488_v28  ;;  %v1170_v48 = vpop.f32.mrb[107].mxu0  ;;  %v1490_v49 = vpop.f32.mrb[107].mxu1  ;;  %v2974_v27 = vld [vmem:[#allocation6_spill] sm:$0xff] }
 0x1dc   : > { %v1566_v51 = vmax.f32 %v1024_v60, 0.0  ;;  %v1630_v11 = vmax.f32 %v1344_v46, 0.0  ;;  %v1349_v8 = vadd.f32 %v2678_v40, %v2974_v27 }
 0x1dd   : > { %v1754_v23 = vmax.f32 %v1690_v56, %v1722_v22  ;;  %v1595_v39 = vmax.f32 %v1169_v0, 0.0  ;;  %v1659_v32 = vmax.f32 %v1489_v57, 0.0 }
 0x1de   : > { %v1173_v16 = vpop.f32.mrb[108].mxu0  ;;  %v1493_v17 = vpop.f32.mrb[108].mxu1 }
 0x1df   : > { %1787 = vst.msk [vmem:[%s2704_s6 + $0xa0] sm:$0xff] %vm1766_vm1, %v1754_v23  ;;  %v1691_v33 = vmax.f32 %v1563_v12, %v1595_v39  ;;  %v1723_v44 = vmax.f32 %v1627_v18, %v1659_v32  ;;  %v1174_v29 = vadd.f32 %v2678_v40, %v1173_v16  ;;  %v1494_v50 = vadd.f32 %v2678_v40, %v1493_v17  ;;  %v1175_v19 = vpop.f32.mrb[109].mxu0  ;;  %v1495_v24 = vpop.f32.mrb[109].mxu1  ;;  %v2975_v18 = vld [vmem:[#allocation7_spill] sm:$0xff]  ;;  %v2976_v39 = vld [vmem:[#allocation8_spill] sm:$0xff] }
 0x1e0   : > { %v1034_v23 = vadd.f32 %v2678_v40, %v2975_v18  ;;  %v1354_v32 = vadd.f32 %v2678_v40, %v2976_v39  ;;  %v1631_v16 = vmax.f32 %v1349_v8, 0.0 }
 0x1e1   : > { %v1755_v63 = vmax.f32 %v1691_v33, %v1723_v44  ;;  %v1596_v41 = vmax.f32 %v1174_v29, 0.0  ;;  %v1660_v2 = vmax.f32 %v1494_v50, 0.0 }
 0x1e2   : > { %v1178_v3 = vpop.f32.mrb[110].mxu0  ;;  %v1498_v14 = vpop.f32.mrb[110].mxu1  ;;  %v1568_v53 = vmax.f32 %v1034_v23, 0.0 }
 0x1e3   : > { %1788 = vst.msk [vmem:[%s2704_s6 + $0xa8] sm:$0xff] %vm1766_vm1, %v1755_v63  ;;  %v1692_v15 = vmax.f32 %v1564_v52, %v1596_v41  ;;  %v1724_v36 = vmax.f32 %v1628_v45, %v1660_v2  ;;  %v1179_v37 = vadd.f32 %v2678_v40, %v1178_v3  ;;  %v1499_v20 = vadd.f32 %v2678_v40, %v1498_v14  ;;  %v1180_v9 = vpop.f32.mrb[111].mxu0  ;;  %v1500_v6 = vpop.f32.mrb[111].mxu1  ;;  %v2977_v41 = vld [vmem:[#allocation9_spill] sm:$0xff]  ;;  %v2978_v3 = vld [vmem:[#allocation10_spill] sm:$0xff] }
 0x1e4   : > { %v1632_v63 = vmax.f32 %v1354_v32, 0.0  ;;  %v1039_v2 = vadd.f32 %v2678_v40, %v2977_v41  ;;  %v1359_v14 = vadd.f32 %v2678_v40, %v2978_v3 }
 0x1e5   : > { %v1756_v30 = vmax.f32 %v1692_v15, %v1724_v36  ;;  %v1597_v31 = vmax.f32 %v1179_v37, 0.0  ;;  %v1661_v58 = vmax.f32 %v1499_v20, 0.0 }
 0x1e6   : > { %v1183_v7 = vpop.f32.mrb[112].mxu0  ;;  %v1503_v59 = vpop.f32.mrb[112].mxu1 }
 0x1e7   : > { %1789 = vst.msk [vmem:[%s2704_s6 + $0xb0] sm:$0xff] %vm1766_vm1, %v1756_v30  ;;  %v1693_v54 = vmax.f32 %v1565_v34, %v1597_v31  ;;  %v1725_v42 = vmax.f32 %v1629_v47, %v1661_v58  ;;  %v1184_v10 = vadd.f32 %v2678_v40, %v1183_v7  ;;  %v1504_v55 = vadd.f32 %v2678_v40, %v1503_v59  ;;  %v1185_v43 = vpop.f32.mrb[113].mxu0  ;;  %v1505_v4 = vpop.f32.mrb[113].mxu1  ;;  %v2979_v30 = vld [vmem:[#allocation11_spill] sm:$0xff]  ;;  %v2980_v58 = vld [vmem:[#allocation12_spill] sm:$0xff] }
 0x1e8   : > { %v1569_v47 = vmax.f32 %v1039_v2, 0.0  ;;  %v1044_v31 = vadd.f32 %v2678_v40, %v2979_v30  ;;  %v1364_v7 = vadd.f32 %v2678_v40, %v2980_v58  ;;  %v1633_v59 = vmax.f32 %v1359_v14, 0.0 }
 0x1e9   : > { %v1757_v1 = vmax.f32 %v1693_v54, %v1725_v42  ;;  %v1598_v35 = vmax.f32 %v1184_v10, 0.0  ;;  %v1662_v28 = vmax.f32 %v1504_v55, 0.0 }
 0x1ea   : > { %v1188_v56 = vpop.f32.mrb[114].mxu0  ;;  %v1508_v22 = vpop.f32.mrb[114].mxu1  ;;  %v1570_v8 = vmax.f32 %v1044_v31, 0.0 }
 0x1eb   : > { %1790 = vst.msk [vmem:[%s2704_s6 + $0xb8] sm:$0xff] %vm1766_vm1, %v1757_v1  ;;  %v1694_v0 = vmax.f32 %v1566_v51, %v1598_v35  ;;  %v1726_v57 = vmax.f32 %v1630_v11, %v1662_v28  ;;  %v1189_v48 = vadd.f32 %v2678_v40, %v1188_v56  ;;  %v1509_v49 = vadd.f32 %v2678_v40, %v1508_v22  ;;  %v1190_v12 = vpop.f32.mrb[115].mxu0  ;;  %v1510_v13 = vpop.f32.mrb[115].mxu1  ;;  %v2981_v35 = vld [vmem:[#allocation13_spill] sm:$0xff]  ;;  %v2982_v56 = vld [vmem:[#allocation14_spill] sm:$0xff] }
 0x1ec   : > { %v1634_v1 = vmax.f32 %v1364_v7, 0.0  ;;  %v1049_v28 = vadd.f32 %v2678_v40, %v2981_v35  ;;  %v1369_v22 = vadd.f32 %v2678_v40, %v2982_v56 }
 0x1ed   : > { %v1758_v17 = vmax.f32 %v1694_v0, %v1726_v57  ;;  %v1599_v33 = vmax.f32 %v1189_v48, 0.0  ;;  %v1663_v44 = vmax.f32 %v1509_v49, 0.0 }
 0x1ee   : > { %v1193_v29 = vpop.f32.mrb[116].mxu0  ;;  %v1513_v50 = vpop.f32.mrb[116].mxu1 }
 0x1ef   : > { %1791 = vst.msk [vmem:[%s2704_s6 + $0xc0] sm:$0xff] %vm1766_vm1, %v1758_v17  ;;  %v1695_v19 = vmax.f32 %v1567_v38, %v1599_v33  ;;  %v1727_v24 = vmax.f32 %v1631_v16, %v1663_v44  ;;  %v1194_v52 = vadd.f32 %v2678_v40, %v1193_v29  ;;  %v1514_v45 = vadd.f32 %v2678_v40, %v1513_v50  ;;  %v1195_v25 = vpop.f32.mrb[117].mxu0  ;;  %v1515_v62 = vpop.f32.mrb[117].mxu1  ;;  %v2983_v17 = vld [vmem:[#allocation15_spill] sm:$0xff]  ;;  %v2984_v44 = vld [vmem:[#allocation16_spill] sm:$0xff] }
 0x1f0   : > { %v1571_v16 = vmax.f32 %v1049_v28, 0.0  ;;  %v1054_v33 = vadd.f32 %v2678_v40, %v2983_v17  ;;  %v1374_v29 = vadd.f32 %v2678_v40, %v2984_v44  ;;  %v1635_v50 = vmax.f32 %v1369_v22, 0.0 }
 0x1f1   : > { %v1759_v15 = vmax.f32 %v1695_v19, %v1727_v24  ;;  %v1600_v36 = vmax.f32 %v1194_v52, 0.0  ;;  %v1664_v37 = vmax.f32 %v1514_v45, 0.0 }
 0x1f2   : > { %v1198_v20 = vpop.f32.mrb[118].mxu0  ;;  %v1518_v9 = vpop.f32.mrb[118].mxu1  ;;  %v1572_v14 = vmax.f32 %v1054_v33, 0.0 }
 0x1f3   : > { %1792 = vst.msk [vmem:[%s2704_s6 + $0xc8] sm:$0xff] %vm1766_vm1, %v1759_v15  ;;  %v1696_v6 = vmax.f32 %v1568_v53, %v1600_v36  ;;  %v1728_v34 = vmax.f32 %v1632_v63, %v1664_v37  ;;  %v1199_v21 = vadd.f32 %v2678_v40, %v1198_v20  ;;  %v1519_v60 = vadd.f32 %v2678_v40, %v1518_v9  ;;  %v1200_v61 = vpop.f32.mrb[119].mxu0  ;;  %v1520_v46 = vpop.f32.mrb[119].mxu1  ;;  %v2985_v36 = vld [vmem:[#allocation17_spill] sm:$0xff]  ;;  %v2986_v20 = vld [vmem:[#allocation18_spill] sm:$0xff] }
 0x1f4   : > { %v1636_v15 = vmax.f32 %v1374_v29, 0.0  ;;  %v1059_v37 = vadd.f32 %v2678_v40, %v2985_v36  ;;  %v1379_v9 = vadd.f32 %v2678_v40, %v2986_v20 }
 0x1f5   : > { %v1760_v54 = vmax.f32 %v1696_v6, %v1728_v34  ;;  %v1601_v42 = vmax.f32 %v1199_v21, 0.0  ;;  %v1665_v10 = vmax.f32 %v1519_v60, 0.0 }
 0x1f6   : > { %v1203_v55 = vpop.f32.mrb[120].mxu0  ;;  %v1523_v43 = vpop.f32.mrb[120].mxu1 }
 0x1f7   : > { %1793 = vst.msk [vmem:[%s2704_s6 + $0xd0] sm:$0xff] %vm1766_vm1, %v1760_v54  ;;  %v1697_v4 = vmax.f32 %v1569_v47, %v1601_v42  ;;  %v1729_v51 = vmax.f32 %v1633_v59, %v1665_v10  ;;  %v1204_v11 = vadd.f32 %v2678_v40, %v1203_v55  ;;  %v1524_v5 = vadd.f32 %v2678_v40, %v1523_v43  ;;  %v1205_v26 = vpop.f32.mrb[121].mxu0  ;;  %v1525_v27 = vpop.f32.mrb[121].mxu1 }
 0x1f8   : > { %v1573_v59 = vmax.f32 %v1059_v37, 0.0  ;;  %v1637_v54 = vmax.f32 %v1379_v9, 0.0 }
 0x1f9   : > { %v1761_v0 = vmax.f32 %v1697_v4, %v1729_v51  ;;  %v1602_v57 = vmax.f32 %v1204_v11, 0.0  ;;  %v1666_v48 = vmax.f32 %v1524_v5, 0.0 }
 0x1fa   : > { %v1208_v49 = vpop.f32.mrb[122].mxu0  ;;  %v1528_v12 = vpop.f32.mrb[122].mxu1 }
 0x1fb   : > { %1794 = vst.msk [vmem:[%s2704_s6 + $0xd8] sm:$0xff] %vm1766_vm1, %v1761_v0  ;;  %v1698_v13 = vmax.f32 %v1570_v8, %v1602_v57  ;;  %v1730_v38 = vmax.f32 %v1634_v1, %v1666_v48  ;;  %v1209_v18 = vadd.f32 %v2678_v40, %v1208_v49  ;;  %v1529_v23 = vadd.f32 %v2678_v40, %v1528_v12  ;;  %v1210_v39 = vpop.f32.mrb[123].mxu0  ;;  %v1530_v32 = vpop.f32.mrb[123].mxu1 }
 0x1fd   : > { %v1762_v19 = vmax.f32 %v1698_v13, %v1730_v38  ;;  %v1603_v24 = vmax.f32 %v1209_v18, 0.0  ;;  %v1667_v52 = vmax.f32 %v1529_v23, 0.0 }
 0x1fe   : > { %v1213_v45 = vpop.f32.mrb[124].mxu0  ;;  %v1533_v25 = vpop.f32.mrb[124].mxu1 }
 0x1ff   : > { %1795 = vst.msk [vmem:[%s2704_s6 + $0xe0] sm:$0xff] %vm1766_vm1, %v1762_v19  ;;  %v1699_v62 = vmax.f32 %v1571_v16, %v1603_v24  ;;  %v1731_v53 = vmax.f32 %v1635_v50, %v1667_v52  ;;  %v1214_v63 = vadd.f32 %v2678_v40, %v1213_v45  ;;  %v1534_v41 = vadd.f32 %v2678_v40, %v1533_v25  ;;  %v1215_v2 = vpop.f32.mrb[125].mxu0  ;;  %v1535_v3 = vpop.f32.mrb[125].mxu1 }
 0x201   : > { %v1763_v6 = vmax.f32 %v1699_v62, %v1731_v53  ;;  %v1604_v34 = vmax.f32 %v1214_v63, 0.0  ;;  %v1668_v21 = vmax.f32 %v1534_v41, 0.0 }
 0x202   : > { %v1218_v60 = vpop.f32.mrb[126].mxu0  ;;  %v1538_v61 = vpop.f32.mrb[126].mxu1 }
 0x203   : > { %1796 = vst.msk [vmem:[%s2704_s6 + $0xe8] sm:$0xff] %vm1766_vm1, %v1763_v6  ;;  %v1700_v46 = vmax.f32 %v1572_v14, %v1604_v34  ;;  %v1732_v47 = vmax.f32 %v1636_v15, %v1668_v21  ;;  %v1219_v30 = vadd.f32 %v2678_v40, %v1218_v60  ;;  %v1539_v31 = vadd.f32 %v2678_v40, %v1538_v61  ;;  %v1220_v58 = vpop.f32.mrb[127].mxu0  ;;  %v1540_v7 = vpop.f32.mrb[127].mxu1 }
 0x205   : > { %v1764_v42 = vmax.f32 %v1700_v46, %v1732_v47  ;;  %v1605_v10 = vmax.f32 %v1219_v30, 0.0  ;;  %v1669_v55 = vmax.f32 %v1539_v31, 0.0 }
 0x207   : > { %1797 = vst.msk [vmem:[%s2704_s6 + $0xf0] sm:$0xff] %vm1766_vm1, %v1764_v42  ;;  %v1701_v43 = vmax.f32 %v1573_v59, %v1605_v10  ;;  %v1733_v4 = vmax.f32 %v1637_v54, %v1669_v55 }
 0x209   : > { %v1765_v51 = vmax.f32 %v1701_v43, %v1733_v4 }
 0x20b   : > { %1798 = vst.msk [vmem:[%s2704_s6 + $0xf8] sm:$0xff] %vm1766_vm1, %v1765_v51 }
 0x20c PF: > { %s13_s12 = sadd.s32 1, %s2056_s12  }
 0x20d   : > { %p10_p4 = scmp.ge.s32.totalorder %s13_s12, 10  }
 0x20f   :  { %12 = sbr.rel (!%p10_p4) target bundleno = 1 (0x1), region = 62 }

// kernel: cnn_forward.6
= control target key start
LH: loop header
LB: loop body
LE: loop exit
PB: predicated region body
PF: predicated region fallthrough
CT: control target
= control target key end

     0   :  { %s3305_s12 = smov 0   ;;  %s4763_s0 = inlined_call_operand.vmem [shape: f32[2,64,16,288], index: 0, kind: input, shape index: {}]   ;;  %s4764_s1 = inlined_call_operand.vmem [shape: f32[288,64], index: 1, kind: input, shape index: {}]   ;;  %s4765_s2 = inlined_call_operand.vmem [shape: f32[1,64], index: 2, kind: input, shape index: {}]   ;;  %s4766_s3 = inlined_call_operand.vmem [shape: f32[2,16,16,64], index: 3, kind: output, shape index: {}]  }
   0x1 LB: > { %s2705_s13 = sadd.s32 4294967295, %s3282_s12   ;;  %p2709_p0 = scmp.ge.s32.totalorder %s3282_s12, 1  ;;  %s3282_s12 = sphi %s3305_s12, %s13_s12  }
   0x2   : > { %p137_p1 = scmp.lt.s32.totalorder %s3282_s12, 3 }
   0x4   : > { %p138_p2 = pnand %p2709_p0, %p137_p1 }
   0x6   : > { %141 = sbr.rel (%p138_p2) target bundleno = 682 (0x2aa), region = 32 }
   0xd   : > { %v555_v0 = vld [vmem:[%s4764_s1] sm:$0xff]  ;;  %v556_v1 = vld [vmem:[%s4764_s1 + $0x8] sm:$0xff]  ;;  %v557_v2 = vld [vmem:[%s4764_s1 + $0x10] sm:$0xff]  ;;  %p161_p3 = scmp.lt.s32.totalorder %s2705_s13, 1  ;;  %v3284_v3 = vmov 0.0|0.0   ;;  %vm598_vm0 = vcmask 261120  }
   0xe   : > { %3177 = vmatprep.subr.bf16.mxu0 %v3284_v3  ;;  %3233 = vmatprep.subr.bf16.mxu1 %v3284_v3  ;;  %v3178_v4 = vpack.c.bf16 %v556_v1, %v555_v0  ;;  %v558_v5 = vld [vmem:[%s4764_s1 + $0x18] sm:$0xff]  ;;  %v559_v7 = vld [vmem:[%s4764_s1 + $0x20] sm:$0xff]  ;;  %v560_v8 = vld [vmem:[%s4764_s1 + $0x28] sm:$0xff]  ;;  %vm2617_vm1 = vcmask 523264  }
   0xf   : > { %s4872_s13 = smov (!%p161_p3, %s2705_s13), 1  ;;  %v3181_v6 = vpack.c.bf16 %v558_v5, %v557_v2  ;;  %v3184_v9 = vpack.c.bf16 %v560_v8, %v559_v7  ;;  %v561_v10 = vld [vmem:[%s4764_s1 + $0x30] sm:$0xff]  ;;  %v562_v11 = vld [vmem:[%s4764_s1 + $0x38] sm:$0xff]  ;;  %v563_v15 = vld [vmem:[%s4764_s1 + $0x40] sm:$0xff] }
  0x10   : > { %3179 = vmatpush1.bf16.msra.mxu0 %v3178_v4  ;;  %3249 = vmatpush1.bf16.msra.mxu1 %v3178_v4  ;;  %s3265_s26 = smul.u32 3072, %s4872_s13  ;;  %v3187_v13 = vpack.c.bf16 %v562_v11, %v561_v10  ;;  %v564_v16 = vld [vmem:[%s4764_s1 + $0x48] sm:$0xff]  ;;  %v565_v18 = vld [vmem:[%s4764_s1 + $0x50] sm:$0xff]  ;;  %v566_v19 = vld [vmem:[%s4764_s1 + $0x58] sm:$0xff]  ;;  %s2844_s20 = sshll.u32 %s4872_s13, 8 }
  0x11   : > { %3180 = vmatprep.subr.bf16.mxu0 %v3284_v3  ;;  %3234 = vmatprep.subr.bf16.mxu1 %v3284_v3  ;;  %v3190_v17 = vpack.c.bf16 %v564_v16, %v563_v15  ;;  %v3193_v20 = vpack.c.bf16 %v566_v19, %v565_v18  ;;  %v567_v21 = vld [vmem:[%s4764_s1 + $0x60] sm:$0xff]  ;;  %v568_v22 = vld [vmem:[%s4764_s1 + $0x68] sm:$0xff]  ;;  %v569_v24 = vld [vmem:[%s4764_s1 + $0x70] sm:$0xff]  ;;  %s4534_s22 = scalar_lea.vmem %s4766_s3, %s2844_s20 }
  0x12   : > { %s3341_s29 = scalar_lea.vmem %s4763_s0, %s3265_s26  ;;  %v3196_v23 = vpack.c.bf16 %v568_v22, %v567_v21  ;;  %v570_v25 = vld [vmem:[%s4764_s1 + $0x78] sm:$0xff]  ;;  %v571_v27 = vld [vmem:[%s4764_s1 + $0x80] sm:$0xff]  ;;  %v572_v28 = vld [vmem:[%s4764_s1 + $0x88] sm:$0xff] }
  0x13   : > { %v172_v12 = vld [vmem:[%s3341_s29 + $0x8] sm:$0xff]  ;;  %v3199_v26 = vpack.c.bf16 %v570_v25, %v569_v24  ;;  %v3202_v29 = vpack.c.bf16 %v572_v28, %v571_v27  ;;  %v573_v30 = vld [vmem:[%s4764_s1 + $0x90] sm:$0xff]  ;;  %v574_v31 = vld [vmem:[%s4764_s1 + $0x98] sm:$0xff] }
  0x14   : > { %3182 = vmatpush1.bf16.msra.mxu0 %v3181_v6  ;;  %3250 = vmatpush1.bf16.msra.mxu1 %v3181_v6  ;;  %v460_v14 = vld [vmem:[%s3341_s29 + $0x908] sm:$0xff]  ;;  %v3205_v32 = vpack.c.bf16 %v574_v31, %v573_v30  ;;  %v575_v33 = vld [vmem:[%s4764_s1 + $0xa0] sm:$0xff]  ;;  %v577_v36 = vld [vmem:[%s4764_s1 + $0xb0] sm:$0xff] }
  0x15   : > { %3183 = vmatprep.subr.bf16.mxu0 %v3284_v3  ;;  %3235 = vmatprep.subr.bf16.mxu1 %v3284_v3  ;;  %v576_v34 = vld [vmem:[%s4764_s1 + $0xa8] sm:$0xff]  ;;  %v578_v37 = vld [vmem:[%s4764_s1 + $0xb8] sm:$0xff]  ;;  %v579_v39 = vld [vmem:[%s4764_s1 + $0xc0] sm:$0xff] }
  0x16   : > { %1047 = vmatprep.mubr.f32.mxu0 %v172_v12  ;;  %1527 = vmatprep.mubr.f32.mxu1 %v460_v14  ;;  %v3208_v35 = vpack.c.bf16 %v576_v34, %v575_v33  ;;  %v3211_v38 = vpack.c.bf16 %v578_v37, %v577_v36  ;;  %v580_v40 = vld [vmem:[%s4764_s1 + $0xc8] sm:$0xff]  ;;  %v581_v42 = vld [vmem:[%s4764_s1 + $0xd0] sm:$0xff]  ;;  %v582_v43 = vld [vmem:[%s4764_s1 + $0xd8] sm:$0xff] }
  0x17   : > { %v3214_v41 = vpack.c.bf16 %v580_v40, %v579_v39  ;;  %v3217_v44 = vpack.c.bf16 %v582_v43, %v581_v42  ;;  %v583_v45 = vld [vmem:[%s4764_s1 + $0xe0] sm:$0xff]  ;;  %v584_v46 = vld [vmem:[%s4764_s1 + $0xe8] sm:$0xff]  ;;  %v585_v48 = vld [vmem:[%s4764_s1 + $0xf0] sm:$0xff] }
  0x18   : > { %3185 = vmatpush1.bf16.msra.mxu0 %v3184_v9  ;;  %3251 = vmatpush1.bf16.msra.mxu1 %v3184_v9  ;;  %v3220_v47 = vpack.c.bf16 %v584_v46, %v583_v45  ;;  %v586_v49 = vld [vmem:[%s4764_s1 + $0xf8] sm:$0xff]  ;;  %v587_v50 = vld [vmem:[%s4764_s1 + $0x100] sm:$0xff]  ;;  %v588_v51 = vld [vmem:[%s4764_s1 + $0x108] sm:$0xff] }
  0x19   : > { %3186 = vmatprep.subr.bf16.mxu0 %v3284_v3  ;;  %3236 = vmatprep.subr.bf16.mxu1 %v3284_v3  ;;  %v3223_v52 = vpack.c.bf16 %v586_v49, %v585_v48  ;;  %v3225_v53 = vpack.c.bf16 %v588_v51, %v587_v50  ;;  %v589_v54 = vld [vmem:[%s4764_s1 + $0x110] sm:$0xff]  ;;  %v590_v55 = vld [vmem:[%s4764_s1 + $0x118] sm:$0xff]  ;;  %v171_v56 = vld [vmem:[%s3341_s29] sm:$0xff] }
  0x1a   : > { %v459_v57 = vld [vmem:[%s3341_s29 + $0x900] sm:$0xff]  ;;  %v3229_v59 = vpack.c.bf16 %v590_v55, %v589_v54  ;;  %v174_v61 = vld [vmem:[%s3341_s29 + $0x18] sm:$0xff]  ;;  %v177_v1 = vld [vmem:[%s3341_s29 + $0x30] sm:$0xff] }
  0x1b   : > { %v175_v58 = vld [vmem:[%s3341_s29 + $0x20] sm:$0xff]  ;;  %v462_v62 = vld [vmem:[%s3341_s29 + $0x918] sm:$0xff]  ;;  %v465_v2 = vld [vmem:[%s3341_s29 + $0x930] sm:$0xff] }
  0x1c   : > { %3188 = vmatpush1.bf16.msra.mxu0 %v3187_v13  ;;  %3252 = vmatpush1.bf16.msra.mxu1 %v3187_v13  ;;  %v463_v60 = vld [vmem:[%s3341_s29 + $0x920] sm:$0xff]  ;;  %v178_v63 = vld [vmem:[%s3341_s29 + $0x38] sm:$0xff]  ;;  %v469_v4 = vld [vmem:[%s3341_s29 + $0x950] sm:$0xff] }
  0x1d   : > { %3189 = vmatprep.subr.bf16.mxu0 %v3284_v3  ;;  %3237 = vmatprep.subr.bf16.mxu1 %v3284_v3  ;;  %v466_v0 = vld [vmem:[%s3341_s29 + $0x938] sm:$0xff]  ;;  %v180_v5 = vld [vmem:[%s3341_s29 + $0x48] sm:$0xff]  ;;  %v183_v9 = vld [vmem:[%s3341_s29 + $0x60] sm:$0xff] }
  0x1e   : > { %v468_v6 = vld [vmem:[%s3341_s29 + $0x948] sm:$0xff]  ;;  %v471_v10 = vld [vmem:[%s3341_s29 + $0x960] sm:$0xff]  ;;  %v186_v13 = vld [vmem:[%s3341_s29 + $0x78] sm:$0xff] }
  0x1f   : > { %v184_v7 = vld [vmem:[%s3341_s29 + $0x68] sm:$0xff]  ;;  %v187_v11 = vld [vmem:[%s3341_s29 + $0x80] sm:$0xff]  ;;  %v474_v14 = vld [vmem:[%s3341_s29 + $0x978] sm:$0xff] }
  0x20   : > { %3191 = vmatpush1.bf16.msra.mxu0 %v3190_v17  ;;  %3253 = vmatpush1.bf16.msra.mxu1 %v3190_v17  ;;  %v472_v8 = vld [vmem:[%s3341_s29 + $0x968] sm:$0xff]  ;;  %v475_v12 = vld [vmem:[%s3341_s29 + $0x980] sm:$0xff]  ;;  %v190_v15 = vld [vmem:[%s3341_s29 + $0x98] sm:$0xff] }
  0x21   : > { %3192 = vmatprep.subr.bf16.mxu0 %v3284_v3  ;;  %3238 = vmatprep.subr.bf16.mxu1 %v3284_v3  ;;  %v478_v16 = vld [vmem:[%s3341_s29 + $0x998] sm:$0xff]  ;;  %v189_v17 = vld [vmem:[%s3341_s29 + $0x90] sm:$0xff]  ;;  %v192_v21 = vld [vmem:[%s3341_s29 + $0xa8] sm:$0xff] }
  0x22   : > { %v477_v18 = vld [vmem:[%s3341_s29 + $0x990] sm:$0xff]  ;;  %v480_v22 = vld [vmem:[%s3341_s29 + $0x9a8] sm:$0xff]  ;;  %v195_v25 = vld [vmem:[%s3341_s29 + $0xc0] sm:$0xff] }
  0x23   : > { %v193_v19 = vld [vmem:[%s3341_s29 + $0xb0] sm:$0xff]  ;;  %v484_v24 = vld [vmem:[%s3341_s29 + $0x9c8] sm:$0xff]  ;;  %v199_v27 = vld [vmem:[%s3341_s29 + $0xe0] sm:$0xff] }
  0x24   : > { %3194 = vmatpush1.bf16.msra.mxu0 %v3193_v20  ;;  %3254 = vmatpush1.bf16.msra.mxu1 %v3193_v20  ;;  %v481_v20 = vld [vmem:[%s3341_s29 + $0x9b0] sm:$0xff]  ;;  %v487_v28 = vld [vmem:[%s3341_s29 + $0x9e0] sm:$0xff]  ;;  %v486_v30 = vld [vmem:[%s3341_s29 + $0x9d8] sm:$0xff] }
  0x25   : > { %3195 = vmatprep.subr.bf16.mxu0 %v3284_v3  ;;  %3239 = vmatprep.subr.bf16.mxu1 %v3284_v3  ;;  %v202_v31 = vld [vmem:[%s3341_s29 + $0xf8] sm:$0xff]  ;;  %v201_v33 = vld [vmem:[%s3341_s29 + $0xf0] sm:$0xff]  ;;  %v204_v37 = vld [vmem:[%s3341_s29 + $0x108] sm:$0xff] }
  0x26   : > { %v489_v34 = vld [vmem:[%s3341_s29 + $0x9f0] sm:$0xff]  ;;  %v208_v39 = vld [vmem:[%s3341_s29 + $0x128] sm:$0xff]  ;;  %v495_v42 = vld [vmem:[%s3341_s29 + $0xa20] sm:$0xff] }
  0x27   : > { %v493_v36 = vld [vmem:[%s3341_s29 + $0xa10] sm:$0xff]  ;;  %v496_v40 = vld [vmem:[%s3341_s29 + $0xa28] sm:$0xff]  ;;  %v211_v43 = vld [vmem:[%s3341_s29 + $0x140] sm:$0xff] }
  0x28   : > { %3197 = vmatpush1.bf16.msra.mxu0 %v3196_v23  ;;  %3255 = vmatpush1.bf16.msra.mxu1 %v3196_v23  ;;  %v196_v23 = vld [vmem:[%s3341_s29 + $0xc8] sm:$0xff]  ;;  %v210_v45 = vld [vmem:[%s3341_s29 + $0x138] sm:$0xff]  ;;  %v213_v49 = vld [vmem:[%s3341_s29 + $0x150] sm:$0xff] }
  0x29   : > { %3198 = vmatprep.subr.bf16.mxu0 %v3284_v3  ;;  %3240 = vmatprep.subr.bf16.mxu1 %v3284_v3  ;;  %v498_v46 = vld [vmem:[%s3341_s29 + $0xa38] sm:$0xff]  ;;  %v501_v50 = vld [vmem:[%s3341_s29 + $0xa50] sm:$0xff]  ;;  %v504_v54 = vld [vmem:[%s3341_s29 + $0xa68] sm:$0xff] }
  0x2a   : > { %v502_v48 = vld [vmem:[%s3341_s29 + $0xa58] sm:$0xff]  ;;  %v217_v51 = vld [vmem:[%s3341_s29 + $0x170] sm:$0xff]  ;;  %v220_v55 = vld [vmem:[%s3341_s29 + $0x188] sm:$0xff] }
  0x2c   : > { %3200 = vmatpush1.bf16.msra.mxu0 %v3199_v26  ;;  %3256 = vmatpush1.bf16.msra.mxu1 %v3199_v26  ;;  %v483_v26 = vld [vmem:[%s3341_s29 + $0x9c0] sm:$0xff] }
  0x2d   : > { %3201 = vmatprep.subr.bf16.mxu0 %v3284_v3  ;;  %3241 = vmatprep.subr.bf16.mxu1 %v3284_v3 }
  0x30   : > { %3203 = vmatpush1.bf16.msra.mxu0 %v3202_v29  ;;  %3257 = vmatpush1.bf16.msra.mxu1 %v3202_v29  ;;  %v198_v29 = vld [vmem:[%s3341_s29 + $0xd8] sm:$0xff] }
  0x31   : > { %3204 = vmatprep.subr.bf16.mxu0 %v3284_v3  ;;  %3242 = vmatprep.subr.bf16.mxu1 %v3284_v3 }
  0x34   : > { %3206 = vmatpush1.bf16.msra.mxu0 %v3205_v32  ;;  %3258 = vmatpush1.bf16.msra.mxu1 %v3205_v32  ;;  %v490_v32 = vld [vmem:[%s3341_s29 + $0x9f8] sm:$0xff] }
  0x35   : > { %3207 = vmatprep.subr.bf16.mxu0 %v3284_v3  ;;  %3243 = vmatprep.subr.bf16.mxu1 %v3284_v3 }
  0x38   : > { %3209 = vmatpush1.bf16.msra.mxu0 %v3208_v35  ;;  %3259 = vmatpush1.bf16.msra.mxu1 %v3208_v35  ;;  %v205_v35 = vld [vmem:[%s3341_s29 + $0x110] sm:$0xff] }
  0x39   : > { %3210 = vmatprep.subr.bf16.mxu0 %v3284_v3  ;;  %3244 = vmatprep.subr.bf16.mxu1 %v3284_v3 }
  0x3c   : > { %3212 = vmatpush1.bf16.msra.mxu0 %v3211_v38  ;;  %3260 = vmatpush1.bf16.msra.mxu1 %v3211_v38  ;;  %v492_v38 = vld [vmem:[%s3341_s29 + $0xa08] sm:$0xff] }
  0x3d   : > { %3213 = vmatprep.subr.bf16.mxu0 %v3284_v3  ;;  %3245 = vmatprep.subr.bf16.mxu1 %v3284_v3 }
  0x40   : > { %3215 = vmatpush1.bf16.msra.mxu0 %v3214_v41  ;;  %3261 = vmatpush1.bf16.msra.mxu1 %v3214_v41  ;;  %v207_v41 = vld [vmem:[%s3341_s29 + $0x120] sm:$0xff] }
  0x41   : > { %3216 = vmatprep.subr.bf16.mxu0 %v3284_v3  ;;  %3246 = vmatprep.subr.bf16.mxu1 %v3284_v3 }
  0x44   : > { %3218 = vmatpush1.bf16.msra.mxu0 %v3217_v44  ;;  %3262 = vmatpush1.bf16.msra.mxu1 %v3217_v44  ;;  %v499_v44 = vld [vmem:[%s3341_s29 + $0xa40] sm:$0xff] }
  0x45   : > { %3219 = vmatprep.subr.bf16.mxu0 %v3284_v3  ;;  %3247 = vmatprep.subr.bf16.mxu1 %v3284_v3 }
  0x48   : > { %3221 = vmatpush1.bf16.msra.mxu0 %v3220_v47  ;;  %3263 = vmatpush1.bf16.msra.mxu1 %v3220_v47  ;;  %v214_v47 = vld [vmem:[%s3341_s29 + $0x158] sm:$0xff] }
  0x49   : > { %3222 = vmatprep.subr.bf16.mxu0 %v3284_v3  ;;  %3248 = vmatprep.subr.bf16.mxu1 %v3284_v3  ;;  %v181_v3 = vld [vmem:[%s3341_s29 + $0x50] sm:$0xff] }
  0x4c   : > { %3224 = vmatpush1.bf16.msra.mxu0 %v3223_v52  ;;  %3264 = vmatpush1.bf16.msra.mxu1 %v3223_v52  ;;  %v505_v52 = vld [vmem:[%s3341_s29 + $0xa70] sm:$0xff] }
  0x4d   : > { %3226 = vmatprep.subr.bf16.mxu1 %v3225_v53 }
  0x4f   : > { %1048 = vmatmul.mubr.f32.vlgmr.msra.gmra.mrb[0].mxu0 %v171_v56  ;;  %1528 = vmatmul.mubr.f32.vlgmr.msra.gmra.mrb[0].mxu1 %v459_v57  ;;  %v508_v56 = vld [vmem:[%s3341_s29 + $0xa88] sm:$0xff]  ;;  %v219_v57 = vld [vmem:[%s3341_s29 + $0x180] sm:$0xff] }
  0x50   : > { %3228 = vmatpush3.bf16.msra.mxu1 %v3225_v53  ;;  %1052 = vmatprep.mubr.f32.mxu0 %v175_v58  ;;  %v216_v53 = vld [vmem:[%s3341_s29 + $0x168] sm:$0xff]  ;;  %v507_v58 = vld [vmem:[%s3341_s29 + $0xa80] sm:$0xff] }
  0x51   : > { %1532 = vmatprep.mubr.f32.mxu1 %v463_v60  ;;  %3230 = vmatprep.subr.bf16.mxu1 %v3229_v59  ;;  %v511_v60 = vld [vmem:[%s3341_s29 + $0xaa0] sm:$0xff] }
  0x53   : > { %1053 = vmatmul.mubr.f32.gmra.mrb[2].mxu0 %v174_v61  ;;  %1533 = vmatmul.mubr.f32.gmra.mrb[2].mxu1 %v462_v62  ;;  %v222_v61 = vld [vmem:[%s3341_s29 + $0x198] sm:$0xff] }
  0x54   : > { %1057 = vmatprep.mubr.f32.mxu0 %v178_v63  ;;  %1537 = vmatprep.mubr.f32.mxu1 %v466_v0  ;;  %v510_v62 = vld [vmem:[%s3341_s29 + $0xa98] sm:$0xff] }
  0x55   : > { %3232 = vmatpush3.bf16.msra.mxu1 %v3229_v59  ;;  %v223_v59 = vld [vmem:[%s3341_s29 + $0x1a0] sm:$0xff]  ;;  %v226_v63 = vld [vmem:[%s3341_s29 + $0x1b8] sm:$0xff] }
  0x56   : > { %v514_v0 = vld [vmem:[%s3341_s29 + $0xab8] sm:$0xff] }
  0x57   : > { %1058 = vmatmul.mubr.f32.gmra.mrb[4].mxu0 %v177_v1  ;;  %1538 = vmatmul.mubr.f32.gmra.mrb[4].mxu1 %v465_v2  ;;  %v225_v1 = vld [vmem:[%s3341_s29 + $0x1b0] sm:$0xff] }
  0x58   : > { %1062 = vmatprep.mubr.f32.mxu0 %v181_v3  ;;  %1542 = vmatprep.mubr.f32.mxu1 %v469_v4  ;;  %v513_v2 = vld [vmem:[%s3341_s29 + $0xab0] sm:$0xff] }
  0x59   : > { %v229_v3 = vld [vmem:[%s3341_s29 + $0x1d0] sm:$0xff] }
  0x5a   : > { %v517_v4 = vld [vmem:[%s3341_s29 + $0xad0] sm:$0xff] }
  0x5b   : > { %1063 = vmatmul.mubr.f32.gmra.mrb[6].mxu0 %v180_v5  ;;  %1543 = vmatmul.mubr.f32.gmra.mrb[6].mxu1 %v468_v6  ;;  %v228_v5 = vld [vmem:[%s3341_s29 + $0x1c8] sm:$0xff] }
  0x5c   : > { %1067 = vmatprep.mubr.f32.mxu0 %v184_v7  ;;  %1547 = vmatprep.mubr.f32.mxu1 %v472_v8  ;;  %v516_v6 = vld [vmem:[%s3341_s29 + $0xac8] sm:$0xff] }
  0x5d   : > { %v232_v7 = vld [vmem:[%s3341_s29 + $0x1e8] sm:$0xff] }
  0x5e   : > { %v520_v8 = vld [vmem:[%s3341_s29 + $0xae8] sm:$0xff] }
  0x5f   : > { %1068 = vmatmul.mubr.f32.gmra.mrb[8].mxu0 %v183_v9  ;;  %1548 = vmatmul.mubr.f32.gmra.mrb[8].mxu1 %v471_v10  ;;  %v231_v9 = vld [vmem:[%s3341_s29 + $0x1e0] sm:$0xff] }
  0x60   : > { %1072 = vmatprep.mubr.f32.mxu0 %v187_v11  ;;  %1552 = vmatprep.mubr.f32.mxu1 %v475_v12  ;;  %v519_v10 = vld [vmem:[%s3341_s29 + $0xae0] sm:$0xff] }
  0x61   : > { %v235_v11 = vld [vmem:[%s3341_s29 + $0x200] sm:$0xff] }
  0x62   : > { %v523_v12 = vld [vmem:[%s3341_s29 + $0xb00] sm:$0xff] }
  0x63   : > { %1073 = vmatmul.mubr.f32.gmra.mrb[10].mxu0 %v186_v13  ;;  %1553 = vmatmul.mubr.f32.gmra.mrb[10].mxu1 %v474_v14  ;;  %v234_v13 = vld [vmem:[%s3341_s29 + $0x1f8] sm:$0xff] }
  0x64   : > { %1077 = vmatprep.mubr.f32.mxu0 %v190_v15  ;;  %1557 = vmatprep.mubr.f32.mxu1 %v478_v16  ;;  %v522_v14 = vld [vmem:[%s3341_s29 + $0xaf8] sm:$0xff] }
  0x65   : > { %v238_v15 = vld [vmem:[%s3341_s29 + $0x218] sm:$0xff] }
  0x66   : > { %v526_v16 = vld [vmem:[%s3341_s29 + $0xb18] sm:$0xff] }
  0x67   : > { %1078 = vmatmul.mubr.f32.gmra.mrb[12].mxu0 %v189_v17  ;;  %1558 = vmatmul.mubr.f32.gmra.mrb[12].mxu1 %v477_v18  ;;  %v237_v17 = vld [vmem:[%s3341_s29 + $0x210] sm:$0xff] }
  0x68   : > { %1082 = vmatprep.mubr.f32.mxu0 %v193_v19  ;;  %1562 = vmatprep.mubr.f32.mxu1 %v481_v20  ;;  %v525_v18 = vld [vmem:[%s3341_s29 + $0xb10] sm:$0xff] }
  0x69   : > { %v241_v19 = vld [vmem:[%s3341_s29 + $0x230] sm:$0xff] }
  0x6a   : > { %v529_v20 = vld [vmem:[%s3341_s29 + $0xb30] sm:$0xff] }
  0x6b   : > { %1083 = vmatmul.mubr.f32.gmra.mrb[14].mxu0 %v192_v21  ;;  %1563 = vmatmul.mubr.f32.gmra.mrb[14].mxu1 %v480_v22  ;;  %v240_v21 = vld [vmem:[%s3341_s29 + $0x228] sm:$0xff] }
  0x6c   : > { %1087 = vmatprep.mubr.f32.mxu0 %v196_v23  ;;  %1567 = vmatprep.mubr.f32.mxu1 %v484_v24  ;;  %v528_v22 = vld [vmem:[%s3341_s29 + $0xb28] sm:$0xff] }
  0x6d   : > { %v244_v23 = vld [vmem:[%s3341_s29 + $0x248] sm:$0xff] }
  0x6e   : > { %v532_v24 = vld [vmem:[%s3341_s29 + $0xb48] sm:$0xff] }
  0x6f   : > { %1088 = vmatmul.mubr.f32.gmra.mrb[16].mxu0 %v195_v25  ;;  %1568 = vmatmul.mubr.f32.gmra.mrb[16].mxu1 %v483_v26  ;;  %v243_v25 = vld [vmem:[%s3341_s29 + $0x240] sm:$0xff] }
  0x70   : > { %1092 = vmatprep.mubr.f32.mxu0 %v199_v27  ;;  %1572 = vmatprep.mubr.f32.mxu1 %v487_v28  ;;  %v531_v26 = vld [vmem:[%s3341_s29 + $0xb40] sm:$0xff] }
  0x71   : > { %v247_v27 = vld [vmem:[%s3341_s29 + $0x260] sm:$0xff] }
  0x72   : > { %v535_v28 = vld [vmem:[%s3341_s29 + $0xb60] sm:$0xff] }
  0x73   : > { %1093 = vmatmul.mubr.f32.gmra.mrb[18].mxu0 %v198_v29  ;;  %1573 = vmatmul.mubr.f32.gmra.mrb[18].mxu1 %v486_v30  ;;  %v246_v29 = vld [vmem:[%s3341_s29 + $0x258] sm:$0xff] }
  0x74   : > { %1097 = vmatprep.mubr.f32.mxu0 %v202_v31  ;;  %1577 = vmatprep.mubr.f32.mxu1 %v490_v32  ;;  %v534_v30 = vld [vmem:[%s3341_s29 + $0xb58] sm:$0xff] }
  0x75   : > { %v250_v31 = vld [vmem:[%s3341_s29 + $0x278] sm:$0xff] }
  0x76   : > { %v538_v32 = vld [vmem:[%s3341_s29 + $0xb78] sm:$0xff] }
  0x77   : > { %1098 = vmatmul.mubr.f32.gmra.mrb[20].mxu0 %v201_v33  ;;  %1578 = vmatmul.mubr.f32.gmra.mrb[20].mxu1 %v489_v34  ;;  %v249_v33 = vld [vmem:[%s3341_s29 + $0x270] sm:$0xff] }
  0x78   : > { %1102 = vmatprep.mubr.f32.mxu0 %v205_v35  ;;  %1582 = vmatprep.mubr.f32.mxu1 %v493_v36  ;;  %v537_v34 = vld [vmem:[%s3341_s29 + $0xb70] sm:$0xff] }
  0x79   : > { %v253_v35 = vld [vmem:[%s3341_s29 + $0x290] sm:$0xff] }
  0x7a   : > { %v541_v36 = vld [vmem:[%s3341_s29 + $0xb90] sm:$0xff] }
  0x7b   : > { %1103 = vmatmul.mubr.f32.gmra.mrb[22].mxu0 %v204_v37  ;;  %1583 = vmatmul.mubr.f32.gmra.mrb[22].mxu1 %v492_v38  ;;  %v252_v37 = vld [vmem:[%s3341_s29 + $0x288] sm:$0xff] }
  0x7c   : > { %1107 = vmatprep.mubr.f32.mxu0 %v208_v39  ;;  %1587 = vmatprep.mubr.f32.mxu1 %v496_v40  ;;  %v540_v38 = vld [vmem:[%s3341_s29 + $0xb88] sm:$0xff] }
  0x7d   : > { %v256_v39 = vld [vmem:[%s3341_s29 + $0x2a8] sm:$0xff] }
  0x7e   : > { %v544_v40 = vld [vmem:[%s3341_s29 + $0xba8] sm:$0xff] }
  0x7f   : > { %1108 = vmatmul.mubr.f32.gmra.mrb[24].mxu0 %v207_v41  ;;  %1588 = vmatmul.mubr.f32.gmra.mrb[24].mxu1 %v495_v42  ;;  %v255_v41 = vld [vmem:[%s3341_s29 + $0x2a0] sm:$0xff] }
  0x80   : > { %1112 = vmatprep.mubr.f32.mxu0 %v211_v43  ;;  %1592 = vmatprep.mubr.f32.mxu1 %v499_v44  ;;  %v543_v42 = vld [vmem:[%s3341_s29 + $0xba0] sm:$0xff] }
  0x81   : > { %v259_v43 = vld [vmem:[%s3341_s29 + $0x2c0] sm:$0xff] }
  0x82   : > { %v547_v44 = vld [vmem:[%s3341_s29 + $0xbc0] sm:$0xff] }
  0x83   : > { %1113 = vmatmul.mubr.f32.gmra.mrb[26].mxu0 %v210_v45  ;;  %1593 = vmatmul.mubr.f32.gmra.mrb[26].mxu1 %v498_v46  ;;  %v258_v45 = vld [vmem:[%s3341_s29 + $0x2b8] sm:$0xff] }
  0x84   : > { %1117 = vmatprep.mubr.f32.mxu0 %v214_v47  ;;  %1597 = vmatprep.mubr.f32.mxu1 %v502_v48  ;;  %v546_v46 = vld [vmem:[%s3341_s29 + $0xbb8] sm:$0xff] }
  0x85   : > { %v262_v47 = vld [vmem:[%s3341_s29 + $0x2d8] sm:$0xff] }
  0x86   : > { %v550_v48 = vld [vmem:[%s3341_s29 + $0xbd8] sm:$0xff] }
  0x87   : > { %1118 = vmatmul.mubr.f32.gmra.mrb[28].mxu0 %v213_v49  ;;  %1598 = vmatmul.mubr.f32.gmra.mrb[28].mxu1 %v501_v50  ;;  %v261_v49 = vld [vmem:[%s3341_s29 + $0x2d0] sm:$0xff] }
  0x88   : > { %1122 = vmatprep.mubr.f32.mxu0 %v217_v51  ;;  %1602 = vmatprep.mubr.f32.mxu1 %v505_v52  ;;  %v549_v50 = vld [vmem:[%s3341_s29 + $0xbd0] sm:$0xff] }
  0x89   : > { %v265_v51 = vld [vmem:[%s3341_s29 + $0x2f0] sm:$0xff] }
  0x8a   : > { %v553_v52 = vld [vmem:[%s3341_s29 + $0xbf0] sm:$0xff] }
  0x8b   : > { %1123 = vmatmul.mubr.f32.gmra.mrb[30].mxu0 %v216_v53  ;;  %1603 = vmatmul.mubr.f32.gmra.mrb[30].mxu1 %v504_v54  ;;  %v264_v53 = vld [vmem:[%s3341_s29 + $0x2e8] sm:$0xff] }
  0x8c   : > { %1127 = vmatprep.mubr.f32.mxu0 %v220_v55  ;;  %1607 = vmatprep.mubr.f32.mxu1 %v508_v56  ;;  %v552_v54 = vld [vmem:[%s3341_s29 + $0xbe8] sm:$0xff]  ;;  %v173_v56 = vld [vmem:[%s3341_s29 + $0x10] sm:$0xff] }
  0x8d   : > { %v268_v55 = vld [vmem:[%s3341_s29 + $0x308] sm:$0xff] }
  0x8f   : > { %1128 = vmatmul.mubr.f32.gmra.mrb[32].mxu0 %v219_v57  ;;  %1608 = vmatmul.mubr.f32.gmra.mrb[32].mxu1 %v507_v58  ;;  %v267_v57 = vld [vmem:[%s3341_s29 + $0x300] sm:$0xff]  ;;  %v176_v58 = vld [vmem:[%s3341_s29 + $0x28] sm:$0xff] }
  0x90   : > { %1132 = vmatprep.mubr.f32.mxu0 %v223_v59  ;;  %1612 = vmatprep.mubr.f32.mxu1 %v511_v60  ;;  %v271_v59 = vld [vmem:[%s3341_s29 + $0x320] sm:$0xff] }
  0x91   : > { %v179_v60 = vld [vmem:[%s3341_s29 + $0x40] sm:$0xff] }
  0x93   : > { %1133 = vmatmul.mubr.f32.gmra.mrb[34].mxu0 %v222_v61  ;;  %1613 = vmatmul.mubr.f32.gmra.mrb[34].mxu1 %v510_v62  ;;  %v270_v61 = vld [vmem:[%s3341_s29 + $0x318] sm:$0xff] }
  0x94   : > { %1137 = vmatprep.mubr.f32.mxu0 %v226_v63  ;;  %1617 = vmatprep.mubr.f32.mxu1 %v514_v0  ;;  %v182_v62 = vld [vmem:[%s3341_s29 + $0x58] sm:$0xff]  ;;  %v185_v0 = vld [vmem:[%s3341_s29 + $0x70] sm:$0xff] }
  0x95   : > { %v274_v63 = vld [vmem:[%s3341_s29 + $0x338] sm:$0xff] }
  0x97   : > { %1138 = vmatmul.mubr.f32.gmra.mrb[36].mxu0 %v225_v1  ;;  %1618 = vmatmul.mubr.f32.gmra.mrb[36].mxu1 %v513_v2  ;;  %v273_v1 = vld [vmem:[%s3341_s29 + $0x330] sm:$0xff]  ;;  %v188_v2 = vld [vmem:[%s3341_s29 + $0x88] sm:$0xff] }
  0x98   : > { %1142 = vmatprep.mubr.f32.mxu0 %v229_v3  ;;  %1622 = vmatprep.mubr.f32.mxu1 %v517_v4  ;;  %v277_v3 = vld [vmem:[%s3341_s29 + $0x350] sm:$0xff]  ;;  %v191_v4 = vld [vmem:[%s3341_s29 + $0xa0] sm:$0xff] }
  0x9b   : > { %1143 = vmatmul.mubr.f32.gmra.mrb[38].mxu0 %v228_v5  ;;  %1623 = vmatmul.mubr.f32.gmra.mrb[38].mxu1 %v516_v6  ;;  %v276_v5 = vld [vmem:[%s3341_s29 + $0x348] sm:$0xff]  ;;  %v194_v6 = vld [vmem:[%s3341_s29 + $0xb8] sm:$0xff] }
  0x9c   : > { %1147 = vmatprep.mubr.f32.mxu0 %v232_v7  ;;  %1627 = vmatprep.mubr.f32.mxu1 %v520_v8  ;;  %v280_v7 = vld [vmem:[%s3341_s29 + $0x368] sm:$0xff]  ;;  %v197_v8 = vld [vmem:[%s3341_s29 + $0xd0] sm:$0xff] }
  0x9f   : > { %1148 = vmatmul.mubr.f32.gmra.mrb[40].mxu0 %v231_v9  ;;  %1628 = vmatmul.mubr.f32.gmra.mrb[40].mxu1 %v519_v10  ;;  %v279_v9 = vld [vmem:[%s3341_s29 + $0x360] sm:$0xff]  ;;  %v200_v10 = vld [vmem:[%s3341_s29 + $0xe8] sm:$0xff] }
  0xa0   : > { %1152 = vmatprep.mubr.f32.mxu0 %v235_v11  ;;  %1632 = vmatprep.mubr.f32.mxu1 %v523_v12  ;;  %v283_v11 = vld [vmem:[%s3341_s29 + $0x380] sm:$0xff] }
  0xa1   : > { %v203_v12 = vld [vmem:[%s3341_s29 + $0x100] sm:$0xff] }
  0xa3   : > { %1153 = vmatmul.mubr.f32.gmra.mrb[42].mxu0 %v234_v13  ;;  %1633 = vmatmul.mubr.f32.gmra.mrb[42].mxu1 %v522_v14  ;;  %v282_v13 = vld [vmem:[%s3341_s29 + $0x378] sm:$0xff] }
  0xa4   : > { %1157 = vmatprep.mubr.f32.mxu0 %v238_v15  ;;  %1637 = vmatprep.mubr.f32.mxu1 %v526_v16  ;;  %v206_v14 = vld [vmem:[%s3341_s29 + $0x118] sm:$0xff]  ;;  %v209_v16 = vld [vmem:[%s3341_s29 + $0x130] sm:$0xff] }
  0xa5   : > { %v286_v15 = vld [vmem:[%s3341_s29 + $0x398] sm:$0xff] }
  0xa7   : > { %1158 = vmatmul.mubr.f32.gmra.mrb[44].mxu0 %v237_v17  ;;  %1638 = vmatmul.mubr.f32.gmra.mrb[44].mxu1 %v525_v18  ;;  %v285_v17 = vld [vmem:[%s3341_s29 + $0x390] sm:$0xff]  ;;  %v212_v18 = vld [vmem:[%s3341_s29 + $0x148] sm:$0xff] }
  0xa8   : > { %1162 = vmatprep.mubr.f32.mxu0 %v241_v19  ;;  %1642 = vmatprep.mubr.f32.mxu1 %v529_v20  ;;  %v289_v19 = vld [vmem:[%s3341_s29 + $0x3b0] sm:$0xff]  ;;  %v215_v20 = vld [vmem:[%s3341_s29 + $0x160] sm:$0xff] }
  0xab   : > { %1163 = vmatmul.mubr.f32.gmra.mrb[46].mxu0 %v240_v21  ;;  %1643 = vmatmul.mubr.f32.gmra.mrb[46].mxu1 %v528_v22  ;;  %v288_v21 = vld [vmem:[%s3341_s29 + $0x3a8] sm:$0xff]  ;;  %v218_v22 = vld [vmem:[%s3341_s29 + $0x178] sm:$0xff] }
  0xac   : > { %1167 = vmatprep.mubr.f32.mxu0 %v244_v23  ;;  %1647 = vmatprep.mubr.f32.mxu1 %v532_v24  ;;  %v292_v23 = vld [vmem:[%s3341_s29 + $0x3c8] sm:$0xff]  ;;  %v221_v24 = vld [vmem:[%s3341_s29 + $0x190] sm:$0xff] }
  0xaf   : > { %1168 = vmatmul.mubr.f32.gmra.mrb[48].mxu0 %v243_v25  ;;  %1648 = vmatmul.mubr.f32.gmra.mrb[48].mxu1 %v531_v26  ;;  %v291_v25 = vld [vmem:[%s3341_s29 + $0x3c0] sm:$0xff]  ;;  %v224_v26 = vld [vmem:[%s3341_s29 + $0x1a8] sm:$0xff] }
  0xb0   : > { %1172 = vmatprep.mubr.f32.mxu0 %v247_v27  ;;  %1652 = vmatprep.mubr.f32.mxu1 %v535_v28  ;;  %v295_v27 = vld [vmem:[%s3341_s29 + $0x3e0] sm:$0xff] }
  0xb1   : > { %v227_v28 = vld [vmem:[%s3341_s29 + $0x1c0] sm:$0xff] }
  0xb3   : > { %1173 = vmatmul.mubr.f32.gmra.mrb[50].mxu0 %v246_v29  ;;  %1653 = vmatmul.mubr.f32.gmra.mrb[50].mxu1 %v534_v30  ;;  %v294_v29 = vld [vmem:[%s3341_s29 + $0x3d8] sm:$0xff] }
  0xb4   : > { %1177 = vmatprep.mubr.f32.mxu0 %v250_v31  ;;  %1657 = vmatprep.mubr.f32.mxu1 %v538_v32  ;;  %v230_v30 = vld [vmem:[%s3341_s29 + $0x1d8] sm:$0xff]  ;;  %v233_v32 = vld [vmem:[%s3341_s29 + $0x1f0] sm:$0xff] }
  0xb5   : > { %v298_v31 = vld [vmem:[%s3341_s29 + $0x3f8] sm:$0xff] }
  0xb7   : > { %1178 = vmatmul.mubr.f32.gmra.mrb[52].mxu0 %v249_v33  ;;  %1658 = vmatmul.mubr.f32.gmra.mrb[52].mxu1 %v537_v34  ;;  %v297_v33 = vld [vmem:[%s3341_s29 + $0x3f0] sm:$0xff]  ;;  %v236_v34 = vld [vmem:[%s3341_s29 + $0x208] sm:$0xff] }
  0xb8   : > { %1182 = vmatprep.mubr.f32.mxu0 %v253_v35  ;;  %1662 = vmatprep.mubr.f32.mxu1 %v541_v36  ;;  %v301_v35 = vld [vmem:[%s3341_s29 + $0x410] sm:$0xff]  ;;  %v239_v36 = vld [vmem:[%s3341_s29 + $0x220] sm:$0xff] }
  0xbb   : > { %1183 = vmatmul.mubr.f32.gmra.mrb[54].mxu0 %v252_v37  ;;  %1663 = vmatmul.mubr.f32.gmra.mrb[54].mxu1 %v540_v38  ;;  %v300_v37 = vld [vmem:[%s3341_s29 + $0x408] sm:$0xff]  ;;  %v242_v38 = vld [vmem:[%s3341_s29 + $0x238] sm:$0xff] }
  0xbc   : > { %1187 = vmatprep.mubr.f32.mxu0 %v256_v39  ;;  %1667 = vmatprep.mubr.f32.mxu1 %v544_v40  ;;  %v304_v39 = vld [vmem:[%s3341_s29 + $0x428] sm:$0xff]  ;;  %v245_v40 = vld [vmem:[%s3341_s29 + $0x250] sm:$0xff] }
  0xbf   : > { %1188 = vmatmul.mubr.f32.gmra.mrb[56].mxu0 %v255_v41  ;;  %1668 = vmatmul.mubr.f32.gmra.mrb[56].mxu1 %v543_v42  ;;  %v303_v41 = vld [vmem:[%s3341_s29 + $0x420] sm:$0xff]  ;;  %v248_v42 = vld [vmem:[%s3341_s29 + $0x268] sm:$0xff] }
  0xc0   : > { %1192 = vmatprep.mubr.f32.mxu0 %v259_v43  ;;  %1672 = vmatprep.mubr.f32.mxu1 %v547_v44  ;;  %v307_v43 = vld [vmem:[%s3341_s29 + $0x440] sm:$0xff] }
  0xc1   : > { %v251_v44 = vld [vmem:[%s3341_s29 + $0x280] sm:$0xff] }
  0xc3   : > { %1193 = vmatmul.mubr.f32.gmra.mrb[58].mxu0 %v258_v45  ;;  %1673 = vmatmul.mubr.f32.gmra.mrb[58].mxu1 %v546_v46  ;;  %v306_v45 = vld [vmem:[%s3341_s29 + $0x438] sm:$0xff] }
  0xc4   : > { %1197 = vmatprep.mubr.f32.mxu0 %v262_v47  ;;  %1677 = vmatprep.mubr.f32.mxu1 %v550_v48  ;;  %v254_v46 = vld [vmem:[%s3341_s29 + $0x298] sm:$0xff]  ;;  %v257_v48 = vld [vmem:[%s3341_s29 + $0x2b0] sm:$0xff] }
  0xc5   : > { %v310_v47 = vld [vmem:[%s3341_s29 + $0x458] sm:$0xff] }
  0xc7   : > { %1198 = vmatmul.mubr.f32.gmra.mrb[60].mxu0 %v261_v49  ;;  %1678 = vmatmul.mubr.f32.gmra.mrb[60].mxu1 %v549_v50  ;;  %v309_v49 = vld [vmem:[%s3341_s29 + $0x450] sm:$0xff]  ;;  %v260_v50 = vld [vmem:[%s3341_s29 + $0x2c8] sm:$0xff] }
  0xc8   : > { %1202 = vmatprep.mubr.f32.mxu0 %v265_v51  ;;  %1682 = vmatprep.mubr.f32.mxu1 %v553_v52  ;;  %v313_v51 = vld [vmem:[%s3341_s29 + $0x470] sm:$0xff]  ;;  %v263_v52 = vld [vmem:[%s3341_s29 + $0x2e0] sm:$0xff] }
  0xcb   : > { %1203 = vmatmul.mubr.f32.gmra.mrb[62].mxu0 %v264_v53  ;;  %1683 = vmatmul.mubr.f32.gmra.mrb[62].mxu1 %v552_v54  ;;  %v312_v53 = vld [vmem:[%s3341_s29 + $0x468] sm:$0xff]  ;;  %v266_v54 = vld [vmem:[%s3341_s29 + $0x2f8] sm:$0xff] }
  0xcc   : > { %1207 = vmatprep.mubr.f32.mxu0 %v268_v55  ;;  %2985 = vmatprep.mubr.msk.f32.mxu1 %vm598_vm0, %v173_v56  ;;  %v316_v55 = vld [vmem:[%s3341_s29 + $0x488] sm:$0xff]  ;;  %v269_v56 = vld [vmem:[%s3341_s29 + $0x310] sm:$0xff] }
  0xcf   : > { %1208 = vmatmul.mubr.f32.gmra.mrb[64].mxu0 %v267_v57  ;;  %2986 = vmatmul.mubr.msk.f32.vlgmr.msra.gmra.mrb[64].mxu1 %vm598_vm0, %v176_v58  ;;  %v315_v57 = vld [vmem:[%s3341_s29 + $0x480] sm:$0xff]  ;;  %v272_v58 = vld [vmem:[%s3341_s29 + $0x328] sm:$0xff] }
  0xd0   : > { %1212 = vmatprep.mubr.f32.mxu0 %v271_v59  ;;  %2988 = vmatprep.mubr.msk.f32.mxu1 %vm598_vm0, %v179_v60  ;;  %v319_v59 = vld [vmem:[%s3341_s29 + $0x4a0] sm:$0xff] }
  0xd1   : > { %v275_v60 = vld [vmem:[%s3341_s29 + $0x340] sm:$0xff] }
  0xd3   : > { %1213 = vmatmul.mubr.f32.gmra.mrb[66].mxu0 %v270_v61  ;;  %2989 = vmatmul.mubr.msk.f32.gmra.mrb[66].mxu1 %vm598_vm0, %v182_v62  ;;  %v318_v61 = vld [vmem:[%s3341_s29 + $0x498] sm:$0xff] }
  0xd4   : > { %1217 = vmatprep.mubr.f32.mxu0 %v274_v63  ;;  %2991 = vmatprep.mubr.msk.f32.mxu1 %vm598_vm0, %v185_v0  ;;  %v278_v62 = vld [vmem:[%s3341_s29 + $0x358] sm:$0xff]  ;;  %v281_v0 = vld [vmem:[%s3341_s29 + $0x370] sm:$0xff] }
  0xd5   : > { %v322_v63 = vld [vmem:[%s3341_s29 + $0x4b8] sm:$0xff] }
  0xd7   : > { %1218 = vmatmul.mubr.f32.gmra.mrb[68].mxu0 %v273_v1  ;;  %2992 = vmatmul.mubr.msk.f32.gmra.mrb[68].mxu1 %vm598_vm0, %v188_v2  ;;  %v321_v1 = vld [vmem:[%s3341_s29 + $0x4b0] sm:$0xff]  ;;  %v284_v2 = vld [vmem:[%s3341_s29 + $0x388] sm:$0xff] }
  0xd8   : > { %1222 = vmatprep.mubr.f32.mxu0 %v277_v3  ;;  %2994 = vmatprep.mubr.msk.f32.mxu1 %vm598_vm0, %v191_v4  ;;  %v325_v3 = vld [vmem:[%s3341_s29 + $0x4d0] sm:$0xff]  ;;  %v287_v4 = vld [vmem:[%s3341_s29 + $0x3a0] sm:$0xff] }
  0xdb   : > { %1223 = vmatmul.mubr.f32.gmra.mrb[70].mxu0 %v276_v5  ;;  %2995 = vmatmul.mubr.msk.f32.gmra.mrb[70].mxu1 %vm598_vm0, %v194_v6  ;;  %v324_v5 = vld [vmem:[%s3341_s29 + $0x4c8] sm:$0xff]  ;;  %v290_v6 = vld [vmem:[%s3341_s29 + $0x3b8] sm:$0xff] }
  0xdc   : > { %1227 = vmatprep.mubr.f32.mxu0 %v280_v7  ;;  %2997 = vmatprep.mubr.msk.f32.mxu1 %vm598_vm0, %v197_v8  ;;  %v328_v7 = vld [vmem:[%s3341_s29 + $0x4e8] sm:$0xff]  ;;  %v293_v8 = vld [vmem:[%s3341_s29 + $0x3d0] sm:$0xff] }
  0xdf   : > { %1228 = vmatmul.mubr.f32.gmra.mrb[72].mxu0 %v279_v9  ;;  %2998 = vmatmul.mubr.msk.f32.gmra.mrb[72].mxu1 %vm598_vm0, %v200_v10  ;;  %v327_v9 = vld [vmem:[%s3341_s29 + $0x4e0] sm:$0xff]  ;;  %v296_v10 = vld [vmem:[%s3341_s29 + $0x3e8] sm:$0xff] }
  0xe0   : > { %1232 = vmatprep.mubr.f32.mxu0 %v283_v11  ;;  %3000 = vmatprep.mubr.msk.f32.mxu1 %vm598_vm0, %v203_v12  ;;  %v331_v11 = vld [vmem:[%s3341_s29 + $0x500] sm:$0xff] }
  0xe1   : > { %v299_v12 = vld [vmem:[%s3341_s29 + $0x400] sm:$0xff] }
  0xe3   : > { %1233 = vmatmul.mubr.f32.gmra.mrb[74].mxu0 %v282_v13  ;;  %3001 = vmatmul.mubr.msk.f32.gmra.mrb[74].mxu1 %vm598_vm0, %v206_v14  ;;  %v330_v13 = vld [vmem:[%s3341_s29 + $0x4f8] sm:$0xff] }
  0xe4   : > { %1237 = vmatprep.mubr.f32.mxu0 %v286_v15  ;;  %3003 = vmatprep.mubr.msk.f32.mxu1 %vm598_vm0, %v209_v16  ;;  %v302_v14 = vld [vmem:[%s3341_s29 + $0x418] sm:$0xff]  ;;  %v305_v16 = vld [vmem:[%s3341_s29 + $0x430] sm:$0xff] }
  0xe5   : > { %v334_v15 = vld [vmem:[%s3341_s29 + $0x518] sm:$0xff] }
  0xe7   : > { %1238 = vmatmul.mubr.f32.gmra.mrb[76].mxu0 %v285_v17  ;;  %3004 = vmatmul.mubr.msk.f32.gmra.mrb[76].mxu1 %vm598_vm0, %v212_v18 }
  0xe8   : > { %1242 = vmatprep.mubr.f32.mxu0 %v289_v19  ;;  %3006 = vmatprep.mubr.msk.f32.mxu1 %vm598_vm0, %v215_v20 }
  0xeb   : > { %1243 = vmatmul.mubr.f32.gmra.mrb[78].mxu0 %v288_v21  ;;  %3007 = vmatmul.mubr.msk.f32.gmra.mrb[78].mxu1 %vm598_vm0, %v218_v22  ;;  %v333_v21 = vld [vmem:[%s3341_s29 + $0x510] sm:$0xff]  ;;  %v308_v22 = vld [vmem:[%s3341_s29 + $0x448] sm:$0xff] }
  0xec   : > { %1247 = vmatprep.mubr.f32.mxu0 %v292_v23  ;;  %3009 = vmatprep.mubr.msk.f32.mxu1 %vm598_vm0, %v221_v24  ;;  %v337_v23 = vld [vmem:[%s3341_s29 + $0x530] sm:$0xff]  ;;  %v311_v24 = vld [vmem:[%s3341_s29 + $0x460] sm:$0xff] }
  0xef   : > { %1248 = vmatmul.mubr.f32.gmra.mrb[80].mxu0 %v291_v25  ;;  %3010 = vmatmul.mubr.msk.f32.gmra.mrb[80].mxu1 %vm598_vm0, %v224_v26 }
  0xf0   : > { %1252 = vmatprep.mubr.f32.mxu0 %v295_v27  ;;  %3012 = vmatprep.mubr.msk.f32.mxu1 %vm598_vm0, %v227_v28 }
  0xf3   : > { %1253 = vmatmul.mubr.f32.gmra.mrb[82].mxu0 %v294_v29  ;;  %3013 = vmatmul.mubr.msk.f32.gmra.mrb[82].mxu1 %vm598_vm0, %v230_v30  ;;  %v336_v29 = vld [vmem:[%s3341_s29 + $0x528] sm:$0xff]  ;;  %v314_v30 = vld [vmem:[%s3341_s29 + $0x478] sm:$0xff] }
  0xf4   : > { %1257 = vmatprep.mubr.f32.mxu0 %v298_v31  ;;  %3015 = vmatprep.mubr.msk.f32.mxu1 %vm598_vm0, %v233_v32  ;;  %v340_v31 = vld [vmem:[%s3341_s29 + $0x548] sm:$0xff]  ;;  %v317_v32 = vld [vmem:[%s3341_s29 + $0x490] sm:$0xff] }
  0xf7   : > { %1258 = vmatmul.mubr.f32.gmra.mrb[84].mxu0 %v297_v33  ;;  %3016 = vmatmul.mubr.msk.f32.gmra.mrb[84].mxu1 %vm598_vm0, %v236_v34 }
  0xf8   : > { %1262 = vmatprep.mubr.f32.mxu0 %v301_v35  ;;  %3018 = vmatprep.mubr.msk.f32.mxu1 %vm598_vm0, %v239_v36 }
  0xfb   : > { %1263 = vmatmul.mubr.f32.gmra.mrb[86].mxu0 %v300_v37  ;;  %3019 = vmatmul.mubr.msk.f32.gmra.mrb[86].mxu1 %vm598_vm0, %v242_v38  ;;  %v339_v37 = vld [vmem:[%s3341_s29 + $0x540] sm:$0xff]  ;;  %v320_v38 = vld [vmem:[%s3341_s29 + $0x4a8] sm:$0xff] }
  0xfc   : > { %1267 = vmatprep.mubr.f32.mxu0 %v304_v39  ;;  %3021 = vmatprep.mubr.msk.f32.mxu1 %vm598_vm0, %v245_v40  ;;  %v343_v39 = vld [vmem:[%s3341_s29 + $0x560] sm:$0xff] }
  0xfd   : > { %v323_v40 = vld [vmem:[%s3341_s29 + $0x4c0] sm:$0xff] }
  0xff   : > { %1268 = vmatmul.mubr.f32.gmra.mrb[88].mxu0 %v303_v41  ;;  %3022 = vmatmul.mubr.msk.f32.gmra.mrb[88].mxu1 %vm598_vm0, %v248_v42 }
 0x100   : > { %1272 = vmatprep.mubr.f32.mxu0 %v307_v43  ;;  %3024 = vmatprep.mubr.msk.f32.mxu1 %vm598_vm0, %v251_v44 }
 0x103   : > { %1273 = vmatmul.mubr.f32.gmra.mrb[90].mxu0 %v306_v45  ;;  %3025 = vmatmul.mubr.msk.f32.gmra.mrb[90].mxu1 %vm598_vm0, %v254_v46  ;;  %v342_v45 = vld [vmem:[%s3341_s29 + $0x558] sm:$0xff] }
 0x104   : > { %1277 = vmatprep.mubr.f32.mxu0 %v310_v47  ;;  %3027 = vmatprep.mubr.msk.f32.mxu1 %vm598_vm0, %v257_v48  ;;  %v326_v46 = vld [vmem:[%s3341_s29 + $0x4d8] sm:$0xff]  ;;  %v329_v48 = vld [vmem:[%s3341_s29 + $0x4f0] sm:$0xff] }
 0x105   : > { %v346_v47 = vld [vmem:[%s3341_s29 + $0x578] sm:$0xff] }
 0x107   : > { %1278 = vmatmul.mubr.f32.gmra.mrb[92].mxu0 %v309_v49  ;;  %3028 = vmatmul.mubr.msk.f32.gmra.mrb[92].mxu1 %vm598_vm0, %v260_v50 }
 0x108   : > { %1282 = vmatprep.mubr.f32.mxu0 %v313_v51  ;;  %3030 = vmatprep.mubr.msk.f32.mxu1 %vm598_vm0, %v263_v52 }
 0x10b   : > { %1283 = vmatmul.mubr.f32.gmra.mrb[94].mxu0 %v312_v53  ;;  %3031 = vmatmul.mubr.msk.f32.gmra.mrb[94].mxu1 %vm598_vm0, %v266_v54  ;;  %v345_v53 = vld [vmem:[%s3341_s29 + $0x570] sm:$0xff]  ;;  %v332_v54 = vld [vmem:[%s3341_s29 + $0x508] sm:$0xff] }
 0x10c   : > { %1287 = vmatprep.mubr.f32.mxu0 %v316_v55  ;;  %3033 = vmatprep.mubr.msk.f32.mxu1 %vm598_vm0, %v269_v56  ;;  %v349_v55 = vld [vmem:[%s3341_s29 + $0x590] sm:$0xff]  ;;  %v335_v56 = vld [vmem:[%s3341_s29 + $0x520] sm:$0xff] }
 0x10f   : > { %1288 = vmatmul.mubr.f32.gmra.mrb[96].mxu0 %v315_v57  ;;  %3034 = vmatmul.mubr.msk.f32.gmra.mrb[96].mxu1 %vm598_vm0, %v272_v58 }
 0x110   : > { %1292 = vmatprep.mubr.f32.mxu0 %v319_v59  ;;  %3036 = vmatprep.mubr.msk.f32.mxu1 %vm598_vm0, %v275_v60 }
 0x113   : > { %1293 = vmatmul.mubr.f32.gmra.mrb[98].mxu0 %v318_v61  ;;  %3037 = vmatmul.mubr.msk.f32.gmra.mrb[98].mxu1 %vm598_vm0, %v278_v62  ;;  %v348_v61 = vld [vmem:[%s3341_s29 + $0x588] sm:$0xff]  ;;  %v338_v62 = vld [vmem:[%s3341_s29 + $0x538] sm:$0xff] }
 0x114   : > { %1297 = vmatprep.mubr.f32.mxu0 %v322_v63  ;;  %3039 = vmatprep.mubr.msk.f32.mxu1 %vm598_vm0, %v281_v0  ;;  %v352_v63 = vld [vmem:[%s3341_s29 + $0x5a8] sm:$0xff]  ;;  %v341_v0 = vld [vmem:[%s3341_s29 + $0x550] sm:$0xff] }
 0x117   : > { %1298 = vmatmul.mubr.f32.gmra.mrb[100].mxu0 %v321_v1  ;;  %3040 = vmatmul.mubr.msk.f32.gmra.mrb[100].mxu1 %vm598_vm0, %v284_v2 }
 0x118   : > { %1302 = vmatprep.mubr.f32.mxu0 %v325_v3  ;;  %3042 = vmatprep.mubr.msk.f32.mxu1 %vm598_vm0, %v287_v4 }
 0x11b   : > { %1303 = vmatmul.mubr.f32.gmra.mrb[102].mxu0 %v324_v5  ;;  %3043 = vmatmul.mubr.msk.f32.gmra.mrb[102].mxu1 %vm598_vm0, %v290_v6  ;;  %v351_v5 = vld [vmem:[%s3341_s29 + $0x5a0] sm:$0xff]  ;;  %v344_v6 = vld [vmem:[%s3341_s29 + $0x568] sm:$0xff] }
 0x11c   : > { %1307 = vmatprep.mubr.f32.mxu0 %v328_v7  ;;  %3045 = vmatprep.mubr.msk.f32.mxu1 %vm598_vm0, %v293_v8  ;;  %v355_v7 = vld [vmem:[%s3341_s29 + $0x5c0] sm:$0xff] }
 0x11d   : > { %v347_v8 = vld [vmem:[%s3341_s29 + $0x580] sm:$0xff] }
 0x11f   : > { %1308 = vmatmul.mubr.f32.gmra.mrb[104].mxu0 %v327_v9  ;;  %3046 = vmatmul.mubr.msk.f32.gmra.mrb[104].mxu1 %vm598_vm0, %v296_v10 }
 0x120   : > { %1312 = vmatprep.mubr.f32.mxu0 %v331_v11  ;;  %3048 = vmatprep.mubr.msk.f32.mxu1 %vm598_vm0, %v299_v12 }
 0x122   : > { %v3722_v17 = vpop.f32.mrb[0].mxu0  ;;  %v3724_v18 = vpop.f32.mrb[0].mxu1 }
 0x123   : > { %4767 = vst [vmem:[#allocation2_spill] sm:$0xff] %v3724_v18  ;;  %v1051_v19 = vpop.f32.mrb[1].mxu0  ;;  %1313 = vmatmul.mubr.f32.gmra.mrb[106].mxu0 %v330_v13  ;;  %v1531_v20 = vpop.f32.mrb[1].mxu1  ;;  %3049 = vmatmul.mubr.msk.f32.gmra.mrb[106].mxu1 %vm598_vm0, %v302_v14  ;;  %v354_v13 = vld [vmem:[%s3341_s29 + $0x5b8] sm:$0xff] }
 0x124   : > { %1317 = vmatprep.mubr.f32.mxu0 %v334_v15  ;;  %3051 = vmatprep.mubr.msk.f32.mxu1 %vm598_vm0, %v305_v16  ;;  %v350_v14 = vld [vmem:[%s3341_s29 + $0x598] sm:$0xff]  ;;  %v353_v16 = vld [vmem:[%s3341_s29 + $0x5b0] sm:$0xff] }
 0x125   : > { %v358_v15 = vld [vmem:[%s3341_s29 + $0x5d8] sm:$0xff] }
 0x126   : > { %v3732_v25 = vpop.f32.mrb[2].mxu0  ;;  %v3734_v26 = vpop.f32.mrb[2].mxu1 }
 0x127   : > { %4768 = vst [vmem:[#allocation3_spill] sm:$0xff] %v3734_v26  ;;  %v1056_v27 = vpop.f32.mrb[3].mxu0  ;;  %1318 = vmatmul.mubr.f32.gmra.mrb[108].mxu0 %v333_v21  ;;  %v1536_v28 = vpop.f32.mrb[3].mxu1  ;;  %3052 = vmatmul.mubr.msk.f32.gmra.mrb[108].mxu1 %vm598_vm0, %v308_v22 }
 0x128   : > { %1322 = vmatprep.mubr.f32.mxu0 %v337_v23  ;;  %3054 = vmatprep.mubr.msk.f32.mxu1 %vm598_vm0, %v311_v24  ;;  %v357_v23 = vld [vmem:[%s3341_s29 + $0x5d0] sm:$0xff]  ;;  %v356_v24 = vld [vmem:[%s3341_s29 + $0x5c8] sm:$0xff]  ;;  %v359_v28 = vld [vmem:[%s3341_s29 + $0x5e0] sm:$0xff] }
 0x129   : > { %v361_v27 = vld [vmem:[%s3341_s29 + $0x5f0] sm:$0xff] }
 0x12a   : > { %v3742_v33 = vpop.f32.mrb[4].mxu0  ;;  %v3744_v34 = vpop.f32.mrb[4].mxu1 }
 0x12b   : > { %4769 = vst [vmem:[#allocation4_spill] sm:$0xff] %v3744_v34  ;;  %v1061_v35 = vpop.f32.mrb[5].mxu0  ;;  %1323 = vmatmul.mubr.f32.gmra.mrb[110].mxu0 %v336_v29  ;;  %v1541_v36 = vpop.f32.mrb[5].mxu1  ;;  %3055 = vmatmul.mubr.msk.f32.gmra.mrb[110].mxu1 %vm598_vm0, %v314_v30 }
 0x12c   : > { %1327 = vmatprep.mubr.f32.mxu0 %v340_v31  ;;  %3057 = vmatprep.mubr.msk.f32.mxu1 %vm598_vm0, %v317_v32  ;;  %v360_v35 = vld [vmem:[%s3341_s29 + $0x5e8] sm:$0xff]  ;;  %v362_v36 = vld [vmem:[%s3341_s29 + $0x5f8] sm:$0xff] }
 0x12e   : > { %v3752_v41 = vpop.f32.mrb[6].mxu0  ;;  %v3754_v42 = vpop.f32.mrb[6].mxu1 }
 0x12f   : > { %4770 = vst [vmem:[#allocation5_spill] sm:$0xff] %v3754_v42  ;;  %v1066_v43 = vpop.f32.mrb[7].mxu0  ;;  %1328 = vmatmul.mubr.f32.gmra.mrb[112].mxu0 %v339_v37  ;;  %v1546_v44 = vpop.f32.mrb[7].mxu1  ;;  %3058 = vmatmul.mubr.msk.f32.gmra.mrb[112].mxu1 %vm598_vm0, %v320_v38  ;;  %v364_v37 = vld [vmem:[%s3341_s29 + $0x608] sm:$0xff]  ;;  %v365_v38 = vld [vmem:[%s3341_s29 + $0x610] sm:$0xff] }
 0x130   : > { %1332 = vmatprep.mubr.f32.mxu0 %v343_v39  ;;  %3060 = vmatprep.mubr.msk.f32.mxu1 %vm598_vm0, %v323_v40 }
 0x132   : > { %v3762_v49 = vpop.f32.mrb[8].mxu0  ;;  %v3764_v50 = vpop.f32.mrb[8].mxu1 }
 0x133   : > { %4771 = vst [vmem:[#allocation6_spill] sm:$0xff] %v3764_v50  ;;  %v1071_v51 = vpop.f32.mrb[9].mxu0  ;;  %1333 = vmatmul.mubr.f32.gmra.mrb[114].mxu0 %v342_v45  ;;  %v1551_v52 = vpop.f32.mrb[9].mxu1  ;;  %3061 = vmatmul.mubr.msk.f32.gmra.mrb[114].mxu1 %vm598_vm0, %v326_v46  ;;  %v363_v45 = vld [vmem:[%s3341_s29 + $0x600] sm:$0xff]  ;;  %v368_v46 = vld [vmem:[%s3341_s29 + $0x628] sm:$0xff] }
 0x134   : > { %1337 = vmatprep.mubr.f32.mxu0 %v346_v47  ;;  %3063 = vmatprep.mubr.msk.f32.mxu1 %vm598_vm0, %v329_v48  ;;  %v367_v47 = vld [vmem:[%s3341_s29 + $0x620] sm:$0xff] }
 0x135   : > { %v371_v48 = vld [vmem:[%s3341_s29 + $0x640] sm:$0xff] }
 0x136   : > { %v3772_v57 = vpop.f32.mrb[10].mxu0  ;;  %v3774_v58 = vpop.f32.mrb[10].mxu1 }
 0x137   : > { %4772 = vst [vmem:[#allocation7_spill] sm:$0xff] %v3774_v58  ;;  %v1076_v59 = vpop.f32.mrb[11].mxu0  ;;  %1338 = vmatmul.mubr.f32.gmra.mrb[116].mxu0 %v345_v53  ;;  %v1556_v60 = vpop.f32.mrb[11].mxu1  ;;  %3064 = vmatmul.mubr.msk.f32.gmra.mrb[116].mxu1 %vm598_vm0, %v332_v54 }
 0x138   : > { %1342 = vmatprep.mubr.f32.mxu0 %v349_v55  ;;  %3066 = vmatprep.mubr.msk.f32.mxu1 %vm598_vm0, %v335_v56  ;;  %v366_v55 = vld [vmem:[%s3341_s29 + $0x618] sm:$0xff]  ;;  %v377_v60 = vld [vmem:[%s3341_s29 + $0x670] sm:$0xff] }
 0x139   : > { %v374_v56 = vld [vmem:[%s3341_s29 + $0x658] sm:$0xff] }
 0x13a   : > { %v3782_v1 = vpop.f32.mrb[12].mxu0  ;;  %v3784_v2 = vpop.f32.mrb[12].mxu1  ;;  %v370_v59 = vld [vmem:[%s3341_s29 + $0x638] sm:$0xff] }
 0x13b   : > { %4773 = vst [vmem:[#allocation8_spill] sm:$0xff] %v3784_v2  ;;  %v1081_v3 = vpop.f32.mrb[13].mxu0  ;;  %1343 = vmatmul.mubr.f32.gmra.mrb[118].mxu0 %v348_v61  ;;  %v1561_v4 = vpop.f32.mrb[13].mxu1  ;;  %3067 = vmatmul.mubr.msk.f32.gmra.mrb[118].mxu1 %vm598_vm0, %v338_v62 }
 0x13c   : > { %1347 = vmatprep.mubr.f32.mxu0 %v352_v63  ;;  %3069 = vmatprep.mubr.msk.f32.mxu1 %vm598_vm0, %v341_v0  ;;  %v369_v3 = vld [vmem:[%s3341_s29 + $0x630] sm:$0xff]  ;;  %v380_v4 = vld [vmem:[%s3341_s29 + $0x688] sm:$0xff] }
 0x13e   : > { %v3792_v9 = vpop.f32.mrb[14].mxu0  ;;  %v3794_v10 = vpop.f32.mrb[14].mxu1 }
 0x13f   : > { %4774 = vst [vmem:[#allocation9_spill] sm:$0xff] %v3794_v10  ;;  %v1086_v11 = vpop.f32.mrb[15].mxu0  ;;  %1348 = vmatmul.mubr.f32.gmra.mrb[120].mxu0 %v351_v5  ;;  %v1566_v12 = vpop.f32.mrb[15].mxu1  ;;  %3070 = vmatmul.mubr.msk.f32.gmra.mrb[120].mxu1 %vm598_vm0, %v344_v6  ;;  %v373_v5 = vld [vmem:[%s3341_s29 + $0x650] sm:$0xff]  ;;  %v383_v6 = vld [vmem:[%s3341_s29 + $0x6a0] sm:$0xff] }
 0x140   : > { %1352 = vmatprep.mubr.f32.mxu0 %v355_v7  ;;  %3072 = vmatprep.mubr.msk.f32.mxu1 %vm598_vm0, %v347_v8 }
 0x142   : > { %v3802_v19 = vpop.f32.mrb[16].mxu0  ;;  %v3804_v20 = vpop.f32.mrb[16].mxu1 }
 0x143   : > { %4775 = vst [vmem:[#allocation10_spill] sm:$0xff] %v3804_v20  ;;  %v1091_v21 = vpop.f32.mrb[17].mxu0  ;;  %1353 = vmatmul.mubr.f32.gmra.mrb[122].mxu0 %v354_v13  ;;  %v1571_v22 = vpop.f32.mrb[17].mxu1  ;;  %3073 = vmatmul.mubr.msk.f32.gmra.mrb[122].mxu1 %vm598_vm0, %v350_v14  ;;  %v372_v13 = vld [vmem:[%s3341_s29 + $0x648] sm:$0xff]  ;;  %v386_v14 = vld [vmem:[%s3341_s29 + $0x6b8] sm:$0xff]  ;;  %v457_v20 = vld [vmem:[%s3341_s29 + $0x8f0] sm:$0xff] }
 0x144   : > { %1357 = vmatprep.mubr.f32.mxu0 %v358_v15  ;;  %3075 = vmatprep.mubr.msk.f32.mxu1 %vm598_vm0, %v353_v16  ;;  %v376_v15 = vld [vmem:[%s3341_s29 + $0x668] sm:$0xff]  ;;  %v389_v16 = vld [vmem:[%s3341_s29 + $0x6d0] sm:$0xff] }
 0x146   : > { %v3812_v29 = vpop.f32.mrb[18].mxu0  ;;  %v3814_v30 = vpop.f32.mrb[18].mxu1 }
 0x147   : > { %4776 = vst [vmem:[#allocation11_spill] sm:$0xff] %v3814_v30  ;;  %v1096_v31 = vpop.f32.mrb[19].mxu0  ;;  %1358 = vmatmul.mubr.f32.gmra.mrb[124].mxu0 %v357_v23  ;;  %v1576_v32 = vpop.f32.mrb[19].mxu1  ;;  %3076 = vmatmul.mubr.msk.f32.gmra.mrb[124].mxu1 %vm598_vm0, %v356_v24 }
 0x148   : > { %1362 = vmatprep.mubr.f32.mxu0 %v361_v27  ;;  %3078 = vmatprep.mubr.msk.f32.mxu1 %vm598_vm0, %v359_v28  ;;  %v375_v27 = vld [vmem:[%s3341_s29 + $0x660] sm:$0xff]  ;;  %v392_v28 = vld [vmem:[%s3341_s29 + $0x6e8] sm:$0xff] }
 0x149   : > { %v379_v31 = vld [vmem:[%s3341_s29 + $0x680] sm:$0xff] }
 0x14a   : > { %v3822_v39 = vpop.f32.mrb[20].mxu0  ;;  %v3824_v40 = vpop.f32.mrb[20].mxu1  ;;  %v395_v32 = vld [vmem:[%s3341_s29 + $0x700] sm:$0xff] }
 0x14b   : > { %4777 = vst [vmem:[#allocation12_spill] sm:$0xff] %v3824_v40  ;;  %v1101_v43 = vpop.f32.mrb[21].mxu0  ;;  %1363 = vmatmul.mubr.f32.gmra.mrb[126].mxu0 %v360_v35  ;;  %v1581_v44 = vpop.f32.mrb[21].mxu1  ;;  %3079 = vmatmul.mubr.msk.f32.gmra.mrb[126].mxu1 %vm598_vm0, %v362_v36  ;;  %v451_v40 = vld [vmem:[%s3341_s29 + $0x8c0] sm:$0xff] }
 0x14c   : > { %1367 = vmatprep.mubr.f32.mxu0 %v364_v37  ;;  %3081 = vmatprep.mubr.msk.f32.mxu1 %vm598_vm0, %v365_v38  ;;  %v378_v43 = vld [vmem:[%s3341_s29 + $0x678] sm:$0xff] }
 0x14d   : > { %v398_v44 = vld [vmem:[%s3341_s29 + $0x718] sm:$0xff] }
 0x14e   : > { %v3832_v51 = vpop.f32.mrb[22].mxu0  ;;  %v3834_v52 = vpop.f32.mrb[22].mxu1 }
 0x14f   : > { %4778 = vst [vmem:[#allocation13_spill] sm:$0xff] %v3834_v52  ;;  %v1106_v53 = vpop.f32.mrb[23].mxu0  ;;  %1368 = vmatmul.mubr.f32.gmra.mrb[128].mxu0 %v363_v45  ;;  %v1586_v54 = vpop.f32.mrb[23].mxu1  ;;  %3082 = vmatmul.mubr.msk.f32.gmra.mrb[128].mxu1 %vm598_vm0, %v368_v46  ;;  %v382_v45 = vld [vmem:[%s3341_s29 + $0x698] sm:$0xff]  ;;  %v401_v46 = vld [vmem:[%s3341_s29 + $0x730] sm:$0xff] }
 0x150   : > { %1372 = vmatprep.mubr.f32.mxu0 %v367_v47  ;;  %3084 = vmatprep.mubr.msk.f32.mxu1 %vm598_vm0, %v371_v48  ;;  %v454_v52 = vld [vmem:[%s3341_s29 + $0x8d8] sm:$0xff] }
 0x152   : > { %v3842_v61 = vpop.f32.mrb[24].mxu0  ;;  %v3844_v62 = vpop.f32.mrb[24].mxu1 }
 0x153   : > { %4779 = vst [vmem:[#allocation14_spill] sm:$0xff] %v3844_v62  ;;  %v1111_v63 = vpop.f32.mrb[25].mxu0  ;;  %1373 = vmatmul.mubr.f32.gmra.mrb[130].mxu0 %v366_v55  ;;  %v1591_v0 = vpop.f32.mrb[25].mxu1  ;;  %3085 = vmatmul.mubr.msk.f32.gmra.mrb[130].mxu1 %vm598_vm0, %v374_v56  ;;  %v381_v55 = vld [vmem:[%s3341_s29 + $0x690] sm:$0xff]  ;;  %v404_v56 = vld [vmem:[%s3341_s29 + $0x748] sm:$0xff] }
 0x154   : > { %1377 = vmatprep.mubr.f32.mxu0 %v370_v59  ;;  %3087 = vmatprep.mubr.msk.f32.mxu1 %vm598_vm0, %v377_v60  ;;  %v385_v59 = vld [vmem:[%s3341_s29 + $0x6b0] sm:$0xff]  ;;  %v407_v60 = vld [vmem:[%s3341_s29 + $0x760] sm:$0xff] }
 0x155   : > { %v445_v62 = vld [vmem:[%s3341_s29 + $0x890] sm:$0xff] }
 0x156   : > { %v3852_v7 = vpop.f32.mrb[26].mxu0  ;;  %v3854_v8 = vpop.f32.mrb[26].mxu1 }
 0x157   : > { %4780 = vst [vmem:[#allocation15_spill] sm:$0xff] %v3854_v8  ;;  %v1116_v11 = vpop.f32.mrb[27].mxu0  ;;  %1378 = vmatmul.mubr.f32.gmra.mrb[132].mxu0 %v369_v3  ;;  %v1596_v12 = vpop.f32.mrb[27].mxu1  ;;  %3088 = vmatmul.mubr.msk.f32.gmra.mrb[132].mxu1 %vm598_vm0, %v380_v4  ;;  %v448_v8 = vld [vmem:[%s3341_s29 + $0x8a8] sm:$0xff] }
 0x158   : > { %1382 = vmatprep.mubr.f32.mxu0 %v373_v5  ;;  %3090 = vmatprep.mubr.msk.f32.mxu1 %vm598_vm0, %v383_v6  ;;  %v384_v5 = vld [vmem:[%s3341_s29 + $0x6a8] sm:$0xff]  ;;  %v410_v6 = vld [vmem:[%s3341_s29 + $0x778] sm:$0xff]  ;;  %v413_v12 = vld [vmem:[%s3341_s29 + $0x790] sm:$0xff] }
 0x159   : > { %v388_v11 = vld [vmem:[%s3341_s29 + $0x6c8] sm:$0xff] }
 0x15a   : > { %v3862_v21 = vpop.f32.mrb[28].mxu0  ;;  %v3864_v22 = vpop.f32.mrb[28].mxu1 }
 0x15b   : > { %4781 = vst [vmem:[#allocation16_spill] sm:$0xff] %v3864_v22  ;;  %v1121_v23 = vpop.f32.mrb[29].mxu0  ;;  %1383 = vmatmul.mubr.f32.gmra.mrb[134].mxu0 %v372_v13  ;;  %v1601_v24 = vpop.f32.mrb[29].mxu1  ;;  %3091 = vmatmul.mubr.msk.f32.gmra.mrb[134].mxu1 %vm598_vm0, %v386_v14  ;;  %v439_v22 = vld [vmem:[%s3341_s29 + $0x860] sm:$0xff] }
 0x15c   : > { %1387 = vmatprep.mubr.f32.mxu0 %v376_v15  ;;  %3093 = vmatprep.mubr.msk.f32.mxu1 %vm598_vm0, %v389_v16  ;;  %v387_v23 = vld [vmem:[%s3341_s29 + $0x6c0] sm:$0xff]  ;;  %v416_v24 = vld [vmem:[%s3341_s29 + $0x7a8] sm:$0xff] }
 0x15e   : > { %v3872_v35 = vpop.f32.mrb[30].mxu0  ;;  %v3874_v36 = vpop.f32.mrb[30].mxu1 }
 0x15f   : > { %4782 = vst [vmem:[#allocation17_spill] sm:$0xff] %v3874_v36  ;;  %v1126_v37 = vpop.f32.mrb[31].mxu0  ;;  %1388 = vmatmul.mubr.f32.gmra.mrb[136].mxu0 %v375_v27  ;;  %v1606_v38 = vpop.f32.mrb[31].mxu1  ;;  %3094 = vmatmul.mubr.msk.f32.gmra.mrb[136].mxu1 %vm598_vm0, %v392_v28  ;;  %v391_v27 = vld [vmem:[%s3341_s29 + $0x6e0] sm:$0xff]  ;;  %v442_v36 = vld [vmem:[%s3341_s29 + $0x878] sm:$0xff] }
 0x160   : > { %1392 = vmatprep.mubr.f32.mxu0 %v379_v31  ;;  %3096 = vmatprep.mubr.msk.f32.mxu1 %vm598_vm0, %v395_v32  ;;  %v419_v28 = vld [vmem:[%s3341_s29 + $0x7c0] sm:$0xff] }
 0x162   : > { %v3882_v47 = vpop.f32.mrb[32].mxu0  ;;  %v3884_v48 = vpop.f32.mrb[32].mxu1 }
 0x163   : > { %4783 = vst [vmem:[#allocation18_spill] sm:$0xff] %v3884_v48  ;;  %v1131_v53 = vpop.f32.mrb[33].mxu0  ;;  %1393 = vmatmul.mubr.f32.gmra.mrb[138].mxu0 %v378_v43  ;;  %v1611_v54 = vpop.f32.mrb[33].mxu1  ;;  %3097 = vmatmul.mubr.msk.f32.gmra.mrb[138].mxu1 %vm598_vm0, %v398_v44  ;;  %v390_v43 = vld [vmem:[%s3341_s29 + $0x6d8] sm:$0xff]  ;;  %v433_v48 = vld [vmem:[%s3341_s29 + $0x830] sm:$0xff] }
 0x164   : > { %1397 = vmatprep.mubr.f32.mxu0 %v382_v45  ;;  %3099 = vmatprep.mubr.msk.f32.mxu1 %vm598_vm0, %v401_v46  ;;  %v422_v44 = vld [vmem:[%s3341_s29 + $0x7d8] sm:$0xff]  ;;  %v425_v46 = vld [vmem:[%s3341_s29 + $0x7f0] sm:$0xff] }
 0x165   : > { %v394_v45 = vld [vmem:[%s3341_s29 + $0x6f8] sm:$0xff] }
 0x166   : > { %v3892_v63 = vpop.f32.mrb[34].mxu0  ;;  %v3894_v0 = vpop.f32.mrb[34].mxu1 }
 0x167   : > { %4784 = vst [vmem:[#allocation19_spill] sm:$0xff] %v3894_v0  ;;  %v1136_v3 = vpop.f32.mrb[35].mxu0  ;;  %1398 = vmatmul.mubr.f32.gmra.mrb[140].mxu0 %v381_v55  ;;  %v1616_v4 = vpop.f32.mrb[35].mxu1  ;;  %3100 = vmatmul.mubr.msk.f32.gmra.mrb[140].mxu1 %vm598_vm0, %v404_v56  ;;  %v436_v0 = vld [vmem:[%s3341_s29 + $0x848] sm:$0xff] }
 0x168   : > { %1402 = vmatprep.mubr.f32.mxu0 %v385_v59  ;;  %3102 = vmatprep.mubr.msk.f32.mxu1 %vm598_vm0, %v407_v60  ;;  %v393_v59 = vld [vmem:[%s3341_s29 + $0x6f0] sm:$0xff]  ;;  %v428_v60 = vld [vmem:[%s3341_s29 + $0x808] sm:$0xff]  ;;  %v431_v4 = vld [vmem:[%s3341_s29 + $0x820] sm:$0xff] }
 0x169   : > { %v397_v3 = vld [vmem:[%s3341_s29 + $0x710] sm:$0xff] }
 0x16a   : > { %v3902_v13 = vpop.f32.mrb[36].mxu0  ;;  %v3904_v14 = vpop.f32.mrb[36].mxu1 }
 0x16b   : > { %4785 = vst [vmem:[#allocation20_spill] sm:$0xff] %v3904_v14  ;;  %v1141_v15 = vpop.f32.mrb[37].mxu0  ;;  %1403 = vmatmul.mubr.f32.gmra.mrb[142].mxu0 %v384_v5  ;;  %v1621_v16 = vpop.f32.mrb[37].mxu1  ;;  %3103 = vmatmul.mubr.msk.f32.gmra.mrb[142].mxu1 %vm598_vm0, %v410_v6 }
 0x16c   : > { %1407 = vmatprep.mubr.f32.mxu0 %v388_v11  ;;  %3105 = vmatprep.mubr.msk.f32.mxu1 %vm598_vm0, %v413_v12  ;;  %v396_v15 = vld [vmem:[%s3341_s29 + $0x708] sm:$0xff]  ;;  %v434_v16 = vld [vmem:[%s3341_s29 + $0x838] sm:$0xff] }
 0x16e   : > { %v3912_v31 = vpop.f32.mrb[38].mxu0  ;;  %v3914_v32 = vpop.f32.mrb[38].mxu1 }
 0x16f   : > { %4786 = vst [vmem:[#allocation21_spill] sm:$0xff] %v3914_v32  ;;  %v1146_v37 = vpop.f32.mrb[39].mxu0  ;;  %1408 = vmatmul.mubr.f32.gmra.mrb[144].mxu0 %v387_v23  ;;  %v1626_v38 = vpop.f32.mrb[39].mxu1  ;;  %3106 = vmatmul.mubr.msk.f32.gmra.mrb[144].mxu1 %vm598_vm0, %v416_v24  ;;  %v400_v23 = vld [vmem:[%s3341_s29 + $0x728] sm:$0xff]  ;;  %v437_v24 = vld [vmem:[%s3341_s29 + $0x850] sm:$0xff] }
 0x170   : > { %1412 = vmatprep.mubr.f32.mxu0 %v391_v27  ;;  %3108 = vmatprep.mubr.msk.f32.mxu1 %vm598_vm0, %v419_v28  ;;  %v500_v32 = vld [vmem:[%s3341_s29 + $0xa48] sm:$0xff] }
 0x172   : > { %v3922_v53 = vpop.f32.mrb[40].mxu0  ;;  %v3924_v54 = vpop.f32.mrb[40].mxu1 }
 0x173   : > { %4787 = vst [vmem:[#allocation22_spill] sm:$0xff] %v3924_v54  ;;  %v1151_v55 = vpop.f32.mrb[41].mxu0  ;;  %1413 = vmatmul.mubr.f32.gmra.mrb[146].mxu0 %v390_v43  ;;  %v1631_v56 = vpop.f32.mrb[41].mxu1  ;;  %3109 = vmatmul.mubr.msk.f32.gmra.mrb[146].mxu1 %vm598_vm0, %v422_v44  ;;  %v399_v43 = vld [vmem:[%s3341_s29 + $0x720] sm:$0xff]  ;;  %v440_v44 = vld [vmem:[%s3341_s29 + $0x868] sm:$0xff] }
 0x174   : > { %1417 = vmatprep.mubr.f32.mxu0 %v394_v45  ;;  %3111 = vmatprep.mubr.msk.f32.mxu1 %vm598_vm0, %v425_v46  ;;  %v403_v45 = vld [vmem:[%s3341_s29 + $0x740] sm:$0xff] }
 0x175   : > { %v443_v46 = vld [vmem:[%s3341_s29 + $0x880] sm:$0xff] }
 0x176   : > { %v3932_v5 = vpop.f32.mrb[42].mxu0  ;;  %v3934_v6 = vpop.f32.mrb[42].mxu1 }
 0x177   : > { %4788 = vst [vmem:[#allocation23_spill] sm:$0xff] %v3934_v6  ;;  %v1156_v11 = vpop.f32.mrb[43].mxu0  ;;  %1418 = vmatmul.mubr.f32.gmra.mrb[148].mxu0 %v393_v59  ;;  %v1636_v12 = vpop.f32.mrb[43].mxu1  ;;  %3112 = vmatmul.mubr.msk.f32.gmra.mrb[148].mxu1 %vm598_vm0, %v428_v60 }
 0x178   : > { %1422 = vmatprep.mubr.f32.mxu0 %v397_v3  ;;  %3114 = vmatprep.mubr.msk.f32.mxu1 %vm598_vm0, %v431_v4  ;;  %v402_v3 = vld [vmem:[%s3341_s29 + $0x738] sm:$0xff]  ;;  %v449_v12 = vld [vmem:[%s3341_s29 + $0x8b0] sm:$0xff] }
 0x179   : > { %v446_v4 = vld [vmem:[%s3341_s29 + $0x898] sm:$0xff] }
 0x17a   : > { %v3942_v27 = vpop.f32.mrb[44].mxu0  ;;  %v3944_v28 = vpop.f32.mrb[44].mxu1  ;;  %v406_v11 = vld [vmem:[%s3341_s29 + $0x758] sm:$0xff] }
 0x17b   : > { %4789 = vst [vmem:[#allocation24_spill] sm:$0xff] %v3944_v28  ;;  %v1161_v37 = vpop.f32.mrb[45].mxu0  ;;  %1423 = vmatmul.mubr.f32.gmra.mrb[150].mxu0 %v396_v15  ;;  %v1641_v38 = vpop.f32.mrb[45].mxu1  ;;  %3115 = vmatmul.mubr.msk.f32.gmra.mrb[150].mxu1 %vm598_vm0, %v434_v16 }
 0x17c   : > { %1427 = vmatprep.mubr.f32.mxu0 %v400_v23  ;;  %3117 = vmatprep.mubr.msk.f32.mxu1 %vm598_vm0, %v437_v24  ;;  %v405_v37 = vld [vmem:[%s3341_s29 + $0x750] sm:$0xff]  ;;  %v452_v38 = vld [vmem:[%s3341_s29 + $0x8c8] sm:$0xff] }
 0x17e   : > { %v3952_v55 = vpop.f32.mrb[46].mxu0  ;;  %v3954_v56 = vpop.f32.mrb[46].mxu1 }
 0x17f   : > { %4790 = vst [vmem:[#allocation25_spill] sm:$0xff] %v3954_v56  ;;  %v1166_v59 = vpop.f32.mrb[47].mxu0  ;;  %1428 = vmatmul.mubr.f32.gmra.mrb[152].mxu0 %v399_v43  ;;  %v1646_v60 = vpop.f32.mrb[47].mxu1  ;;  %3118 = vmatmul.mubr.msk.f32.gmra.mrb[152].mxu1 %vm598_vm0, %v440_v44  ;;  %v409_v43 = vld [vmem:[%s3341_s29 + $0x770] sm:$0xff]  ;;  %v455_v44 = vld [vmem:[%s3341_s29 + $0x8e0] sm:$0xff] }
 0x180   : > { %1432 = vmatprep.mubr.f32.mxu0 %v403_v45  ;;  %3120 = vmatprep.mubr.msk.f32.mxu1 %vm598_vm0, %v443_v46 }
 0x182   : > { %v3962_v15 = vpop.f32.mrb[48].mxu0  ;;  %v3964_v16 = vpop.f32.mrb[48].mxu1 }
 0x183   : > { %4791 = vst [vmem:[#allocation26_spill] sm:$0xff] %v3964_v16  ;;  %v1171_v23 = vpop.f32.mrb[49].mxu0  ;;  %1433 = vmatmul.mubr.f32.gmra.mrb[154].mxu0 %v402_v3  ;;  %v1651_v24 = vpop.f32.mrb[49].mxu1  ;;  %3121 = vmatmul.mubr.msk.f32.gmra.mrb[154].mxu1 %vm598_vm0, %v446_v4  ;;  %v408_v3 = vld [vmem:[%s3341_s29 + $0x768] sm:$0xff]  ;;  %v458_v4 = vld [vmem:[%s3341_s29 + $0x8f8] sm:$0xff] }
 0x184   : > { %1437 = vmatprep.mubr.f32.mxu0 %v406_v11  ;;  %3123 = vmatprep.mubr.msk.f32.mxu1 %vm598_vm0, %v449_v12  ;;  %v412_v11 = vld [vmem:[%s3341_s29 + $0x788] sm:$0xff]  ;;  %v461_v12 = vld [vmem:[%s3341_s29 + $0x910] sm:$0xff] }
 0x186   : > { %v3972_v45 = vpop.f32.mrb[50].mxu0  ;;  %v3974_v46 = vpop.f32.mrb[50].mxu1 }
 0x187   : > { %4792 = vst [vmem:[#allocation27_spill] sm:$0xff] %v3974_v46  ;;  %v1176_v59 = vpop.f32.mrb[51].mxu0  ;;  %1438 = vmatmul.mubr.f32.gmra.mrb[156].mxu0 %v405_v37  ;;  %v1656_v60 = vpop.f32.mrb[51].mxu1  ;;  %3124 = vmatmul.mubr.msk.f32.gmra.mrb[156].mxu1 %vm598_vm0, %v452_v38  ;;  %v411_v38 = vld [vmem:[%s3341_s29 + $0x780] sm:$0xff] }
 0x188   : > { %1442 = vmatprep.mubr.f32.mxu0 %v409_v43  ;;  %3126 = vmatprep.mubr.msk.f32.mxu1 %vm598_vm0, %v455_v44  ;;  %v464_v43 = vld [vmem:[%s3341_s29 + $0x928] sm:$0xff]  ;;  %v415_v44 = vld [vmem:[%s3341_s29 + $0x7a0] sm:$0xff] }
 0x189   : > { %v467_v60 = vld [vmem:[%s3341_s29 + $0x940] sm:$0xff] }
 0x18a   : > { %v3982_v23 = vpop.f32.mrb[52].mxu0  ;;  %v3984_v24 = vpop.f32.mrb[52].mxu1 }
 0x18b   : > { %4793 = vst [vmem:[#allocation28_spill] sm:$0xff] %v3984_v24  ;;  %v1181_v59 = vpop.f32.mrb[53].mxu0  ;;  %1443 = vmatmul.mubr.f32.gmra.mrb[158].mxu0 %v408_v3  ;;  %v1661_v37 = vpop.f32.mrb[53].mxu1  ;;  %3127 = vmatmul.mubr.msk.f32.gmra.mrb[158].mxu1 %vm598_vm0, %v458_v4  ;;  %v414_v4 = vld [vmem:[%s3341_s29 + $0x798] sm:$0xff] }
 0x18c   : > { %1447 = vmatprep.mubr.f32.mxu0 %v412_v11  ;;  %3129 = vmatprep.mubr.msk.f32.mxu1 %vm598_vm0, %v461_v12  ;;  %v470_v11 = vld [vmem:[%s3341_s29 + $0x958] sm:$0xff]  ;;  %v473_v37 = vld [vmem:[%s3341_s29 + $0x970] sm:$0xff] }
 0x18d   : > { %v418_v12 = vld [vmem:[%s3341_s29 + $0x7b8] sm:$0xff] }
 0x18e   : > { %v3992_v16 = vpop.f32.mrb[54].mxu0  ;;  %v3994_v46 = vpop.f32.mrb[54].mxu1 }
 0x18f   : > { %4794 = vst [vmem:[#allocation29_spill] sm:$0xff] %v3994_v46  ;;  %v1186_v59 = vpop.f32.mrb[55].mxu0  ;;  %1448 = vmatmul.mubr.f32.gmra.mrb[160].mxu0 %v411_v38  ;;  %v1666_v3 = vpop.f32.mrb[55].mxu1  ;;  %3130 = vmatmul.mubr.msk.f32.gmra.mrb[160].mxu1 %vm598_vm0, %v464_v43  ;;  %v417_v43 = vld [vmem:[%s3341_s29 + $0x7b0] sm:$0xff] }
 0x190   : > { %1452 = vmatprep.mubr.f32.mxu0 %v415_v44  ;;  %3132 = vmatprep.mubr.msk.f32.mxu1 %vm598_vm0, %v467_v60  ;;  %v476_v44 = vld [vmem:[%s3341_s29 + $0x988] sm:$0xff]  ;;  %v421_v60 = vld [vmem:[%s3341_s29 + $0x7d0] sm:$0xff]  ;;  %v479_v3 = vld [vmem:[%s3341_s29 + $0x9a0] sm:$0xff] }
 0x192   : > { %v4002_v24 = vpop.f32.mrb[56].mxu0  ;;  %v4004_v28 = vpop.f32.mrb[56].mxu1 }
 0x193   : > { %4795 = vst [vmem:[#allocation30_spill] sm:$0xff] %v4004_v28  ;;  %v1191_v59 = vpop.f32.mrb[57].mxu0  ;;  %1453 = vmatmul.mubr.f32.gmra.mrb[162].mxu0 %v414_v4  ;;  %v1671_v38 = vpop.f32.mrb[57].mxu1  ;;  %3133 = vmatmul.mubr.msk.f32.gmra.mrb[162].mxu1 %vm598_vm0, %v470_v11  ;;  %v420_v11 = vld [vmem:[%s3341_s29 + $0x7c8] sm:$0xff] }
 0x194   : > { %1457 = vmatprep.mubr.f32.mxu0 %v418_v12  ;;  %3135 = vmatprep.mubr.msk.f32.mxu1 %vm598_vm0, %v473_v37  ;;  %v482_v12 = vld [vmem:[%s3341_s29 + $0x9b8] sm:$0xff]  ;;  %v424_v37 = vld [vmem:[%s3341_s29 + $0x7e8] sm:$0xff]  ;;  %v485_v38 = vld [vmem:[%s3341_s29 + $0x9d0] sm:$0xff] }
 0x196   : > { %v4012_v46 = vpop.f32.mrb[58].mxu0  ;;  %v4014_v56 = vpop.f32.mrb[58].mxu1 }
 0x197   : > { %4796 = vst [vmem:[#allocation31_spill] sm:$0xff] %v4014_v56  ;;  %v1196_v59 = vpop.f32.mrb[59].mxu0  ;;  %1458 = vmatmul.mubr.f32.gmra.mrb[164].mxu0 %v417_v43  ;;  %v1676_v4 = vpop.f32.mrb[59].mxu1  ;;  %3136 = vmatmul.mubr.msk.f32.gmra.mrb[164].mxu1 %vm598_vm0, %v476_v44  ;;  %v423_v44 = vld [vmem:[%s3341_s29 + $0x7e0] sm:$0xff] }
 0x198   : > { %1462 = vmatprep.mubr.f32.mxu0 %v421_v60  ;;  %3138 = vmatprep.mubr.msk.f32.mxu1 %vm598_vm0, %v479_v3  ;;  %v488_v60 = vld [vmem:[%s3341_s29 + $0x9e8] sm:$0xff]  ;;  %v427_v3 = vld [vmem:[%s3341_s29 + $0x800] sm:$0xff] }
 0x199   : > { %v491_v4 = vld [vmem:[%s3341_s29 + $0xa00] sm:$0xff] }
 0x19a   : > { %v4022_v28 = vpop.f32.mrb[60].mxu0  ;;  %v4024_v54 = vpop.f32.mrb[60].mxu1 }
 0x19b   : > { %4797 = vst [vmem:[#allocation32_spill] sm:$0xff] %v4024_v54  ;;  %v1201_v59 = vpop.f32.mrb[61].mxu0  ;;  %1463 = vmatmul.mubr.f32.gmra.mrb[166].mxu0 %v420_v11  ;;  %v1681_v43 = vpop.f32.mrb[61].mxu1  ;;  %3139 = vmatmul.mubr.msk.f32.gmra.mrb[166].mxu1 %vm598_vm0, %v482_v12  ;;  %v4039_v11 = vld [vmem:[%s4765_s2] ss:$0 sm:$0xff]  ;;  %v430_v54 = vld [vmem:[%s3341_s29 + $0x818] sm:$0xff] }
 0x19c   : > { %1467 = vmatprep.mubr.f32.mxu0 %v424_v37  ;;  %3141 = vmatprep.mubr.msk.f32.mxu1 %vm598_vm0, %v485_v38  ;;  %v426_v38 = vld [vmem:[%s3341_s29 + $0x7f8] sm:$0xff]  ;;  %v1055_v43 = vadd.f32 %v4039_v11, %v3732_v25  ;;  %v429_v25 = vld [vmem:[%s3341_s29 + $0x810] sm:$0xff]  ;;  %v1150_v30 = vadd.f32 %v4039_v11, %v3922_v53 }
 0x19d   : > { %v494_v59 = vld [vmem:[%s3341_s29 + $0xa18] sm:$0xff] }
 0x19e   : > { %v4032_v56 = vpop.f32.mrb[62].mxu0  ;;  %v4034_v6 = vpop.f32.mrb[62].mxu1 }
 0x19f   : > { %4798 = vst [vmem:[#allocation33_spill] sm:$0xff] %v4034_v6  ;;  %v1206_v12 = vpop.f32.mrb[63].mxu0  ;;  %1468 = vmatmul.mubr.f32.gmra.mrb[168].mxu0 %v423_v44  ;;  %v1686_v37 = vpop.f32.mrb[63].mxu1  ;;  %3142 = vmatmul.mubr.msk.f32.gmra.mrb[168].mxu1 %vm598_vm0, %v488_v60  ;;  %v497_v6 = vld [vmem:[%s3341_s29 + $0xa30] sm:$0xff]  ;;  %v1050_v44 = vadd.f32 %v4039_v11, %v3722_v17  ;;  %v1065_v17 = vadd.f32 %v4039_v11, %v3752_v41  ;;  %v432_v41 = vld [vmem:[%s3341_s29 + $0x828] sm:$0xff] }
 0x1a0   : > { %1472 = vmatprep.mubr.f32.mxu0 %v427_v3  ;;  %3144 = vmatprep.mubr.msk.f32.mxu1 %vm598_vm0, %v491_v4 }
 0x1a2   : > { %v4051_v12 = vpop.f32.mrb[64].mxu0  ;;  %v2987_v60 = vpop.f32.mrb[64].mxu1 }
 0x1a3   : > { %v4053_v3 = vadd.f32 %v2987_v60, %v1055_v43  ;;  %v1211_v4 = vpop.f32.mrb[65].mxu0  ;;  %1473 = vmatmul.mubr.f32.gmra.mrb[170].mxu0 %v426_v38  ;;  %v1754_v37 = vpop.f32.mrb[65].mxu1  ;;  %3145 = vmatmul.mubr.msk.f32.gmra.mrb[170].mxu1 %vm598_vm0, %v494_v59  ;;  %v503_v43 = vld [vmem:[%s3341_s29 + $0xa60] sm:$0xff]  ;;  %v1060_v38 = vadd.f32 %v4039_v11, %v3742_v33  ;;  %v1075_v33 = vadd.f32 %v4039_v11, %v3772_v57 }
 0x1a4   : > { %v4056_v14 = vadd.f32 %v1754_v37, %v1050_v44  ;;  %1477 = vmatprep.mubr.f32.mxu0 %v430_v54  ;;  %3147 = vmatprep.mubr.msk.f32.mxu1 %vm598_vm0, %v497_v6  ;;  %v506_v37 = vld [vmem:[%s3341_s29 + $0xa78] sm:$0xff]  ;;  %v435_v57 = vld [vmem:[%s3341_s29 + $0x840] sm:$0xff] }
 0x1a6   : > { %v4067_v59 = vpop.f32.mrb[66].mxu0  ;;  %v2990_v44 = vpop.f32.mrb[66].mxu1 }
 0x1a7   : > { %v4069_v54 = vadd.f32 %v2990_v44, %v1065_v17  ;;  %v1216_v6 = vpop.f32.mrb[67].mxu0  ;;  %1478 = vmatmul.mubr.f32.gmra.mrb[172].mxu0 %v429_v25  ;;  %v1764_v60 = vpop.f32.mrb[67].mxu1  ;;  %3148 = vmatmul.mubr.msk.f32.gmra.mrb[172].mxu1 %vm598_vm0, %v500_v32  ;;  %v509_v17 = vld [vmem:[%s3341_s29 + $0xa90] sm:$0xff]  ;;  %v1070_v25 = vadd.f32 %v4039_v11, %v3762_v49  ;;  %v1085_v49 = vadd.f32 %v4039_v11, %v3792_v9  ;;  %v438_v9 = vld [vmem:[%s3341_s29 + $0x858] sm:$0xff] }
 0x1a8   : > { %v4072_v4 = vadd.f32 %v1764_v60, %v1060_v38  ;;  %1482 = vmatprep.mubr.f32.mxu0 %v433_v48  ;;  %3150 = vmatprep.mubr.msk.f32.mxu1 %vm598_vm0, %v503_v43  ;;  %v512_v60 = vld [vmem:[%s3341_s29 + $0xaa8] sm:$0xff] }
 0x1aa   : > { %v4083_v32 = vpop.f32.mrb[68].mxu0  ;;  %v2993_v38 = vpop.f32.mrb[68].mxu1 }
 0x1ab   : > { %v4085_v48 = vadd.f32 %v2993_v38, %v1075_v33  ;;  %v1221_v43 = vpop.f32.mrb[69].mxu0  ;;  %1483 = vmatmul.mubr.f32.gmra.mrb[174].mxu0 %v432_v41  ;;  %v1774_v44 = vpop.f32.mrb[69].mxu1  ;;  %3151 = vmatmul.mubr.msk.f32.gmra.mrb[174].mxu1 %vm598_vm0, %v506_v37  ;;  %v515_v33 = vld [vmem:[%s3341_s29 + $0xac0] sm:$0xff]  ;;  %v1080_v41 = vadd.f32 %v4039_v11, %v3782_v1  ;;  %v1095_v1 = vadd.f32 %v4039_v11, %v3812_v29  ;;  %v441_v29 = vld [vmem:[%s3341_s29 + $0x870] sm:$0xff] }
 0x1ac   : > { %v4088_v6 = vadd.f32 %v1774_v44, %v1070_v25  ;;  %1487 = vmatprep.mubr.f32.mxu0 %v436_v0  ;;  %3153 = vmatprep.mubr.msk.f32.mxu1 %vm598_vm0, %v509_v17  ;;  %v518_v44 = vld [vmem:[%s3341_s29 + $0xad8] sm:$0xff] }
 0x1ae   : > { %v4099_v37 = vpop.f32.mrb[70].mxu0  ;;  %v2996_v25 = vpop.f32.mrb[70].mxu1 }
 0x1af   : > { %v4101_v0 = vadd.f32 %v2996_v25, %v1085_v49  ;;  %v1226_v17 = vpop.f32.mrb[71].mxu0  ;;  %1488 = vmatmul.mubr.f32.gmra.mrb[176].mxu0 %v435_v57  ;;  %v1784_v38 = vpop.f32.mrb[71].mxu1  ;;  %3154 = vmatmul.mubr.msk.f32.gmra.mrb[176].mxu1 %vm598_vm0, %v512_v60  ;;  %v521_v49 = vld [vmem:[%s3341_s29 + $0xaf0] sm:$0xff]  ;;  %v1090_v57 = vadd.f32 %v4039_v11, %v3802_v19  ;;  %v1105_v19 = vadd.f32 %v4039_v11, %v3832_v51  ;;  %v444_v51 = vld [vmem:[%s3341_s29 + $0x888] sm:$0xff] }
 0x1b0   : > { %v4104_v43 = vadd.f32 %v1784_v38, %v1080_v41  ;;  %1492 = vmatprep.mubr.f32.mxu0 %v439_v22  ;;  %3156 = vmatprep.mubr.msk.f32.mxu1 %vm598_vm0, %v515_v33  ;;  %v524_v38 = vld [vmem:[%s3341_s29 + $0xb08] sm:$0xff] }
 0x1b2   : > { %v4115_v60 = vpop.f32.mrb[72].mxu0  ;;  %v2999_v41 = vpop.f32.mrb[72].mxu1 }
 0x1b3   : > { %v4117_v22 = vadd.f32 %v2999_v41, %v1095_v1  ;;  %v1231_v33 = vpop.f32.mrb[73].mxu0  ;;  %1493 = vmatmul.mubr.f32.gmra.mrb[178].mxu0 %v438_v9  ;;  %v1794_v25 = vpop.f32.mrb[73].mxu1  ;;  %3157 = vmatmul.mubr.msk.f32.gmra.mrb[178].mxu1 %vm598_vm0, %v518_v44  ;;  %v527_v1 = vld [vmem:[%s3341_s29 + $0xb20] sm:$0xff]  ;;  %v1100_v9 = vadd.f32 %v4039_v11, %v3822_v39  ;;  %v1115_v39 = vadd.f32 %v4039_v11, %v3852_v7 }
 0x1b4   : > { %v4120_v17 = vadd.f32 %v1794_v25, %v1090_v57  ;;  %1497 = vmatprep.mubr.f32.mxu0 %v442_v36  ;;  %3159 = vmatprep.mubr.msk.f32.mxu1 %vm598_vm0, %v521_v49  ;;  %v530_v25 = vld [vmem:[%s3341_s29 + $0xb38] sm:$0xff]  ;;  %v447_v7 = vld [vmem:[%s3341_s29 + $0x8a0] sm:$0xff] }
 0x1b6   : > { %v4131_v44 = vpop.f32.mrb[74].mxu0  ;;  %v3002_v57 = vpop.f32.mrb[74].mxu1 }
 0x1b7   : > { %v4133_v36 = vadd.f32 %v3002_v57, %v1105_v19  ;;  %v1236_v49 = vpop.f32.mrb[75].mxu0  ;;  %1498 = vmatmul.mubr.f32.gmra.mrb[180].mxu0 %v441_v29  ;;  %v1804_v41 = vpop.f32.mrb[75].mxu1  ;;  %3160 = vmatmul.mubr.msk.f32.gmra.mrb[180].mxu1 %vm598_vm0, %v524_v38  ;;  %v533_v19 = vld [vmem:[%s3341_s29 + $0xb50] sm:$0xff]  ;;  %v1110_v29 = vadd.f32 %v4039_v11, %v3842_v61  ;;  %v1125_v61 = vadd.f32 %v4039_v11, %v3872_v35  ;;  %v450_v35 = vld [vmem:[%s3341_s29 + $0x8b8] sm:$0xff] }
 0x1b8   : > { %v4136_v33 = vadd.f32 %v1804_v41, %v1100_v9  ;;  %1502 = vmatprep.mubr.f32.mxu0 %v445_v62  ;;  %3162 = vmatprep.mubr.msk.f32.mxu1 %vm598_vm0, %v527_v1  ;;  %v536_v41 = vld [vmem:[%s3341_s29 + $0xb68] sm:$0xff] }
 0x1ba   : > { %v4147_v38 = vpop.f32.mrb[76].mxu0  ;;  %v3005_v9 = vpop.f32.mrb[76].mxu1 }
 0x1bb   : > { %v4149_v62 = vadd.f32 %v3005_v9, %v1115_v39  ;;  %v1241_v1 = vpop.f32.mrb[77].mxu0  ;;  %1503 = vmatmul.mubr.f32.gmra.mrb[182].mxu0 %v444_v51  ;;  %v1814_v57 = vpop.f32.mrb[77].mxu1  ;;  %3163 = vmatmul.mubr.msk.f32.gmra.mrb[182].mxu1 %vm598_vm0, %v530_v25  ;;  %v539_v39 = vld [vmem:[%s3341_s29 + $0xb80] sm:$0xff]  ;;  %v1120_v51 = vadd.f32 %v4039_v11, %v3862_v21  ;;  %v1135_v21 = vadd.f32 %v4039_v11, %v3892_v63  ;;  %v453_v63 = vld [vmem:[%s3341_s29 + $0x8d0] sm:$0xff] }
 0x1bc   : > { %v4152_v49 = vadd.f32 %v1814_v57, %v1110_v29  ;;  %1507 = vmatprep.mubr.f32.mxu0 %v448_v8  ;;  %3165 = vmatprep.mubr.msk.f32.mxu1 %vm598_vm0, %v533_v19  ;;  %v542_v57 = vld [vmem:[%s3341_s29 + $0xb98] sm:$0xff] }
 0x1be   : > { %v4163_v25 = vpop.f32.mrb[78].mxu0  ;;  %v3008_v29 = vpop.f32.mrb[78].mxu1 }
 0x1bf   : > { %v4165_v8 = vadd.f32 %v3008_v29, %v1125_v61  ;;  %v1246_v19 = vpop.f32.mrb[79].mxu0  ;;  %1508 = vmatmul.mubr.f32.gmra.mrb[184].mxu0 %v447_v7  ;;  %v1824_v9 = vpop.f32.mrb[79].mxu1  ;;  %3166 = vmatmul.mubr.msk.f32.gmra.mrb[184].mxu1 %vm598_vm0, %v536_v41  ;;  %v545_v61 = vld [vmem:[%s3341_s29 + $0xbb0] sm:$0xff]  ;;  %v1130_v7 = vadd.f32 %v4039_v11, %v3882_v47  ;;  %v1145_v47 = vadd.f32 %v4039_v11, %v3912_v31  ;;  %v456_v31 = vld [vmem:[%s3341_s29 + $0x8e8] sm:$0xff] }
 0x1c0   : > { %v4168_v1 = vadd.f32 %v1824_v9, %v1120_v51  ;;  %1512 = vmatprep.mubr.f32.mxu0 %v451_v40  ;;  %3168 = vmatprep.mubr.msk.f32.mxu1 %vm598_vm0, %v539_v39  ;;  %v548_v9 = vld [vmem:[%s3341_s29 + $0xbc8] sm:$0xff] }
 0x1c2   : > { %v4179_v41 = vpop.f32.mrb[80].mxu0  ;;  %v3011_v51 = vpop.f32.mrb[80].mxu1 }
 0x1c3   : > { %v4181_v40 = vadd.f32 %v3011_v51, %v1135_v21  ;;  %v1251_v39 = vpop.f32.mrb[81].mxu0  ;;  %1513 = vmatmul.mubr.f32.gmra.mrb[186].mxu0 %v450_v35  ;;  %v1834_v29 = vpop.f32.mrb[81].mxu1  ;;  %3169 = vmatmul.mubr.msk.f32.gmra.mrb[186].mxu1 %vm598_vm0, %v542_v57  ;;  %v551_v21 = vld [vmem:[%s3341_s29 + $0xbe0] sm:$0xff]  ;;  %v1140_v35 = vadd.f32 %v4039_v11, %v3902_v13  ;;  %v1155_v13 = vadd.f32 %v4039_v11, %v3932_v5 }
 0x1c4   : > { %v4184_v19 = vadd.f32 %v1834_v29, %v1130_v7  ;;  %1517 = vmatprep.mubr.f32.mxu0 %v454_v52  ;;  %3171 = vmatprep.mubr.msk.f32.mxu1 %vm598_vm0, %v545_v61  ;;  %v554_v29 = vld [vmem:[%s3341_s29 + $0xbf8] sm:$0xff]  ;;  %v1160_v5 = vadd.f32 %v4039_v11, %v3942_v27 }
 0x1c6   : > { %v4195_v51 = vpop.f32.mrb[82].mxu0  ;;  %v3014_v57 = vpop.f32.mrb[82].mxu1 }
 0x1c7   : > { %v4197_v7 = vadd.f32 %v3014_v57, %v1145_v47  ;;  %v1256_v52 = vpop.f32.mrb[83].mxu0  ;;  %1518 = vmatmul.mubr.f32.gmra.mrb[188].mxu0 %v453_v63  ;;  %v1844_v61 = vpop.f32.mrb[83].mxu1  ;;  %3172 = vmatmul.mubr.msk.f32.gmra.mrb[188].mxu1 %vm598_vm0, %v548_v9 }
 0x1c8   : > { %v4200_v39 = vadd.f32 %v1844_v61, %v1140_v35  ;;  %1522 = vmatprep.mubr.f32.mxu0 %v457_v20  ;;  %3174 = vmatprep.mubr.msk.f32.mxu1 %vm598_vm0, %v551_v21  ;;  %v1165_v21 = vadd.f32 %v4039_v11, %v3952_v55 }
 0x1ca   : > { %v4209_v47 = vpop.f32.mrb[84].mxu0  ;;  %v3017_v57 = vpop.f32.mrb[84].mxu1 }
 0x1cb   : > { %v4211_v63 = vadd.f32 %v3017_v57, %v1155_v13  ;;  %v1261_v52 = vpop.f32.mrb[85].mxu0  ;;  %1523 = vmatmul.mubr.f32.gmra.mrb[190].mxu0 %v456_v31  ;;  %v1854_v9 = vpop.f32.mrb[85].mxu1  ;;  %3175 = vmatmul.mubr.msk.f32.gmra.mrb[190].mxu1 %vm598_vm0, %v554_v29  ;;  %v1175_v31 = vadd.f32 %v4039_v11, %v3972_v45 }
 0x1cc   : > { %v4214_v20 = vadd.f32 %v1854_v9, %v1150_v30  ;;  %v1170_v30 = vadd.f32 %v4039_v11, %v3962_v15 }
 0x1ce   : > { %v4220_v35 = vpop.f32.mrb[86].mxu0  ;;  %v3020_v53 = vpop.f32.mrb[86].mxu1 }
 0x1cf   : > { %v4222_v61 = vadd.f32 %v3020_v53, %v1165_v21  ;;  %v1266_v13 = vpop.f32.mrb[87].mxu0  ;;  %v1864_v57 = vpop.f32.mrb[87].mxu1  ;;  %v1185_v21 = vadd.f32 %v4039_v11, %v3992_v16 }
 0x1d0   : > { %v4224_v52 = vadd.f32 %v1864_v57, %v1160_v5  ;;  %v1180_v5 = vadd.f32 %v4039_v11, %v3982_v23 }
 0x1d2   : > { %v4230_v29 = vpop.f32.mrb[88].mxu0  ;;  %v3023_v55 = vpop.f32.mrb[88].mxu1 }
 0x1d3   : > { %v4232_v9 = vadd.f32 %v3023_v55, %v1175_v31  ;;  %v1271_v27 = vpop.f32.mrb[89].mxu0  ;;  %v1874_v2 = vpop.f32.mrb[89].mxu1  ;;  %v1195_v31 = vadd.f32 %v4039_v11, %v4012_v46 }
 0x1d4   : > { %v4234_v10 = vadd.f32 %v1874_v2, %v1170_v30  ;;  %v1190_v2 = vadd.f32 %v4039_v11, %v4002_v24 }
 0x1d6   : > { %v4240_v53 = vpop.f32.mrb[90].mxu0  ;;  %v3026_v45 = vpop.f32.mrb[90].mxu1 }
 0x1d7   : > { %v4242_v13 = vadd.f32 %v3026_v45, %v1185_v21  ;;  %v1276_v15 = vpop.f32.mrb[91].mxu0  ;;  %v1884_v57 = vpop.f32.mrb[91].mxu1  ;;  %v1205_v21 = vadd.f32 %v4039_v11, %v4032_v56 }
 0x1d8   : > { %v4244_v50 = vadd.f32 %v1884_v57, %v1180_v5  ;;  %v1200_v5 = vadd.f32 %v4039_v11, %v4022_v28 }
 0x1da   : > { %v4250_v30 = vpop.f32.mrb[92].mxu0  ;;  %v3029_v16 = vpop.f32.mrb[92].mxu1 }
 0x1db   : > { %v4252_v55 = vadd.f32 %v3029_v16, %v1195_v31  ;;  %v1281_v23 = vpop.f32.mrb[93].mxu0  ;;  %v1894_v27 = vpop.f32.mrb[93].mxu1  ;;  %v1215_v31 = vadd.f32 %v4039_v11, %v4067_v59  ;;  %v1220_v59 = vadd.f32 %v4039_v11, %v4083_v32  ;;  %v2395_v32 = vmax.f32 %v4072_v4, 0.0 }
 0x1dc   : > { %v4254_v58 = vadd.f32 %v1894_v27, %v1190_v2  ;;  %v1210_v2 = vadd.f32 %v4039_v11, %v4051_v12  ;;  %v1245_v4 = vadd.f32 %v4039_v11, %v4163_v25  ;;  %v2400_v25 = vmax.f32 %v4101_v0, 0.0 }
 0x1de   : > { %v4260_v45 = vpop.f32.mrb[94].mxu0  ;;  %v3032_v46 = vpop.f32.mrb[94].mxu1 }
 0x1df   : > { %v4262_v15 = vadd.f32 %v3032_v46, %v1205_v21  ;;  %v1286_v24 = vpop.f32.mrb[95].mxu0  ;;  %v1904_v57 = vpop.f32.mrb[95].mxu1  ;;  %v2394_v21 = vmax.f32 %v4053_v3, 0.0  ;;  %v1225_v46 = vadd.f32 %v4039_v11, %v4099_v37  ;;  %v2396_v37 = vmax.f32 %v4069_v54, 0.0 }
 0x1e0   : > { %v4264_v34 = vadd.f32 %v1904_v57, %v1200_v5  ;;  %v2393_v24 = vmax.f32 %v4056_v14, 0.0  ;;  %v1235_v14 = vadd.f32 %v4039_v11, %v4131_v44  ;;  %v2398_v44 = vmax.f32 %v4085_v48, 0.0 }
 0x1e2   : > { %v4270_v16 = vpop.f32.mrb[96].mxu0  ;;  %v3035_v56 = vpop.f32.mrb[96].mxu1 }
 0x1e3   : > { %v1920_v23 = vadd.f32 %v3035_v56, %v1215_v31  ;;  %v1291_v28 = vpop.f32.mrb[97].mxu0  ;;  %v1914_v27 = vpop.f32.mrb[97].mxu1 }
 0x1e4   : > { %v1915_v42 = vadd.f32 %v1914_v27, %v1210_v2 }
 0x1e5   : > { %v2426_v5 = vmax.f32 %v1920_v23, 0.0 }
 0x1e6   : > { %v2425_v57 = vmax.f32 %v1915_v42, 0.0  ;;  %v4278_v12 = vpop.f32.mrb[98].mxu0  ;;  %v3038_v18 = vpop.f32.mrb[98].mxu1  ;;  %v1230_v42 = vadd.f32 %v4039_v11, %v4115_v60  ;;  %v2397_v60 = vmax.f32 %v4088_v6, 0.0  ;;  %v1255_v6 = vadd.f32 %v4039_v11, %v4195_v51 }
 0x1e7   : > { %v4280_v26 = vmax.f32 %v2394_v21, %v2426_v5  ;;  %v1930_v31 = vadd.f32 %v3038_v18, %v1225_v46  ;;  %v1296_v56 = vpop.f32.mrb[99].mxu0  ;;  %v1924_v2 = vpop.f32.mrb[99].mxu1  ;;  %v2402_v51 = vmax.f32 %v4117_v22, 0.0 }
 0x1e8   : > { %v4282_v28 = vmax.f32 %v2393_v24, %v2425_v57  ;;  %v1925_v3 = vadd.f32 %v1924_v2, %v1220_v59  ;;  %v1240_v56 = vadd.f32 %v4039_v11, %v4147_v38  ;;  %v2399_v38 = vmax.f32 %v4104_v43, 0.0 }
 0x1e9   : > { %v2428_v23 = vmax.f32 %v1930_v31, 0.0  ;;  %v1265_v43 = vadd.f32 %v4039_v11, %v4220_v35  ;;  %v2404_v35 = vmax.f32 %v4133_v36, 0.0 }
 0x1ea   : > { %v2427_v27 = vmax.f32 %v1925_v3, 0.0  ;;  %v4290_v21 = vpop.f32.mrb[100].mxu0  ;;  %v3041_v18 = vpop.f32.mrb[100].mxu1 }
 0x1eb   : > { %v4292_v46 = vmax.f32 %v2396_v37, %v2428_v23  ;;  %v1940_v5 = vadd.f32 %v3041_v18, %v1235_v14  ;;  %v1301_v24 = vpop.f32.mrb[101].mxu0  ;;  %v1934_v59 = vpop.f32.mrb[101].mxu1 }
 0x1ec   : > { %v4294_v57 = vmax.f32 %v2395_v32, %v2427_v27  ;;  %v1935_v54 = vadd.f32 %v1934_v59, %v1230_v42 }
 0x1ed   : > { %v2430_v31 = vmax.f32 %v1940_v5, 0.0  ;;  %v1250_v5 = vadd.f32 %v4039_v11, %v4179_v41  ;;  %v2401_v41 = vmax.f32 %v4120_v17, 0.0  ;;  %v1275_v17 = vadd.f32 %v4039_v11, %v4240_v53 }
 0x1ee   : > { %v2429_v2 = vmax.f32 %v1935_v54, 0.0  ;;  %v4302_v3 = vpop.f32.mrb[102].mxu0  ;;  %v3044_v37 = vpop.f32.mrb[102].mxu1  ;;  %v2406_v53 = vmax.f32 %v4149_v62, 0.0 }
 0x1ef   : > { %v4304_v14 = vmax.f32 %v2398_v44, %v2430_v31  ;;  %v1950_v23 = vadd.f32 %v3044_v37, %v1245_v4  ;;  %v1306_v32 = vpop.f32.mrb[103].mxu0  ;;  %v1944_v42 = vpop.f32.mrb[103].mxu1  ;;  %v1260_v37 = vadd.f32 %v4039_v11, %v4209_v47  ;;  %v2403_v47 = vmax.f32 %v4136_v33, 0.0 }
 0x1f0   : > { %v4306_v27 = vmax.f32 %v2397_v60, %v2429_v2  ;;  %v1945_v48 = vadd.f32 %v1944_v42, %v1240_v56  ;;  %v1285_v33 = vadd.f32 %v4039_v11, %v4260_v45  ;;  %v1295_v45 = vadd.f32 %v4039_v11, %v4278_v12 }
 0x1f1   : > { %v2432_v18 = vmax.f32 %v1950_v23, 0.0  ;;  %v1305_v12 = vadd.f32 %v4039_v11, %v4302_v3 }
 0x1f2   : > { %v2431_v24 = vmax.f32 %v1945_v48, 0.0  ;;  %v4314_v59 = vpop.f32.mrb[104].mxu0  ;;  %v3047_v54 = vpop.f32.mrb[104].mxu1 }
 0x1f3   : > { %v4316_v44 = vmax.f32 %v2400_v25, %v2432_v18  ;;  %v1960_v4 = vadd.f32 %v3047_v54, %v1255_v6  ;;  %v1311_v31 = vpop.f32.mrb[105].mxu0  ;;  %v1954_v60 = vpop.f32.mrb[105].mxu1 }
 0x1f4   : > { %v4318_v56 = vmax.f32 %v2399_v38, %v2431_v24  ;;  %v1955_v0 = vadd.f32 %v1954_v60, %v1250_v5  ;;  %v1270_v24 = vadd.f32 %v4039_v11, %v4230_v29  ;;  %v2405_v29 = vmax.f32 %v4152_v49, 0.0 }
 0x1f5   : > { %v2434_v2 = vmax.f32 %v1960_v4, 0.0 }
 0x1f6   : > { %v2433_v23 = vmax.f32 %v1955_v0, 0.0  ;;  %v4326_v32 = vpop.f32.mrb[106].mxu0  ;;  %v3050_v42 = vpop.f32.mrb[106].mxu1 }
 0x1f7   : > { %v4328_v48 = vmax.f32 %v2402_v51, %v2434_v2  ;;  %v1970_v25 = vadd.f32 %v3050_v42, %v1265_v43  ;;  %v1316_v6 = vpop.f32.mrb[107].mxu0  ;;  %v1964_v18 = vpop.f32.mrb[107].mxu1  ;;  %v1315_v3 = vadd.f32 %v4039_v11, %v4326_v32 }
 0x1f8   : > { %v4330_v38 = vmax.f32 %v2401_v41, %v2433_v23  ;;  %v1965_v22 = vadd.f32 %v1964_v18, %v1260_v37  ;;  %v1280_v37 = vadd.f32 %v4039_v11, %v4250_v30  ;;  %v1290_v30 = vadd.f32 %v4039_v11, %v4270_v16 }
 0x1f9   : > { %v2436_v5 = vmax.f32 %v1970_v25, 0.0  ;;  %v1300_v16 = vadd.f32 %v4039_v11, %v4290_v21  ;;  %v1310_v21 = vadd.f32 %v4039_v11, %v4314_v59 }
 0x1fa   : > { %v2435_v54 = vmax.f32 %v1965_v22, 0.0  ;;  %v4338_v4 = vpop.f32.mrb[108].mxu0  ;;  %v3053_v31 = vpop.f32.mrb[108].mxu1 }
 0x1fb   : > { %v4340_v60 = vmax.f32 %v2404_v35, %v2436_v5  ;;  %v1980_v0 = vadd.f32 %v3053_v31, %v1275_v17  ;;  %v1321_v51 = vpop.f32.mrb[109].mxu0  ;;  %v1974_v43 = vpop.f32.mrb[109].mxu1  ;;  %v2408_v5 = vmax.f32 %v4165_v8, 0.0  ;;  %v1320_v59 = vadd.f32 %v4039_v11, %v4338_v4 }
 0x1fc   : > { %v4342_v2 = vmax.f32 %v2403_v47, %v2435_v54  ;;  %v1975_v36 = vadd.f32 %v1974_v43, %v1270_v24  ;;  %v2407_v47 = vmax.f32 %v4168_v1, 0.0 }
 0x1fd   : > { %v2438_v41 = vmax.f32 %v1980_v0, 0.0 }
 0x1fe   : > { %v2437_v23 = vmax.f32 %v1975_v36, 0.0  ;;  %v1324_v42 = vpop.f32.mrb[110].mxu0  ;;  %v3056_v25 = vpop.f32.mrb[110].mxu1 }
 0x1ff   : > { %v4350_v6 = vmax.f32 %v2406_v53, %v2438_v41  ;;  %v1990_v18 = vadd.f32 %v3056_v25, %v1285_v33  ;;  %v1326_v22 = vpop.f32.mrb[111].mxu0  ;;  %v1984_v35 = vpop.f32.mrb[111].mxu1  ;;  %v2410_v33 = vmax.f32 %v4181_v40, 0.0  ;;  %v2409_v41 = vmax.f32 %v4184_v19, 0.0 }
 0x200   : > { %v4352_v17 = vmax.f32 %v2405_v29, %v2437_v23  ;;  %v1985_v62 = vadd.f32 %v1984_v35, %v1280_v37  ;;  %v1325_v32 = vadd.f32 %v4039_v11, %v1324_v42 }
 0x201   : > { %v2440_v49 = vmax.f32 %v1990_v18, 0.0 }
 0x202   : > { %v2439_v24 = vmax.f32 %v1985_v62, 0.0  ;;  %v1329_v54 = vpop.f32.mrb[112].mxu0  ;;  %v3059_v31 = vpop.f32.mrb[112].mxu1 }
 0x203   : > { %v4360_v0 = vmax.f32 %v2408_v5, %v2440_v49  ;;  %v2000_v51 = vadd.f32 %v3059_v31, %v1295_v45  ;;  %v1331_v43 = vpop.f32.mrb[113].mxu0  ;;  %v1994_v36 = vpop.f32.mrb[113].mxu1  ;;  %v2412_v5 = vmax.f32 %v4197_v7, 0.0  ;;  %v2411_v45 = vmax.f32 %v4200_v39, 0.0 }
 0x204   : > { %v4362_v53 = vmax.f32 %v2407_v47, %v2439_v24  ;;  %v1995_v8 = vadd.f32 %v1994_v36, %v1290_v30  ;;  %v2413_v39 = vmax.f32 %v4214_v20, 0.0  ;;  %v2415_v20 = vmax.f32 %v4224_v52, 0.0 }
 0x205   : > { %v2442_v1 = vmax.f32 %v2000_v51, 0.0  ;;  %v1330_v4 = vadd.f32 %v4039_v11, %v1329_v54  ;;  %v2417_v52 = vmax.f32 %v4234_v10, 0.0  ;;  %v2419_v10 = vmax.f32 %v4244_v50, 0.0 }
 0x206   : > { %v2441_v29 = vmax.f32 %v1995_v8, 0.0  ;;  %v1334_v37 = vpop.f32.mrb[114].mxu0  ;;  %v3062_v23 = vpop.f32.mrb[114].mxu1  ;;  %v2414_v8 = vmax.f32 %v4211_v63, 0.0  ;;  %v2416_v63 = vmax.f32 %v4222_v61, 0.0  ;;  %v2418_v61 = vmax.f32 %v4232_v9, 0.0 }
 0x207   : > { %v4370_v25 = vmax.f32 %v2410_v33, %v2442_v1  ;;  %v2010_v18 = vadd.f32 %v3062_v23, %v1305_v12  ;;  %v1336_v22 = vpop.f32.mrb[115].mxu0  ;;  %v2004_v35 = vpop.f32.mrb[115].mxu1  ;;  %v1335_v42 = vadd.f32 %v4039_v11, %v1334_v37  ;;  %v2420_v9 = vmax.f32 %v4242_v13, 0.0 }
 0x208   : > { %v4372_v62 = vmax.f32 %v2409_v41, %v2441_v29  ;;  %v2005_v40 = vadd.f32 %v2004_v35, %v1300_v16  ;;  %v2422_v13 = vmax.f32 %v4252_v55, 0.0  ;;  %v2423_v55 = vmax.f32 %v4264_v34, 0.0 }
 0x209   : > { %v2444_v19 = vmax.f32 %v2010_v18, 0.0 }
 0x20a   : > { %v2443_v49 = vmax.f32 %v2005_v40, 0.0  ;;  %v1339_v47 = vpop.f32.mrb[116].mxu0  ;;  %v3065_v30 = vpop.f32.mrb[116].mxu1 }
 0x20b   : > { %v4380_v24 = vmax.f32 %v2412_v5, %v2444_v19  ;;  %v2020_v31 = vadd.f32 %v3065_v30, %v1315_v3  ;;  %v1341_v51 = vpop.f32.mrb[117].mxu0  ;;  %v2014_v43 = vpop.f32.mrb[117].mxu1  ;;  %v1340_v54 = vadd.f32 %v4039_v11, %v1339_v47 }
 0x20c   : > { %v4382_v36 = vmax.f32 %v2411_v45, %v2443_v49  ;;  %v2015_v7 = vadd.f32 %v2014_v43, %v1310_v21 }
 0x20d   : > { %4799 = vst [vmem:[#allocation34_spill] sm:$0xff] %v4380_v24  ;;  %v2446_v33 = vmax.f32 %v2020_v31, 0.0  ;;  %v4823_v24 = vld [vmem:[#allocation7_spill] sm:$0xff] }
 0x20e   : > { %4800 = vst [vmem:[#allocation35_spill] sm:$0xff] %v4382_v36  ;;  %v2445_v12 = vmax.f32 %v2015_v7, 0.0  ;;  %v1344_v1 = vpop.f32.mrb[118].mxu0  ;;  %v3068_v41 = vpop.f32.mrb[118].mxu1 }
 0x20f   : > { %v4389_v16 = vmax.f32 %v2414_v8, %v2446_v33  ;;  %v2030_v29 = vadd.f32 %v3068_v41, %v1325_v32  ;;  %v1346_v23 = vpop.f32.mrb[119].mxu0  ;;  %v2024_v18 = vpop.f32.mrb[119].mxu1  ;;  %v1345_v37 = vadd.f32 %v4039_v11, %v1344_v1 }
 0x210   : > { %v4391_v22 = vmax.f32 %v2413_v39, %v2445_v12  ;;  %v2025_v35 = vadd.f32 %v2024_v18, %v1320_v59 }
 0x211   : > { %4801 = vst [vmem:[#allocation36_spill] sm:$0xff] %v4389_v16  ;;  %v2448_v40 = vmax.f32 %v2030_v29, 0.0  ;;  %v4821_v16 = vld [vmem:[#allocation5_spill] sm:$0xff] }
 0x212   : > { %4802 = vst [vmem:[#allocation37_spill] sm:$0xff] %v4391_v22  ;;  %v2447_v5 = vmax.f32 %v2025_v35, 0.0  ;;  %v1349_v3 = vpop.f32.mrb[120].mxu0  ;;  %v3071_v19 = vpop.f32.mrb[120].mxu1 }
 0x213   : > { %v4397_v45 = vmax.f32 %v2416_v63, %v2448_v40  ;;  %v2040_v21 = vadd.f32 %v3071_v19, %v1335_v42  ;;  %v1351_v49 = vpop.f32.mrb[121].mxu0  ;;  %v2034_v30 = vpop.f32.mrb[121].mxu1  ;;  %v1350_v47 = vadd.f32 %v4039_v11, %v1349_v3 }
 0x214   : > { %v4399_v31 = vmax.f32 %v2415_v20, %v2447_v5  ;;  %v2035_v51 = vadd.f32 %v2034_v30, %v1330_v4  ;;  %v2421_v49 = vmax.f32 %v4254_v58, 0.0 }
 0x215   : > { %4803 = vst [vmem:[#allocation38_spill] sm:$0xff] %v4397_v45  ;;  %v2450_v43 = vmax.f32 %v2040_v21, 0.0 }
 0x216   : > { %4804 = vst [vmem:[#allocation39_spill] sm:$0xff] %v4399_v31  ;;  %v2449_v7 = vmax.f32 %v2035_v51, 0.0  ;;  %v1354_v8 = vpop.f32.mrb[122].mxu0  ;;  %v3074_v32 = vpop.f32.mrb[122].mxu1 }
 0x217   : > { %v4405_v33 = vmax.f32 %v2418_v61, %v2450_v43  ;;  %v2050_v39 = vadd.f32 %v3074_v32, %v1345_v37  ;;  %v1356_v59 = vpop.f32.mrb[123].mxu0  ;;  %v2044_v12 = vpop.f32.mrb[123].mxu1  ;;  %v1355_v1 = vadd.f32 %v4039_v11, %v1354_v8 }
 0x218   : > { %v4407_v41 = vmax.f32 %v2417_v52, %v2449_v7  ;;  %v2045_v29 = vadd.f32 %v2044_v12, %v1340_v54  ;;  %v2424_v59 = vmax.f32 %v4262_v15, 0.0 }
 0x219   : > { %4805 = vst [vmem:[#allocation40_spill] sm:$0xff] %v4405_v33  ;;  %v2452_v23 = vmax.f32 %v2050_v39, 0.0 }
 0x21a   : > { %4806 = vst [vmem:[#allocation41_spill] sm:$0xff] %v4407_v41  ;;  %v2451_v18 = vmax.f32 %v2045_v29, 0.0  ;;  %v1359_v35 = vpop.f32.mrb[124].mxu0  ;;  %v3077_v63 = vpop.f32.mrb[124].mxu1 }
 0x21b   : > { %v4413_v42 = vmax.f32 %v2420_v9, %v2452_v23  ;;  %v2060_v40 = vadd.f32 %v3077_v63, %v1355_v1  ;;  %v1361_v20 = vpop.f32.mrb[125].mxu0  ;;  %v2054_v4 = vpop.f32.mrb[125].mxu1  ;;  %v1360_v50 = vadd.f32 %v4039_v11, %v1359_v35 }
 0x21c   : > { %v4415_v5 = vmax.f32 %v2419_v10, %v2451_v18  ;;  %v2055_v19 = vadd.f32 %v2054_v4, %v1350_v47 }
 0x21d   : > { %4807 = vst [vmem:[#allocation42_spill] sm:$0xff] %v4413_v42  ;;  %v2454_v21 = vmax.f32 %v2060_v40, 0.0 }
 0x21e   : > { %4808 = vst [vmem:[#allocation43_spill] sm:$0xff] %v4415_v5  ;;  %v2453_v30 = vmax.f32 %v2055_v19, 0.0  ;;  %v1364_v3 = vpop.f32.mrb[126].mxu0  ;;  %v3080_v51 = vpop.f32.mrb[126].mxu1 }
 0x21f   : > { %v4420_v61 = vmax.f32 %v2422_v13, %v2454_v21  ;;  %v1365_v37 = vadd.f32 %v4039_v11, %v1364_v3  ;;  %v1366_v43 = vpop.f32.mrb[127].mxu0  ;;  %v2064_v52 = vpop.f32.mrb[127].mxu1 }
 0x220   : > { %v4423_v54 = vmax.f32 %v2421_v49, %v2453_v30  ;;  %v2065_v7 = vadd.f32 %v2064_v52, %v1360_v50 }
 0x221   : > { %4809 = vst [vmem:[#allocation44_spill] sm:$0xff] %v4420_v61  ;;  %v2070_v8 = vadd.f32 %v3080_v51, %v1365_v37 }
 0x222   : > { %4810 = vst [vmem:[#allocation45_spill] sm:$0xff] %v4423_v54  ;;  %v2455_v32 = vmax.f32 %v2065_v7, 0.0  ;;  %v1369_v39 = vpop.f32.mrb[128].mxu0  ;;  %v3083_v58 = vpop.f32.mrb[128].mxu1 }
 0x223   : > { %v2456_v12 = vmax.f32 %v2070_v8, 0.0  ;;  %v1370_v29 = vadd.f32 %v4039_v11, %v1369_v39  ;;  %v1371_v9 = vpop.f32.mrb[129].mxu0  ;;  %v2074_v1 = vpop.f32.mrb[129].mxu1 }
 0x224   : > { %v4428_v23 = vmax.f32 %v2423_v55, %v2455_v32 }
 0x225   : > { %v4430_v10 = vmax.f32 %v2424_v59, %v2456_v12  ;;  %v4432_v47 = vadd.f32 %v2074_v1, %v1370_v29 }
 0x226   : > { %4811 = vst [vmem:[#allocation46_spill] sm:$0xff] %v4428_v23  ;;  %v1374_v18 = vpop.f32.mrb[130].mxu0  ;;  %v3086_v35 = vpop.f32.mrb[130].mxu1 }
 0x227   : > { %4812 = vst [vmem:[#allocation47_spill] sm:$0xff] %v4430_v10  ;;  %v1375_v34 = vadd.f32 %v4039_v11, %v1374_v18  ;;  %v1376_v63 = vpop.f32.mrb[131].mxu0  ;;  %v2084_v40 = vpop.f32.mrb[131].mxu1 }
 0x229   : > { %v4435_v20 = vadd.f32 %v3083_v58, %v1375_v34 }
 0x22a   : > { %v1379_v15 = vpop.f32.mrb[132].mxu0  ;;  %v3089_v4 = vpop.f32.mrb[132].mxu1 }
 0x22b   : > { %v1380_v19 = vadd.f32 %v4039_v11, %v1379_v15  ;;  %v1381_v13 = vpop.f32.mrb[133].mxu0  ;;  %v2094_v21 = vpop.f32.mrb[133].mxu1 }
 0x22d   : > { %v4438_v49 = vadd.f32 %v2084_v40, %v1380_v19 }
 0x22e   : > { %v1384_v50 = vpop.f32.mrb[134].mxu0  ;;  %v3092_v30 = vpop.f32.mrb[134].mxu1 }
 0x22f   : > { %v1385_v3 = vadd.f32 %v4039_v11, %v1384_v50  ;;  %v1386_v51 = vpop.f32.mrb[135].mxu0  ;;  %v2104_v37 = vpop.f32.mrb[135].mxu1 }
 0x231   : > { %v4441_v43 = vadd.f32 %v3086_v35, %v1385_v3 }
 0x232   : > { %v1389_v52 = vpop.f32.mrb[136].mxu0  ;;  %v3095_v7 = vpop.f32.mrb[136].mxu1 }
 0x233   : > { %v1390_v8 = vadd.f32 %v4039_v11, %v1389_v52  ;;  %v1391_v55 = vpop.f32.mrb[137].mxu0  ;;  %v2114_v32 = vpop.f32.mrb[137].mxu1 }
 0x235   : > { %v4444_v39 = vadd.f32 %v2094_v21, %v1390_v8 }
 0x236   : > { %v1394_v58 = vpop.f32.mrb[138].mxu0  ;;  %v3098_v59 = vpop.f32.mrb[138].mxu1 }
 0x237   : > { %v1395_v12 = vadd.f32 %v4039_v11, %v1394_v58  ;;  %v1396_v29 = vpop.f32.mrb[139].mxu0  ;;  %v2124_v9 = vpop.f32.mrb[139].mxu1 }
 0x239   : > { %v4447_v1 = vadd.f32 %v3089_v4, %v1395_v12 }
 0x23a   : > { %v1399_v18 = vpop.f32.mrb[140].mxu0  ;;  %v3101_v34 = vpop.f32.mrb[140].mxu1 }
 0x23b   : > { %v1400_v35 = vadd.f32 %v4039_v11, %v1399_v18  ;;  %v1401_v63 = vpop.f32.mrb[141].mxu0  ;;  %v2134_v40 = vpop.f32.mrb[141].mxu1 }
 0x23d   : > { %v4450_v15 = vadd.f32 %v2104_v37, %v1400_v35 }
 0x23e   : > { %v1404_v19 = vpop.f32.mrb[142].mxu0  ;;  %v3104_v13 = vpop.f32.mrb[142].mxu1 }
 0x23f   : > { %v1405_v21 = vadd.f32 %v4039_v11, %v1404_v19  ;;  %v1406_v50 = vpop.f32.mrb[143].mxu0  ;;  %v2144_v3 = vpop.f32.mrb[143].mxu1 }
 0x241   : > { %v4453_v51 = vadd.f32 %v3092_v30, %v1405_v21 }
 0x242   : > { %v1409_v52 = vpop.f32.mrb[144].mxu0  ;;  %v4455_v8 = vpop.f32.mrb[144].mxu1 }
 0x243   : > { %v1410_v4 = vadd.f32 %v4039_v11, %v1409_v52  ;;  %v1411_v55 = vpop.f32.mrb[145].mxu0  ;;  %v2154_v58 = vpop.f32.mrb[145].mxu1 }
 0x245   : > { %v4458_v12 = vadd.f32 %v2114_v32, %v1410_v4 }
 0x246   : > { %v1414_v29 = vpop.f32.mrb[146].mxu0  ;;  %v4460_v37 = vpop.f32.mrb[146].mxu1 }
 0x247   : > { %v1415_v18 = vadd.f32 %v4039_v11, %v1414_v29  ;;  %v1416_v35 = vpop.f32.mrb[147].mxu0  ;;  %v4463_v63 = vpop.f32.mrb[147].mxu1 }
 0x249   : > { %v4465_v19 = vadd.f32 %v3095_v7, %v1415_v18 }
 0x24a   : > { %v1419_v30 = vpop.f32.mrb[148].mxu0  ;;  %v4467_v21 = vpop.f32.mrb[148].mxu1 }
 0x24b   : > { %v1420_v50 = vadd.f32 %v4039_v11, %v1419_v30  ;;  %v1421_v52 = vpop.f32.mrb[149].mxu0  ;;  %v4470_v55 = vpop.f32.mrb[149].mxu1  ;;  %v4486_v30 = vld [vmem:[%s4765_s2] ss:$0 sm:$0xff] }
 0x24d   : > { %v4472_v32 = vadd.f32 %v2124_v9, %v1420_v50 }
 0x24e   : > { %v1424_v4 = vpop.f32.mrb[150].mxu0  ;;  %v4474_v10 = vpop.f32.mrb[150].mxu1 }
 0x24f   : > { %v1425_v29 = vadd.f32 %v4039_v11, %v1424_v4  ;;  %v1426_v35 = vpop.f32.mrb[151].mxu0  ;;  %v4477_v23 = vpop.f32.mrb[151].mxu1 }
 0x251   : > { %v4479_v7 = vadd.f32 %v3098_v59, %v1425_v29 }
 0x252   : > { %v1429_v18 = vpop.f32.mrb[152].mxu0  ;;  %v4481_v54 = vpop.f32.mrb[152].mxu1 }
 0x253   : > { %v1430_v9 = vadd.f32 %v4486_v30, %v1429_v18  ;;  %v1431_v50 = vpop.f32.mrb[153].mxu0  ;;  %v4489_v52 = vpop.f32.mrb[153].mxu1 }
 0x255   : > { %v4491_v61 = vadd.f32 %v2134_v40, %v1430_v9 }
 0x256   : > { %v1434_v11 = vpop.f32.mrb[154].mxu0  ;;  %v4493_v4 = vpop.f32.mrb[154].mxu1 }
 0x257   : > { %4813 = vst [vmem:[#allocation48_spill] sm:$0xff] %v4493_v4  ;;  %v1435_v59 = vadd.f32 %v4486_v30, %v1434_v11  ;;  %v1436_v29 = vpop.f32.mrb[155].mxu0  ;;  %v4496_v35 = vpop.f32.mrb[155].mxu1 }
 0x258   : > { %4814 = vst [vmem:[#allocation49_spill] sm:$0xff] %v4496_v35 }
 0x259   : > { %v4498_v5 = vadd.f32 %v3101_v34, %v1435_v59  ;;  %v4819_v34 = vld [vmem:[#allocation3_spill] sm:$0xff] }
 0x25a   : > { %v1439_v42 = vpop.f32.mrb[156].mxu0  ;;  %v4500_v41 = vpop.f32.mrb[156].mxu1  ;;  %v1535_v59 = vadd.f32 %v4486_v30, %v4819_v34 }
 0x25b   : > { %4815 = vst [vmem:[#allocation50_spill] sm:$0xff] %v4500_v41  ;;  %v1440_v18 = vadd.f32 %v4486_v30, %v1439_v42  ;;  %v1441_v50 = vpop.f32.mrb[157].mxu0  ;;  %v4503_v33 = vpop.f32.mrb[157].mxu1  ;;  %v4820_v42 = vld [vmem:[#allocation2_spill] sm:$0xff] }
 0x25c   : > { %4816 = vst [vmem:[#allocation51_spill] sm:$0xff] %v4503_v33  ;;  %v1530_v50 = vadd.f32 %v4486_v30, %v4820_v42  ;;  %v2457_v42 = vmax.f32 %v4432_v47, 0.0 }
 0x25d   : > { %v4505_v40 = vadd.f32 %v2144_v3, %v1440_v18 }
 0x25e   : > { %v1444_v9 = vpop.f32.mrb[158].mxu0  ;;  %v4507_v31 = vpop.f32.mrb[158].mxu1 }
 0x25f   : > { %4817 = vst [vmem:[#allocation52_spill] sm:$0xff] %v4507_v31  ;;  %v1445_v11 = vadd.f32 %v4486_v30, %v1444_v9  ;;  %v1446_v29 = vpop.f32.mrb[159].mxu0  ;;  %v4510_v45 = vpop.f32.mrb[159].mxu1 }
 0x260   : > { %4818 = vst [vmem:[#allocation53_spill] sm:$0xff] %v4510_v45  ;;  %v1545_v29 = vadd.f32 %v4486_v30, %v4821_v16  ;;  %v2458_v45 = vmax.f32 %v4435_v20, 0.0  ;;  %v1555_v20 = vadd.f32 %v4486_v30, %v4823_v24 }
 0x261   : > { %v4514_v41 = vadd.f32 %v3104_v13, %v1445_v11  ;;  %v4822_v11 = vld [vmem:[#allocation4_spill] sm:$0xff] }
 0x262   : > { %v1449_v33 = vpop.f32.mrb[160].mxu0  ;;  %v3131_v3 = vpop.f32.mrb[160].mxu1  ;;  %v1540_v34 = vadd.f32 %v4486_v30, %v4822_v11 }
 0x263   : > { %v1450_v18 = vadd.f32 %v4486_v30, %v1449_v33  ;;  %v2240_v22 = vadd.f32 %v3131_v3, %v1535_v59  ;;  %v1451_v31 = vpop.f32.mrb[161].mxu0  ;;  %v2234_v4 = vpop.f32.mrb[161].mxu1 }
 0x264   : > { %v2235_v9 = vadd.f32 %v2234_v4, %v1530_v50 }
 0x265   : > { %v4522_v36 = vadd.f32 %v2154_v58, %v1450_v18  ;;  %v2490_v13 = vmax.f32 %v2240_v22, 0.0  ;;  %v2460_v58 = vmax.f32 %v4441_v43, 0.0 }
 0x266   : > { %v2489_v35 = vmax.f32 %v2235_v9, 0.0  ;;  %v1454_v33 = vpop.f32.mrb[162].mxu0  ;;  %v3134_v59 = vpop.f32.mrb[162].mxu1 }
 0x267   : > { %v2554_v31 = vmax.f32 %v2458_v45, %v2490_v13  ;;  %v1455_v4 = vadd.f32 %v4486_v30, %v1454_v33  ;;  %v2250_v50 = vadd.f32 %v3134_v59, %v1545_v29  ;;  %v1456_v3 = vpop.f32.mrb[163].mxu0  ;;  %v2244_v16 = vpop.f32.mrb[163].mxu1  ;;  %v4824_v29 = vld [vmem:[#allocation6_spill] sm:$0xff]  ;;  %v2459_v13 = vmax.f32 %v4438_v49, 0.0 }
 0x268   : > { %v2553_v22 = vmax.f32 %v2457_v42, %v2489_v35  ;;  %v2245_v47 = vadd.f32 %v2244_v16, %v1540_v34  ;;  %v1550_v24 = vadd.f32 %v4486_v30, %v4824_v29 }
 0x269   : > { %v2586_v45 = vmax.f32 %v4280_v26, %v2554_v31  ;;  %v4539_v18 = vadd.f32 %v4455_v8, %v1455_v4  ;;  %v2492_v9 = vmax.f32 %v2250_v50, 0.0  ;;  %v4825_v31 = vld [vmem:[#allocation9_spill] sm:$0xff] }
 0x26a   : > { %v2585_v11 = vmax.f32 %v4282_v28, %v2553_v22  ;;  %v2491_v33 = vmax.f32 %v2245_v47, 0.0  ;;  %v1459_v59 = vpop.f32.mrb[164].mxu0  ;;  %v3137_v35 = vpop.f32.mrb[164].mxu1  ;;  %v1565_v4 = vadd.f32 %v4486_v30, %v4825_v31  ;;  %v2462_v28 = vmax.f32 %v4447_v1, 0.0 }
 0x26b   : > { %2619 = vst.msk [vmem:[%s4534_s22 + $0x8] sm:$0xff] %vm2617_vm1, %v2586_v45  ;;  %v2556_v43 = vmax.f32 %v2460_v58, %v2492_v9  ;;  %v1460_v26 = vadd.f32 %v4486_v30, %v1459_v59  ;;  %v2260_v34 = vadd.f32 %v3137_v35, %v1555_v20  ;;  %v1461_v42 = vpop.f32.mrb[165].mxu0  ;;  %v2254_v8 = vpop.f32.mrb[165].mxu1  ;;  %v4826_v20 = vld [vmem:[#allocation8_spill] sm:$0xff]  ;;  %v2461_v58 = vmax.f32 %v4444_v39, 0.0 }
 0x26c   : > { %2618 = vst.msk [vmem:[%s4534_s22] sm:$0xff] %vm2617_vm1, %v2585_v11  ;;  %v2555_v49 = vmax.f32 %v2459_v13, %v2491_v33  ;;  %v2255_v50 = vadd.f32 %v2254_v8, %v1550_v24  ;;  %v1560_v47 = vadd.f32 %v4486_v30, %v4826_v20  ;;  %v4827_v33 = vld [vmem:[#allocation11_spill] sm:$0xff]  ;;  %v4828_v42 = vld [vmem:[#allocation10_spill] sm:$0xff]  ;;  %v2463_v31 = vmax.f32 %v4450_v15, 0.0  ;;  %v4829_v20 = vld [vmem:[#allocation13_spill] sm:$0xff] }
 0x26d   : > { %v2588_v3 = vmax.f32 %v4292_v46, %v2556_v43  ;;  %v4555_v16 = vadd.f32 %v4463_v63, %v1460_v26  ;;  %v2494_v22 = vmax.f32 %v2260_v34, 0.0  ;;  %v1575_v59 = vadd.f32 %v4486_v30, %v4827_v33 }
 0x26e   : > { %v2587_v45 = vmax.f32 %v4294_v57, %v2555_v49  ;;  %v2493_v9 = vmax.f32 %v2255_v50, 0.0  ;;  %v1464_v29 = vpop.f32.mrb[166].mxu0  ;;  %v3140_v13 = vpop.f32.mrb[166].mxu1  ;;  %v2464_v57 = vmax.f32 %v4453_v51, 0.0  ;;  %v1570_v8 = vadd.f32 %v4486_v30, %v4828_v42 }
 0x26f   : > { %2621 = vst.msk [vmem:[%s4534_s22 + $0x18] sm:$0xff] %vm2617_vm1, %v2588_v3  ;;  %v2558_v1 = vmax.f32 %v2462_v28, %v2494_v22  ;;  %v1465_v46 = vadd.f32 %v4486_v30, %v1464_v29  ;;  %v2270_v24 = vadd.f32 %v3140_v13, %v1565_v4  ;;  %v1466_v11 = vpop.f32.mrb[167].mxu0  ;;  %v2264_v63 = vpop.f32.mrb[167].mxu1  ;;  %v4830_v13 = vld [vmem:[#allocation12_spill] sm:$0xff] }
 0x270   : > { %2620 = vst.msk [vmem:[%s4534_s22 + $0x10] sm:$0xff] %vm2617_vm1, %v2587_v45  ;;  %v2557_v39 = vmax.f32 %v2461_v58, %v2493_v9  ;;  %v2265_v35 = vadd.f32 %v2264_v63, %v1560_v47  ;;  %v1585_v47 = vadd.f32 %v4486_v30, %v4829_v20 }
 0x271   : > { %v2590_v43 = vmax.f32 %v4304_v14, %v2558_v1  ;;  %v4571_v26 = vadd.f32 %v4460_v37, %v1465_v46  ;;  %v2496_v34 = vmax.f32 %v2270_v24, 0.0  ;;  %v1580_v1 = vadd.f32 %v4486_v30, %v4830_v13 }
 0x272   : > { %v2589_v4 = vmax.f32 %v4306_v27, %v2557_v39  ;;  %v2495_v49 = vmax.f32 %v2265_v35, 0.0  ;;  %v1469_v50 = vpop.f32.mrb[168].mxu0  ;;  %v3143_v28 = vpop.f32.mrb[168].mxu1  ;;  %v2466_v27 = vmax.f32 %v4465_v19, 0.0  ;;  %v2465_v46 = vmax.f32 %v4458_v12, 0.0  ;;  %v4831_v35 = vld [vmem:[#allocation15_spill] sm:$0xff] }
 0x273   : > { %2623 = vst.msk [vmem:[%s4534_s22 + $0x28] sm:$0xff] %vm2617_vm1, %v2590_v43  ;;  %v2560_v51 = vmax.f32 %v2464_v57, %v2496_v34  ;;  %v1470_v14 = vadd.f32 %v4486_v30, %v1469_v50  ;;  %v2280_v3 = vadd.f32 %v3143_v28, %v1575_v59  ;;  %v1471_v22 = vpop.f32.mrb[169].mxu0  ;;  %v2274_v37 = vpop.f32.mrb[169].mxu1  ;;  %v1595_v57 = vadd.f32 %v4486_v30, %v4831_v35 }
 0x274   : > { %2622 = vst.msk [vmem:[%s4534_s22 + $0x20] sm:$0xff] %vm2617_vm1, %v2589_v4  ;;  %v2559_v15 = vmax.f32 %v2463_v31, %v2495_v49  ;;  %v2275_v58 = vadd.f32 %v2274_v37, %v1570_v8  ;;  %v4832_v31 = vld [vmem:[#allocation14_spill] sm:$0xff]  ;;  %v2467_v49 = vmax.f32 %v4472_v32, 0.0  ;;  %v4833_v37 = vld [vmem:[#allocation17_spill] sm:$0xff]  ;;  %v2469_v13 = vmax.f32 %v4491_v61, 0.0 }
 0x275   : > { %v2592_v45 = vmax.f32 %v4316_v44, %v2560_v51  ;;  %v4587_v9 = vadd.f32 %v4470_v55, %v1470_v14  ;;  %v2498_v29 = vmax.f32 %v2280_v3, 0.0  ;;  %v1590_v4 = vadd.f32 %v4486_v30, %v4832_v31 }
 0x276   : > { %v2591_v24 = vmax.f32 %v4318_v56, %v2559_v15  ;;  %v2497_v11 = vmax.f32 %v2275_v58, 0.0  ;;  %v1474_v63 = vpop.f32.mrb[170].mxu0  ;;  %v3146_v33 = vpop.f32.mrb[170].mxu1  ;;  %v2468_v56 = vmax.f32 %v4479_v7, 0.0  ;;  %v1605_v20 = vadd.f32 %v4486_v30, %v4833_v37 }
 0x277   : > { %2625 = vst.msk [vmem:[%s4534_s22 + $0x38] sm:$0xff] %vm2617_vm1, %v2592_v45  ;;  %v2562_v19 = vmax.f32 %v2466_v27, %v2498_v29  ;;  %v1475_v44 = vadd.f32 %v4486_v30, %v1474_v63  ;;  %v2290_v59 = vadd.f32 %v3146_v33, %v1585_v47  ;;  %v1476_v39 = vpop.f32.mrb[171].mxu0  ;;  %v2284_v55 = vpop.f32.mrb[171].mxu1  ;;  %v4834_v45 = vld [vmem:[#allocation16_spill] sm:$0xff] }
 0x278   : > { %2624 = vst.msk [vmem:[%s4534_s22 + $0x30] sm:$0xff] %vm2617_vm1, %v2591_v24  ;;  %v2561_v12 = vmax.f32 %v2465_v46, %v2497_v11  ;;  %v2285_v43 = vadd.f32 %v2284_v55, %v1580_v1  ;;  %v1600_v29 = vadd.f32 %v4486_v30, %v4834_v45 }
 0x279   : > { %v2594_v34 = vmax.f32 %v4328_v48, %v2562_v19  ;;  %v4603_v42 = vadd.f32 %v4467_v21, %v1475_v44  ;;  %v2500_v8 = vmax.f32 %v2290_v59, 0.0  ;;  %v4835_v19 = vld [vmem:[#allocation19_spill] sm:$0xff] }
 0x27a   : > { %v2593_v50 = vmax.f32 %v4330_v38, %v2561_v12  ;;  %v2499_v28 = vmax.f32 %v2285_v43, 0.0  ;;  %v1479_v51 = vpop.f32.mrb[172].mxu0  ;;  %v3149_v14 = vpop.f32.mrb[172].mxu1  ;;  %v2470_v38 = vmax.f32 %v4498_v5, 0.0  ;;  %v1615_v44 = vadd.f32 %v4486_v30, %v4835_v19 }
 0x27b   : > { %2627 = vst.msk [vmem:[%s4534_s22 + $0x48] sm:$0xff] %vm2617_vm1, %v2594_v34  ;;  %v2564_v7 = vmax.f32 %v2468_v56, %v2500_v8  ;;  %v1480_v48 = vadd.f32 %v4486_v30, %v1479_v51  ;;  %v2300_v3 = vadd.f32 %v3149_v14, %v1595_v57  ;;  %v1481_v22 = vpop.f32.mrb[173].mxu0  ;;  %v2294_v21 = vpop.f32.mrb[173].mxu1  ;;  %v4836_v57 = vld [vmem:[#allocation18_spill] sm:$0xff]  ;;  %v2471_v43 = vmax.f32 %v4505_v40, 0.0 }
 0x27c   : > { %2626 = vst.msk [vmem:[%s4534_s22 + $0x40] sm:$0xff] %vm2617_vm1, %v2593_v50  ;;  %v2563_v32 = vmax.f32 %v2467_v49, %v2499_v28  ;;  %v2295_v47 = vadd.f32 %v2294_v21, %v1590_v4  ;;  %v1610_v12 = vadd.f32 %v4486_v30, %v4836_v57  ;;  %v4837_v50 = vld [vmem:[#allocation21_spill] sm:$0xff]  ;;  %v2473_v21 = vmax.f32 %v4522_v36, 0.0 }
 0x27d   : > { %v2596_v15 = vmax.f32 %v4340_v60, %v2564_v7  ;;  %v4619_v58 = vadd.f32 %v4477_v23, %v1480_v48  ;;  %v2502_v27 = vmax.f32 %v2300_v3, 0.0  ;;  %v1625_v28 = vadd.f32 %v4486_v30, %v4837_v50  ;;  %v4838_v3 = vld [vmem:[#allocation20_spill] sm:$0xff]  ;;  %v4843_v57 = vld [vmem:[#allocation49_spill] sm:$0xff] }
 0x27e   : > { %v2595_v1 = vmax.f32 %v4342_v2, %v2563_v32  ;;  %v2501_v46 = vmax.f32 %v2295_v47, 0.0  ;;  %v1484_v24 = vpop.f32.mrb[174].mxu0  ;;  %v3152_v11 = vpop.f32.mrb[174].mxu1  ;;  %v2472_v2 = vmax.f32 %v4514_v41, 0.0  ;;  %v1620_v22 = vadd.f32 %v4486_v30, %v4838_v3  ;;  %v4847_v3 = vld [vmem:[#allocation36_spill] sm:$0xff] }
 0x27f   : > { %2629 = vst.msk [vmem:[%s4534_s22 + $0x58] sm:$0xff] %vm2617_vm1, %v2596_v15  ;;  %v2566_v5 = vmax.f32 %v2470_v38, %v2502_v27  ;;  %v1485_v60 = vadd.f32 %v4486_v30, %v1484_v24  ;;  %v2310_v63 = vadd.f32 %v3152_v11, %v1605_v20  ;;  %v1486_v33 = vpop.f32.mrb[175].mxu0  ;;  %v2304_v23 = vpop.f32.mrb[175].mxu1  ;;  %v4839_v27 = vld [vmem:[#allocation23_spill] sm:$0xff]  ;;  %v4840_v24 = vld [vmem:[#allocation22_spill] sm:$0xff] }
 0x280   : > { %2628 = vst.msk [vmem:[%s4534_s22 + $0x50] sm:$0xff] %vm2617_vm1, %v2595_v1  ;;  %v2565_v61 = vmax.f32 %v2469_v13, %v2501_v46  ;;  %v2305_v59 = vadd.f32 %v2304_v23, %v1600_v29  ;;  %v1635_v45 = vadd.f32 %v4486_v30, %v4839_v27  ;;  %v1630_v11 = vadd.f32 %v4486_v30, %v4840_v24 }
 0x281   : > { %v2598_v39 = vmax.f32 %v4350_v6, %v2566_v5  ;;  %v4635_v55 = vadd.f32 %v4474_v10, %v1485_v60  ;;  %v2504_v35 = vmax.f32 %v2310_v63, 0.0  ;;  %v2475_v5 = vmax.f32 %v4555_v16, 0.0 }
 0x282   : > { %v2597_v56 = vmax.f32 %v4352_v17, %v2565_v61  ;;  %v2503_v34 = vmax.f32 %v2305_v59, 0.0  ;;  %v1489_v8 = vpop.f32.mrb[176].mxu0  ;;  %v3155_v31 = vpop.f32.mrb[176].mxu1  ;;  %v2474_v17 = vmax.f32 %v4539_v18, 0.0  ;;  %v4841_v61 = vld [vmem:[#allocation25_spill] sm:$0xff] }
 0x283   : > { %2631 = vst.msk [vmem:[%s4534_s22 + $0x68] sm:$0xff] %vm2617_vm1, %v2598_v39  ;;  %v2568_v41 = vmax.f32 %v2472_v2, %v2504_v35  ;;  %v1490_v6 = vadd.f32 %v4486_v30, %v1489_v8  ;;  %v2320_v4 = vadd.f32 %v3155_v31, %v1615_v44  ;;  %v1491_v49 = vpop.f32.mrb[177].mxu0  ;;  %v2314_v10 = vpop.f32.mrb[177].mxu1  ;;  %v1645_v59 = vadd.f32 %v4486_v30, %v4841_v61  ;;  %v4842_v39 = vld [vmem:[#allocation34_spill] sm:$0xff]  ;;  %v4845_v31 = vld [vmem:[#allocation35_spill] sm:$0xff] }
 0x284   : > { %2630 = vst.msk [vmem:[%s4534_s22 + $0x60] sm:$0xff] %vm2617_vm1, %v2597_v56  ;;  %v2567_v40 = vmax.f32 %v2471_v43, %v2503_v34  ;;  %v2315_v51 = vadd.f32 %v2314_v10, %v1610_v12  ;;  %v4844_v56 = vld [vmem:[#allocation24_spill] sm:$0xff]  ;;  %v2477_v8 = vmax.f32 %v4587_v9, 0.0 }
 0x285   : > { %v2600_v14 = vmax.f32 %v4360_v0, %v2568_v41  ;;  %v4651_v7 = vadd.f32 %v4489_v52, %v1490_v6  ;;  %v2506_v48 = vmax.f32 %v2320_v4, 0.0  ;;  %v1640_v34 = vadd.f32 %v4486_v30, %v4844_v56 }
 0x286   : > { %v2599_v37 = vmax.f32 %v4362_v53, %v2567_v40  ;;  %v2505_v20 = vmax.f32 %v2315_v51, 0.0  ;;  %v1494_v32 = vpop.f32.mrb[178].mxu0  ;;  %v3158_v47 = vpop.f32.mrb[178].mxu1  ;;  %v2476_v53 = vmax.f32 %v4571_v26, 0.0  ;;  %v4846_v51 = vld [vmem:[#allocation27_spill] sm:$0xff] }
 0x287   : > { %2633 = vst.msk [vmem:[%s4534_s22 + $0x78] sm:$0xff] %vm2617_vm1, %v2600_v14  ;;  %v2570_v18 = vmax.f32 %v2474_v17, %v2506_v48  ;;  %v1495_v0 = vadd.f32 %v4486_v30, %v1494_v32  ;;  %v2330_v38 = vadd.f32 %v3158_v47, %v1625_v28  ;;  %v1496_v15 = vpop.f32.mrb[179].mxu0  ;;  %v2324_v52 = vpop.f32.mrb[179].mxu1  ;;  %v1655_v17 = vadd.f32 %v4486_v30, %v4846_v51  ;;  %v4849_v32 = vld [vmem:[#allocation26_spill] sm:$0xff] }
 0x288   : > { %2632 = vst.msk [vmem:[%s4534_s22 + $0x70] sm:$0xff] %vm2617_vm1, %v2599_v37  ;;  %v2569_v36 = vmax.f32 %v2473_v21, %v2505_v20  ;;  %v2325_v29 = vadd.f32 %v2324_v52, %v1620_v22  ;;  %v2480_v48 = vmax.f32 %v4635_v55, 0.0  ;;  %v4848_v21 = vld [vmem:[#allocation48_spill] sm:$0xff]  ;;  %v1650_v47 = vadd.f32 %v4486_v30, %v4849_v32 }
 0x289   : > { %v2602_v13 = vmax.f32 %v4370_v25, %v2570_v18  ;;  %v4667_v1 = vadd.f32 %v4481_v54, %v1495_v0  ;;  %v2508_v46 = vmax.f32 %v2330_v38, 0.0  ;;  %v2479_v18 = vmax.f32 %v4619_v58, 0.0  ;;  %v4850_v0 = vld [vmem:[#allocation37_spill] sm:$0xff] }
 0x28a   : > { %v2601_v60 = vmax.f32 %v4372_v62, %v2569_v36  ;;  %v2507_v63 = vmax.f32 %v2325_v29, 0.0  ;;  %v1499_v33 = vpop.f32.mrb[180].mxu0  ;;  %v3161_v23 = vpop.f32.mrb[180].mxu1  ;;  %v2478_v62 = vmax.f32 %v4603_v42, 0.0 }
 0x28b   : > { %2635 = vst.msk [vmem:[%s4534_s22 + $0x88] sm:$0xff] %vm2617_vm1, %v2602_v13  ;;  %v2572_v26 = vmax.f32 %v2476_v53, %v2508_v46  ;;  %v1500_v25 = vadd.f32 %v4486_v30, %v1499_v33  ;;  %v2340_v19 = vadd.f32 %v3161_v23, %v1635_v45  ;;  %v1501_v44 = vpop.f32.mrb[181].mxu0  ;;  %v2334_v54 = vpop.f32.mrb[181].mxu1  ;;  %v4851_v13 = vld [vmem:[#allocation29_spill] sm:$0xff] }
 0x28c   : > { %2634 = vst.msk [vmem:[%s4534_s22 + $0x80] sm:$0xff] %vm2617_vm1, %v2601_v60  ;;  %v2571_v16 = vmax.f32 %v2475_v5, %v2507_v63  ;;  %v2335_v2 = vadd.f32 %v2334_v54, %v1630_v11  ;;  %v1665_v46 = vadd.f32 %v4486_v30, %v4851_v13  ;;  %v2482_v11 = vmax.f32 %v4667_v1, 0.0  ;;  %v4852_v5 = vld [vmem:[#allocation38_spill] sm:$0xff]  ;;  %v4853_v63 = vld [vmem:[#allocation51_spill] sm:$0xff] }
 0x28d   : > { %v2604_v35 = vmax.f32 %v4842_v39, %v2572_v26  ;;  %v4683_v12 = vadd.f32 %v4843_v57, %v1500_v25  ;;  %v2510_v43 = vmax.f32 %v2340_v19, 0.0  ;;  %v4854_v26 = vld [vmem:[#allocation28_spill] sm:$0xff]  ;;  %v2481_v19 = vmax.f32 %v4651_v7, 0.0  ;;  %v4855_v44 = vld [vmem:[#allocation39_spill] sm:$0xff] }
 0x28e   : > { %v2603_v41 = vmax.f32 %v4845_v31, %v2571_v16  ;;  %v2509_v6 = vmax.f32 %v2335_v2, 0.0  ;;  %v1504_v4 = vpop.f32.mrb[182].mxu0  ;;  %v3164_v49 = vpop.f32.mrb[182].mxu1  ;;  %v1660_v25 = vadd.f32 %v4486_v30, %v4854_v26  ;;  %v4856_v57 = vld [vmem:[#allocation31_spill] sm:$0xff]  ;;  %v4867_v26 = vld [vmem:[#allocation52_spill] sm:$0xff] }
 0x28f   : > { %2637 = vst.msk [vmem:[%s4534_s22 + $0x98] sm:$0xff] %vm2617_vm1, %v2604_v35  ;;  %v2574_v42 = vmax.f32 %v2478_v62, %v2510_v43  ;;  %v1505_v10 = vadd.f32 %v4486_v30, %v1504_v4  ;;  %v2350_v50 = vadd.f32 %v3164_v49, %v1645_v59  ;;  %v1506_v28 = vpop.f32.mrb[183].mxu0  ;;  %v2344_v40 = vpop.f32.mrb[183].mxu1  ;;  %v1675_v43 = vadd.f32 %v4486_v30, %v4856_v57  ;;  %v4859_v49 = vld [vmem:[#allocation30_spill] sm:$0xff] }
 0x290   : > { %2636 = vst.msk [vmem:[%s4534_s22 + $0x90] sm:$0xff] %vm2617_vm1, %v2603_v41  ;;  %v2573_v9 = vmax.f32 %v2477_v8, %v2509_v6  ;;  %v2345_v14 = vadd.f32 %v2344_v40, %v1640_v34  ;;  %v4857_v8 = vld [vmem:[#allocation40_spill] sm:$0xff]  ;;  %v4858_v41 = vld [vmem:[#allocation50_spill] sm:$0xff] }
 0x291   : > { %v2606_v22 = vmax.f32 %v4847_v3, %v2574_v42  ;;  %v2210_v37 = vadd.f32 %v4848_v21, %v1505_v10  ;;  %v2512_v20 = vmax.f32 %v2350_v50, 0.0  ;;  %v1670_v42 = vadd.f32 %v4486_v30, %v4859_v49  ;;  %v4860_v50 = vld [vmem:[#allocation41_spill] sm:$0xff] }
 0x292   : > { %v2605_v38 = vmax.f32 %v4850_v0, %v2573_v9  ;;  %v2511_v15 = vmax.f32 %v2345_v14, 0.0  ;;  %v1509_v52 = vpop.f32.mrb[184].mxu0  ;;  %v3167_v27 = vpop.f32.mrb[184].mxu1  ;;  %v2483_v10 = vmax.f32 %v4683_v12, 0.0  ;;  %v4861_v21 = vld [vmem:[#allocation33_spill] sm:$0xff] }
 0x293   : > { %2639 = vst.msk [vmem:[%s4534_s22 + $0xa8] sm:$0xff] %vm2617_vm1, %v2606_v22  ;;  %v2576_v45 = vmax.f32 %v2480_v48, %v2512_v20  ;;  %v1510_v55 = vadd.f32 %v4486_v30, %v1509_v52  ;;  %v2360_v36 = vadd.f32 %v3167_v27, %v1655_v17  ;;  %v1511_v29 = vpop.f32.mrb[185].mxu0  ;;  %v2354_v53 = vpop.f32.mrb[185].mxu1  ;;  %v2484_v34 = vmax.f32 %v2210_v37, 0.0  ;;  %v4863_v0 = vld [vmem:[#allocation53_spill] sm:$0xff]  ;;  %v4864_v52 = vld [vmem:[#allocation32_spill] sm:$0xff] }
 0x294   : > { %2638 = vst.msk [vmem:[%s4534_s22 + $0xa0] sm:$0xff] %vm2617_vm1, %v2605_v38  ;;  %v2575_v58 = vmax.f32 %v2479_v18, %v2511_v15  ;;  %v2355_v24 = vadd.f32 %v2354_v53, %v1650_v47  ;;  %v1685_v37 = vadd.f32 %v4486_v30, %v4861_v21  ;;  %v4862_v47 = vld [vmem:[#allocation42_spill] sm:$0xff]  ;;  %v1680_v27 = vadd.f32 %v4486_v30, %v4864_v52 }
 0x295   : > { %v2608_v60 = vmax.f32 %v4852_v5, %v2576_v45  ;;  %v2215_v33 = vadd.f32 %v4853_v63, %v1510_v55  ;;  %v2514_v23 = vmax.f32 %v2360_v36, 0.0  ;;  %v4865_v55 = vld [vmem:[#allocation43_spill] sm:$0xff] }
 0x296   : > { %v2607_v54 = vmax.f32 %v4855_v44, %v2575_v58  ;;  %v2513_v61 = vmax.f32 %v2355_v24, 0.0  ;;  %v1514_v59 = vpop.f32.mrb[186].mxu0  ;;  %v3170_v16 = vpop.f32.mrb[186].mxu1  ;;  %v4868_v44 = vld [vmem:[#allocation45_spill] sm:$0xff] }
 0x297   : > { %2641 = vst.msk [vmem:[%s4534_s22 + $0xb8] sm:$0xff] %vm2617_vm1, %v2608_v60  ;;  %v2578_v2 = vmax.f32 %v2482_v11, %v2514_v23  ;;  %v1515_v1 = vadd.f32 %v4486_v30, %v1514_v59  ;;  %v2370_v62 = vadd.f32 %v3170_v16, %v1665_v46  ;;  %v1516_v39 = vpop.f32.mrb[187].mxu0  ;;  %v2364_v35 = vpop.f32.mrb[187].mxu1  ;;  %v2485_v45 = vmax.f32 %v2215_v33, 0.0  ;;  %v4866_v33 = vld [vmem:[#allocation44_spill] sm:$0xff] }
 0x298   : > { %2640 = vst.msk [vmem:[%s4534_s22 + $0xb0] sm:$0xff] %vm2617_vm1, %v2607_v54  ;;  %v2577_v7 = vmax.f32 %v2481_v19, %v2513_v61  ;;  %v2365_v56 = vadd.f32 %v2364_v35, %v1660_v25  ;;  %v4870_v39 = vld [vmem:[#allocation47_spill] sm:$0xff] }
 0x299   : > { %v2610_v31 = vmax.f32 %v4857_v8, %v2578_v2  ;;  %v2220_v6 = vadd.f32 %v4858_v41, %v1515_v1  ;;  %v2516_v4 = vmax.f32 %v2370_v62, 0.0  ;;  %v4869_v1 = vld [vmem:[#allocation46_spill] sm:$0xff] }
 0x29a   : > { %v2609_v28 = vmax.f32 %v4860_v50, %v2577_v7  ;;  %v2515_v40 = vmax.f32 %v2365_v56, 0.0  ;;  %v1519_v51 = vpop.f32.mrb[188].mxu0  ;;  %v3173_v17 = vpop.f32.mrb[188].mxu1 }
 0x29b   : > { %2643 = vst.msk [vmem:[%s4534_s22 + $0xc8] sm:$0xff] %vm2617_vm1, %v2610_v31  ;;  %v2580_v9 = vmax.f32 %v2484_v34, %v2516_v4  ;;  %v1520_v14 = vadd.f32 %v4486_v30, %v1519_v51  ;;  %v2380_v48 = vadd.f32 %v3173_v17, %v1675_v43  ;;  %v1521_v3 = vpop.f32.mrb[189].mxu0  ;;  %v2374_v22 = vpop.f32.mrb[189].mxu1  ;;  %v2486_v32 = vmax.f32 %v2220_v6, 0.0 }
 0x29c   : > { %2642 = vst.msk [vmem:[%s4534_s22 + $0xc0] sm:$0xff] %vm2617_vm1, %v2609_v28  ;;  %v2579_v12 = vmax.f32 %v2483_v10, %v2515_v40  ;;  %v2375_v20 = vadd.f32 %v2374_v22, %v1670_v42 }
 0x29d   : > { %v2612_v18 = vmax.f32 %v4862_v47, %v2580_v9  ;;  %v2225_v38 = vadd.f32 %v4863_v0, %v1520_v14  ;;  %v2518_v15 = vmax.f32 %v2380_v48, 0.0 }
 0x29e   : > { %v2611_v36 = vmax.f32 %v4865_v55, %v2579_v12  ;;  %v2517_v29 = vmax.f32 %v2375_v20, 0.0  ;;  %v1524_v53 = vpop.f32.mrb[190].mxu0  ;;  %v3176_v13 = vpop.f32.mrb[190].mxu1 }
 0x29f   : > { %2645 = vst.msk [vmem:[%s4534_s22 + $0xd8] sm:$0xff] %vm2617_vm1, %v2612_v18  ;;  %v2582_v46 = vmax.f32 %v2486_v32, %v2518_v15  ;;  %v1525_v58 = vadd.f32 %v4486_v30, %v1524_v53  ;;  %v2390_v24 = vadd.f32 %v3176_v13, %v1685_v37  ;;  %v1526_v11 = vpop.f32.mrb[191].mxu0  ;;  %v2384_v5 = vpop.f32.mrb[191].mxu1  ;;  %v2487_v19 = vmax.f32 %v2225_v38, 0.0 }
 0x2a0   : > { %2644 = vst.msk [vmem:[%s4534_s22 + $0xd0] sm:$0xff] %vm2617_vm1, %v2611_v36  ;;  %v2581_v60 = vmax.f32 %v2485_v45, %v2517_v29  ;;  %v2385_v63 = vadd.f32 %v2384_v5, %v1680_v27 }
 0x2a1   : > { %v2614_v23 = vmax.f32 %v4866_v33, %v2582_v46  ;;  %v2230_v25 = vadd.f32 %v4867_v26, %v1525_v58  ;;  %v2520_v59 = vmax.f32 %v2390_v24, 0.0 }
 0x2a2   : > { %v2613_v54 = vmax.f32 %v4868_v44, %v2581_v60  ;;  %v2519_v61 = vmax.f32 %v2385_v63, 0.0 }
 0x2a3   : > { %2647 = vst.msk [vmem:[%s4534_s22 + $0xe8] sm:$0xff] %vm2617_vm1, %v2614_v23  ;;  %v2488_v30 = vmax.f32 %v2230_v25, 0.0 }
 0x2a4   : > { %2646 = vst.msk [vmem:[%s4534_s22 + $0xe0] sm:$0xff] %vm2617_vm1, %v2613_v54  ;;  %v2583_v16 = vmax.f32 %v2487_v19, %v2519_v61 }
 0x2a5   : > { %v2584_v2 = vmax.f32 %v2488_v30, %v2520_v59 }
 0x2a6   : > { %v2615_v62 = vmax.f32 %v4869_v1, %v2583_v16 }
 0x2a7   : > { %v2616_v35 = vmax.f32 %v4870_v39, %v2584_v2 }
 0x2a8   : > { %2648 = vst.msk [vmem:[%s4534_s22 + $0xf0] sm:$0xff] %vm2617_vm1, %v2615_v62 }
 0x2a9   : > { %2649 = vst.msk [vmem:[%s4534_s22 + $0xf8] sm:$0xff] %vm2617_vm1, %v2616_v35 }
 0x2aa PF: > { %s13_s12 = sadd.s32 1, %s3282_s12  }
 0x2ab   : > { %p10_p4 = scmp.ge.s32.totalorder %s13_s12, 4  }
 0x2ad   :  { %12 = sbr.rel (!%p10_p4) target bundleno = 1 (0x1), region = 62 }

// kernel: cnn_forward.7
= control target key start
LH: loop header
LB: loop body
LE: loop exit
PB: predicated region body
PF: predicated region fallthrough
CT: control target
= control target key end

     0   :  { %10 = vsyncpa [#allocation4], 0  ;;  %s2059_s18 = smov 0   ;;  %s2466_s0 = inlined_call_operand.vmem [shape: f32[2,16384], index: 0, kind: input, shape index: {}]   ;;  %s2467_s1 = inlined_call_operand.vmem [shape: f32[16384,128], index: 1, kind: input, shape index: {}]   ;;  %s2468_s2 = inlined_call_operand.vmem [shape: f32[1,128], index: 2, kind: input, shape index: {}]   ;;  %s2469_s3 = inlined_call_operand.vmem [shape: f32[128,5], index: 3, kind: input, shape index: {}]   ;;  %s2470_s4 = inlined_call_operand.vmem [shape: f32[1,5], index: 4, kind: input, shape index: {}]   ;;  %s2471_s5 = inlined_call_operand.hbm [shape: f32[2,5], index: 5, kind: output, shape index: {}]  }
   0x1 LB: > { %s2065_s19 = sadd.s32 4294967295, %s2021_s18   ;;  %p1332_p0 = scmp.ge.s32.totalorder %s2021_s18, 1  ;;  %s2021_s18 = sphi %s2059_s18, %s16_s18  }
   0x2   : > { %p195_p1 = scmp.lt.s32.totalorder %s2021_s18, 9 }
   0x4   : > { %p196_p2 = pnand %p1332_p0, %p195_p1 }
   0x5   : > { %s1333_s20 = sshll.u32 (!%p196_p2), %s2065_s19, 4  ;;  %s1335_s21 = sshll.u32 (!%p196_p2), %s2065_s19, 8 }
   0x6   : > { %199 = sbr.rel (%p196_p2) target bundleno = 942 (0x3ae), region = 40  ;;  %p224_p3 = scmp.lt.s32.totalorder (!%p196_p2), %s1333_s20, 127 }
   0x7   : > { %p230_p4 = scmp.lt.s32.totalorder (!%p196_p2), %s1335_s21, 2047  ;;  %p1337_p5 = scmp.ne.s32.totalorder (!%p196_p2), %s2065_s19, 0 }
   0xd   : > { %s2473_s20 = smov (!%p224_p3, %s1333_s20), 127  ;;  %s2475_s21 = smov (!%p230_p4, %s1335_s21), 2047 }
   0xe   : > { %s1334_s22 = sshll.u32 %s2473_s20, 1  ;;  %s1336_s26 = sshll.u32 %s2475_s21, 3  ;;  %v2023_v0 = vmov (!%p1337_p5), 0.0  }
   0xf   : > { %s2074_s25 = scalar_lea.vmem %s2466_s0, %s1334_s22  ;;  %s2079_s29 = scalar_lea.vmem %s2467_s1, %s1336_s26  ;;  %239 = vst [vmem:[#allocation2] sm:$0x3] (!%p1337_p5), %v2023_v0 }
  0x10   : > { %238 = sbr.rel (%p1337_p5) target bundleno = 23 (0x17), region = 44 }
  0x17 PF: > { %v261_v1 = vld [vmem:[%s2079_s29 + $0x80] sm:$0xff]  ;;  %v262_v2 = vld [vmem:[%s2079_s29 + $0x88] sm:$0xff]  ;;  %v263_v12 = vld [vmem:[%s2079_s29 + $0x90] sm:$0xff]  ;;  %v2024_v48 = vmov 1983009808   ;;  %v509_v50 = vlaneseq  ;;  %p1338_p6 = scmp.ne.s32.totalorder %s2065_s19, 7 }
  0x18   : > { %v293_v3 = vld [vmem:[%s2079_s29 + $0x180] sm:$0xff]  ;;  %v1677_v4 = vpack.c.bf16 %v262_v2, %v261_v1  ;;  %v294_v5 = vld [vmem:[%s2079_s29 + $0x188] sm:$0xff]  ;;  %v264_v14 = vld [vmem:[%s2079_s29 + $0x98] sm:$0xff]  ;;  %v507_v49 = vunpack.c.l.s4 %v2024_v48  ;;  %vm2026_vm0 = vmmov (!%p1338_p6), 0   ;;  %vm1258_vm1 = vcmask (!%p1338_p6), 33792  }
  0x19   : > { %v245_v6 = vld [vmem:[%s2079_s29] sm:$0xff]  ;;  %v246_v7 = vld [vmem:[%s2079_s29 + $0x8] sm:$0xff]  ;;  %v1709_v8 = vpack.c.bf16 %v294_v5, %v293_v3  ;;  %v295_v15 = vld [vmem:[%s2079_s29 + $0x190] sm:$0xff]  ;;  %v1681_v17 = vpack.c.bf16 %v264_v14, %v263_v12  ;;  %v510_v1 = vshrl.u32 %v509_v50, 7 }
  0x1a   : > { %v1679_v9 = vpack.c.bf16 %v246_v7, %v245_v6  ;;  %v277_v10 = vld [vmem:[%s2079_s29 + $0x100] sm:$0xff]  ;;  %v278_v11 = vld [vmem:[%s2079_s29 + $0x108] sm:$0xff]  ;;  %1678 = vmatprep.subr.bf16.mxu0 %v1677_v4  ;;  %v296_v16 = vld [vmem:[%s2079_s29 + $0x198] sm:$0xff]  ;;  %v508_v0 = vunpack.c.0.s8 %v507_v49 }
  0x1b   : > { %v1711_v13 = vpack.c.bf16 %v278_v11, %v277_v10  ;;  %1710 = vmatprep.subr.bf16.mxu1 %v1709_v8  ;;  %v1713_v18 = vpack.c.bf16 %v296_v16, %v295_v15  ;;  %v247_v19 = vld [vmem:[%s2079_s29 + $0x10] sm:$0xff]  ;;  %v248_v20 = vld [vmem:[%s2079_s29 + $0x18] sm:$0xff]  ;;  %v265_v24 = vld [vmem:[%s2079_s29 + $0xa0] sm:$0xff] }
  0x1c   : > { %1680 = vmatpush3.bf16.msra.mxu0 %v1679_v9  ;;  %v279_v21 = vld [vmem:[%s2079_s29 + $0x110] sm:$0xff]  ;;  %v1683_v22 = vpack.c.bf16 %v248_v20, %v247_v19  ;;  %v280_v23 = vld [vmem:[%s2079_s29 + $0x118] sm:$0xff]  ;;  %v266_v25 = vld [vmem:[%s2079_s29 + $0xa8] sm:$0xff]  ;;  %v2132_v14 = vsub.s32 %v508_v0, %v510_v1 }
  0x1d   : > { %1712 = vmatpush3.bf16.msra.mxu1 %v1711_v13  ;;  %1682 = vmatprep.subr.bf16.mxu0 %v1681_v17  ;;  %v1715_v26 = vpack.c.bf16 %v280_v23, %v279_v21  ;;  %v1685_v27 = vpack.c.bf16 %v266_v25, %v265_v24  ;;  %v297_v28 = vld [vmem:[%s2079_s29 + $0x1a0] sm:$0xff]  ;;  %v298_v29 = vld [vmem:[%s2079_s29 + $0x1a8] sm:$0xff]  ;;  %v267_v36 = vld [vmem:[%s2079_s29 + $0xb0] sm:$0xff] }
  0x1e   : > { %1714 = vmatprep.subr.bf16.mxu1 %v1713_v18  ;;  %v249_v30 = vld [vmem:[%s2079_s29 + $0x20] sm:$0xff]  ;;  %v1717_v31 = vpack.c.bf16 %v298_v29, %v297_v28  ;;  %v250_v32 = vld [vmem:[%s2079_s29 + $0x28] sm:$0xff]  ;;  %v268_v37 = vld [vmem:[%s2079_s29 + $0xb8] sm:$0xff] }
  0x1f   : > { %v281_v33 = vld [vmem:[%s2079_s29 + $0x120] sm:$0xff]  ;;  %v282_v34 = vld [vmem:[%s2079_s29 + $0x128] sm:$0xff]  ;;  %v1687_v35 = vpack.c.bf16 %v250_v32, %v249_v30  ;;  %v299_v38 = vld [vmem:[%s2079_s29 + $0x1b0] sm:$0xff]  ;;  %v1689_v40 = vpack.c.bf16 %v268_v37, %v267_v36 }
  0x20   : > { %1684 = vmatpush3.bf16.msra.mxu0 %v1683_v22  ;;  %v1719_v39 = vpack.c.bf16 %v282_v34, %v281_v33  ;;  %v300_v41 = vld [vmem:[%s2079_s29 + $0x1b8] sm:$0xff]  ;;  %v251_v42 = vld [vmem:[%s2079_s29 + $0x30] sm:$0xff]  ;;  %v269_v47 = vld [vmem:[%s2079_s29 + $0xc0] sm:$0xff] }
  0x21   : > { %1716 = vmatpush3.bf16.msra.mxu1 %v1715_v26  ;;  %1686 = vmatprep.subr.bf16.mxu0 %v1685_v27  ;;  %v252_v43 = vld [vmem:[%s2079_s29 + $0x38] sm:$0xff]  ;;  %v1721_v44 = vpack.c.bf16 %v300_v41, %v299_v38  ;;  %v283_v45 = vld [vmem:[%s2079_s29 + $0x130] sm:$0xff]  ;;  %v270_v51 = vld [vmem:[%s2079_s29 + $0xc8] sm:$0xff] }
  0x22   : > { %1718 = vmatprep.subr.bf16.mxu1 %v1717_v31  ;;  %v284_v46 = vld [vmem:[%s2079_s29 + $0x138] sm:$0xff]  ;;  %v301_v52 = vld [vmem:[%s2079_s29 + $0x1c0] sm:$0xff]  ;;  %v302_v53 = vld [vmem:[%s2079_s29 + $0x1c8] sm:$0xff]  ;;  %v1691_v54 = vpack.c.bf16 %v252_v43, %v251_v42  ;;  %v1693_v56 = vpack.c.bf16 %v270_v51, %v269_v47 }
  0x23   : > { %v1723_v55 = vpack.c.bf16 %v284_v46, %v283_v45  ;;  %v253_v57 = vld [vmem:[%s2079_s29 + $0x40] sm:$0xff]  ;;  %v254_v58 = vld [vmem:[%s2079_s29 + $0x48] sm:$0xff]  ;;  %v1725_v60 = vpack.c.bf16 %v302_v53, %v301_v52  ;;  %v271_v62 = vld [vmem:[%s2079_s29 + $0xd0] sm:$0xff] }
  0x24   : > { %1688 = vmatpush3.bf16.msra.mxu0 %v1687_v35  ;;  %v285_v59 = vld [vmem:[%s2079_s29 + $0x140] sm:$0xff]  ;;  %v286_v61 = vld [vmem:[%s2079_s29 + $0x148] sm:$0xff]  ;;  %v272_v63 = vld [vmem:[%s2079_s29 + $0xd8] sm:$0xff]  ;;  %v1695_v4 = vpack.c.bf16 %v254_v58, %v253_v57 }
  0x25   : > { %1720 = vmatpush3.bf16.msra.mxu1 %v1719_v39  ;;  %1690 = vmatprep.subr.bf16.mxu0 %v1689_v40  ;;  %v303_v2 = vld [vmem:[%s2079_s29 + $0x1d0] sm:$0xff]  ;;  %v304_v3 = vld [vmem:[%s2079_s29 + $0x1d8] sm:$0xff]  ;;  %v1727_v5 = vpack.c.bf16 %v286_v61, %v285_v59  ;;  %v1697_v6 = vpack.c.bf16 %v272_v63, %v271_v62  ;;  %v273_v12 = vld [vmem:[%s2079_s29 + $0xe0] sm:$0xff] }
  0x26   : > { %1722 = vmatprep.subr.bf16.mxu1 %v1721_v44  ;;  %v255_v7 = vld [vmem:[%s2079_s29 + $0x50] sm:$0xff]  ;;  %v256_v8 = vld [vmem:[%s2079_s29 + $0x58] sm:$0xff]  ;;  %v1729_v10 = vpack.c.bf16 %v304_v3, %v303_v2  ;;  %v274_v13 = vld [vmem:[%s2079_s29 + $0xe8] sm:$0xff] }
  0x27   : > { %v287_v9 = vld [vmem:[%s2079_s29 + $0x150] sm:$0xff]  ;;  %v288_v11 = vld [vmem:[%s2079_s29 + $0x158] sm:$0xff]  ;;  %v305_v15 = vld [vmem:[%s2079_s29 + $0x1e0] sm:$0xff]  ;;  %v1699_v17 = vpack.c.bf16 %v256_v8, %v255_v7  ;;  %v1701_v20 = vpack.c.bf16 %v274_v13, %v273_v12 }
  0x28   : > { %1692 = vmatpush3.bf16.msra.mxu0 %v1691_v54  ;;  %v306_v16 = vld [vmem:[%s2079_s29 + $0x1e8] sm:$0xff]  ;;  %v257_v18 = vld [vmem:[%s2079_s29 + $0x60] sm:$0xff]  ;;  %v1731_v19 = vpack.c.bf16 %v288_v11, %v287_v9  ;;  %v275_v26 = vld [vmem:[%s2079_s29 + $0xf0] sm:$0xff] }
  0x29   : > { %1724 = vmatpush3.bf16.msra.mxu1 %v1723_v55  ;;  %1694 = vmatprep.subr.bf16.mxu0 %v1693_v56  ;;  %v258_v21 = vld [vmem:[%s2079_s29 + $0x68] sm:$0xff]  ;;  %v289_v22 = vld [vmem:[%s2079_s29 + $0x160] sm:$0xff]  ;;  %v1733_v24 = vpack.c.bf16 %v306_v16, %v305_v15  ;;  %v276_v27 = vld [vmem:[%s2079_s29 + $0xf8] sm:$0xff] }
  0x2a   : > { %1726 = vmatprep.subr.bf16.mxu1 %v1725_v60  ;;  %v241_v23 = vld [vmem:[%s2074_s25] sm:$0xff]  ;;  %v290_v25 = vld [vmem:[%s2079_s29 + $0x168] sm:$0xff]  ;;  %v307_v30 = vld [vmem:[%s2079_s29 + $0x1f0] sm:$0xff]  ;;  %v1703_v32 = vpack.c.bf16 %v258_v21, %v257_v18  ;;  %v1705_v36 = vpack.c.bf16 %v276_v27, %v275_v26 }
  0x2b   : > { %v512_v28 = vrot.slane %v241_v23, %v2132_v14  ;;  %v505_v29 = vcombine.high %v241_v23, %v241_v23  ;;  %v308_v31 = vld [vmem:[%s2079_s29 + $0x1f8] sm:$0xff]  ;;  %v1735_v35 = vpack.c.bf16 %v290_v25, %v289_v22  ;;  %v259_v37 = vld [vmem:[%s2079_s29 + $0x70] sm:$0xff]  ;;  %v325_v43 = vld [vmem:[%s2079_s29 + $0x280] sm:$0xff] }
  0x2c   : > { %1696 = vmatpush3.bf16.msra.mxu0 %v1695_v4  ;;  %v260_v38 = vld [vmem:[%s2079_s29 + $0x78] sm:$0xff]  ;;  %v291_v39 = vld [vmem:[%s2079_s29 + $0x170] sm:$0xff]  ;;  %v1737_v40 = vpack.c.bf16 %v308_v31, %v307_v30  ;;  %v326_v44 = vld [vmem:[%s2079_s29 + $0x288] sm:$0xff] }
  0x2d   : > { %1728 = vmatpush3.bf16.msra.mxu1 %v1727_v5  ;;  %1698 = vmatprep.subr.bf16.mxu0 %v1697_v6  ;;  %v520_v33 = vcombine.high %v512_v28, %v512_v28  ;;  %v519_v34 = vrot.slane %v505_v29, %v2132_v14  ;;  %v292_v41 = vld [vmem:[%s2079_s29 + $0x178] sm:$0xff]  ;;  %v357_v45 = vld [vmem:[%s2079_s29 + $0x380] sm:$0xff]  ;;  %v358_v46 = vld [vmem:[%s2079_s29 + $0x388] sm:$0xff]  ;;  %v1707_v47 = vpack.c.bf16 %v260_v38, %v259_v37 }
  0x2e   : > { %1730 = vmatprep.subr.bf16.mxu1 %v1729_v10  ;;  %v1739_v48 = vpack.c.bf16 %v292_v41, %v291_v39  ;;  %v1741_v49 = vpack.c.bf16 %v326_v44, %v325_v43  ;;  %v309_v50 = vld [vmem:[%s2079_s29 + $0x200] sm:$0xff]  ;;  %v310_v51 = vld [vmem:[%s2079_s29 + $0x208] sm:$0xff]  ;;  %v1773_v53 = vpack.c.bf16 %v358_v46, %v357_v45  ;;  %v327_v55 = vld [vmem:[%s2079_s29 + $0x290] sm:$0xff] }
  0x2f   : > { %653 = vmatprep.mubr.f32.mxu0 %v520_v33  ;;  %v521_v42 = vcombine.high %v519_v34, %v519_v34  ;;  %v341_v52 = vld [vmem:[%s2079_s29 + $0x300] sm:$0xff]  ;;  %v342_v54 = vld [vmem:[%s2079_s29 + $0x308] sm:$0xff]  ;;  %v328_v56 = vld [vmem:[%s2079_s29 + $0x298] sm:$0xff]  ;;  %v1743_v59 = vpack.c.bf16 %v310_v51, %v309_v50 }
  0x30   : > { %1700 = vmatpush3.bf16.msra.mxu0 %v1699_v17  ;;  %v359_v57 = vld [vmem:[%s2079_s29 + $0x390] sm:$0xff]  ;;  %v360_v58 = vld [vmem:[%s2079_s29 + $0x398] sm:$0xff]  ;;  %v1775_v60 = vpack.c.bf16 %v342_v54, %v341_v52  ;;  %v1745_v61 = vpack.c.bf16 %v328_v56, %v327_v55  ;;  %v329_v3 = vld [vmem:[%s2079_s29 + $0x2a0] sm:$0xff] }
  0x31   : > { %1732 = vmatpush3.bf16.msra.mxu1 %v1731_v19  ;;  %1702 = vmatprep.subr.bf16.mxu0 %v1701_v20  ;;  %v311_v62 = vld [vmem:[%s2079_s29 + $0x210] sm:$0xff]  ;;  %v312_v63 = vld [vmem:[%s2079_s29 + $0x218] sm:$0xff]  ;;  %v1777_v1 = vpack.c.bf16 %v360_v58, %v359_v57  ;;  %v330_v4 = vld [vmem:[%s2079_s29 + $0x2a8] sm:$0xff] }
  0x32   : > { %1734 = vmatprep.subr.bf16.mxu1 %v1733_v24  ;;  %723 = vmatprep.mubr.f32.mxu1 %v521_v42  ;;  %v343_v0 = vld [vmem:[%s2079_s29 + $0x310] sm:$0xff]  ;;  %v344_v2 = vld [vmem:[%s2079_s29 + $0x318] sm:$0xff]  ;;  %v361_v5 = vld [vmem:[%s2079_s29 + $0x3a0] sm:$0xff]  ;;  %v1747_v7 = vpack.c.bf16 %v312_v63, %v311_v62  ;;  %v1749_v9 = vpack.c.bf16 %v330_v4, %v329_v3 }
  0x33   : > { %v362_v6 = vld [vmem:[%s2079_s29 + $0x3a8] sm:$0xff]  ;;  %v1779_v8 = vpack.c.bf16 %v344_v2, %v343_v0  ;;  %v313_v10 = vld [vmem:[%s2079_s29 + $0x220] sm:$0xff]  ;;  %v331_v16 = vld [vmem:[%s2079_s29 + $0x2b0] sm:$0xff] }
  0x34   : > { %1704 = vmatpush3.bf16.msra.mxu0 %v1703_v32  ;;  %v314_v11 = vld [vmem:[%s2079_s29 + $0x228] sm:$0xff]  ;;  %v345_v12 = vld [vmem:[%s2079_s29 + $0x320] sm:$0xff]  ;;  %v1781_v13 = vpack.c.bf16 %v362_v6, %v361_v5  ;;  %v332_v17 = vld [vmem:[%s2079_s29 + $0x2b8] sm:$0xff] }
  0x35   : > { %1736 = vmatpush3.bf16.msra.mxu1 %v1735_v35  ;;  %1706 = vmatprep.subr.bf16.mxu0 %v1705_v36  ;;  %v346_v15 = vld [vmem:[%s2079_s29 + $0x328] sm:$0xff]  ;;  %v363_v18 = vld [vmem:[%s2079_s29 + $0x3b0] sm:$0xff]  ;;  %v364_v19 = vld [vmem:[%s2079_s29 + $0x3b8] sm:$0xff]  ;;  %v1751_v20 = vpack.c.bf16 %v314_v11, %v313_v10  ;;  %v1753_v22 = vpack.c.bf16 %v332_v17, %v331_v16 }
  0x36   : > { %1738 = vmatprep.subr.bf16.mxu1 %v1737_v40  ;;  %v1783_v21 = vpack.c.bf16 %v346_v15, %v345_v12  ;;  %v315_v23 = vld [vmem:[%s2079_s29 + $0x230] sm:$0xff]  ;;  %v316_v24 = vld [vmem:[%s2079_s29 + $0x238] sm:$0xff]  ;;  %v1785_v26 = vpack.c.bf16 %v364_v19, %v363_v18  ;;  %v334_v29 = vld [vmem:[%s2079_s29 + $0x2c8] sm:$0xff] }
  0x37   : > { %v347_v25 = vld [vmem:[%s2079_s29 + $0x330] sm:$0xff]  ;;  %v348_v27 = vld [vmem:[%s2079_s29 + $0x338] sm:$0xff]  ;;  %v365_v30 = vld [vmem:[%s2079_s29 + $0x3c0] sm:$0xff]  ;;  %v1755_v33 = vpack.c.bf16 %v316_v24, %v315_v23 }
  0x38   : > { %1708 = vmatpush3.bf16.msra.mxu0 %v1707_v47  ;;  %v366_v31 = vld [vmem:[%s2079_s29 + $0x3c8] sm:$0xff]  ;;  %v1787_v36 = vpack.c.bf16 %v348_v27, %v347_v25  ;;  %v317_v38 = vld [vmem:[%s2079_s29 + $0x240] sm:$0xff]  ;;  %v335_v43 = vld [vmem:[%s2079_s29 + $0x2d0] sm:$0xff] }
  0x39   : > { %1740 = vmatpush3.bf16.msra.mxu1 %v1739_v48  ;;  %1742 = vmatprep.subr.bf16.mxu0 %v1741_v49  ;;  %v242_v32 = vld [vmem:[%s2074_s25 + $0x8] sm:$0xff]  ;;  %v349_v40 = vld [vmem:[%s2079_s29 + $0x340] sm:$0xff]  ;;  %v1789_v41 = vpack.c.bf16 %v366_v31, %v365_v30  ;;  %v336_v44 = vld [vmem:[%s2079_s29 + $0x2d8] sm:$0xff] }
  0x3a   : > { %1774 = vmatprep.subr.bf16.mxu1 %v1773_v53  ;;  %v522_v35 = vcombine.high %v242_v32, %v242_v32  ;;  %v318_v39 = vld [vmem:[%s2079_s29 + $0x248] sm:$0xff]  ;;  %v367_v47 = vld [vmem:[%s2079_s29 + $0x3d0] sm:$0xff]  ;;  %v368_v48 = vld [vmem:[%s2079_s29 + $0x3d8] sm:$0xff]  ;;  %v1761_v52 = vpack.c.bf16 %v336_v44, %v335_v43 }
  0x3b   : > { %654 = vmatmul.mubr.f32.vlgmr.msra.gmra.mrb[0].mxu0 %v512_v28  ;;  %v333_v28 = vld [vmem:[%s2079_s29 + $0x2c0] sm:$0xff]  ;;  %v350_v42 = vld [vmem:[%s2079_s29 + $0x348] sm:$0xff]  ;;  %v1759_v49 = vpack.c.bf16 %v318_v39, %v317_v38  ;;  %v319_v53 = vld [vmem:[%s2079_s29 + $0x250] sm:$0xff]  ;;  %v1793_v56 = vpack.c.bf16 %v368_v48, %v367_v47 }
  0x3c   : > { %724 = vmatmul.mubr.f32.vlgmr.msra.gmra.mrb[0].mxu1 %v519_v34  ;;  %1744 = vmatpush3.bf16.msra.mxu0 %v1743_v59  ;;  %v2189_v34 = vrot.slane %v242_v32, %v2132_v14  ;;  %v1757_v37 = vpack.c.bf16 %v334_v29, %v333_v28  ;;  %v2200_v46 = vrot.slane %v522_v35, %v2132_v14  ;;  %v320_v54 = vld [vmem:[%s2079_s29 + $0x258] sm:$0xff]  ;;  %v351_v55 = vld [vmem:[%s2079_s29 + $0x350] sm:$0xff]  ;;  %v337_v58 = vld [vmem:[%s2079_s29 + $0x2e0] sm:$0xff] }
  0x3d   : > { %1776 = vmatpush3.bf16.msra.mxu1 %v1775_v60  ;;  %1746 = vmatprep.subr.bf16.mxu0 %v1745_v61  ;;  %v1791_v51 = vpack.c.bf16 %v350_v42, %v349_v40  ;;  %v352_v57 = vld [vmem:[%s2079_s29 + $0x358] sm:$0xff]  ;;  %v338_v59 = vld [vmem:[%s2079_s29 + $0x2e8] sm:$0xff]  ;;  %v369_v60 = vld [vmem:[%s2079_s29 + $0x3e0] sm:$0xff]  ;;  %v1763_v62 = vpack.c.bf16 %v320_v54, %v319_v53 }
  0x3e   : > { %1778 = vmatprep.subr.bf16.mxu1 %v1777_v1  ;;  %v537_v45 = vcombine.high %v2189_v34, %v2189_v34  ;;  %v538_v50 = vcombine.high %v2200_v46, %v2200_v46  ;;  %v370_v61 = vld [vmem:[%s2079_s29 + $0x3e8] sm:$0xff]  ;;  %v1795_v63 = vpack.c.bf16 %v352_v57, %v351_v55  ;;  %v1765_v0 = vpack.c.bf16 %v338_v59, %v337_v58  ;;  %v321_v1 = vld [vmem:[%s2079_s29 + $0x260] sm:$0xff]  ;;  %v339_v6 = vld [vmem:[%s2079_s29 + $0x2f0] sm:$0xff] }
  0x3f   : > { %v322_v2 = vld [vmem:[%s2079_s29 + $0x268] sm:$0xff]  ;;  %v353_v3 = vld [vmem:[%s2079_s29 + $0x360] sm:$0xff]  ;;  %v1797_v4 = vpack.c.bf16 %v370_v61, %v369_v60  ;;  %v324_v15 = vld [vmem:[%s2079_s29 + $0x278] sm:$0xff] }
  0x40   : > { %1748 = vmatpush3.bf16.msra.mxu0 %v1747_v7  ;;  %793 = vmatprep.mubr.f32.mxu0 %v537_v45  ;;  %v354_v5 = vld [vmem:[%s2079_s29 + $0x368] sm:$0xff]  ;;  %v340_v7 = vld [vmem:[%s2079_s29 + $0x2f8] sm:$0xff]  ;;  %v1767_v10 = vpack.c.bf16 %v322_v2, %v321_v1  ;;  %v355_v16 = vld [vmem:[%s2079_s29 + $0x370] sm:$0xff] }
  0x41   : > { %1780 = vmatpush3.bf16.msra.mxu1 %v1779_v8  ;;  %1750 = vmatprep.subr.bf16.mxu0 %v1749_v9  ;;  %v371_v8 = vld [vmem:[%s2079_s29 + $0x3f0] sm:$0xff]  ;;  %v372_v9 = vld [vmem:[%s2079_s29 + $0x3f8] sm:$0xff]  ;;  %v1799_v11 = vpack.c.bf16 %v354_v5, %v353_v3  ;;  %v1769_v12 = vpack.c.bf16 %v340_v7, %v339_v6  ;;  %v389_v19 = vld [vmem:[%s2079_s29 + $0x480] sm:$0xff] }
  0x42   : > { %1782 = vmatprep.subr.bf16.mxu1 %v1781_v13  ;;  %863 = vmatprep.mubr.f32.mxu1 %v538_v50  ;;  %v323_v13 = vld [vmem:[%s2079_s29 + $0x270] sm:$0xff]  ;;  %v1801_v17 = vpack.c.bf16 %v372_v9, %v371_v8  ;;  %v356_v18 = vld [vmem:[%s2079_s29 + $0x378] sm:$0xff]  ;;  %v373_v24 = vld [vmem:[%s2079_s29 + $0x400] sm:$0xff] }
  0x43   : > { %v1771_v23 = vpack.c.bf16 %v324_v15, %v323_v13  ;;  %v1803_v25 = vpack.c.bf16 %v356_v18, %v355_v16  ;;  %v374_v27 = vld [vmem:[%s2079_s29 + $0x408] sm:$0xff]  ;;  %v405_v28 = vld [vmem:[%s2079_s29 + $0x500] sm:$0xff]  ;;  %v391_v31 = vld [vmem:[%s2079_s29 + $0x490] sm:$0xff] }
  0x44   : > { %1752 = vmatpush3.bf16.msra.mxu0 %v1751_v20  ;;  %v390_v20 = vld [vmem:[%s2079_s29 + $0x488] sm:$0xff]  ;;  %v392_v32 = vld [vmem:[%s2079_s29 + $0x498] sm:$0xff]  ;;  %v243_v38 = vld [vmem:[%s2074_s25 + $0x10] sm:$0xff] }
  0x45   : > { %1784 = vmatpush3.bf16.msra.mxu1 %v1783_v21  ;;  %1754 = vmatprep.subr.bf16.mxu0 %v1753_v22  ;;  %v421_v21 = vld [vmem:[%s2079_s29 + $0x580] sm:$0xff]  ;;  %v422_v22 = vld [vmem:[%s2079_s29 + $0x588] sm:$0xff]  ;;  %v424_v35 = vld [vmem:[%s2079_s29 + $0x598] sm:$0xff]  ;;  %v1809_v39 = vpack.c.bf16 %v392_v32, %v391_v31  ;;  %v2243_v43 = vrot.slane %v243_v38, %v2132_v14  ;;  %v539_v44 = vcombine.high %v243_v38, %v243_v38 }
  0x46   : > { %1786 = vmatprep.subr.bf16.mxu1 %v1785_v26  ;;  %v1805_v26 = vpack.c.bf16 %v390_v20, %v389_v19  ;;  %v406_v29 = vld [vmem:[%s2079_s29 + $0x508] sm:$0xff]  ;;  %v1837_v30 = vpack.c.bf16 %v422_v22, %v421_v21  ;;  %v375_v40 = vld [vmem:[%s2079_s29 + $0x410] sm:$0xff]  ;;  %v408_v47 = vld [vmem:[%s2079_s29 + $0x518] sm:$0xff] }
  0x47   : > { %v407_v42 = vld [vmem:[%s2079_s29 + $0x510] sm:$0xff]  ;;  %v393_v48 = vld [vmem:[%s2079_s29 + $0x4a0] sm:$0xff]  ;;  %v2254_v53 = vrot.slane %v539_v44, %v2132_v14  ;;  %v378_v57 = vld [vmem:[%s2079_s29 + $0x428] sm:$0xff] }
  0x48   : > { %1756 = vmatpush3.bf16.msra.mxu0 %v1755_v33  ;;  %v423_v33 = vld [vmem:[%s2079_s29 + $0x590] sm:$0xff]  ;;  %v425_v50 = vld [vmem:[%s2079_s29 + $0x5a0] sm:$0xff]  ;;  %v410_v61 = vld [vmem:[%s2079_s29 + $0x528] sm:$0xff] }
  0x49   : > { %1788 = vmatpush3.bf16.msra.mxu1 %v1787_v36  ;;  %1758 = vmatprep.subr.bf16.mxu0 %v1757_v37  ;;  %v1807_v36 = vpack.c.bf16 %v374_v27, %v373_v24  ;;  %v1839_v37 = vpack.c.bf16 %v406_v29, %v405_v28  ;;  %v1841_v45 = vpack.c.bf16 %v424_v35, %v423_v33  ;;  %v409_v58 = vld [vmem:[%s2079_s29 + $0x520] sm:$0xff]  ;;  %v380_v5 = vld [vmem:[%s2079_s29 + $0x438] sm:$0xff]  ;;  %v411_v6 = vld [vmem:[%s2079_s29 + $0x530] sm:$0xff] }
  0x4a   : > { %1790 = vmatprep.subr.bf16.mxu1 %v1789_v41  ;;  %v376_v41 = vld [vmem:[%s2079_s29 + $0x418] sm:$0xff]  ;;  %v555_v59 = vcombine.high %v2254_v53, %v2254_v53  ;;  %v1847_v2 = vpack.c.bf16 %v410_v61, %v409_v58  ;;  %v397_v9 = vld [vmem:[%s2079_s29 + $0x4c0] sm:$0xff]  ;;  %v382_v18 = vld [vmem:[%s2079_s29 + $0x448] sm:$0xff] }
  0x4b   : > { %v1811_v54 = vpack.c.bf16 %v376_v41, %v375_v40  ;;  %v412_v8 = vld [vmem:[%s2079_s29 + $0x538] sm:$0xff]  ;;  %v413_v19 = vld [vmem:[%s2079_s29 + $0x540] sm:$0xff]  ;;  %v414_v21 = vld [vmem:[%s2079_s29 + $0x548] sm:$0xff] }
  0x4c   : > { %1760 = vmatpush3.bf16.msra.mxu0 %v1759_v49  ;;  %v394_v49 = vld [vmem:[%s2079_s29 + $0x4a8] sm:$0xff]  ;;  %v1851_v15 = vpack.c.bf16 %v412_v8, %v411_v6  ;;  %v399_v22 = vld [vmem:[%s2079_s29 + $0x4d0] sm:$0xff]  ;;  %v1855_v27 = vpack.c.bf16 %v414_v21, %v413_v19  ;;  %v416_v33 = vld [vmem:[%s2079_s29 + $0x558] sm:$0xff] }
  0x4d   : > { %1792 = vmatpush3.bf16.msra.mxu1 %v1791_v51  ;;  %1762 = vmatprep.subr.bf16.mxu0 %v1761_v52  ;;  %v426_v51 = vld [vmem:[%s2079_s29 + $0x5a8] sm:$0xff]  ;;  %v554_v52 = vcombine.high %v2243_v43, %v2243_v43  ;;  %v1813_v55 = vpack.c.bf16 %v394_v49, %v393_v48  ;;  %v431_v24 = vld [vmem:[%s2079_s29 + $0x5d0] sm:$0xff]  ;;  %v401_v35 = vld [vmem:[%s2079_s29 + $0x4e0] sm:$0xff] }
  0x4e   : > { %1794 = vmatprep.subr.bf16.mxu1 %v1793_v56  ;;  %v377_v56 = vld [vmem:[%s2079_s29 + $0x420] sm:$0xff]  ;;  %v1845_v60 = vpack.c.bf16 %v426_v51, %v425_v50  ;;  %v383_v29 = vld [vmem:[%s2079_s29 + $0x450] sm:$0xff]  ;;  %v434_v38 = vld [vmem:[%s2079_s29 + $0x5e8] sm:$0xff] }
  0x4f   : > { %v1815_v1 = vpack.c.bf16 %v378_v57, %v377_v56  ;;  %v415_v31 = vld [vmem:[%s2079_s29 + $0x550] sm:$0xff]  ;;  %v386_v44 = vld [vmem:[%s2079_s29 + $0x468] sm:$0xff]  ;;  %v404_v50 = vld [vmem:[%s2079_s29 + $0x4f8] sm:$0xff] }
  0x50   : > { %1764 = vmatpush3.bf16.msra.mxu0 %v1763_v62  ;;  %v396_v62 = vld [vmem:[%s2079_s29 + $0x4b8] sm:$0xff]  ;;  %v1859_v40 = vpack.c.bf16 %v416_v33, %v415_v31  ;;  %v418_v48 = vld [vmem:[%s2079_s29 + $0x568] sm:$0xff]  ;;  %v403_v49 = vld [vmem:[%s2079_s29 + $0x4f0] sm:$0xff] }
  0x51   : > { %1796 = vmatpush3.bf16.msra.mxu1 %v1795_v63  ;;  %1766 = vmatprep.subr.bf16.mxu0 %v1765_v0  ;;  %v427_v63 = vld [vmem:[%s2079_s29 + $0x5b0] sm:$0xff]  ;;  %v428_v0 = vld [vmem:[%s2079_s29 + $0x5b8] sm:$0xff]  ;;  %v1833_v56 = vpack.c.bf16 %v404_v50, %v403_v49  ;;  %v438_v6 = vld [vmem:[%s2079_s29 + $0x608] sm:$0xff] }
  0x52   : > { %1798 = vmatprep.subr.bf16.mxu1 %v1797_v4  ;;  %v379_v4 = vld [vmem:[%s2079_s29 + $0x430] sm:$0xff]  ;;  %v1849_v7 = vpack.c.bf16 %v428_v0, %v427_v63  ;;  %v388_v58 = vld [vmem:[%s2079_s29 + $0x478] sm:$0xff]  ;;  %v485_v63 = vld [vmem:[%s2079_s29 + $0x780] sm:$0xff] }
  0x53   : > { %v1819_v13 = vpack.c.bf16 %v380_v5, %v379_v4  ;;  %v435_v51 = vld [vmem:[%s2079_s29 + $0x5f0] sm:$0xff]  ;;  %v420_v61 = vld [vmem:[%s2079_s29 + $0x578] sm:$0xff]  ;;  %v486_v0 = vld [vmem:[%s2079_s29 + $0x788] sm:$0xff] }
  0x54   : > { %1768 = vmatpush3.bf16.msra.mxu0 %v1767_v10  ;;  %v398_v10 = vld [vmem:[%s2079_s29 + $0x4c8] sm:$0xff]  ;;  %v387_v57 = vld [vmem:[%s2079_s29 + $0x470] sm:$0xff]  ;;  %v437_v5 = vld [vmem:[%s2079_s29 + $0x600] sm:$0xff]  ;;  %v1901_v8 = vpack.c.bf16 %v486_v0, %v485_v63 }
  0x55   : > { %1800 = vmatpush3.bf16.msra.mxu1 %v1799_v11  ;;  %1770 = vmatprep.subr.bf16.mxu0 %v1769_v12  ;;  %v429_v11 = vld [vmem:[%s2079_s29 + $0x5c0] sm:$0xff]  ;;  %v430_v12 = vld [vmem:[%s2079_s29 + $0x5c8] sm:$0xff]  ;;  %v1821_v16 = vpack.c.bf16 %v398_v10, %v397_v9  ;;  %v455_v10 = vld [vmem:[%s2079_s29 + $0x690] sm:$0xff] }
  0x56   : > { %1802 = vmatprep.subr.bf16.mxu1 %v1801_v17  ;;  %v381_v17 = vld [vmem:[%s2079_s29 + $0x440] sm:$0xff]  ;;  %v1853_v20 = vpack.c.bf16 %v430_v12, %v429_v11  ;;  %v470_v9 = vld [vmem:[%s2079_s29 + $0x708] sm:$0xff]  ;;  %v456_v11 = vld [vmem:[%s2079_s29 + $0x698] sm:$0xff] }
  0x57   : > { %v1873_v19 = vpack.c.bf16 %v456_v11, %v455_v10  ;;  %v440_v21 = vld [vmem:[%s2079_s29 + $0x618] sm:$0xff]  ;;  %v441_v33 = vld [vmem:[%s2079_s29 + $0x620] sm:$0xff]  ;;  %v495_v0 = vld [vmem:[%s2079_s29 + $0x7d0] sm:$0xff] }
  0x58   : > { %1772 = vmatpush3.bf16.msra.mxu0 %v1771_v23  ;;  %v400_v23 = vld [vmem:[%s2079_s29 + $0x4d8] sm:$0xff]  ;;  %v465_v10 = vld [vmem:[%s2079_s29 + $0x6e0] sm:$0xff]  ;;  %v466_v11 = vld [vmem:[%s2079_s29 + $0x6e8] sm:$0xff] }
  0x59   : > { %1804 = vmatpush3.bf16.msra.mxu1 %v1803_v25  ;;  %1806 = vmatprep.subr.bf16.mxu0 %v1805_v26  ;;  %v432_v25 = vld [vmem:[%s2079_s29 + $0x5d8] sm:$0xff]  ;;  %v1823_v26 = vpack.c.bf16 %v382_v18, %v381_v17  ;;  %v1825_v28 = vpack.c.bf16 %v400_v23, %v399_v22  ;;  %v1871_v17 = vpack.c.bf16 %v438_v6, %v437_v5  ;;  %v471_v22 = vld [vmem:[%s2079_s29 + $0x710] sm:$0xff] }
  0x5a   : > { %1838 = vmatprep.subr.bf16.mxu1 %v1837_v30  ;;  %v384_v30 = vld [vmem:[%s2079_s29 + $0x458] sm:$0xff]  ;;  %v1857_v32 = vpack.c.bf16 %v432_v25, %v431_v24  ;;  %v457_v25 = vld [vmem:[%s2079_s29 + $0x6a0] sm:$0xff]  ;;  %v447_v5 = vld [vmem:[%s2079_s29 + $0x650] sm:$0xff] }
  0x5b   : > { %794 = vmatmul.mubr.f32.vlgmr.msra.gmra.mrb[2].mxu0 %v2189_v34  ;;  %v1843_v34 = vpack.c.bf16 %v408_v47, %v407_v42  ;;  %v385_v42 = vld [vmem:[%s2079_s29 + $0x460] sm:$0xff]  ;;  %v472_v24 = vld [vmem:[%s2079_s29 + $0x718] sm:$0xff] }
  0x5c   : > { %1808 = vmatpush3.bf16.msra.mxu0 %v1807_v36  ;;  %864 = vmatmul.mubr.f32.vlgmr.msra.gmra.mrb[2].mxu1 %v2200_v46  ;;  %v395_v46 = vld [vmem:[%s2079_s29 + $0x4b0] sm:$0xff]  ;;  %v402_v36 = vld [vmem:[%s2079_s29 + $0x4e8] sm:$0xff]  ;;  %v1907_v31 = vpack.c.bf16 %v472_v24, %v471_v22  ;;  %v476_v50 = vld [vmem:[%s2079_s29 + $0x738] sm:$0xff] }
  0x5d   : > { %1840 = vmatpush3.bf16.msra.mxu1 %v1839_v37  ;;  %1810 = vmatprep.subr.bf16.mxu0 %v1809_v39  ;;  %v1817_v3 = vpack.c.bf16 %v396_v62, %v395_v46  ;;  %v433_v37 = vld [vmem:[%s2079_s29 + $0x5e0] sm:$0xff]  ;;  %v1827_v39 = vpack.c.bf16 %v384_v30, %v383_v29  ;;  %v1829_v41 = vpack.c.bf16 %v402_v36, %v401_v35  ;;  %v454_v62 = vld [vmem:[%s2079_s29 + $0x688] sm:$0xff]  ;;  %v464_v63 = vld [vmem:[%s2079_s29 + $0x6d8] sm:$0xff] }
  0x5e   : > { %1842 = vmatprep.subr.bf16.mxu1 %v1841_v45  ;;  %933 = vmatprep.mubr.f32.mxu0 %v554_v52  ;;  %v417_v45 = vld [vmem:[%s2079_s29 + $0x560] sm:$0xff]  ;;  %v1861_v47 = vpack.c.bf16 %v434_v38, %v433_v37  ;;  %v436_v52 = vld [vmem:[%s2079_s29 + $0x5f8] sm:$0xff]  ;;  %v474_v37 = vld [vmem:[%s2079_s29 + $0x728] sm:$0xff] }
  0x5f   : > { %1003 = vmatprep.mubr.f32.mxu1 %v555_v59  ;;  %v419_v59 = vld [vmem:[%s2079_s29 + $0x570] sm:$0xff]  ;;  %v453_v46 = vld [vmem:[%s2079_s29 + $0x680] sm:$0xff]  ;;  %v448_v6 = vld [vmem:[%s2079_s29 + $0x658] sm:$0xff] }
  0x60   : > { %1812 = vmatpush3.bf16.msra.mxu0 %v1811_v54  ;;  %v1831_v54 = vpack.c.bf16 %v386_v44, %v385_v42  ;;  %v1869_v4 = vpack.c.bf16 %v454_v62, %v453_v46  ;;  %v473_v35 = vld [vmem:[%s2079_s29 + $0x720] sm:$0xff]  ;;  %v459_v38 = vld [vmem:[%s2079_s29 + $0x6b0] sm:$0xff]  ;;  %v478_v46 = vld [vmem:[%s2079_s29 + $0x748] sm:$0xff] }
  0x61   : > { %1844 = vmatpush3.bf16.msra.mxu1 %v1843_v34  ;;  %1814 = vmatprep.subr.bf16.mxu0 %v1813_v55  ;;  %v244_v34 = vld [vmem:[%s2074_s25 + $0x18] sm:$0xff]  ;;  %v1863_v55 = vpack.c.bf16 %v418_v48, %v417_v45  ;;  %v1911_v42 = vpack.c.bf16 %v474_v37, %v473_v35  ;;  %v443_v45 = vld [vmem:[%s2079_s29 + $0x630] sm:$0xff]  ;;  %v481_v22 = vld [vmem:[%s2079_s29 + $0x760] sm:$0xff] }
  0x62   : > { %1846 = vmatprep.subr.bf16.mxu1 %v1845_v60  ;;  %v1865_v60 = vpack.c.bf16 %v436_v52, %v435_v51  ;;  %v2315_v12 = vrot.slane %v244_v34, %v2132_v14  ;;  %v475_v48 = vld [vmem:[%s2079_s29 + $0x730] sm:$0xff]  ;;  %v461_v51 = vld [vmem:[%s2079_s29 + $0x6c0] sm:$0xff]  ;;  %v462_v52 = vld [vmem:[%s2079_s29 + $0x6c8] sm:$0xff] }
  0x63   : > { %v463_v62 = vld [vmem:[%s2079_s29 + $0x6d0] sm:$0xff]  ;;  %v482_v24 = vld [vmem:[%s2079_s29 + $0x768] sm:$0xff]  ;;  %v484_v35 = vld [vmem:[%s2079_s29 + $0x778] sm:$0xff] }
  0x64   : > { %1816 = vmatpush3.bf16.msra.mxu0 %v1815_v1  ;;  %v556_v1 = vcombine.high %v244_v34, %v244_v34  ;;  %v494_v34 = vld [vmem:[%s2079_s29 + $0x7c8] sm:$0xff] }
  0x65   : > { %1848 = vmatpush3.bf16.msra.mxu1 %v1847_v2  ;;  %1818 = vmatprep.subr.bf16.mxu0 %v1817_v3  ;;  %v1835_v2 = vpack.c.bf16 %v388_v58, %v387_v57  ;;  %v1867_v3 = vpack.c.bf16 %v420_v61, %v419_v59  ;;  %v1885_v57 = vpack.c.bf16 %v462_v52, %v461_v51  ;;  %v445_v58 = vld [vmem:[%s2079_s29 + $0x640] sm:$0xff]  ;;  %v446_v59 = vld [vmem:[%s2079_s29 + $0x648] sm:$0xff] }
  0x66   : > { %1850 = vmatprep.subr.bf16.mxu1 %v1849_v7  ;;  %v469_v7 = vld [vmem:[%s2079_s29 + $0x700] sm:$0xff] }
  0x67   : > { %v1903_v18 = vpack.c.bf16 %v470_v9, %v469_v7  ;;  %v479_v7 = vld [vmem:[%s2079_s29 + $0x750] sm:$0xff]  ;;  %v480_v9 = vld [vmem:[%s2079_s29 + $0x758] sm:$0xff] }
  0x68   : > { %1820 = vmatpush3.bf16.msra.mxu0 %v1819_v13  ;;  %v487_v13 = vld [vmem:[%s2079_s29 + $0x790] sm:$0xff] }
  0x69   : > { %1852 = vmatpush3.bf16.msra.mxu1 %v1851_v15  ;;  %1822 = vmatprep.subr.bf16.mxu0 %v1821_v16  ;;  %v488_v15 = vld [vmem:[%s2079_s29 + $0x798] sm:$0xff]  ;;  %v2320_v16 = vrot.slane %v556_v1, %v2132_v14  ;;  %v458_v14 = vld [vmem:[%s2079_s29 + $0x6a8] sm:$0xff] }
  0x6a   : > { %1854 = vmatprep.subr.bf16.mxu1 %v1853_v20  ;;  %v439_v20 = vld [vmem:[%s2079_s29 + $0x610] sm:$0xff]  ;;  %v1905_v23 = vpack.c.bf16 %v488_v15, %v487_v13  ;;  %v496_v1 = vld [vmem:[%s2079_s29 + $0x7d8] sm:$0xff]  ;;  %v497_v13 = vld [vmem:[%s2079_s29 + $0x7e0] sm:$0xff] }
  0x6b   : > { %v572_v29 = vcombine.high %v2320_v16, %v2320_v16  ;;  %v1875_v30 = vpack.c.bf16 %v440_v21, %v439_v20  ;;  %v498_v15 = vld [vmem:[%s2079_s29 + $0x7e8] sm:$0xff]  ;;  %v449_v20 = vld [vmem:[%s2079_s29 + $0x660] sm:$0xff] }
  0x6c   : > { %1824 = vmatpush3.bf16.msra.mxu0 %v1823_v26  ;;  %v571_v26 = vcombine.high %v2315_v12, %v2315_v12  ;;  %v450_v21 = vld [vmem:[%s2079_s29 + $0x668] sm:$0xff] }
  0x6d   : > { %1856 = vmatpush3.bf16.msra.mxu1 %v1855_v27  ;;  %1826 = vmatprep.subr.bf16.mxu0 %v1825_v28  ;;  %v489_v27 = vld [vmem:[%s2079_s29 + $0x7a0] sm:$0xff]  ;;  %v490_v28 = vld [vmem:[%s2079_s29 + $0x7a8] sm:$0xff] }
  0x6e   : > { %1858 = vmatprep.subr.bf16.mxu1 %v1857_v32  ;;  %v1877_v32 = vpack.c.bf16 %v458_v14, %v457_v25  ;;  %v1909_v36 = vpack.c.bf16 %v490_v28, %v489_v27  ;;  %v467_v25 = vld [vmem:[%s2079_s29 + $0x6f0] sm:$0xff]  ;;  %v468_v14 = vld [vmem:[%s2079_s29 + $0x6f8] sm:$0xff]  ;;  %v1895_v28 = vpack.c.bf16 %v450_v21, %v449_v20 }
  0x6f   : > { %v500_v27 = vld [vmem:[%s2079_s29 + $0x7f8] sm:$0xff] }
  0x70   : > { %1828 = vmatpush3.bf16.msra.mxu0 %v1827_v39  ;;  %v460_v39 = vld [vmem:[%s2079_s29 + $0x6b8] sm:$0xff] }
  0x71   : > { %1860 = vmatpush3.bf16.msra.mxu1 %v1859_v40  ;;  %1830 = vmatprep.subr.bf16.mxu0 %v1829_v41  ;;  %v492_v40 = vld [vmem:[%s2079_s29 + $0x7b8] sm:$0xff]  ;;  %v1881_v44 = vpack.c.bf16 %v460_v39, %v459_v38 }
  0x72   : > { %1862 = vmatprep.subr.bf16.mxu1 %v1861_v47  ;;  %v444_v47 = vld [vmem:[%s2079_s29 + $0x638] sm:$0xff] }
  0x73   : > { %v1172_v20 = vld [vmem:[%s2469_s3 + $0x38] sm:$0xff] (!%p1338_p6) }
  0x74   : > { %1832 = vmatpush3.bf16.msra.mxu0 %v1831_v54  ;;  %v493_v54 = vld [vmem:[%s2079_s29 + $0x7c0] sm:$0xff] }
  0x75   : > { %1864 = vmatpush3.bf16.msra.mxu1 %v1863_v55  ;;  %1834 = vmatprep.subr.bf16.mxu0 %v1833_v56  ;;  %v1883_v55 = vpack.c.bf16 %v444_v47, %v443_v45  ;;  %v1915_v56 = vpack.c.bf16 %v476_v50, %v475_v48  ;;  %v1917_v61 = vpack.c.bf16 %v494_v34, %v493_v54 }
  0x76   : > { %1866 = vmatprep.subr.bf16.mxu1 %v1865_v60  ;;  %v477_v60 = vld [vmem:[%s2079_s29 + $0x740] sm:$0xff] }
  0x78   : > { %1836 = vmatpush3.bf16.msra.mxu0 %v1835_v2  ;;  %v1887_v2 = vpack.c.bf16 %v446_v59, %v445_v58 }
  0x79   : > { %1868 = vmatpush3.bf16.msra.mxu1 %v1867_v3  ;;  %1870 = vmatprep.subr.bf16.mxu0 %v1869_v4  ;;  %v1919_v3 = vpack.c.bf16 %v478_v46, %v477_v60  ;;  %v1889_v4 = vpack.c.bf16 %v464_v63, %v463_v62 }
  0x7a   : > { %1902 = vmatprep.subr.bf16.mxu1 %v1901_v8  ;;  %v1921_v8 = vpack.c.bf16 %v496_v1, %v495_v0 }
  0x7b   : > { %934 = vmatmul.mubr.f32.vlgmr.msra.gmra.mrb[4].mxu0 %v2243_v43  ;;  %v442_v43 = vld [vmem:[%s2079_s29 + $0x628] sm:$0xff] }
  0x7c   : > { %1872 = vmatpush3.bf16.msra.mxu0 %v1871_v17  ;;  %1004 = vmatmul.mubr.f32.vlgmr.msra.gmra.mrb[4].mxu1 %v2254_v53  ;;  %v491_v53 = vld [vmem:[%s2079_s29 + $0x7b0] sm:$0xff]  ;;  %v1879_v41 = vpack.c.bf16 %v442_v43, %v441_v33  ;;  %v1891_v17 = vpack.c.bf16 %v448_v6, %v447_v5  ;;  %v1165_v5 = vld [vmem:[%s2469_s3] sm:$0xff] (!%p1338_p6)  ;;  %v1166_v6 = vld [vmem:[%s2469_s3 + $0x8] sm:$0xff] (!%p1338_p6) }
  0x7d   : > { %1904 = vmatpush3.bf16.msra.mxu1 %v1903_v18  ;;  %1874 = vmatprep.subr.bf16.mxu0 %v1873_v19  ;;  %v1913_v49 = vpack.c.bf16 %v492_v40, %v491_v53  ;;  %v1923_v18 = vpack.c.bf16 %v480_v9, %v479_v7  ;;  %v1893_v19 = vpack.c.bf16 %v466_v11, %v465_v10  ;;  %v483_v43 = vld [vmem:[%s2079_s29 + $0x770] sm:$0xff]  ;;  %v1168_v10 = vld [vmem:[%s2469_s3 + $0x18] sm:$0xff] (!%p1338_p6)  ;;  %v2027_v11 = vmov (!%p1338_p6), 0.0  }
  0x7e   : > { %1906 = vmatprep.subr.bf16.mxu1 %v1905_v23  ;;  %1073 = vmatprep.mubr.f32.mxu0 %v571_v26  ;;  %v1925_v23 = vpack.c.bf16 %v498_v15, %v497_v13  ;;  %v499_v26 = vld [vmem:[%s2079_s29 + $0x7f0] sm:$0xff]  ;;  %v1931_v37 = vpack.c.bf16 %v484_v35, %v483_v43  ;;  %v1934_v9 = vpack.c.bf16 (!%p1338_p6), %v1166_v6, %v1165_v5  ;;  %v1169_v15 = vld [vmem:[%s2469_s3 + $0x20] sm:$0xff] (!%p1338_p6) }
  0x7f   : > { %1143 = vmatprep.mubr.f32.mxu1 %v572_v29  ;;  %v1927_v29 = vpack.c.bf16 %v482_v24, %v481_v22  ;;  %v1929_v33 = vpack.c.bf16 %v500_v27, %v499_v26  ;;  %v1167_v7 = vld [vmem:[%s2469_s3 + $0x10] sm:$0xff] (!%p1338_p6)  ;;  %v1173_v22 = vld [vmem:[%s2469_s3 + $0x40] sm:$0xff] (!%p1338_p6) }
  0x80   : > { %1876 = vmatpush3.bf16.msra.mxu0 %v1875_v30  ;;  %v1897_v30 = vpack.c.bf16 %v468_v14, %v467_v25  ;;  %v1937_v13 = vpack.c.bf16 (!%p1338_p6), %v1168_v10, %v1167_v7  ;;  %v1175_v25 = vld [vmem:[%s2469_s3 + $0x50] sm:$0xff] (!%p1338_p6)  ;;  %v1176_v14 = vld [vmem:[%s2469_s3 + $0x58] sm:$0xff] (!%p1338_p6)  ;;  %v1177_v27 = vld [vmem:[%s2469_s3 + $0x60] sm:$0xff] (!%p1338_p6) }
  0x81   : > { %1908 = vmatpush3.bf16.msra.mxu1 %v1907_v31  ;;  %1878 = vmatprep.subr.bf16.mxu0 %v1877_v32  ;;  %v451_v31 = vld [vmem:[%s2079_s29 + $0x670] sm:$0xff]  ;;  %v452_v32 = vld [vmem:[%s2079_s29 + $0x678] sm:$0xff]  ;;  %v1949_v26 = vpack.c.bf16 (!%p1338_p6), %v1176_v14, %v1175_v25 }
  0x82   : > { %1910 = vmatprep.subr.bf16.mxu1 %v1909_v36  ;;  %v1899_v36 = vpack.c.bf16 %v452_v32, %v451_v31  ;;  %v1339_v31 = vld [vmem:[%s2468_s2] ss:$0 sm:$0xff] (!%p1338_p6)  ;;  %v1179_v32 = vld [vmem:[%s2469_s3 + $0x70] sm:$0xff] (!%p1338_p6) }
  0x84   : > { %1880 = vmatpush3.bf16.msra.mxu0 %v1879_v41 }
  0x85   : > { %1912 = vmatpush3.bf16.msra.mxu1 %v1911_v42  ;;  %1882 = vmatprep.subr.bf16.mxu0 %v1881_v44 }
  0x86   : > { %1914 = vmatprep.subr.bf16.mxu1 %v1913_v49 }
  0x88   : > { %1884 = vmatpush3.bf16.msra.mxu0 %v1883_v55 }
  0x89   : > { %1916 = vmatpush3.bf16.msra.mxu1 %v1915_v56  ;;  %1886 = vmatprep.subr.bf16.mxu0 %v1885_v57 }
  0x8a   : > { %1918 = vmatprep.subr.bf16.mxu1 %v1917_v61 }
  0x8c   : > { %1888 = vmatpush3.bf16.msra.mxu0 %v1887_v2  ;;  %v240_v2 = vld [vmem:[#allocation2] sm:$0x3] }
  0x8d   : > { %1920 = vmatpush3.bf16.msra.mxu1 %v1919_v3  ;;  %1890 = vmatprep.subr.bf16.mxu0 %v1889_v4 }
  0x8e   : > { %1922 = vmatprep.subr.bf16.mxu1 %v1921_v8  ;;  %v2025_v8 = vmov (!%p1338_p6), 0.0|0.0  }
  0x90   : > { %1892 = vmatpush3.bf16.msra.mxu0 %v1891_v17  ;;  %v1170_v17 = vld [vmem:[%s2469_s3 + $0x28] sm:$0xff] (!%p1338_p6) }
  0x91   : > { %1924 = vmatpush3.bf16.msra.mxu1 %v1923_v18  ;;  %1894 = vmatprep.subr.bf16.mxu0 %v1893_v19  ;;  %v1940_v18 = vpack.c.bf16 (!%p1338_p6), %v1170_v17, %v1169_v15  ;;  %v1171_v19 = vld [vmem:[%s2469_s3 + $0x30] sm:$0xff] (!%p1338_p6) }
  0x92   : > { %1926 = vmatprep.subr.bf16.mxu1 %v1925_v23  ;;  %v1943_v21 = vpack.c.bf16 (!%p1338_p6), %v1172_v20, %v1171_v19  ;;  %v1174_v23 = vld [vmem:[%s2469_s3 + $0x48] sm:$0xff] (!%p1338_p6) }
  0x93   : > { %v1946_v24 = vpack.c.bf16 (!%p1338_p6), %v1174_v23, %v1173_v22 }
  0x94   : > { %1896 = vmatpush3.bf16.msra.mxu0 %v1895_v28  ;;  %v1178_v28 = vld [vmem:[%s2469_s3 + $0x68] sm:$0xff] (!%p1338_p6) }
  0x95   : > { %1928 = vmatpush3.bf16.msra.mxu1 %v1927_v29  ;;  %1898 = vmatprep.subr.bf16.mxu0 %v1897_v30  ;;  %v1952_v29 = vpack.c.bf16 (!%p1338_p6), %v1178_v28, %v1177_v27 }
  0x96   : > { %1930 = vmatprep.subr.bf16.mxu1 %v1929_v33  ;;  %v1180_v33 = vld [vmem:[%s2469_s3 + $0x78] sm:$0xff] (!%p1338_p6) }
  0x97   : > { %v1955_v35 = vpack.c.bf16 (!%p1338_p6), %v1180_v33, %v1179_v32 }
  0x98   : > { %1900 = vmatpush3.bf16.msra.mxu0 %v1899_v36 }
  0x99   : > { %1932 = vmatpush3.bf16.msra.mxu1 %v1931_v37  ;;  %1933 = vmatprep.subr.bf16.mxu0 (!%p1338_p6), %v2025_v8  ;;  %v1340_v37 = vld [vmem:[%s2470_s4] ss:$0 sm:$0xff] (!%p1338_p6) }
  0x9b   : > { %1074 = vmatmul.mubr.f32.vlgmr.msra.gmra.mrb[6].mxu0 %v2315_v12 }
  0x9c   : > { %1144 = vmatmul.mubr.f32.vlgmr.msra.gmra.mrb[6].mxu1 %v2320_v16  ;;  %1674 = vmatprep.mubr.msk.f32.mxu0 (!%p1338_p6), %vm2026_vm0, %v2027_v11 }
  0x9d   : > { %1935 = vmatpush3.bf16.msra.mxu0 (!%p1338_p6), %v1934_v9 }
  0x9e   : > { %1936 = vmatprep.subr.bf16.mxu0 (!%p1338_p6), %v2025_v8 }
  0xa1   : > { %1938 = vmatpush3.bf16.msra.mxu0 (!%p1338_p6), %v1937_v13 }
  0xa2   : > { %1939 = vmatprep.subr.bf16.mxu0 (!%p1338_p6), %v2025_v8 }
  0xa5   : > { %1941 = vmatpush3.bf16.msra.mxu0 (!%p1338_p6), %v1940_v18 }
  0xa6   : > { %1942 = vmatprep.subr.bf16.mxu0 (!%p1338_p6), %v2025_v8 }
  0xa9   : > { %1944 = vmatpush3.bf16.msra.mxu0 (!%p1338_p6), %v1943_v21 }
  0xaa   : > { %1945 = vmatprep.subr.bf16.mxu0 (!%p1338_p6), %v2025_v8 }
  0xad   : > { %1947 = vmatpush3.bf16.msra.mxu0 (!%p1338_p6), %v1946_v24 }
  0xae   : > { %1948 = vmatprep.subr.bf16.mxu0 (!%p1338_p6), %v2025_v8 }
  0xb1   : > { %1950 = vmatpush3.bf16.msra.mxu0 (!%p1338_p6), %v1949_v26 }
  0xb2   : > { %1951 = vmatprep.subr.bf16.mxu0 (!%p1338_p6), %v2025_v8 }
  0xb5   : > { %1953 = vmatpush3.bf16.msra.mxu0 (!%p1338_p6), %v1952_v29 }
  0xb6   : > { %1954 = vmatprep.subr.bf16.mxu0 (!%p1338_p6), %v2025_v8 }
  0xb9   : > { %1956 = vmatpush3.bf16.msra.mxu0 (!%p1338_p6), %v1955_v35 }
 0x10e   : > { %v1377_v38 = vpop.f32.mrb[0].mxu0 }
 0x10f   : > { %v1412_v39 = vpop.f32.mrb[0].mxu1  ;;  %v1378_v53 = vpop.f32.mrb[1].mxu0 }
 0x110   : > { %v1379_v40 = vadd.f32 %v1378_v53, %v1377_v38  ;;  %v1413_v41 = vpop.f32.mrb[1].mxu1 }
 0x111   : > { %v1414_v42 = vadd.f32 %v1413_v41, %v1412_v39 }
 0x113   : > { %v726_v44 = vadd.f32 %v1414_v42, %v1379_v40 }
 0x12e   : > { %v1447_v45 = vpop.f32.mrb[2].mxu0 }
 0x12f   : > { %v1448_v47 = vpop.f32.mrb[3].mxu0  ;;  %v1482_v48 = vpop.f32.mrb[2].mxu1 }
 0x130   : > { %v1449_v49 = vadd.f32 %v1448_v47, %v1447_v45  ;;  %v1483_v50 = vpop.f32.mrb[3].mxu1 }
 0x131   : > { %v1484_v51 = vadd.f32 %v1483_v50, %v1482_v48 }
 0x132   : > { %v796_v52 = vadd.f32 %v1449_v49, %v726_v44 }
 0x134   : > { %v866_v54 = vadd.f32 %v1484_v51, %v796_v52 }
 0x14e   : > { %v1517_v34 = vpop.f32.mrb[4].mxu0 }
 0x14f   : > { %v1518_v55 = vpop.f32.mrb[5].mxu0  ;;  %v1552_v12 = vpop.f32.mrb[4].mxu1 }
 0x150   : > { %v1519_v56 = vadd.f32 %v1518_v55, %v1517_v34  ;;  %v1553_v16 = vpop.f32.mrb[5].mxu1 }
 0x151   : > { %v1554_v57 = vadd.f32 %v1553_v16, %v1552_v12 }
 0x152   : > { %v936_v58 = vadd.f32 %v1519_v56, %v866_v54 }
 0x154   : > { %v1006_v59 = vadd.f32 %v1554_v57, %v936_v58 }
 0x16e   : > { %v1587_v60 = vpop.f32.mrb[6].mxu0 }
 0x16f   : > { %v1588_v61 = vpop.f32.mrb[7].mxu0  ;;  %v1622_v46 = vpop.f32.mrb[6].mxu1 }
 0x170   : > { %v1589_v62 = vadd.f32 %v1588_v61, %v1587_v60  ;;  %v1623_v63 = vpop.f32.mrb[7].mxu1 }
 0x171   : > { %v1624_v0 = vadd.f32 %v1623_v63, %v1622_v46 }
 0x172   : > { %v1076_v1 = vadd.f32 %v1589_v62, %v1006_v59  ;;  %1154 = sbr.rel (%p1338_p6) target bundleno = 917 (0x395), region = 48 }
 0x174   : > { %v1146_v3 = vadd.f32 %v1624_v0, %v1076_v1 }
 0x176   : > { %v1149_v4 = vadd.f32 %v1146_v3, %v240_v2 }
 0x178   : > { %1150 = vst [vmem:[#allocation2] sm:$0x3] %v1149_v4 }
 0x17f   : > { %v1155_v30 = vld [vmem:[#allocation2] sm:$0x3] }
 0x180   : > { %v1163_v43 = vadd.f32 %v1339_v31, %v1155_v30 }
 0x182   : > { %v1164_v36 = vmax.f32 %v1163_v43, 0.0 }
 0x184   : > { %1675 = vmatmul.mubr.f32.vlgmr.msra.gmra.mrb[0].mxu0 %v1164_v36 }
 0x257   : > { %v1254_v38 = vpop.f32.mrb[0].mxu0 }
 0x258   : > { %v1255_v39 = vadd.f32 %v1340_v37, %v1254_v38  ;;  %v1676_v53 = vpop.f32.mrb[1].mxu0 }
 0x25a   : > { %v1259_v40 = vsel %vm1258_vm1, %v1255_v39, -inf }
 0x25b   : > { %1260 = vmax.xlane.f32.xlu0 %v1259_v40 }
 0x2e8   : > { %v1261_v41 = vpop.xlane.xlu0 %1260 }
 0x2e9   : > { %v1262_v42 = vsub.f32 %v1255_v39, %v1261_v41 }
 0x2eb   : > { %v1263_v44 = vmul.f32 1.442695, %v1262_v42 }
 0x2ed   : > { %1981 = vpow2.f32 %v1263_v44 }
 0x2f7   : > { %v1982_v45 = vpop.eup %1981 }
 0x2f8   : > { %v1265_v47 = vsel %vm1258_vm1, %v1982_v45, 0.0 }
 0x2f9   : > { %1266 = vadd.xlane.f32.xlu0 %v1265_v47 }
 0x386   : > { %v1267_v48 = vpop.xlane.xlu0 %1266 }
 0x387   : > { %1983 = vrcp.f32 %v1267_v48 }
 0x391   : > { %v1984_v49 = vpop.eup %1983 }
 0x392   : > { %v1269_v50 = vmul.f32 %v1984_v49, %v1982_v45 }
 0x394   : > { %1270 = vst.msk [vmem:[#allocation3] sm:$0x3] %vm1258_vm1, %v1269_v50 }
 0x395 PF: > { %p1961_p7 = scmp.eq.s32.totalorder %s2065_s19, 7  ;;  %s2028_s20 = smov [#allocation3]  }
 0x396   : > { %s1278_s21 = sshll.u32 %s2028_s20, 4  ;;  %s1279_s21 = int_to_ptr.vmem [resolvable:$true] %s1278_s21 }
 0x397   : > { %s1985_s22 = scalar_lea.vmem %s1279_s21, 32  ;;  %p1992_p11 = scmp.lt.s32.totalorder %s1279_s21, %s1279_s21 }
 0x398   : > { %p1986_p8 = scmp.ne.s32.totalorder %s1279_s21, %s1985_s22  ;;  %p1993_p12 = scmp.lt.s32.totalorder %s1985_s22, %s1985_s22 }
 0x39a   : > { %p1987_p9 = pnand %p1986_p8, %p1961_p7  ;;  %p1994_p13 = por %p1993_p12, %p1992_p11 }
 0x39c   : > { %p1988_p10 = pneg %p1987_p9 }
 0x39e   : > { %p1995_p0 = pnand %p1994_p13, %p1988_p10 }
 0x3a0   : > { %1998 = shalt.err (!%p1995_p0)
}
 0x3a1   : > { %s1999_s25 = scalar_lea.hbm %s2471_s5, 32 }
 0x3a2   : > { %p2000_p1 = scmp.ne.s32.totalorder %s2471_s5, %s1999_s25  ;;  %p2005_p4 = scmp.lt.u32.totalorder %s1999_s25, %s2471_s5 }
 0x3a4   : > { %p2001_p2 = pnand %p2000_p1, %p1961_p7 }
 0x3a6   : > { %p2002_p3 = pneg %p2001_p2 }
 0x3a8   : > { %p2007_p5 = pnand %p2005_p4, %p2002_p3 }
 0x3aa   : > { %2010 = shalt.err (!%p2007_p5)
}
 0x3ab   : > { %1958 = dma.vmem_to_hbm [thread:$0]  (%p1961_p7), %s1279_s21, 32, %s2471_s5, [#allocation4]  }
 0x3ac   : > { %2016 = dma.done.wait (%p1961_p7), [#allocation4], 32  }
 0x3ad   : > { %2018 = vsyncadd (%p1961_p7), [#allocation4], 4294967264 }
 0x3ae PF: > { %s16_s18 = sadd.s32 1, %s2021_s18  }
 0x3af   : > { %p13_p6 = scmp.ge.s32.totalorder %s16_s18, 10  }
 0x3b1   :  { %15 = sbr.rel (!%p13_p6) target bundleno = 1 (0x1), region = 78 }
 0x3b8   :  { %1291 = vsyncpa [#allocation4], 1 }
 0x3b9   :  { %1293 = vsyncpa [#allocation4 + $0x1], 1 }

</bundles_post_ra>
